<compile_context>
chip_gen: v6e
topology: v6e:2x2x1
jax: 0.10.0
libtpu: 0.0.40
codegen_flags: <defaults>
</compile_context>

<pallas_src>
import jax
import jax.numpy as jnp
import numpy as np
from jax.experimental import pallas as pl
from jax.experimental.pallas import tpu as pltpu

# ---------------- demo sizes (small, consistent with the module) ----------------
BATCH = 256        # many independent sequences stacked to fill MXU rows
SEQ = 8            # sequence length
EMB = 32           # embedding_dim (module uses 300; shrunk for the demo)
HID = 32           # hidden_dim    (module uses 300; shrunk for the demo)
OUT = 2            # output_size
BLOCK_B = 128      # batch rows per grid step (MXU row fill; 2 blocks -> both v7x TCs)

_PREC = jax.lax.Precision.DEFAULT   # explicit; bf16 MXU passes for f32 on TPU


# --------------------------- fused LSTM + head kernel ---------------------------
def lstm_block_kernel(x_ref, wih_ref, whh_ref, b_ref, h0_ref, c0_ref,
                      wout_ref, bout_ref, out_ref):
    """One grid step = one block of `bm` independent sequences.

    x_ref   : (bm, T, E)  batch-first block (time slice taken in-kernel)
    wih_ref : (E, 4H)     gate order [i, f, g, o]; g columns pre-scaled by 2
    whh_ref : (H, 4H)     g columns pre-scaled by 2
    b_ref   : (1, 4H)     b_ih + b_hh; g portion pre-scaled by 2
    wout_ref: (H, OUT), bout_ref: (1, OUT)
    out_ref : (bm, OUT)   log-softmax logits
    """
    bm, T, _ = x_ref.shape
    H = h0_ref.shape[1]

    wih = wih_ref[...]
    whh = whh_ref[...]
    b = b_ref[...]

    # Lane mask selecting the g-gate columns [2H, 3H) of the (bm, 4H) gate vreg.
    lane = jax.lax.broadcasted_iota(jnp.int32, (bm, 4 * H), 1)
    g_mask = (lane >= 2 * H) & (lane < 3 * H)

    h = h0_ref[...].astype(jnp.float32)
    c = c0_ref[...].astype(jnp.float32)

    # T is small & static -> fully unrolled; h/c live in vregs, no scratch.
    for t in range(T):
        # Per-step input projection: independent of h -> off the serial
        # critical path; avoids holding a (bm*T, 4H) gates_x value live
        # across the whole unrolled loop (vreg-spill hazard at large bm).
        x_t = x_ref[:, t, :]                               # (bm, E) strided load
        gx = jnp.dot(x_t, wih, preferred_element_type=jnp.float32,
                     precision=_PREC)
        gates = gx + b + jnp.dot(h, whh, preferred_element_type=jnp.float32,
                                 precision=_PREC)
        # Single full-vreg sigmoid pass; the g block (pre-activation pre-scaled
        # by 2) is fixed up via tanh(x) = 2*sigmoid(2x) - 1.
        s = jax.nn.sigmoid(gates)
        act = jnp.where(g_mask, 2.0 * s - 1.0, s)
        # Lane-offset sub-slices (f/g/o) cost a lane shift each; acceptable at
        # this size per review (XLU slot, overlaps VPU/MXU work).
        i_g = act[:, 0:H]
        f_g = act[:, H:2 * H]
        g_g = act[:, 2 * H:3 * H]
        o_g = act[:, 3 * H:4 * H]
        c = f_g * c + i_g * g_g
        h = o_g * jnp.tanh(c)

    # Dropout (eval) is identity; fused Linear(H, OUT) + LogSoftmax head.
    logits = jnp.dot(h, wout_ref[...], preferred_element_type=jnp.float32,
                     precision=_PREC) + bout_ref[...]
    m = jnp.max(logits, axis=-1, keepdims=True)
    lse = jnp.log(jnp.sum(jnp.exp(logits - m), axis=-1, keepdims=True)) + m
    out_ref[...] = (logits - lse).astype(out_ref.dtype)


# -------------------- one-time parameter packing (load time) --------------------
def pack_params(w_ih, w_hh, b_ih, b_hh, w_out, b_out):
    """Run ONCE at parameter-load time, NOT per forward.

    Pre-transposes the weights, pre-scales the g-gate block by 2 (so the kernel
    can use a single full-vreg sigmoid pass with tanh(x) = 2*sigmoid(2x) - 1),
    sums the biases and reshapes the head parameters.
    """
    H4 = w_ih.shape[0]
    H = H4 // 4
    col = jnp.arange(H4)
    scale = jnp.where((col >= 2 * H) & (col < 3 * H), 2.0, 1.0).astype(jnp.float32)
    return {
        "wih": jnp.transpose(w_ih, (1, 0)) * scale[None, :],   # (E, 4H)
        "whh": jnp.transpose(w_hh, (1, 0)) * scale[None, :],   # (H, 4H)
        "b":   ((b_ih + b_hh) * scale).reshape(1, H4),         # (1, 4H)
        "wout": jnp.transpose(w_out, (1, 0)),                  # (H, OUT)
        "bout": b_out.reshape(1, -1),                          # (1, OUT)
    }


# ----------------------------------- forward ------------------------------------
def lstm_forward(x, params, h0, c0, *, block_b=BLOCK_B):
    """x: (B, T, E) batch_first. Returns log-softmax logits (B, OUT)."""
    B, T, E = x.shape
    H = params["whh"].shape[0]
    O = params["wout"].shape[1]

    # Batch block: multiple of 8 sublanes, capped at block_b (MXU row fill).
    bm = min(block_b, ((B + 7) // 8) * 8)
    B_pad = ((B + bm - 1) // bm) * bm
    if B_pad != B:
        pad = B_pad - B
        x = jnp.pad(x, ((0, pad), (0, 0), (0, 0)))
        h0 = jnp.pad(h0, ((0, pad), (0, 0)))
        c0 = jnp.pad(c0, ((0, pad), (0, 0)))

    grid = (B_pad // bm,)
    out = pl.pallas_call(
        lstm_block_kernel,
        out_shape=jax.ShapeDtypeStruct((B_pad, O), jnp.float32),
        grid_spec=pltpu.PrefetchScalarGridSpec(
            num_scalar_prefetch=0,
            grid=grid,
            in_specs=[
                pl.BlockSpec((bm, T, E), lambda i: (i, 0, 0)),   # x block
                pl.BlockSpec((E, 4 * H), lambda i: (0, 0)),      # W_ih^T (scaled)
                pl.BlockSpec((H, 4 * H), lambda i: (0, 0)),      # W_hh^T (scaled)
                pl.BlockSpec((1, 4 * H), lambda i: (0, 0)),      # bias
                pl.BlockSpec((bm, H), lambda i: (i, 0)),         # h0 block
                pl.BlockSpec((bm, H), lambda i: (i, 0)),         # c0 block
                pl.BlockSpec((H, O), lambda i: (0, 0)),          # W_out^T
                pl.BlockSpec((1, O), lambda i: (0, 0)),          # b_out
            ],
            out_specs=pl.BlockSpec((bm, O), lambda i: (i, 0)),
        ),
        compiler_params=pltpu.CompilerParams(
            dimension_semantics=("parallel",)),                  # v7x: 2 TCs
    )(x, params["wih"], params["whh"], params["b"], h0, c0,
      params["wout"], params["bout"])
    return out[:B] if B_pad != B else out


# ------------------------------ pure-JAX reference ------------------------------
def lstm_forward_ref(x, w_ih, w_hh, b_ih, b_hh, w_out, b_out, h0, c0):
    B, T, E = x.shape
    H = w_hh.shape[1]
    h, c = h0, c0
    for t in range(T):
        gates = x[:, t, :] @ w_ih.T + h @ w_hh.T + b_ih + b_hh
        i_g = jax.nn.sigmoid(gates[:, 0:H])
        f_g = jax.nn.sigmoid(gates[:, H:2 * H])
        g_g = jnp.tanh(gates[:, 2 * H:3 * H])
        o_g = jax.nn.sigmoid(gates[:, 3 * H:4 * H])
        c = f_g * c + i_g * g_g
        h = o_g * jnp.tanh(c)
    logits = h @ w_out.T + b_out
    return jax.nn.log_softmax(logits, axis=-1)


if __name__ == "__main__":
    key = jax.random.PRNGKey(0)
    ks = jax.random.split(key, 9)
    bound = 1.0 / np.sqrt(HID)

    # PyTorch-style uniform(-1/sqrt(H), 1/sqrt(H)) parameter init (deterministic).
    w_ih = jax.random.uniform(ks[0], (4 * HID, EMB), jnp.float32, -bound, bound)
    w_hh = jax.random.uniform(ks[1], (4 * HID, HID), jnp.float32, -bound, bound)
    b_ih = jax.random.uniform(ks[2], (4 * HID,), jnp.float32, -bound, bound)
    b_hh = jax.random.uniform(ks[3], (4 * HID,), jnp.float32, -bound, bound)
    w_out = jax.random.uniform(ks[4], (OUT, HID), jnp.float32, -bound, bound)
    b_out = jax.random.uniform(ks[5], (OUT,), jnp.float32, -bound, bound)

    # forward uses randomly-initialized hidden state (init_hidden -> randn);
    # made deterministic here with fixed keys.
    h0 = jax.random.normal(ks[6], (BATCH, HID), jnp.float32)
    c0 = jax.random.normal(ks[7], (BATCH, HID), jnp.float32)

    x = jax.random.normal(ks[8], (BATCH, SEQ, EMB), jnp.float32)

    # Parameter packing happens ONCE here (parameter-load time), not per call.
    packed = pack_params(w_ih, w_hh, b_ih, b_hh, w_out, b_out)

    out = lstm_forward(x, packed, h0, c0)
    out = jax.block_until_ready(out)

    ref = lstm_forward_ref(x, w_ih, w_hh, b_ih, b_hh, w_out, b_out, h0, c0)
    # Tolerance: kernel uses tanh(x) = 2*sigmoid(2x) - 1 for the g gate (exact
    # in math, ULP-level differences) and both sides use default TPU matmul
    # precision; 2e-4 leaves margin for the larger (256x2) sample of outputs.
    np.testing.assert_allclose(np.asarray(out), np.asarray(ref),
                               atol=2e-4, rtol=2e-4)

    print("KERNEL_OK")
</pallas_src>

<mosaic_0001>
module attributes {stable_mosaic.version = 11 : i64} {
  func.func @lstm_block_kernel(%arg0: i32, %arg1: memref<128x8x32xf32, #tpu.memory_space<vmem>>, %arg2: memref<32x128xf32, #tpu.memory_space<vmem>>, %arg3: memref<32x128xf32, #tpu.memory_space<vmem>>, %arg4: memref<1x128xf32, #tpu.memory_space<vmem>>, %arg5: memref<128x32xf32, #tpu.memory_space<vmem>>, %arg6: memref<128x32xf32, #tpu.memory_space<vmem>>, %arg7: memref<32x2xf32, #tpu.memory_space<vmem>>, %arg8: memref<1x2xf32, #tpu.memory_space<vmem>>, %arg9: memref<128x2xf32, #tpu.memory_space<vmem>>) attributes {dimension_semantics = [#tpu.dimension_semantics<parallel>], iteration_bounds = array<i64: 2>, scalar_prefetch = 0 : i64, scratch_operands = 0 : i64, tpu.core_type = #tpu.core_type<tc>, window_params = [{transform_indices = @transform_0, window_bounds = array<i64: 128, 8, 32>}, {pipeline_mode = #tpu.pipeline_mode<synchronous>, transform_indices = @transform_1, window_bounds = array<i64: 32, 128>}, {pipeline_mode = #tpu.pipeline_mode<synchronous>, transform_indices = @transform_2, window_bounds = array<i64: 32, 128>}, {pipeline_mode = #tpu.pipeline_mode<synchronous>, transform_indices = @transform_3, window_bounds = array<i64: 1, 128>}, {transform_indices = @transform_4, window_bounds = array<i64: 128, 32>}, {transform_indices = @transform_5, window_bounds = array<i64: 128, 32>}, {pipeline_mode = #tpu.pipeline_mode<synchronous>, transform_indices = @transform_6, window_bounds = array<i64: 32, 2>}, {pipeline_mode = #tpu.pipeline_mode<synchronous>, transform_indices = @transform_7, window_bounds = array<i64: 1, 2>}, {transform_indices = @transform_8, window_bounds = array<i64: 128, 2>}]} {
    %c0 = arith.constant 0 : index
    %c0_0 = arith.constant 0 : index
    %0 = vector.load %arg2[%c0, %c0_0] : memref<32x128xf32, #tpu.memory_space<vmem>>, vector<32x128xf32>
    %c0_1 = arith.constant 0 : index
    %c0_2 = arith.constant 0 : index
    %1 = vector.load %arg3[%c0_1, %c0_2] : memref<32x128xf32, #tpu.memory_space<vmem>>, vector<32x128xf32>
    %c0_3 = arith.constant 0 : index
    %c0_4 = arith.constant 0 : index
    %2 = vector.load %arg4[%c0_3, %c0_4] : memref<1x128xf32, #tpu.memory_space<vmem>>, vector<1x128xf32>
    %3 = tpu.iota {dimensions = array<i32: 1>} : vector<128x128xi32>
    %c64_i32 = arith.constant 64 : i32
    %4 = vector.broadcast %c64_i32 : i32 to vector<128x128xi32>
    %5 = arith.cmpi sge, %3, %4 : vector<128x128xi32>
    %c96_i32 = arith.constant 96 : i32
    %6 = vector.broadcast %c96_i32 : i32 to vector<128x128xi32>
    %7 = arith.cmpi slt, %3, %6 : vector<128x128xi32>
    %8 = arith.andi %5, %7 : vector<128x128xi1>
    %c0_5 = arith.constant 0 : index
    %c0_6 = arith.constant 0 : index
    %9 = vector.load %arg5[%c0_5, %c0_6] : memref<128x32xf32, #tpu.memory_space<vmem>>, vector<128x32xf32>
    %c0_7 = arith.constant 0 : index
    %c0_8 = arith.constant 0 : index
    %10 = vector.load %arg6[%c0_7, %c0_8] : memref<128x32xf32, #tpu.memory_space<vmem>>, vector<128x32xf32>
    %c0_9 = arith.constant 0 : index
    %c0_10 = arith.constant 0 : index
    %c0_11 = arith.constant 0 : index
    %11 = vector.load %arg1[%c0_9, %c0_10, %c0_11] : memref<128x8x32xf32, #tpu.memory_space<vmem>>, vector<128x1x32xf32>
    %12 = vector.shape_cast %11 : vector<128x1x32xf32> to vector<128x32xf32>
    %cst = arith.constant dense<0.000000e+00> : vector<128x128xf32>
    %13 = tpu.matmul %12, %0, %cst {dimension_numbers = #tpu.dot_dimension_numbers<[1], [0], [0], [1], [0, 0, 1, 1], [], []>} : vector<128x32xf32>, vector<32x128xf32>, vector<128x128xf32> -> vector<128x128xf32>
    %14 = vector.broadcast %2 : vector<1x128xf32> to vector<128x128xf32>
    %15 = arith.addf %13, %14 : vector<128x128xf32>
    %cst_12 = arith.constant dense<0.000000e+00> : vector<128x128xf32>
    %16 = tpu.matmul %9, %1, %cst_12 {dimension_numbers = #tpu.dot_dimension_numbers<[1], [0], [0], [1], [0, 0, 1, 1], [], []>} : vector<128x32xf32>, vector<32x128xf32>, vector<128x128xf32> -> vector<128x128xf32>
    %17 = arith.addf %15, %16 : vector<128x128xf32>
    %18 = arith.negf %17 : vector<128x128xf32>
    %19 = math.exp %18 : vector<128x128xf32>
    %cst_13 = arith.constant 1.000000e+00 : f32
    %20 = vector.broadcast %cst_13 : f32 to vector<128x128xf32>
    %21 = arith.addf %20, %19 : vector<128x128xf32>
    %22 = arith.divf %20, %21 : vector<128x128xf32>
    %cst_14 = arith.constant 2.000000e+00 : f32
    %23 = vector.broadcast %cst_14 : f32 to vector<128x128xf32>
    %24 = arith.mulf %23, %22 : vector<128x128xf32>
    %cst_15 = arith.constant 1.000000e+00 : f32
    %25 = vector.broadcast %cst_15 : f32 to vector<128x128xf32>
    %26 = arith.subf %24, %25 : vector<128x128xf32>
    %27 = arith.select %8, %26, %22 : vector<128x128xi1>, vector<128x128xf32>
    %28 = vector.extract_strided_slice %27 {offsets = [0, 0], sizes = [128, 32], strides = [1, 1]} : vector<128x128xf32> to vector<128x32xf32>
    %29 = vector.extract_strided_slice %27 {offsets = [0, 32], sizes = [128, 32], strides = [1, 1]} : vector<128x128xf32> to vector<128x32xf32>
    %30 = vector.extract_strided_slice %27 {offsets = [0, 64], sizes = [128, 32], strides = [1, 1]} : vector<128x128xf32> to vector<128x32xf32>
    %31 = vector.extract_strided_slice %27 {offsets = [0, 96], sizes = [128, 32], strides = [1, 1]} : vector<128x128xf32> to vector<128x32xf32>
    %32 = arith.mulf %29, %10 : vector<128x32xf32>
    %33 = arith.mulf %28, %30 : vector<128x32xf32>
    %34 = arith.addf %32, %33 : vector<128x32xf32>
    %35 = math.tanh %34 : vector<128x32xf32>
    %36 = arith.mulf %31, %35 : vector<128x32xf32>
    %c0_16 = arith.constant 0 : index
    %c1 = arith.constant 1 : index
    %c0_17 = arith.constant 0 : index
    %37 = vector.load %arg1[%c0_16, %c1, %c0_17] : memref<128x8x32xf32, #tpu.memory_space<vmem>>, vector<128x1x32xf32>
    %38 = vector.shape_cast %37 : vector<128x1x32xf32> to vector<128x32xf32>
    %cst_18 = arith.constant dense<0.000000e+00> : vector<128x128xf32>
    %39 = tpu.matmul %38, %0, %cst_18 {dimension_numbers = #tpu.dot_dimension_numbers<[1], [0], [0], [1], [0, 0, 1, 1], [], []>} : vector<128x32xf32>, vector<32x128xf32>, vector<128x128xf32> -> vector<128x128xf32>
    %40 = vector.broadcast %2 : vector<1x128xf32> to vector<128x128xf32>
    %41 = arith.addf %39, %40 : vector<128x128xf32>
    %cst_19 = arith.constant dense<0.000000e+00> : vector<128x128xf32>
    %42 = tpu.matmul %36, %1, %cst_19 {dimension_numbers = #tpu.dot_dimension_numbers<[1], [0], [0], [1], [0, 0, 1, 1], [], []>} : vector<128x32xf32>, vector<32x128xf32>, vector<128x128xf32> -> vector<128x128xf32>
    %43 = arith.addf %41, %42 : vector<128x128xf32>
    %44 = arith.negf %43 : vector<128x128xf32>
    %45 = math.exp %44 : vector<128x128xf32>
    %cst_20 = arith.constant 1.000000e+00 : f32
    %46 = vector.broadcast %cst_20 : f32 to vector<128x128xf32>
    %47 = arith.addf %46, %45 : vector<128x128xf32>
    %48 = arith.divf %46, %47 : vector<128x128xf32>
    %cst_21 = arith.constant 2.000000e+00 : f32
    %49 = vector.broadcast %cst_21 : f32 to vector<128x128xf32>
    %50 = arith.mulf %49, %48 : vector<128x128xf32>
    %cst_22 = arith.constant 1.000000e+00 : f32
    %51 = vector.broadcast %cst_22 : f32 to vector<128x128xf32>
    %52 = arith.subf %50, %51 : vector<128x128xf32>
    %53 = arith.select %8, %52, %48 : vector<128x128xi1>, vector<128x128xf32>
    %54 = vector.extract_strided_slice %53 {offsets = [0, 0], sizes = [128, 32], strides = [1, 1]} : vector<128x128xf32> to vector<128x32xf32>
    %55 = vector.extract_strided_slice %53 {offsets = [0, 32], sizes = [128, 32], strides = [1, 1]} : vector<128x128xf32> to vector<128x32xf32>
    %56 = vector.extract_strided_slice %53 {offsets = [0, 64], sizes = [128, 32], strides = [1, 1]} : vector<128x128xf32> to vector<128x32xf32>
    %57 = vector.extract_strided_slice %53 {offsets = [0, 96], sizes = [128, 32], strides = [1, 1]} : vector<128x128xf32> to vector<128x32xf32>
    %58 = arith.mulf %55, %34 : vector<128x32xf32>
    %59 = arith.mulf %54, %56 : vector<128x32xf32>
    %60 = arith.addf %58, %59 : vector<128x32xf32>
    %61 = math.tanh %60 : vector<128x32xf32>
    %62 = arith.mulf %57, %61 : vector<128x32xf32>
    %c0_23 = arith.constant 0 : index
    %c2 = arith.constant 2 : index
    %c0_24 = arith.constant 0 : index
    %63 = vector.load %arg1[%c0_23, %c2, %c0_24] : memref<128x8x32xf32, #tpu.memory_space<vmem>>, vector<128x1x32xf32>
    %64 = vector.shape_cast %63 : vector<128x1x32xf32> to vector<128x32xf32>
    %cst_25 = arith.constant dense<0.000000e+00> : vector<128x128xf32>
    %65 = tpu.matmul %64, %0, %cst_25 {dimension_numbers = #tpu.dot_dimension_numbers<[1], [0], [0], [1], [0, 0, 1, 1], [], []>} : vector<128x32xf32>, vector<32x128xf32>, vector<128x128xf32> -> vector<128x128xf32>
    %66 = vector.broadcast %2 : vector<1x128xf32> to vector<128x128xf32>
    %67 = arith.addf %65, %66 : vector<128x128xf32>
    %cst_26 = arith.constant dense<0.000000e+00> : vector<128x128xf32>
    %68 = tpu.matmul %62, %1, %cst_26 {dimension_numbers = #tpu.dot_dimension_numbers<[1], [0], [0], [1], [0, 0, 1, 1], [], []>} : vector<128x32xf32>, vector<32x128xf32>, vector<128x128xf32> -> vector<128x128xf32>
    %69 = arith.addf %67, %68 : vector<128x128xf32>
    %70 = arith.negf %69 : vector<128x128xf32>
    %71 = math.exp %70 : vector<128x128xf32>
    %cst_27 = arith.constant 1.000000e+00 : f32
    %72 = vector.broadcast %cst_27 : f32 to vector<128x128xf32>
    %73 = arith.addf %72, %71 : vector<128x128xf32>
    %74 = arith.divf %72, %73 : vector<128x128xf32>
    %cst_28 = arith.constant 2.000000e+00 : f32
    %75 = vector.broadcast %cst_28 : f32 to vector<128x128xf32>
    %76 = arith.mulf %75, %74 : vector<128x128xf32>
    %cst_29 = arith.constant 1.000000e+00 : f32
    %77 = vector.broadcast %cst_29 : f32 to vector<128x128xf32>
    %78 = arith.subf %76, %77 : vector<128x128xf32>
    %79 = arith.select %8, %78, %74 : vector<128x128xi1>, vector<128x128xf32>
    %80 = vector.extract_strided_slice %79 {offsets = [0, 0], sizes = [128, 32], strides = [1, 1]} : vector<128x128xf32> to vector<128x32xf32>
    %81 = vector.extract_strided_slice %79 {offsets = [0, 32], sizes = [128, 32], strides = [1, 1]} : vector<128x128xf32> to vector<128x32xf32>
    %82 = vector.extract_strided_slice %79 {offsets = [0, 64], sizes = [128, 32], strides = [1, 1]} : vector<128x128xf32> to vector<128x32xf32>
    %83 = vector.extract_strided_slice %79 {offsets = [0, 96], sizes = [128, 32], strides = [1, 1]} : vector<128x128xf32> to vector<128x32xf32>
    %84 = arith.mulf %81, %60 : vector<128x32xf32>
    %85 = arith.mulf %80, %82 : vector<128x32xf32>
    %86 = arith.addf %84, %85 : vector<128x32xf32>
    %87 = math.tanh %86 : vector<128x32xf32>
    %88 = arith.mulf %83, %87 : vector<128x32xf32>
    %c0_30 = arith.constant 0 : index
    %c3 = arith.constant 3 : index
    %c0_31 = arith.constant 0 : index
    %89 = vector.load %arg1[%c0_30, %c3, %c0_31] : memref<128x8x32xf32, #tpu.memory_space<vmem>>, vector<128x1x32xf32>
    %90 = vector.shape_cast %89 : vector<128x1x32xf32> to vector<128x32xf32>
    %cst_32 = arith.constant dense<0.000000e+00> : vector<128x128xf32>
    %91 = tpu.matmul %90, %0, %cst_32 {dimension_numbers = #tpu.dot_dimension_numbers<[1], [0], [0], [1], [0, 0, 1, 1], [], []>} : vector<128x32xf32>, vector<32x128xf32>, vector<128x128xf32> -> vector<128x128xf32>
    %92 = vector.broadcast %2 : vector<1x128xf32> to vector<128x128xf32>
    %93 = arith.addf %91, %92 : vector<128x128xf32>
    %cst_33 = arith.constant dense<0.000000e+00> : vector<128x128xf32>
    %94 = tpu.matmul %88, %1, %cst_33 {dimension_numbers = #tpu.dot_dimension_numbers<[1], [0], [0], [1], [0, 0, 1, 1], [], []>} : vector<128x32xf32>, vector<32x128xf32>, vector<128x128xf32> -> vector<128x128xf32>
    %95 = arith.addf %93, %94 : vector<128x128xf32>
    %96 = arith.negf %95 : vector<128x128xf32>
    %97 = math.exp %96 : vector<128x128xf32>
    %cst_34 = arith.constant 1.000000e+00 : f32
    %98 = vector.broadcast %cst_34 : f32 to vector<128x128xf32>
    %99 = arith.addf %98, %97 : vector<128x128xf32>
    %100 = arith.divf %98, %99 : vector<128x128xf32>
    %cst_35 = arith.constant 2.000000e+00 : f32
    %101 = vector.broadcast %cst_35 : f32 to vector<128x128xf32>
    %102 = arith.mulf %101, %100 : vector<128x128xf32>
    %cst_36 = arith.constant 1.000000e+00 : f32
    %103 = vector.broadcast %cst_36 : f32 to vector<128x128xf32>
    %104 = arith.subf %102, %103 : vector<128x128xf32>
    %105 = arith.select %8, %104, %100 : vector<128x128xi1>, vector<128x128xf32>
    %106 = vector.extract_strided_slice %105 {offsets = [0, 0], sizes = [128, 32], strides = [1, 1]} : vector<128x128xf32> to vector<128x32xf32>
    %107 = vector.extract_strided_slice %105 {offsets = [0, 32], sizes = [128, 32], strides = [1, 1]} : vector<128x128xf32> to vector<128x32xf32>
    %108 = vector.extract_strided_slice %105 {offsets = [0, 64], sizes = [128, 32], strides = [1, 1]} : vector<128x128xf32> to vector<128x32xf32>
    %109 = vector.extract_strided_slice %105 {offsets = [0, 96], sizes = [128, 32], strides = [1, 1]} : vector<128x128xf32> to vector<128x32xf32>
    %110 = arith.mulf %107, %86 : vector<128x32xf32>
    %111 = arith.mulf %106, %108 : vector<128x32xf32>
    %112 = arith.addf %110, %111 : vector<128x32xf32>
    %113 = math.tanh %112 : vector<128x32xf32>
    %114 = arith.mulf %109, %113 : vector<128x32xf32>
    %c0_37 = arith.constant 0 : index
    %c4 = arith.constant 4 : index
    %c0_38 = arith.constant 0 : index
    %115 = vector.load %arg1[%c0_37, %c4, %c0_38] : memref<128x8x32xf32, #tpu.memory_space<vmem>>, vector<128x1x32xf32>
    %116 = vector.shape_cast %115 : vector<128x1x32xf32> to vector<128x32xf32>
    %cst_39 = arith.constant dense<0.000000e+00> : vector<128x128xf32>
    %117 = tpu.matmul %116, %0, %cst_39 {dimension_numbers = #tpu.dot_dimension_numbers<[1], [0], [0], [1], [0, 0, 1, 1], [], []>} : vector<128x32xf32>, vector<32x128xf32>, vector<128x128xf32> -> vector<128x128xf32>
    %118 = vector.broadcast %2 : vector<1x128xf32> to vector<128x128xf32>
    %119 = arith.addf %117, %118 : vector<128x128xf32>
    %cst_40 = arith.constant dense<0.000000e+00> : vector<128x128xf32>
    %120 = tpu.matmul %114, %1, %cst_40 {dimension_numbers = #tpu.dot_dimension_numbers<[1], [0], [0], [1], [0, 0, 1, 1], [], []>} : vector<128x32xf32>, vector<32x128xf32>, vector<128x128xf32> -> vector<128x128xf32>
    %121 = arith.addf %119, %120 : vector<128x128xf32>
    %122 = arith.negf %121 : vector<128x128xf32>
    %123 = math.exp %122 : vector<128x128xf32>
    %cst_41 = arith.constant 1.000000e+00 : f32
    %124 = vector.broadcast %cst_41 : f32 to vector<128x128xf32>
    %125 = arith.addf %124, %123 : vector<128x128xf32>
    %126 = arith.divf %124, %125 : vector<128x128xf32>
    %cst_42 = arith.constant 2.000000e+00 : f32
    %127 = vector.broadcast %cst_42 : f32 to vector<128x128xf32>
    %128 = arith.mulf %127, %126 : vector<128x128xf32>
    %cst_43 = arith.constant 1.000000e+00 : f32
    %129 = vector.broadcast %cst_43 : f32 to vector<128x128xf32>
    %130 = arith.subf %128, %129 : vector<128x128xf32>
    %131 = arith.select %8, %130, %126 : vector<128x128xi1>, vector<128x128xf32>
    %132 = vector.extract_strided_slice %131 {offsets = [0, 0], sizes = [128, 32], strides = [1, 1]} : vector<128x128xf32> to vector<128x32xf32>
    %133 = vector.extract_strided_slice %131 {offsets = [0, 32], sizes = [128, 32], strides = [1, 1]} : vector<128x128xf32> to vector<128x32xf32>
    %134 = vector.extract_strided_slice %131 {offsets = [0, 64], sizes = [128, 32], strides = [1, 1]} : vector<128x128xf32> to vector<128x32xf32>
    %135 = vector.extract_strided_slice %131 {offsets = [0, 96], sizes = [128, 32], strides = [1, 1]} : vector<128x128xf32> to vector<128x32xf32>
    %136 = arith.mulf %133, %112 : vector<128x32xf32>
    %137 = arith.mulf %132, %134 : vector<128x32xf32>
    %138 = arith.addf %136, %137 : vector<128x32xf32>
    %139 = math.tanh %138 : vector<128x32xf32>
    %140 = arith.mulf %135, %139 : vector<128x32xf32>
    %c0_44 = arith.constant 0 : index
    %c5 = arith.constant 5 : index
    %c0_45 = arith.constant 0 : index
    %141 = vector.load %arg1[%c0_44, %c5, %c0_45] : memref<128x8x32xf32, #tpu.memory_space<vmem>>, vector<128x1x32xf32>
    %142 = vector.shape_cast %141 : vector<128x1x32xf32> to vector<128x32xf32>
    %cst_46 = arith.constant dense<0.000000e+00> : vector<128x128xf32>
    %143 = tpu.matmul %142, %0, %cst_46 {dimension_numbers = #tpu.dot_dimension_numbers<[1], [0], [0], [1], [0, 0, 1, 1], [], []>} : vector<128x32xf32>, vector<32x128xf32>, vector<128x128xf32> -> vector<128x128xf32>
    %144 = vector.broadcast %2 : vector<1x128xf32> to vector<128x128xf32>
    %145 = arith.addf %143, %144 : vector<128x128xf32>
    %cst_47 = arith.constant dense<0.000000e+00> : vector<128x128xf32>
    %146 = tpu.matmul %140, %1, %cst_47 {dimension_numbers = #tpu.dot_dimension_numbers<[1], [0], [0], [1], [0, 0, 1, 1], [], []>} : vector<128x32xf32>, vector<32x128xf32>, vector<128x128xf32> -> vector<128x128xf32>
    %147 = arith.addf %145, %146 : vector<128x128xf32>
    %148 = arith.negf %147 : vector<128x128xf32>
    %149 = math.exp %148 : vector<128x128xf32>
    %cst_48 = arith.constant 1.000000e+00 : f32
    %150 = vector.broadcast %cst_48 : f32 to vector<128x128xf32>
    %151 = arith.addf %150, %149 : vector<128x128xf32>
    %152 = arith.divf %150, %151 : vector<128x128xf32>
    %cst_49 = arith.constant 2.000000e+00 : f32
    %153 = vector.broadcast %cst_49 : f32 to vector<128x128xf32>
    %154 = arith.mulf %153, %152 : vector<128x128xf32>
    %cst_50 = arith.constant 1.000000e+00 : f32
    %155 = vector.broadcast %cst_50 : f32 to vector<128x128xf32>
    %156 = arith.subf %154, %155 : vector<128x128xf32>
    %157 = arith.select %8, %156, %152 : vector<128x128xi1>, vector<128x128xf32>
    %158 = vector.extract_strided_slice %157 {offsets = [0, 0], sizes = [128, 32], strides = [1, 1]} : vector<128x128xf32> to vector<128x32xf32>
    %159 = vector.extract_strided_slice %157 {offsets = [0, 32], sizes = [128, 32], strides = [1, 1]} : vector<128x128xf32> to vector<128x32xf32>
    %160 = vector.extract_strided_slice %157 {offsets = [0, 64], sizes = [128, 32], strides = [1, 1]} : vector<128x128xf32> to vector<128x32xf32>
    %161 = vector.extract_strided_slice %157 {offsets = [0, 96], sizes = [128, 32], strides = [1, 1]} : vector<128x128xf32> to vector<128x32xf32>
    %162 = arith.mulf %159, %138 : vector<128x32xf32>
    %163 = arith.mulf %158, %160 : vector<128x32xf32>
    %164 = arith.addf %162, %163 : vector<128x32xf32>
    %165 = math.tanh %164 : vector<128x32xf32>
    %166 = arith.mulf %161, %165 : vector<128x32xf32>
    %c0_51 = arith.constant 0 : index
    %c6 = arith.constant 6 : index
    %c0_52 = arith.constant 0 : index
    %167 = vector.load %arg1[%c0_51, %c6, %c0_52] : memref<128x8x32xf32, #tpu.memory_space<vmem>>, vector<128x1x32xf32>
    %168 = vector.shape_cast %167 : vector<128x1x32xf32> to vector<128x32xf32>
    %cst_53 = arith.constant dense<0.000000e+00> : vector<128x128xf32>
    %169 = tpu.matmul %168, %0, %cst_53 {dimension_numbers = #tpu.dot_dimension_numbers<[1], [0], [0], [1], [0, 0, 1, 1], [], []>} : vector<128x32xf32>, vector<32x128xf32>, vector<128x128xf32> -> vector<128x128xf32>
    %170 = vector.broadcast %2 : vector<1x128xf32> to vector<128x128xf32>
    %171 = arith.addf %169, %170 : vector<128x128xf32>
    %cst_54 = arith.constant dense<0.000000e+00> : vector<128x128xf32>
    %172 = tpu.matmul %166, %1, %cst_54 {dimension_numbers = #tpu.dot_dimension_numbers<[1], [0], [0], [1], [0, 0, 1, 1], [], []>} : vector<128x32xf32>, vector<32x128xf32>, vector<128x128xf32> -> vector<128x128xf32>
    %173 = arith.addf %171, %172 : vector<128x128xf32>
    %174 = arith.negf %173 : vector<128x128xf32>
    %175 = math.exp %174 : vector<128x128xf32>
    %cst_55 = arith.constant 1.000000e+00 : f32
    %176 = vector.broadcast %cst_55 : f32 to vector<128x128xf32>
    %177 = arith.addf %176, %175 : vector<128x128xf32>
    %178 = arith.divf %176, %177 : vector<128x128xf32>
    %cst_56 = arith.constant 2.000000e+00 : f32
    %179 = vector.broadcast %cst_56 : f32 to vector<128x128xf32>
    %180 = arith.mulf %179, %178 : vector<128x128xf32>
    %cst_57 = arith.constant 1.000000e+00 : f32
    %181 = vector.broadcast %cst_57 : f32 to vector<128x128xf32>
    %182 = arith.subf %180, %181 : vector<128x128xf32>
    %183 = arith.select %8, %182, %178 : vector<128x128xi1>, vector<128x128xf32>
    %184 = vector.extract_strided_slice %183 {offsets = [0, 0], sizes = [128, 32], strides = [1, 1]} : vector<128x128xf32> to vector<128x32xf32>
    %185 = vector.extract_strided_slice %183 {offsets = [0, 32], sizes = [128, 32], strides = [1, 1]} : vector<128x128xf32> to vector<128x32xf32>
    %186 = vector.extract_strided_slice %183 {offsets = [0, 64], sizes = [128, 32], strides = [1, 1]} : vector<128x128xf32> to vector<128x32xf32>
    %187 = vector.extract_strided_slice %183 {offsets = [0, 96], sizes = [128, 32], strides = [1, 1]} : vector<128x128xf32> to vector<128x32xf32>
    %188 = arith.mulf %185, %164 : vector<128x32xf32>
    %189 = arith.mulf %184, %186 : vector<128x32xf32>
    %190 = arith.addf %188, %189 : vector<128x32xf32>
    %191 = math.tanh %190 : vector<128x32xf32>
    %192 = arith.mulf %187, %191 : vector<128x32xf32>
    %c0_58 = arith.constant 0 : index
    %c7 = arith.constant 7 : index
    %c0_59 = arith.constant 0 : index
    %193 = vector.load %arg1[%c0_58, %c7, %c0_59] : memref<128x8x32xf32, #tpu.memory_space<vmem>>, vector<128x1x32xf32>
    %194 = vector.shape_cast %193 : vector<128x1x32xf32> to vector<128x32xf32>
    %cst_60 = arith.constant dense<0.000000e+00> : vector<128x128xf32>
    %195 = tpu.matmul %194, %0, %cst_60 {dimension_numbers = #tpu.dot_dimension_numbers<[1], [0], [0], [1], [0, 0, 1, 1], [], []>} : vector<128x32xf32>, vector<32x128xf32>, vector<128x128xf32> -> vector<128x128xf32>
    %196 = vector.broadcast %2 : vector<1x128xf32> to vector<128x128xf32>
    %197 = arith.addf %195, %196 : vector<128x128xf32>
    %cst_61 = arith.constant dense<0.000000e+00> : vector<128x128xf32>
    %198 = tpu.matmul %192, %1, %cst_61 {dimension_numbers = #tpu.dot_dimension_numbers<[1], [0], [0], [1], [0, 0, 1, 1], [], []>} : vector<128x32xf32>, vector<32x128xf32>, vector<128x128xf32> -> vector<128x128xf32>
    %199 = arith.addf %197, %198 : vector<128x128xf32>
    %200 = arith.negf %199 : vector<128x128xf32>
    %201 = math.exp %200 : vector<128x128xf32>
    %cst_62 = arith.constant 1.000000e+00 : f32
    %202 = vector.broadcast %cst_62 : f32 to vector<128x128xf32>
    %203 = arith.addf %202, %201 : vector<128x128xf32>
    %204 = arith.divf %202, %203 : vector<128x128xf32>
    %cst_63 = arith.constant 2.000000e+00 : f32
    %205 = vector.broadcast %cst_63 : f32 to vector<128x128xf32>
    %206 = arith.mulf %205, %204 : vector<128x128xf32>
    %cst_64 = arith.constant 1.000000e+00 : f32
    %207 = vector.broadcast %cst_64 : f32 to vector<128x128xf32>
    %208 = arith.subf %206, %207 : vector<128x128xf32>
    %209 = arith.select %8, %208, %204 : vector<128x128xi1>, vector<128x128xf32>
    %210 = vector.extract_strided_slice %209 {offsets = [0, 0], sizes = [128, 32], strides = [1, 1]} : vector<128x128xf32> to vector<128x32xf32>
    %211 = vector.extract_strided_slice %209 {offsets = [0, 32], sizes = [128, 32], strides = [1, 1]} : vector<128x128xf32> to vector<128x32xf32>
    %212 = vector.extract_strided_slice %209 {offsets = [0, 64], sizes = [128, 32], strides = [1, 1]} : vector<128x128xf32> to vector<128x32xf32>
    %213 = vector.extract_strided_slice %209 {offsets = [0, 96], sizes = [128, 32], strides = [1, 1]} : vector<128x128xf32> to vector<128x32xf32>
    %214 = arith.mulf %211, %190 : vector<128x32xf32>
    %215 = arith.mulf %210, %212 : vector<128x32xf32>
    %216 = arith.addf %214, %215 : vector<128x32xf32>
    %217 = math.tanh %216 : vector<128x32xf32>
    %218 = arith.mulf %213, %217 : vector<128x32xf32>
    %c0_65 = arith.constant 0 : index
    %c0_66 = arith.constant 0 : index
    %219 = vector.load %arg7[%c0_65, %c0_66] : memref<32x2xf32, #tpu.memory_space<vmem>>, vector<32x2xf32>
    %cst_67 = arith.constant dense<0.000000e+00> : vector<128x2xf32>
    %220 = tpu.matmul %218, %219, %cst_67 {dimension_numbers = #tpu.dot_dimension_numbers<[1], [0], [0], [1], [0, 0, 1, 1], [], []>} : vector<128x32xf32>, vector<32x2xf32>, vector<128x2xf32> -> vector<128x2xf32>
    %c0_68 = arith.constant 0 : index
    %c0_69 = arith.constant 0 : index
    %221 = vector.load %arg8[%c0_68, %c0_69] : memref<1x2xf32, #tpu.memory_space<vmem>>, vector<1x2xf32>
    %222 = vector.broadcast %221 : vector<1x2xf32> to vector<128x2xf32>
    %223 = arith.addf %220, %222 : vector<128x2xf32>
    %cst_70 = arith.constant dense<0xFF800000> : vector<128xf32>
    %224 = vector.multi_reduction <maximumf>, %223, %cst_70 [1] : vector<128x2xf32> to vector<128xf32>
    %225 = vector.shape_cast %224 : vector<128xf32> to vector<128x1xf32>
    %226 = vector.broadcast %225 : vector<128x1xf32> to vector<128x2xf32>
    %227 = arith.subf %223, %226 : vector<128x2xf32>
    %228 = math.exp %227 : vector<128x2xf32>
    %cst_71 = arith.constant dense<0.000000e+00> : vector<128xf32>
    %229 = vector.multi_reduction <add>, %228, %cst_71 [1] : vector<128x2xf32> to vector<128xf32>
    %230 = vector.shape_cast %229 : vector<128xf32> to vector<128x1xf32>
    %231 = math.log %230 : vector<128x1xf32>
    %232 = arith.addf %231, %225 : vector<128x1xf32>
    %233 = vector.broadcast %232 : vector<128x1xf32> to vector<128x2xf32>
    %234 = arith.subf %223, %233 : vector<128x2xf32>
    %c0_72 = arith.constant 0 : index
    %c0_73 = arith.constant 0 : index
    %235 = vector.load %arg9[%c0_72, %c0_73] : memref<128x2xf32, #tpu.memory_space<vmem>>, vector<128x2xf32>
    tpu.vector_store %arg9[%c0_72, %c0_73], %234 {strides = array<i32>} : memref<128x2xf32, #tpu.memory_space<vmem>>, vector<128x2xf32>,
    return
  }
  func.func @transform_0(%arg0: i32) -> (i32, i32, i32) {
    %c0_i32 = arith.constant 0 : i32
    %c0_i32_0 = arith.constant 0 : i32
    %c0_i32_1 = arith.constant 0 : i32
    return %arg0, %c0_i32, %c0_i32_0 : i32, i32, i32
  }
  func.func @transform_1(%arg0: i32) -> (i32, i32) {
    %c0_i32 = arith.constant 0 : i32
    %c0_i32_0 = arith.constant 0 : i32
    %c0_i32_1 = arith.constant 0 : i32
    return %c0_i32, %c0_i32_0 : i32, i32
  }
  func.func @transform_2(%arg0: i32) -> (i32, i32) {
    %c0_i32 = arith.constant 0 : i32
    %c0_i32_0 = arith.constant 0 : i32
    %c0_i32_1 = arith.constant 0 : i32
    return %c0_i32, %c0_i32_0 : i32, i32
  }
  func.func @transform_3(%arg0: i32) -> (i32, i32) {
    %c0_i32 = arith.constant 0 : i32
    %c0_i32_0 = arith.constant 0 : i32
    %c0_i32_1 = arith.constant 0 : i32
    return %c0_i32, %c0_i32_0 : i32, i32
  }
  func.func @transform_4(%arg0: i32) -> (i32, i32) {
    %c0_i32 = arith.constant 0 : i32
    %c0_i32_0 = arith.constant 0 : i32
    return %arg0, %c0_i32 : i32, i32
  }
  func.func @transform_5(%arg0: i32) -> (i32, i32) {
    %c0_i32 = arith.constant 0 : i32
    %c0_i32_0 = arith.constant 0 : i32
    return %arg0, %c0_i32 : i32, i32
  }
  func.func @transform_6(%arg0: i32) -> (i32, i32) {
    %c0_i32 = arith.constant 0 : i32
    %c0_i32_0 = arith.constant 0 : i32
    %c0_i32_1 = arith.constant 0 : i32
    return %c0_i32, %c0_i32_0 : i32, i32
  }
  func.func @transform_7(%arg0: i32) -> (i32, i32) {
    %c0_i32 = arith.constant 0 : i32
    %c0_i32_0 = arith.constant 0 : i32
    %c0_i32_1 = arith.constant 0 : i32
    return %c0_i32, %c0_i32_0 : i32, i32
  }
  func.func @transform_8(%arg0: i32) -> (i32, i32) {
    %c0_i32 = arith.constant 0 : i32
    %c0_i32_0 = arith.constant 0 : i32
    return %arg0, %c0_i32 : i32, i32
  }
}

</mosaic_0001>

<bundles_post_ra>
// kernel: tpu_custom_call.1
= control target key start
LH: loop header
LB: loop body
LE: loop exit
PB: predicated region body
PF: predicated region fallthrough
CT: control target
= control target key end

     0   :  { %s13887_s27 = smov 0   ;;  %s18799_s0 = inlined_call_operand.vmem [shape: f32[256,8,32], index: 0, kind: input, shape index: {}]   ;;  %s18800_s1 = inlined_call_operand.vmem [shape: f32[32,128], index: 1, kind: input, shape index: {}]   ;;  %s18801_s2 = inlined_call_operand.vmem [shape: f32[32,128], index: 2, kind: input, shape index: {}]   ;;  %s18802_s3 = inlined_call_operand.vmem [shape: f32[1,128], index: 3, kind: input, shape index: {}]   ;;  %s18803_s4 = inlined_call_operand.vmem [shape: f32[256,32], index: 4, kind: input, shape index: {}]   ;;  %s18804_s5 = inlined_call_operand.vmem [shape: f32[256,32], index: 5, kind: input, shape index: {}]   ;;  %s18805_s6 = inlined_call_operand.vmem [shape: f32[32,2], index: 6, kind: input, shape index: {}]   ;;  %s18806_s7 = inlined_call_operand.vmem [shape: f32[1,2], index: 7, kind: input, shape index: {}]   ;;  %s18807_s8 = inlined_call_operand.vmem [shape: f32[256,2], index: 8, kind: output, shape index: {}]  }
   0x1 LB: > { %s11498_s28 = sadd.s32 4294967295, %s13838_s27   ;;  %p11502_p0 = scmp.ge.s32.totalorder %s13838_s27, 1  ;;  %s13838_s27 = sphi %s13887_s27, %s18_s27  }
   0x2   : > { %p285_p1 = scmp.lt.s32.totalorder %s13838_s27, 3 }
   0x4   : > { %p286_p2 = pnand %p11502_p0, %p285_p1 }
   0x5   : > { %s11503_s11 = sshll.u32 (!%p286_p2), %s11498_s28, 7  ;;  %s14054_s30 = sshll.u32 (!%p286_p2), %s11498_s28, 4 }
   0x6   : > { %289 = sbr.rel (%p286_p2) target bundleno = 6340 (0x18c4), region = 52  ;;  %p330_p3 = scmp.lt.s32.totalorder (!%p286_p2), %s11503_s11, 255 }
   0x7   : > { %p336_p4 = scmp.lt.s32.totalorder (!%p286_p2), %s14054_s30, 31  ;;  %s13840_s14 = smov (!%p286_p2), 64  }
   0x8   : > { %s13841_s18 = smov (!%p286_p2), 32  }
   0xb   : > { %v13898_v0 = vld [vmem:[%s18800_s1 + $0x18] sm:$0xff]  ;;  %v13903_v1 = vld [vmem:[%s18800_s1 + $0x10] sm:$0xff]  ;;  %v13913_v2 = vld [vmem:[%s18800_s1 + $0x8] sm:$0xff]  ;;  %s18811_s11 = smov (!%p330_p3, %s11503_s11), 255  ;;  %vm662_vm0 = vcmask 1041409   ;;  %vm665_vm1 = vcmask 1042434  }
   0xc   : > { %12927 = vmatprep.subr.mxu1 %v13898_v0  ;;  %12383 = vmatprep.subr.mxu0 %v13898_v0  ;;  %v13922_v3 = vld [vmem:[%s18800_s1] sm:$0xff]  ;;  %s11504_s16 = sshll.u32 %s18811_s11, 3  ;;  %vm668_vm2 = vcmask 1043459   ;;  %vm671_vm3 = vcmask 1044484   ;;  %vm674_vm4 = vcmask 1045509   ;;  %vm677_vm5 = vcmask 1046534  }
   0xd   : > { %12931 = vmatpush3.msra.mxu1 %v13898_v0  ;;  %12384 = vmatpush3.msra.mxu0 %v13898_v0  ;;  %s13931_s19 = scalar_lea.vmem %s18799_s0, %s11504_s16  ;;  %vm680_vm6 = vcmask 1047559   ;;  %v13936_v4 = vld [vmem:[%s18801_s2 + $0x18] sm:$0xff]  ;;  %vm892_vm7 = vcmask 261120   ;;  %s18813_s30 = smov (!%p336_p4, %s14054_s30), 31  ;;  %vm11193_vm11 = vcmask 15360  }
   0xe   : > { %12928 = vmatprep.subr.mxu1 %v13903_v1  ;;  %12385 = vmatprep.subr.mxu0 %v13903_v1  ;;  %v463_v5 = vld [vmem:[%s13931_s19 + $0x200] sm:$0x1]  ;;  %v464_v6 = vld [vmem:[%s13931_s19 + $0x208] sm:$0x1]  ;;  %v465_v7 = vld [vmem:[%s13931_s19 + $0x210] sm:$0x1] }
   0xf   : > { %12932 = vmatpush3.msra.mxu1 %v13903_v1  ;;  %12386 = vmatpush3.msra.mxu0 %v13903_v1  ;;  %v466_v8 = vld [vmem:[%s13931_s19 + $0x218] sm:$0x1]  ;;  %v467_v9 = vld [vmem:[%s13931_s19 + $0x220] sm:$0x1]  ;;  %v468_v10 = vld [vmem:[%s13931_s19 + $0x228] sm:$0x1] }
  0x10   : > { %12929 = vmatprep.subr.mxu1 %v13913_v2  ;;  %12387 = vmatprep.subr.mxu0 %v13913_v2  ;;  %v469_v11 = vld [vmem:[%s13931_s19 + $0x230] sm:$0x1]  ;;  %v470_v12 = vld [vmem:[%s13931_s19 + $0x238] sm:$0x1]  ;;  %v780_v13 = vrot.slane %v464_v6, 7  ;;  %v782_v14 = vrot.slane %v465_v7, 6 }
  0x11   : > { %12933 = vmatpush3.msra.mxu1 %v13913_v2  ;;  %12388 = vmatpush3.msra.mxu0 %v13913_v2  ;;  %v784_v15 = vrot.slane %v466_v8, 5  ;;  %v786_v16 = vrot.slane %v467_v9, 4  ;;  %v788_v17 = vrot.slane %v468_v10, 3  ;;  %v471_v18 = vld [vmem:[%s13931_s19 + $0x240] sm:$0x1]  ;;  %v790_v20 = vrot.slane %v469_v11, 2 }
  0x12   : > { %12930 = vmatprep.subr.mxu1 %v13922_v3  ;;  %12389 = vmatprep.subr.mxu0 %v13922_v3  ;;  %v781_v19 = vsel %vm662_vm0, %v780_v13, %v463_v5  ;;  %v792_v21 = vrot.slane %v470_v12, 1  ;;  %v472_v22 = vld [vmem:[%s13931_s19 + $0x248] sm:$0x1]  ;;  %v473_v23 = vld [vmem:[%s13931_s19 + $0x250] sm:$0x1]  ;;  %s14109_s28 = sshll.u32 %s18813_s30, 3 }
  0x13   : > { %12934 = vmatpush3.msra.mxu1 %v13922_v3  ;;  %12390 = vmatpush3.msra.mxu0 %v13922_v3  ;;  %v783_v24 = vsel %vm665_vm1, %v782_v14, %v781_v19  ;;  %v474_v25 = vld [vmem:[%s13931_s19 + $0x258] sm:$0x1]  ;;  %v475_v26 = vld [vmem:[%s13931_s19 + $0x260] sm:$0x1]  ;;  %v476_v27 = vld [vmem:[%s13931_s19 + $0x268] sm:$0x1]  ;;  %s14133_s11 = scalar_lea.vmem %s18803_s4, %s14109_s28  ;;  %s14335_s17 = scalar_lea.vmem %s18804_s5, %s14109_s28 }
  0x14   : > { %12415 = vmatprep.subr.mxu1 %v13936_v4  ;;  %12447 = vmatprep.subr.mxu0 %v13898_v0  ;;  %v785_v28 = vsel %vm668_vm2, %v784_v15, %v783_v24  ;;  %v477_v29 = vld [vmem:[%s13931_s19 + $0x270] sm:$0x1]  ;;  %v478_v30 = vld [vmem:[%s13931_s19 + $0x278] sm:$0x1]  ;;  %v794_v31 = vrot.slane %v472_v22, 7  ;;  %v796_v32 = vrot.slane %v473_v23, 6  ;;  %s18731_s20 = scalar_lea.vmem %s18807_s8, %s14109_s28 }
  0x15   : > { %v787_v33 = vsel %vm671_vm3, %v786_v16, %v785_v28  ;;  %v798_v34 = vrot.slane %v474_v25, 5  ;;  %v800_v35 = vrot.slane %v475_v26, 4  ;;  %v802_v36 = vrot.slane %v476_v27, 3  ;;  %v479_v37 = vld [vmem:[%s13931_s19 + $0x280] sm:$0x1]  ;;  %v13987_v5 = vld [vmem:[%s18801_s2 + $0x10] sm:$0xff] }
  0x16   : > { %v789_v38 = vsel %vm674_vm4, %v788_v17, %v787_v33  ;;  %v795_v39 = vsel %vm662_vm0, %v794_v31, %v471_v18  ;;  %v804_v40 = vrot.slane %v477_v29, 2  ;;  %v806_v41 = vrot.slane %v478_v30, 1  ;;  %v480_v42 = vld [vmem:[%s13931_s19 + $0x288] sm:$0x1]  ;;  %v481_v43 = vld [vmem:[%s13931_s19 + $0x290] sm:$0x1] }
  0x17   : > { %v791_v44 = vsel %vm677_vm5, %v790_v20, %v789_v38  ;;  %v797_v45 = vsel %vm665_vm1, %v796_v32, %v795_v39  ;;  %v482_v46 = vld [vmem:[%s13931_s19 + $0x298] sm:$0x1]  ;;  %v483_v47 = vld [vmem:[%s13931_s19 + $0x2a0] sm:$0x1]  ;;  %v484_v48 = vld [vmem:[%s13931_s19 + $0x2a8] sm:$0x1] }
  0x18   : > { %v793_v49 = vsel %vm680_vm6, %v792_v21, %v791_v44  ;;  %v799_v50 = vsel %vm668_vm2, %v798_v34, %v797_v45  ;;  %v485_v51 = vld [vmem:[%s13931_s19 + $0x2b0] sm:$0x1]  ;;  %v486_v52 = vld [vmem:[%s13931_s19 + $0x2b8] sm:$0x1]  ;;  %v808_v53 = vrot.slane %v480_v42, 7  ;;  %v810_v54 = vrot.slane %v481_v43, 6 }
  0x19   : > { %12403 = vmatprep.mubr.msk.f32.mxu1 %vm892_vm7, %v793_v49  ;;  %v801_v55 = vsel %vm671_vm3, %v800_v35, %v799_v50  ;;  %v812_v56 = vrot.slane %v482_v46, 5  ;;  %v814_v57 = vrot.slane %v483_v47, 4  ;;  %v816_v58 = vrot.slane %v484_v48, 3  ;;  %v487_v59 = vld [vmem:[%s13931_s19 + $0x2c0] sm:$0x1]  ;;  %v14006_v24 = vld [vmem:[%s18801_s2 + $0x8] sm:$0xff] }
  0x1a   : > { %v803_v60 = vsel %vm674_vm4, %v802_v36, %v801_v55  ;;  %v809_v61 = vsel %vm662_vm0, %v808_v53, %v479_v37  ;;  %v818_v62 = vrot.slane %v485_v51, 2  ;;  %v820_v63 = vrot.slane %v486_v52, 1  ;;  %v488_v6 = vld [vmem:[%s13931_s19 + $0x2c8] sm:$0x1]  ;;  %v489_v7 = vld [vmem:[%s13931_s19 + $0x2d0] sm:$0x1] }
  0x1b   : > { %v805_v8 = vsel %vm677_vm5, %v804_v40, %v803_v60  ;;  %v811_v9 = vsel %vm665_vm1, %v810_v54, %v809_v61  ;;  %v490_v10 = vld [vmem:[%s13931_s19 + $0x2d8] sm:$0x1]  ;;  %v491_v11 = vld [vmem:[%s13931_s19 + $0x2e0] sm:$0x1]  ;;  %v492_v12 = vld [vmem:[%s13931_s19 + $0x2e8] sm:$0x1] }
  0x1c   : > { %v807_v13 = vsel %vm680_vm6, %v806_v41, %v805_v8  ;;  %v813_v14 = vsel %vm668_vm2, %v812_v56, %v811_v9  ;;  %v493_v15 = vld [vmem:[%s13931_s19 + $0x2f0] sm:$0x1]  ;;  %v494_v16 = vld [vmem:[%s13931_s19 + $0x2f8] sm:$0x1]  ;;  %v822_v17 = vrot.slane %v488_v6, 7  ;;  %v824_v18 = vrot.slane %v489_v7, 6 }
  0x1d   : > { %12404 = vmatmul.mubr.msk.f32.vlgmr.msra.gmra.mxu1 %vm892_vm7, %v807_v13  ;;  %v815_v19 = vsel %vm671_vm3, %v814_v57, %v813_v14  ;;  %v826_v20 = vrot.slane %v490_v10, 5  ;;  %v828_v21 = vrot.slane %v491_v11, 4  ;;  %v830_v22 = vrot.slane %v492_v12, 3  ;;  %v495_v23 = vld [vmem:[%s13931_s19 + $0x300] sm:$0x1] }
  0x1e   : > { %12416 = vmatpush3.msra.mxu1 %v13936_v4  ;;  %v817_v25 = vsel %vm674_vm4, %v816_v58, %v815_v19  ;;  %v823_v26 = vsel %vm662_vm0, %v822_v17, %v487_v59  ;;  %v832_v27 = vrot.slane %v493_v15, 2  ;;  %v834_v28 = vrot.slane %v494_v16, 1  ;;  %v496_v29 = vld [vmem:[%s13931_s19 + $0x308] sm:$0x1]  ;;  %v497_v30 = vld [vmem:[%s13931_s19 + $0x310] sm:$0x1] }
  0x1f   : > { %v14016_v31 = vld [vmem:[%s18801_s2] sm:$0xff]  ;;  %v819_v32 = vsel %vm677_vm5, %v818_v62, %v817_v25  ;;  %12417 = vmatprep.subr.mxu1 %v13987_v5  ;;  %v825_v33 = vsel %vm665_vm1, %v824_v18, %v823_v26  ;;  %v498_v34 = vld [vmem:[%s13931_s19 + $0x318] sm:$0x1]  ;;  %v500_v36 = vld [vmem:[%s13931_s19 + $0x328] sm:$0x1]  ;;  %v836_v41 = vrot.slane %v496_v29, 7 }
  0x20   : > { %v499_v35 = vld [vmem:[%s13931_s19 + $0x320] sm:$0x1]  ;;  %v821_v37 = vsel %vm680_vm6, %v820_v63, %v819_v32  ;;  %v827_v38 = vsel %vm668_vm2, %v826_v20, %v825_v33  ;;  %12418 = vmatpush3.msra.mxu1 %v13987_v5  ;;  %v501_v39 = vld [vmem:[%s13931_s19 + $0x330] sm:$0x1]  ;;  %v502_v40 = vld [vmem:[%s13931_s19 + $0x338] sm:$0x1] }
  0x21   : > { %v838_v42 = vrot.slane %v497_v30, 6  ;;  %12406 = vmatprep.mubr.msk.f32.mxu1 %vm892_vm7, %v821_v37  ;;  %v829_v43 = vsel %vm671_vm3, %v828_v21, %v827_v38  ;;  %v840_v44 = vrot.slane %v498_v34, 5  ;;  %v842_v45 = vrot.slane %v499_v35, 4  ;;  %12419 = vmatprep.subr.mxu1 %v14006_v24  ;;  %v503_v47 = vld [vmem:[%s13931_s19 + $0x340] sm:$0x1] }
  0x22   : > { %v844_v46 = vrot.slane %v500_v36, 3  ;;  %v831_v48 = vsel %vm674_vm4, %v830_v22, %v829_v43  ;;  %v837_v49 = vsel %vm662_vm0, %v836_v41, %v495_v23  ;;  %v846_v50 = vrot.slane %v501_v39, 2  ;;  %v504_v52 = vld [vmem:[%s13931_s19 + $0x348] sm:$0x1]  ;;  %v505_v53 = vld [vmem:[%s13931_s19 + $0x350] sm:$0x1]  ;;  %12420 = vmatpush3.msra.mxu1 %v14006_v24 }
  0x23   : > { %v848_v51 = vrot.slane %v502_v40, 1  ;;  %v833_v54 = vsel %vm677_vm5, %v832_v27, %v831_v48  ;;  %v839_v55 = vsel %vm665_vm1, %v838_v42, %v837_v49  ;;  %v506_v56 = vld [vmem:[%s13931_s19 + $0x358] sm:$0x1]  ;;  %v507_v57 = vld [vmem:[%s13931_s19 + $0x360] sm:$0x1]  ;;  %12421 = vmatprep.subr.mxu1 %v14016_v31  ;;  %v850_v63 = vrot.slane %v504_v52, 7 }
  0x24   : > { %v508_v58 = vld [vmem:[%s13931_s19 + $0x368] sm:$0x1]  ;;  %v835_v59 = vsel %vm680_vm6, %v834_v28, %v833_v54  ;;  %v841_v60 = vsel %vm668_vm2, %v840_v44, %v839_v55  ;;  %v509_v61 = vld [vmem:[%s13931_s19 + $0x370] sm:$0x1]  ;;  %v510_v62 = vld [vmem:[%s13931_s19 + $0x378] sm:$0x1]  ;;  %12422 = vmatpush3.msra.mxu1 %v14016_v31 }
  0x25   : > { %v852_v6 = vrot.slane %v505_v53, 6  ;;  %12407 = vmatmul.mubr.msk.f32.gmra.mxu1 %vm892_vm7, %v835_v59  ;;  %v843_v7 = vsel %vm671_vm3, %v842_v45, %v841_v60  ;;  %v854_v8 = vrot.slane %v506_v56, 5  ;;  %v856_v9 = vrot.slane %v507_v57, 4  ;;  %v399_v11 = vld [vmem:[%s13931_s19] sm:$0x1]  ;;  %12479 = vmatprep.subr.mxu1 %v13936_v4 }
  0x26   : > { %v858_v10 = vrot.slane %v508_v58, 3  ;;  %v845_v12 = vsel %vm674_vm4, %v844_v46, %v843_v7  ;;  %v851_v13 = vsel %vm662_vm0, %v850_v63, %v503_v47  ;;  %v860_v14 = vrot.slane %v509_v61, 2  ;;  %v400_v16 = vld [vmem:[%s13931_s19 + $0x8] sm:$0x1]  ;;  %v401_v17 = vld [vmem:[%s13931_s19 + $0x10] sm:$0x1] }
  0x27   : > { %v862_v15 = vrot.slane %v510_v62, 1  ;;  %v847_v18 = vsel %vm677_vm5, %v846_v50, %v845_v12  ;;  %v853_v19 = vsel %vm665_vm1, %v852_v6, %v851_v13  ;;  %v402_v20 = vld [vmem:[%s13931_s19 + $0x18] sm:$0x1]  ;;  %v403_v21 = vld [vmem:[%s13931_s19 + $0x20] sm:$0x1]  ;;  %v661_v28 = vrot.slane %v400_v16, 7 }
  0x28   : > { %v404_v22 = vld [vmem:[%s13931_s19 + $0x28] sm:$0x1]  ;;  %v849_v23 = vsel %vm680_vm6, %v848_v51, %v847_v18  ;;  %v855_v25 = vsel %vm668_vm2, %v854_v8, %v853_v19  ;;  %v405_v26 = vld [vmem:[%s13931_s19 + $0x30] sm:$0x1]  ;;  %v406_v27 = vld [vmem:[%s13931_s19 + $0x38] sm:$0x1] }
  0x29   : > { %v664_v29 = vrot.slane %v401_v17, 6  ;;  %12409 = vmatprep.mubr.msk.f32.mxu1 %vm892_vm7, %v849_v23  ;;  %v857_v30 = vsel %vm671_vm3, %v856_v9, %v855_v25  ;;  %v667_v32 = vrot.slane %v402_v20, 5  ;;  %v670_v33 = vrot.slane %v403_v21, 4  ;;  %v511_v35 = vld [vmem:[%s13931_s19 + $0x380] sm:$0x1] }
  0x2a   : > { %v673_v34 = vrot.slane %v404_v22, 3  ;;  %v859_v36 = vsel %vm674_vm4, %v858_v10, %v857_v30  ;;  %v663_v37 = vsel %vm662_vm0, %v661_v28, %v399_v11  ;;  %v676_v38 = vrot.slane %v405_v26, 2  ;;  %v512_v40 = vld [vmem:[%s13931_s19 + $0x388] sm:$0x1]  ;;  %v513_v41 = vld [vmem:[%s13931_s19 + $0x390] sm:$0x1] }
  0x2b   : > { %v679_v39 = vrot.slane %v406_v27, 1  ;;  %v861_v42 = vsel %vm677_vm5, %v860_v14, %v859_v36  ;;  %v666_v43 = vsel %vm665_vm1, %v664_v29, %v663_v37  ;;  %v514_v44 = vld [vmem:[%s13931_s19 + $0x398] sm:$0x1]  ;;  %v515_v45 = vld [vmem:[%s13931_s19 + $0x3a0] sm:$0x1]  ;;  %v864_v51 = vrot.slane %v512_v40, 7 }
  0x2c   : > { %v516_v46 = vld [vmem:[%s13931_s19 + $0x3a8] sm:$0x1]  ;;  %v863_v47 = vsel %vm680_vm6, %v862_v15, %v861_v42  ;;  %v669_v48 = vsel %vm668_vm2, %v667_v32, %v666_v43  ;;  %v517_v49 = vld [vmem:[%s13931_s19 + $0x3b0] sm:$0x1]  ;;  %v518_v50 = vld [vmem:[%s13931_s19 + $0x3b8] sm:$0x1] }
  0x2d   : > { %v866_v52 = vrot.slane %v513_v41, 6  ;;  %12410 = vmatmul.mubr.msk.f32.gmra.mxu1 %vm892_vm7, %v863_v47  ;;  %v672_v53 = vsel %vm671_vm3, %v670_v33, %v669_v48  ;;  %v868_v54 = vrot.slane %v514_v44, 5  ;;  %v870_v55 = vrot.slane %v515_v45, 4  ;;  %v407_v57 = vld [vmem:[%s13931_s19 + $0x40] sm:$0x1] }
  0x2e   : > { %v872_v56 = vrot.slane %v516_v46, 3  ;;  %v675_v58 = vsel %vm674_vm4, %v673_v34, %v672_v53  ;;  %v865_v59 = vsel %vm662_vm0, %v864_v51, %v511_v35  ;;  %v874_v60 = vrot.slane %v517_v49, 2  ;;  %v408_v62 = vld [vmem:[%s13931_s19 + $0x48] sm:$0x1]  ;;  %v409_v63 = vld [vmem:[%s13931_s19 + $0x50] sm:$0x1] }
  0x2f   : > { %v876_v61 = vrot.slane %v518_v50, 1  ;;  %v678_v6 = vsel %vm677_vm5, %v676_v38, %v675_v58  ;;  %v867_v7 = vsel %vm665_vm1, %v866_v52, %v865_v59  ;;  %v410_v8 = vld [vmem:[%s13931_s19 + $0x58] sm:$0x1]  ;;  %v411_v9 = vld [vmem:[%s13931_s19 + $0x60] sm:$0x1]  ;;  %v682_v15 = vrot.slane %v408_v62, 7 }
  0x30   : > { %v412_v10 = vld [vmem:[%s13931_s19 + $0x68] sm:$0x1]  ;;  %v681_v11 = vsel %vm680_vm6, %v679_v39, %v678_v6  ;;  %v869_v12 = vsel %vm668_vm2, %v868_v54, %v867_v7  ;;  %v413_v13 = vld [vmem:[%s13931_s19 + $0x70] sm:$0x1]  ;;  %v414_v14 = vld [vmem:[%s13931_s19 + $0x78] sm:$0x1] }
  0x31   : > { %v684_v16 = vrot.slane %v409_v63, 6  ;;  %12391 = vmatprep.mubr.msk.f32.mxu0 %vm892_vm7, %v681_v11  ;;  %v871_v17 = vsel %vm671_vm3, %v870_v55, %v869_v12  ;;  %v686_v18 = vrot.slane %v410_v8, 5  ;;  %v688_v19 = vrot.slane %v411_v9, 4  ;;  %v519_v21 = vld [vmem:[%s13931_s19 + $0x3c0] sm:$0x1] }
  0x32   : > { %v690_v20 = vrot.slane %v412_v10, 3  ;;  %v873_v22 = vsel %vm674_vm4, %v872_v56, %v871_v17  ;;  %v683_v23 = vsel %vm662_vm0, %v682_v15, %v407_v57  ;;  %v692_v25 = vrot.slane %v413_v13, 2  ;;  %v520_v27 = vld [vmem:[%s13931_s19 + $0x3c8] sm:$0x1]  ;;  %v521_v28 = vld [vmem:[%s13931_s19 + $0x3d0] sm:$0x1] }
  0x33   : > { %v694_v26 = vrot.slane %v414_v14, 1  ;;  %v875_v29 = vsel %vm677_vm5, %v874_v60, %v873_v22  ;;  %v685_v30 = vsel %vm665_vm1, %v684_v16, %v683_v23  ;;  %v522_v32 = vld [vmem:[%s13931_s19 + $0x3d8] sm:$0x1]  ;;  %v523_v33 = vld [vmem:[%s13931_s19 + $0x3e0] sm:$0x1]  ;;  %v878_v39 = vrot.slane %v520_v27, 7 }
  0x34   : > { %v524_v34 = vld [vmem:[%s13931_s19 + $0x3e8] sm:$0x1]  ;;  %v877_v35 = vsel %vm680_vm6, %v876_v61, %v875_v29  ;;  %v687_v36 = vsel %vm668_vm2, %v686_v18, %v685_v30  ;;  %v525_v37 = vld [vmem:[%s13931_s19 + $0x3f0] sm:$0x1]  ;;  %v526_v38 = vld [vmem:[%s13931_s19 + $0x3f8] sm:$0x1] }
  0x35   : > { %v880_v40 = vrot.slane %v521_v28, 6  ;;  %12412 = vmatprep.mubr.msk.f32.mxu1 %vm892_vm7, %v877_v35  ;;  %v689_v41 = vsel %vm671_vm3, %v688_v19, %v687_v36  ;;  %v882_v42 = vrot.slane %v522_v32, 5  ;;  %v884_v43 = vrot.slane %v523_v33, 4  ;;  %v415_v45 = vld [vmem:[%s13931_s19 + $0x80] sm:$0x1]  ;;  %v369_v35 = vld [vmem:[%s14133_s11 + $0x10] sm:$0xff] }
  0x36   : > { %v886_v44 = vrot.slane %v524_v34, 3  ;;  %v691_v46 = vsel %vm674_vm4, %v690_v20, %v689_v41  ;;  %v879_v47 = vsel %vm662_vm0, %v878_v39, %v519_v21  ;;  %v888_v48 = vrot.slane %v525_v37, 2  ;;  %v416_v50 = vld [vmem:[%s13931_s19 + $0x88] sm:$0x1]  ;;  %v417_v51 = vld [vmem:[%s13931_s19 + $0x90] sm:$0x1] }
  0x37   : > { %v890_v49 = vrot.slane %v526_v38, 1  ;;  %v693_v52 = vsel %vm677_vm5, %v692_v25, %v691_v46  ;;  %v881_v53 = vsel %vm665_vm1, %v880_v40, %v879_v47  ;;  %v418_v54 = vld [vmem:[%s13931_s19 + $0x98] sm:$0x1]  ;;  %v419_v55 = vld [vmem:[%s13931_s19 + $0xa0] sm:$0x1]  ;;  %v696_v61 = vrot.slane %v416_v50, 7 }
  0x38   : > { %v420_v56 = vld [vmem:[%s13931_s19 + $0xa8] sm:$0x1]  ;;  %v695_v57 = vsel %vm680_vm6, %v694_v26, %v693_v52  ;;  %v883_v58 = vsel %vm668_vm2, %v882_v42, %v881_v53  ;;  %v421_v59 = vld [vmem:[%s13931_s19 + $0xb0] sm:$0x1]  ;;  %v422_v60 = vld [vmem:[%s13931_s19 + $0xb8] sm:$0x1] }
  0x39   : > { %v698_v62 = vrot.slane %v417_v51, 6  ;;  %12392 = vmatmul.mubr.msk.f32.vlgmr.msra.gmra.mxu0 %vm892_vm7, %v695_v57  ;;  %v885_v63 = vsel %vm671_vm3, %v884_v43, %v883_v58  ;;  %v367_v6 = vld [vmem:[%s14133_s11] sm:$0xff]  ;;  %v700_v7 = vrot.slane %v418_v54, 5  ;;  %v702_v8 = vrot.slane %v419_v55, 4  ;;  %v424_v15 = vld [vmem:[%s13931_s19 + $0xc8] sm:$0x1] }
  0x3a   : > { %v704_v9 = vrot.slane %v420_v56, 3  ;;  %v423_v10 = vld [vmem:[%s13931_s19 + $0xc0] sm:$0x1]  ;;  %v887_v11 = vsel %vm674_vm4, %v886_v44, %v885_v63  ;;  %v697_v12 = vsel %vm662_vm0, %v696_v61, %v415_v45  ;;  %v706_v13 = vrot.slane %v421_v59, 2  ;;  %v425_v16 = vld [vmem:[%s13931_s19 + $0xd0] sm:$0x1]  ;;  %12448 = vmatpush3.msra.mxu0 %v13898_v0 }
  0x3b   : > { %v708_v14 = vrot.slane %v422_v60, 1  ;;  %v889_v17 = vsel %vm677_vm5, %v888_v48, %v887_v11  ;;  %v699_v18 = vsel %vm665_vm1, %v698_v62, %v697_v12  ;;  %v426_v19 = vld [vmem:[%s13931_s19 + $0xd8] sm:$0x1]  ;;  %v427_v20 = vld [vmem:[%s13931_s19 + $0xe0] sm:$0x1]  ;;  %12449 = vmatprep.subr.mxu0 %v13903_v1  ;;  %v368_v25 = vld [vmem:[%s14133_s11 + $0x8] sm:$0xff] }
  0x3c   : > { %v428_v21 = vld [vmem:[%s13931_s19 + $0xe8] sm:$0x1]  ;;  %v891_v22 = vsel %vm680_vm6, %v890_v49, %v889_v17  ;;  %v701_v23 = vsel %vm668_vm2, %v700_v7, %v699_v18  ;;  %v429_v26 = vld [vmem:[%s13931_s19 + $0xf0] sm:$0x1]  ;;  %v430_v27 = vld [vmem:[%s13931_s19 + $0xf8] sm:$0x1]  ;;  %12450 = vmatpush3.msra.mxu0 %v13903_v1 }
  0x3d   : > { %v710_v28 = vrot.slane %v424_v15, 7  ;;  %v712_v29 = vrot.slane %v425_v16, 6  ;;  %12413 = vmatmul.mubr.msk.f32.gmra.mxu1 %vm892_vm7, %v891_v22  ;;  %v703_v30 = vsel %vm671_vm3, %v702_v8, %v701_v23  ;;  %v714_v32 = vrot.slane %v426_v19, 5  ;;  %v431_v36 = vld [vmem:[%s13931_s19 + $0x100] sm:$0x1]  ;;  %12451 = vmatprep.subr.mxu0 %v13913_v2  ;;  %v370_v49 = vld [vmem:[%s14133_s11 + $0x18] sm:$0xff] }
  0x3e   : > { %v716_v33 = vrot.slane %v427_v20, 4  ;;  %v718_v34 = vrot.slane %v428_v21, 3  ;;  %12423 = vmatprep.mubr.msk.f32.mxu1 %vm892_vm7, %v367_v6  ;;  %v705_v37 = vsel %vm674_vm4, %v704_v9, %v703_v30  ;;  %v720_v38 = vrot.slane %v429_v26, 2  ;;  %v432_v40 = vld [vmem:[%s13931_s19 + $0x108] sm:$0x1]  ;;  %12452 = vmatpush3.msra.mxu0 %v13913_v2  ;;  %v371_v58 = vld [vmem:[%s14133_s11 + $0x20] sm:$0xff] }
  0x3f   : > { %v711_v1 = vsel %vm662_vm0, %v710_v28, %v423_v10  ;;  %v722_v39 = vrot.slane %v430_v27, 1  ;;  %v433_v41 = vld [vmem:[%s13931_s19 + $0x110] sm:$0x1]  ;;  %v707_v42 = vsel %vm677_vm5, %v706_v13, %v705_v37  ;;  %v434_v44 = vld [vmem:[%s13931_s19 + $0x118] sm:$0x1]  ;;  %12453 = vmatprep.subr.mxu0 %v13922_v3  ;;  %v724_v52 = vrot.slane %v432_v40, 7 }
  0x40   : > { %v713_v43 = vsel %vm665_vm1, %v712_v29, %v711_v1  ;;  %v435_v45 = vld [vmem:[%s13931_s19 + $0x120] sm:$0x1]  ;;  %v436_v46 = vld [vmem:[%s13931_s19 + $0x128] sm:$0x1]  ;;  %v709_v47 = vsel %vm680_vm6, %v708_v14, %v707_v42  ;;  %v437_v50 = vld [vmem:[%s13931_s19 + $0x130] sm:$0x1]  ;;  %12454 = vmatpush3.msra.mxu0 %v13922_v3 }
  0x41   : > { %v715_v48 = vsel %vm668_vm2, %v714_v32, %v713_v43  ;;  %v438_v51 = vld [vmem:[%s13931_s19 + $0x138] sm:$0x1]  ;;  %v726_v2 = vrot.slane %v433_v41, 6  ;;  %12394 = vmatprep.mubr.msk.f32.mxu0 %vm892_vm7, %v709_v47  ;;  %12424 = vmatmul.mubr.msk.f32.vlgmr.msra.gmra.mxu1 %vm892_vm7, %v368_v25  ;;  %v728_v54 = vrot.slane %v434_v44, 5  ;;  %v730_v55 = vrot.slane %v435_v45, 4  ;;  %v372_v17 = vld [vmem:[%s14133_s11 + $0x28] sm:$0xff] }
  0x42   : > { %v717_v53 = vsel %vm671_vm3, %v716_v33, %v715_v48  ;;  %v732_v56 = vrot.slane %v436_v46, 3  ;;  %v439_v57 = vld [vmem:[%s13931_s19 + $0x140] sm:$0x1]  ;;  %12426 = vmatprep.mubr.msk.f32.mxu1 %vm892_vm7, %v369_v35  ;;  %v725_v3 = vsel %vm662_vm0, %v724_v52, %v431_v36  ;;  %v734_v60 = vrot.slane %v437_v50, 2  ;;  %v440_v62 = vld [vmem:[%s13931_s19 + $0x148] sm:$0x1]  ;;  %12480 = vmatpush3.msra.mxu1 %v13936_v4 }
  0x43   : > { %v719_v59 = vsel %vm674_vm4, %v718_v34, %v717_v53  ;;  %v736_v61 = vrot.slane %v438_v51, 1  ;;  %v441_v63 = vld [vmem:[%s13931_s19 + $0x150] sm:$0x1]  ;;  %v727_v7 = vsel %vm665_vm1, %v726_v2, %v725_v3  ;;  %v442_v8 = vld [vmem:[%s13931_s19 + $0x158] sm:$0x1]  ;;  %12481 = vmatprep.subr.mxu1 %v13987_v5  ;;  %12511 = vmatprep.subr.mxu0 %v13898_v0  ;;  %v738_v15 = vrot.slane %v440_v62, 7 }
  0x44   : > { %v721_v6 = vsel %vm677_vm5, %v720_v38, %v719_v59  ;;  %v443_v9 = vld [vmem:[%s13931_s19 + $0x160] sm:$0x1]  ;;  %v444_v10 = vld [vmem:[%s13931_s19 + $0x168] sm:$0x1]  ;;  %v729_v12 = vsel %vm668_vm2, %v728_v54, %v727_v7  ;;  %v445_v13 = vld [vmem:[%s13931_s19 + $0x170] sm:$0x1]  ;;  %12482 = vmatpush3.msra.mxu1 %v13987_v5 }
  0x45   : > { %v723_v11 = vsel %vm680_vm6, %v722_v39, %v721_v6  ;;  %v446_v14 = vld [vmem:[%s13931_s19 + $0x178] sm:$0x1]  ;;  %v740_v16 = vrot.slane %v441_v63, 6  ;;  %12427 = vmatmul.mubr.msk.f32.gmra.mxu1 %vm892_vm7, %v370_v49  ;;  %v731_v0 = vsel %vm671_vm3, %v730_v55, %v729_v12  ;;  %v742_v18 = vrot.slane %v442_v8, 5  ;;  %v447_v21 = vld [vmem:[%s13931_s19 + $0x180] sm:$0x1]  ;;  %12483 = vmatprep.subr.mxu1 %v14006_v24 }
  0x46   : > { %12395 = vmatmul.mubr.msk.f32.gmra.mxu0 %vm892_vm7, %v723_v11  ;;  %v744_v19 = vrot.slane %v443_v9, 4  ;;  %v746_v20 = vrot.slane %v444_v10, 3  ;;  %v373_v22 = vld [vmem:[%s14133_s11 + $0x30] sm:$0xff]  ;;  %v733_v23 = vsel %vm674_vm4, %v732_v56, %v731_v0  ;;  %v739_v25 = vsel %vm662_vm0, %v738_v15, %v439_v57  ;;  %12429 = vmatprep.mubr.msk.f32.mxu1 %vm892_vm7, %v371_v58  ;;  %v448_v27 = vld [vmem:[%s13931_s19 + $0x188] sm:$0x1]  ;;  %v374_v40 = vld [vmem:[%s14133_s11 + $0x38] sm:$0xff] }
  0x47   : > { %v748_v5 = vrot.slane %v445_v13, 2  ;;  %v750_v26 = vrot.slane %v446_v14, 1  ;;  %v449_v28 = vld [vmem:[%s13931_s19 + $0x190] sm:$0x1]  ;;  %v735_v29 = vsel %vm677_vm5, %v734_v60, %v733_v23  ;;  %v741_v30 = vsel %vm665_vm1, %v740_v16, %v739_v25  ;;  %v450_v32 = vld [vmem:[%s13931_s19 + $0x198] sm:$0x1]  ;;  %12484 = vmatpush3.msra.mxu1 %v14006_v24 }
  0x48   : > { %v451_v33 = vld [vmem:[%s13931_s19 + $0x1a0] sm:$0x1]  ;;  %v452_v34 = vld [vmem:[%s13931_s19 + $0x1a8] sm:$0x1]  ;;  %v737_v35 = vsel %vm680_vm6, %v736_v61, %v735_v29  ;;  %v743_v36 = vsel %vm668_vm2, %v742_v18, %v741_v30  ;;  %v453_v37 = vld [vmem:[%s13931_s19 + $0x1b0] sm:$0x1]  ;;  %12485 = vmatprep.subr.mxu1 %v14016_v31 }
  0x49   : > { %v454_v1 = vld [vmem:[%s13931_s19 + $0x1b8] sm:$0x1]  ;;  %v752_v38 = vrot.slane %v448_v27, 7  ;;  %v754_v39 = vrot.slane %v449_v28, 6  ;;  %12397 = vmatprep.mubr.msk.f32.mxu0 %vm892_vm7, %v737_v35  ;;  %v745_v41 = vsel %vm671_vm3, %v744_v19, %v743_v36  ;;  %12430 = vmatmul.mubr.msk.f32.gmra.mxu1 %vm892_vm7, %v372_v17  ;;  %v756_v24 = vrot.slane %v450_v32, 5  ;;  %v375_v45 = vld [vmem:[%s14133_s11 + $0x40] sm:$0xff] }
  0x4a   : > { %v758_v42 = vrot.slane %v451_v33, 4  ;;  %v760_v43 = vrot.slane %v452_v34, 3  ;;  %v455_v44 = vld [vmem:[%s13931_s19 + $0x1c0] sm:$0x1]  ;;  %v747_v46 = vsel %vm674_vm4, %v746_v20, %v745_v41  ;;  %v762_v48 = vrot.slane %v453_v37, 2  ;;  %12432 = vmatprep.mubr.msk.f32.mxu1 %vm892_vm7, %v373_v22  ;;  %12486 = vmatpush3.msra.mxu1 %v14016_v31  ;;  %v376_v7 = vld [vmem:[%s14133_s11 + $0x48] sm:$0xff] }
  0x4b   : > { %v753_v47 = vsel %vm662_vm0, %v752_v38, %v447_v21  ;;  %v764_v49 = vrot.slane %v454_v1, 1  ;;  %v456_v50 = vld [vmem:[%s13931_s19 + $0x1c8] sm:$0x1]  ;;  %v457_v51 = vld [vmem:[%s13931_s19 + $0x1d0] sm:$0x1]  ;;  %v749_v52 = vsel %vm677_vm5, %v748_v5, %v747_v46  ;;  %12543 = vmatprep.subr.mxu1 %v13936_v4  ;;  %v378_v17 = vld [vmem:[%s14133_s11 + $0x58] sm:$0xff] }
  0x4c   : > { %v755_v2 = vsel %vm665_vm1, %v754_v39, %v753_v47  ;;  %v458_v53 = vld [vmem:[%s13931_s19 + $0x1d8] sm:$0x1]  ;;  %v459_v54 = vld [vmem:[%s13931_s19 + $0x1e0] sm:$0x1]  ;;  %v460_v55 = vld [vmem:[%s13931_s19 + $0x1e8] sm:$0x1]  ;;  %v751_v56 = vsel %vm680_vm6, %v750_v26, %v749_v52 }
  0x4d   : > { %v757_v57 = vsel %vm668_vm2, %v756_v24, %v755_v2  ;;  %v461_v58 = vld [vmem:[%s13931_s19 + $0x1f0] sm:$0x1]  ;;  %v766_v59 = vrot.slane %v456_v50, 7  ;;  %v768_v3 = vrot.slane %v457_v51, 6  ;;  %12398 = vmatmul.mubr.msk.f32.gmra.mxu0 %vm892_vm7, %v751_v56  ;;  %v462_v60 = vld [vmem:[%s13931_s19 + $0x1f8] sm:$0x1]  ;;  %12433 = vmatmul.mubr.msk.f32.gmra.mxu1 %vm892_vm7, %v374_v40 }
  0x4e   : > { %v759_v31 = vsel %vm671_vm3, %v758_v42, %v757_v57  ;;  %v770_v61 = vrot.slane %v458_v53, 5  ;;  %v772_v62 = vrot.slane %v459_v54, 4  ;;  %v774_v6 = vrot.slane %v460_v55, 3  ;;  %12435 = vmatprep.mubr.msk.f32.mxu1 %vm892_vm7, %v375_v45  ;;  %v377_v11 = vld [vmem:[%s14133_s11 + $0x50] sm:$0xff]  ;;  %v379_v18 = vld [vmem:[%s14133_s11 + $0x60] sm:$0xff]  ;;  %v380_v20 = vld [vmem:[%s14133_s11 + $0x68] sm:$0xff] }
  0x4f   : > { %v761_v4 = vsel %vm674_vm4, %v760_v43, %v759_v31  ;;  %v767_v63 = vsel %vm662_vm0, %v766_v59, %v455_v44  ;;  %v776_v10 = vrot.slane %v461_v58, 2  ;;  %v778_v14 = vrot.slane %v462_v60, 1  ;;  %v381_v21 = vld [vmem:[%s14133_s11 + $0x70] sm:$0xff]  ;;  %v382_v22 = vld [vmem:[%s14133_s11 + $0x78] sm:$0xff]  ;;  %v14295_v30 = vld [vmem:[%s18802_s3] ss:$0 sm:$0xff] }
  0x50   : > { %v763_v8 = vsel %vm677_vm5, %v762_v48, %v761_v4  ;;  %v769_v9 = vsel %vm665_vm1, %v768_v3, %v767_v63 }
  0x51   : > { %v765_v12 = vsel %vm680_vm6, %v764_v49, %v763_v8  ;;  %v771_v13 = vsel %vm668_vm2, %v770_v61, %v769_v9  ;;  %12436 = vmatmul.mubr.msk.f32.gmra.mxu1 %vm892_vm7, %v376_v7 }
  0x52   : > { %12400 = vmatprep.mubr.msk.f32.mxu0 %vm892_vm7, %v765_v12  ;;  %v773_v15 = vsel %vm671_vm3, %v772_v62, %v771_v13  ;;  %12438 = vmatprep.mubr.msk.f32.mxu1 %vm892_vm7, %v377_v11 }
  0x53   : > { %v775_v16 = vsel %vm674_vm4, %v774_v6, %v773_v15 }
  0x54   : > { %v777_v0 = vsel %vm677_vm5, %v776_v10, %v775_v16 }
  0x55   : > { %v779_v19 = vsel %vm680_vm6, %v778_v14, %v777_v0  ;;  %12439 = vmatmul.mubr.msk.f32.gmra.mxu1 %vm892_vm7, %v378_v17 }
  0x56   : > { %12401 = vmatmul.mubr.msk.f32.gmra.mxu0 %vm892_vm7, %v779_v19  ;;  %12441 = vmatprep.mubr.msk.f32.mxu1 %vm892_vm7, %v379_v18 }
  0x59   : > { %12442 = vmatmul.mubr.msk.f32.gmra.mxu1 %vm892_vm7, %v380_v20  ;;  %v362_v20 = vlaneseq }
  0x5a   : > { %12444 = vmatprep.mubr.msk.f32.mxu1 %vm892_vm7, %v381_v21 }
  0x5d   : > { %12445 = vmatmul.mubr.msk.f32.gmra.mxu1 %vm892_vm7, %v382_v22 }
  0xdd   : > { %v12405_v23 = vpop.f32.mrf.mxu1 }
  0xde   : > { %v1037_v57 = vadd.f32 %v12405_v23, %v14295_v30 }
  0xdf   : > { %v1031_v25 = vpop.f32.mrf.mxu1 }
  0xe0   : > { %v1032_v4 = vadd.f32 %v14295_v30, %v1031_v25 }
  0xe5   : > { %v12408_v5 = vpop.f32.mrf.mxu1 }
  0xe6   : > { %v1047_v6 = vadd.f32 %v12408_v5, %v14295_v30 }
  0xe7   : > { %v1041_v26 = vpop.f32.mrf.mxu1 }
  0xe8   : > { %v1042_v17 = vadd.f32 %v14295_v30, %v1041_v26 }
  0xed   : > { %v14288_v27 = vpop.f32.mrf.mxu1 }
  0xee   : > { %v1057_v5 = vadd.f32 %v14288_v27, %v14295_v30 }
  0xef   : > { %v14290_v28 = vpop.f32.mrf.mxu1 }
  0xf9   : > { %v12393_v29 = vpop.f32.mrf.mxu0 }
  0xfa   : > { %v997_v33 = vadd.f32 %v12393_v29, %v14295_v30  ;;  %v1052_v29 = vadd.f32 %v14295_v30, %v14290_v28 }
  0xfb   : > { %v991_v34 = vpop.f32.mrf.mxu0 }
  0xfc   : > { %v992_v37 = vadd.f32 %v14295_v30, %v991_v34 }
  0xfd   : > { %v14297_v32 = vpop.f32.mrf.mxu1 }
  0xff   : > { %v14300_v35 = vpop.f32.mrf.mxu1 }
 0x101   : > { %v12425_v36 = vpop.f32.mrf.mxu1 }
 0x102   : > { %v1264_v1 = vadd.f32 %v12425_v36, %v997_v33 }
 0x103   : > { %v1184_v38 = vpop.f32.mrf.mxu1 }
 0x104   : > { %v11545_v39 = vmul.f32 -1.442695, %v1264_v1  ;;  %v1263_v40 = vadd.f32 %v1184_v38, %v992_v37  ;;  %v1067_v38 = vadd.f32 %v14297_v32, %v14295_v30 }
 0x105   : > { %v12428_v24 = vpop.f32.mrf.mxu1 }
 0x106   : > { %v12396_v41 = vpop.f32.mrf.mxu0  ;;  %12945 = vpow2.f32 %v11545_v39  ;;  %v11544_v43 = vmul.f32 -1.442695, %v1263_v40 }
 0x107   : > { %v1007_v42 = vadd.f32 %v12396_v41, %v14295_v30  ;;  %v1194_v45 = vpop.f32.mrf.mxu1 }
 0x108   : > { %v1001_v44 = vpop.f32.mrf.mxu0  ;;  %12947 = vpow2.f32 %v11544_v43 }
 0x109   : > { %v1002_v46 = vadd.f32 %v14295_v30, %v1001_v44  ;;  %v1266_v47 = vadd.f32 %v12428_v24, %v1007_v42  ;;  %v12431_v48 = vpop.f32.mrf.mxu1  ;;  %v363_v44 = vand.u32 127, %v362_v20 }
 0x10b   : > { %v11547_v49 = vmul.f32 -1.442695, %v1266_v47  ;;  %v1265_v50 = vadd.f32 %v1194_v45, %v1002_v46  ;;  %v1204_v51 = vpop.f32.mrf.mxu1  ;;  %v1062_v45 = vadd.f32 %v14295_v30, %v14300_v35  ;;  %vm364_vm8 = vcmp.ge.s32.totalorder %v363_v44, 64 }
 0x10c   : > { %vm365_vm9 = vcmp.lt.s32.totalorder %v363_v44, 96 }
 0x10d   : > { %12949 = vpow2.f32 %v11547_v49  ;;  %v11546_v52 = vmul.f32 -1.442695, %v1265_v50  ;;  %v12399_v2 = vpop.f32.mrf.mxu0  ;;  %v12434_v53 = vpop.f32.mrf.mxu1  ;;  %vm14321_vm10 = vmand %vm364_vm8, %vm365_vm9 }
 0x10e   : > { %v1017_v54 = vadd.f32 %v12399_v2, %v14295_v30 }
 0x10f   : > { %12951 = vpow2.f32 %v11546_v52  ;;  %v1011_v55 = vpop.f32.mrf.mxu0  ;;  %v1214_v56 = vpop.f32.mrf.mxu1 }
 0x110   : > { %v1012_v58 = vadd.f32 %v14295_v30, %v1011_v55  ;;  %v1268_v59 = vadd.f32 %v12431_v48, %v1017_v54 }
 0x111   : > { %v12437_v3 = vpop.f32.mrf.mxu1 }
 0x112   : > { %v11549_v31 = vmul.f32 -1.442695, %v1268_v59  ;;  %v1267_v60 = vadd.f32 %v1204_v51, %v1012_v58  ;;  %v1272_v61 = vadd.f32 %v12437_v3, %v1037_v57 }
 0x113   : > { %v12946_v62 = vpop.eup %12945  ;;  %v1224_v63 = vpop.f32.mrf.mxu1 }
 0x114   : > { %v1328_v7 = vadd.f32 1.0, %v12946_v62  ;;  %12953 = vpow2.f32 %v11549_v31  ;;  %v11548_v8 = vmul.f32 -1.442695, %v1267_v60  ;;  %v11553_v11 = vmul.f32 -1.442695, %v1272_v61 }
 0x115   : > { %v12948_v9 = vpop.eup %12947  ;;  %v1271_v12 = vadd.f32 %v1224_v63, %v1032_v4  ;;  %v12440_v13 = vpop.f32.mrf.mxu1 }
 0x116   : > { %v12402_v10 = vpop.f32.mrf.mxu0  ;;  %12955 = vrcp.f32 %v1328_v7  ;;  %v1327_v14 = vadd.f32 1.0, %v12948_v9  ;;  %v1274_v16 = vadd.f32 %v12440_v13, %v1047_v6 }
 0x117   : > { %v1027_v15 = vadd.f32 %v12402_v10, %v14295_v30  ;;  %12957 = vpow2.f32 %v11548_v8  ;;  %v11552_v18 = vmul.f32 -1.442695, %v1271_v12  ;;  %v1234_v19 = vpop.f32.mrf.mxu1 }
 0x118   : > { %v1021_v0 = vpop.f32.mrf.mxu0  ;;  %12959 = vrcp.f32 %v1327_v14  ;;  %v11555_v23 = vmul.f32 -1.442695, %v1274_v16  ;;  %v1273_v33 = vadd.f32 %v1234_v19, %v1042_v17  ;;  %v383_v19 = vld [vmem:[%s14335_s17] sm:$0xff] }
 0x119   : > { %v1022_v21 = vadd.f32 %v14295_v30, %v1021_v0  ;;  %v1270_v22 = vadd.f32 %v12434_v53, %v1027_v15  ;;  %12961 = vpow2.f32 %v11553_v11  ;;  %v12443_v26 = vpop.f32.mrf.mxu1 }
 0x11a   : > { %v12950_v25 = vpop.eup %12949  ;;  %12963 = vpow2.f32 %v11552_v18  ;;  %v11554_v39 = vmul.f32 -1.442695, %v1273_v33  ;;  %v1276_v40 = vadd.f32 %v12443_v26, %v1057_v5 }
 0x11b   : > { %v1330_v34 = vadd.f32 1.0, %v12950_v25  ;;  %v11551_v36 = vmul.f32 -1.442695, %v1270_v22  ;;  %v1269_v37 = vadd.f32 %v1214_v56, %v1022_v21  ;;  %12965 = vpow2.f32 %v11555_v23  ;;  %v1244_v41 = vpop.f32.mrf.mxu1 }
 0x11c   : > { %v12952_v1 = vpop.eup %12951  ;;  %v1275_v42 = vadd.f32 %v1244_v41, %v1052_v29  ;;  %v11557_v28 = vmul.f32 -1.442695, %v1276_v40 }
 0x11d   : > { %12967 = vrcp.f32 %v1330_v34  ;;  %v1329_v27 = vadd.f32 1.0, %v12952_v1  ;;  %v11550_v24 = vmul.f32 -1.442695, %v1269_v37  ;;  %v12446_v43 = vpop.f32.mrf.mxu1 }
 0x11e   : > { %12969 = vpow2.f32 %v11551_v36  ;;  %v11556_v46 = vmul.f32 -1.442695, %v1275_v42  ;;  %v1278_v47 = vadd.f32 %v12446_v43, %v1067_v38  ;;  %v384_v36 = vld [vmem:[%s14335_s17 + $0x8] sm:$0xff] }
 0x11f   : > { %12971 = vrcp.f32 %v1329_v27  ;;  %v1254_v32 = vpop.f32.mrf.mxu1 }
 0x120   : > { %12973 = vpow2.f32 %v11550_v24  ;;  %v11559_v48 = vmul.f32 -1.442695, %v1278_v47  ;;  %v1277_v49 = vadd.f32 %v1254_v32, %v1062_v45 }
 0x121   : > { %12975 = vpow2.f32 %v11554_v39  ;;  %v12954_v50 = vpop.eup %12953 }
 0x122   : > { %12977 = vpow2.f32 %v11557_v28  ;;  %v1332_v51 = vadd.f32 1.0, %v12954_v50  ;;  %v11558_v52 = vmul.f32 -1.442695, %v1277_v49 }
 0x123   : > { %12979 = vpow2.f32 %v11556_v46  ;;  %v12956_v2 = vpop.eup %12955 }
 0x124   : > { %12981 = vpow2.f32 %v11559_v48  ;;  %v12958_v53 = vpop.eup %12957  ;;  %v1376_v30 = vmul.f32 2.0, %v12956_v2 }
 0x125   : > { %12983 = vrcp.f32 %v1332_v51  ;;  %v12960_v35 = vpop.eup %12959  ;;  %v1331_v54 = vadd.f32 1.0, %v12958_v53 }
 0x126   : > { %12985 = vpow2.f32 %v11558_v52  ;;  %v12962_v56 = vpop.eup %12961  ;;  %v11561_v57 = vadd.f32 -1.0, %v1376_v30  ;;  %v1375_v58 = vmul.f32 2.0, %v12960_v35 }
 0x127   : > { %v12964_v59 = vpop.eup %12963  ;;  %12987 = vrcp.f32 %v1331_v54  ;;  %v1336_v3 = vadd.f32 1.0, %v12962_v56 }
 0x128   : > { %v12966_v31 = vpop.eup %12965  ;;  %v1335_v60 = vadd.f32 1.0, %v12964_v59  ;;  %v14327_v61 = vsel %vm14321_vm10, %v11561_v57, %v12956_v2  ;;  %v11560_v62 = vadd.f32 -1.0, %v1375_v58 }
 0x129   : > { %1521 = vrot.lane.b32.xlu0 %v14327_v61, %s13840_s14  ;;  %v1338_v6 = vadd.f32 1.0, %v12966_v31  ;;  %12989 = vrcp.f32 %v1336_v3 }
 0x12a   : > { %v12968_v4 = vpop.eup %12967  ;;  %12991 = vrcp.f32 %v1335_v60  ;;  %v14339_v12 = vsel %vm14321_vm10, %v11560_v62, %v12960_v35 }
 0x12b   : > { %v12970_v63 = vpop.eup %12969  ;;  %v1378_v7 = vmul.f32 2.0, %v12968_v4 }
 0x12c   : > { %v12972_v8 = vpop.eup %12971  ;;  %v1334_v9 = vadd.f32 1.0, %v12970_v63 }
 0x12d   : > { %v12974_v10 = vpop.eup %12973  ;;  %v11563_v11 = vadd.f32 -1.0, %v1378_v7  ;;  %v1377_v13 = vmul.f32 2.0, %v12972_v8  ;;  %1519 = vrot.lane.b32.xlu0 %v14339_v12, %s13840_s14 }
 0x12e   : > { %v12976_v14 = vpop.eup %12975  ;;  %12993 = vrcp.f32 %v1334_v9  ;;  %v1333_v15 = vadd.f32 1.0, %v12974_v10 }
 0x12f   : > { %v12978_v16 = vpop.eup %12977  ;;  %12995 = vrcp.f32 %v1338_v6  ;;  %v1337_v17 = vadd.f32 1.0, %v12976_v14  ;;  %v14345_v0 = vsel %vm14321_vm10, %v11563_v11, %v12968_v4  ;;  %v11562_v18 = vadd.f32 -1.0, %v1377_v13 }
 0x130   : > { %v12980_v20 = vpop.eup %12979  ;;  %12997 = vrcp.f32 %v1333_v15  ;;  %v1340_v21 = vadd.f32 1.0, %v12978_v16  ;;  %1525 = vrot.lane.b32.xlu1 %v14345_v0, %s13840_s14 }
 0x131   : > { %v12982_v22 = vpop.eup %12981  ;;  %12999 = vrcp.f32 %v1337_v17  ;;  %v1339_v25 = vadd.f32 1.0, %v12980_v20  ;;  %1439 = vrot.lane.b32.xlu0 %v383_v19, %s13841_s18  ;;  %v14353_v29 = vsel %vm14321_vm10, %v11562_v18, %v12972_v8  ;;  %v386_v17 = vld [vmem:[%s14335_s17 + $0x18] sm:$0xff]  ;;  %v385_v18 = vld [vmem:[%s14335_s17 + $0x10] sm:$0xff]  ;;  %v388_v19 = vld [vmem:[%s14335_s17 + $0x28] sm:$0xff] }
 0x132   : > { %v12984_v23 = vpop.eup %12983  ;;  %13001 = vrcp.f32 %v1340_v21  ;;  %v1342_v26 = vadd.f32 1.0, %v12982_v22  ;;  %v387_v20 = vld [vmem:[%s14335_s17 + $0x20] sm:$0xff]  ;;  %v390_v21 = vld [vmem:[%s14335_s17 + $0x38] sm:$0xff]  ;;  %v389_v22 = vld [vmem:[%s14335_s17 + $0x30] sm:$0xff] }
 0x133   : > { %v12986_v5 = vpop.eup %12985  ;;  %v1380_v33 = vmul.f32 2.0, %v12984_v23  ;;  %13003 = vrcp.f32 %v1339_v25  ;;  %v391_v25 = vld [vmem:[%s14335_s17 + $0x40] sm:$0xff] }
 0x134   : > { %1523 = vrot.lane.b32.xlu1 %v14353_v29, %s13840_s14  ;;  %v12988_v34 = vpop.eup %12987  ;;  %v1341_v37 = vadd.f32 1.0, %v12986_v5  ;;  %13005 = vrcp.f32 %v1342_v26  ;;  %v394_v5 = vld [vmem:[%s14335_s17 + $0x58] sm:$0xff]  ;;  %v396_v26 = vld [vmem:[%s14335_s17 + $0x68] sm:$0xff] }
 0x135   : > { %v1379_v1 = vmul.f32 2.0, %v12988_v34  ;;  %v11565_v38 = vadd.f32 -1.0, %v1380_v33  ;;  %v393_v33 = vld [vmem:[%s14335_s17 + $0x50] sm:$0xff] }
 0x136   : > { %v12990_v40 = vpop.eup %12989  ;;  %13007 = vrcp.f32 %v1341_v37  ;;  %v397_v37 = vld [vmem:[%s14335_s17 + $0x70] sm:$0xff] }
 0x137   : > { %v11564_v39 = vadd.f32 -1.0, %v1379_v1  ;;  %v12992_v41 = vpop.eup %12991  ;;  %v14367_v42 = vsel %vm14321_vm10, %v11565_v38, %v12984_v23  ;;  %v1384_v44 = vmul.f32 2.0, %v12990_v40  ;;  %v392_v23 = vld [vmem:[%s14335_s17 + $0x48] sm:$0xff] }
 0x138   : > { %1441 = vrot.lane.b32.xlu1 %v384_v36, %s13841_s18  ;;  %v1383_v32 = vmul.f32 2.0, %v12992_v41  ;;  %v398_v36 = vld [vmem:[%s14335_s17 + $0x78] sm:$0xff] }
 0x139   : > { %v14361_v27 = vsel %vm14321_vm10, %v11564_v39, %v12988_v34  ;;  %v11569_v51 = vadd.f32 -1.0, %v1384_v44  ;;  %v395_v34 = vld [vmem:[%s14335_s17 + $0x60] sm:$0xff] }
 0x13a   : > { %1527 = vrot.lane.b32.xlu0 %v14361_v27, %s13840_s14  ;;  %v11568_v30 = vadd.f32 -1.0, %v1383_v32 }
 0x13b   : > { %v12994_v24 = vpop.eup %12993  ;;  %v14385_v56 = vsel %vm14321_vm10, %v11569_v51, %v12990_v40 }
 0x13c   : > { %v12996_v28 = vpop.eup %12995  ;;  %1529 = vrot.lane.b32.xlu1 %v14367_v42, %s13840_s14  ;;  %v1382_v43 = vmul.f32 2.0, %v12994_v24  ;;  %v14391_v3 = vsel %vm14321_vm10, %v11568_v30, %v12992_v41 }
 0x13d   : > { %v12998_v45 = vpop.eup %12997  ;;  %v1386_v52 = vmul.f32 2.0, %v12996_v28 }
 0x13e   : > { %v1381_v46 = vmul.f32 2.0, %v12998_v45  ;;  %v11567_v47 = vadd.f32 -1.0, %v1382_v43  ;;  %v13000_v48 = vpop.eup %12999 }
 0x13f   : > { %v13002_v2 = vpop.eup %13001  ;;  %v1385_v35 = vmul.f32 2.0, %v13000_v48  ;;  %v11571_v57 = vadd.f32 -1.0, %v1386_v52 }
 0x140   : > { %v11566_v49 = vadd.f32 -1.0, %v1381_v46  ;;  %v14373_v50 = vsel %vm14321_vm10, %v11567_v47, %v12994_v24  ;;  %v13004_v54 = vpop.eup %13003  ;;  %v1388_v58 = vmul.f32 2.0, %v13002_v2 }
 0x141   : > { %1533 = vrot.lane.b32.xlu1 %v14373_v50, %s13840_s14  ;;  %v13006_v59 = vpop.eup %13005  ;;  %v11570_v31 = vadd.f32 -1.0, %v1385_v35  ;;  %v1387_v60 = vmul.f32 2.0, %v13004_v54  ;;  %v14397_v4 = vsel %vm14321_vm10, %v11571_v57, %v12996_v28 }
 0x142   : > { %v14379_v53 = vsel %vm14321_vm10, %v11566_v49, %v12998_v45  ;;  %v11573_v63 = vadd.f32 -1.0, %v1388_v58  ;;  %v1390_v6 = vmul.f32 2.0, %v13006_v59 }
 0x143   : > { %1531 = vrot.lane.b32.xlu0 %v14379_v53, %s13840_s14  ;;  %v13008_v62 = vpop.eup %13007  ;;  %v14403_v7 = vsel %vm14321_vm10, %v11570_v31, %v13000_v48  ;;  %v11572_v8 = vadd.f32 -1.0, %v1387_v60 }
 0x144   : > { %v1389_v9 = vmul.f32 2.0, %v13008_v62  ;;  %v14409_v10 = vsel %vm14321_vm10, %v11573_v63, %v13002_v2  ;;  %v11575_v11 = vadd.f32 -1.0, %v1390_v6 }
 0x145   : > { %1537 = vrot.lane.b32.xlu1 %v14385_v56, %s13840_s14  ;;  %v14415_v13 = vsel %vm14321_vm10, %v11572_v8, %v13004_v54 }
 0x146   : > { %v11574_v14 = vadd.f32 -1.0, %v1389_v9  ;;  %v14421_v15 = vsel %vm14321_vm10, %v11575_v11, %v13006_v59 }
 0x147   : > { %1535 = vrot.lane.b32.xlu0 %v14391_v3, %s13840_s14 }
 0x148   : > { %v14427_v16 = vsel %vm14321_vm10, %v11574_v14, %v13008_v62 }
 0x149   : > { %1541 = vrot.lane.b32.xlu1 %v14397_v4, %s13840_s14 }
 0x14b   : > { %1539 = vrot.lane.b32.xlu0 %v14403_v7, %s13840_s14 }
 0x14d   : > { %1545 = vrot.lane.b32.xlu1 %v14409_v10, %s13840_s14 }
 0x14f   : > { %1543 = vrot.lane.b32.xlu0 %v14415_v13, %s13840_s14 }
 0x151   : > { %1549 = vrot.lane.b32.xlu1 %v14421_v15, %s13840_s14 }
 0x153   : > { %1547 = vrot.lane.b32.xlu0 %v14427_v16, %s13840_s14 }
 0x155   : > { %1445 = vrot.lane.b32.xlu1 %v386_v17, %s13841_s18 }
 0x157   : > { %1443 = vrot.lane.b32.xlu0 %v385_v18, %s13841_s18 }
 0x159   : > { %1449 = vrot.lane.b32.xlu1 %v388_v19, %s13841_s18 }
 0x15b   : > { %1447 = vrot.lane.b32.xlu0 %v387_v20, %s13841_s18 }
 0x15d   : > { %1453 = vrot.lane.b32.xlu1 %v390_v21, %s13841_s18 }
 0x15f   : > { %1451 = vrot.lane.b32.xlu0 %v389_v22, %s13841_s18 }
 0x161   : > { %1457 = vrot.lane.b32.xlu1 %v392_v23, %s13841_s18 }
 0x163   : > { %1455 = vrot.lane.b32.xlu0 %v391_v25, %s13841_s18 }
 0x165   : > { %1461 = vrot.lane.b32.xlu1 %v394_v5, %s13841_s18 }
 0x167   : > { %1459 = vrot.lane.b32.xlu0 %v393_v33, %s13841_s18 }
 0x169   : > { %1465 = vrot.lane.b32.xlu1 %v396_v26, %s13841_s18 }
 0x16b   : > { %1463 = vrot.lane.b32.xlu0 %v395_v34, %s13841_s18 }
 0x16d   : > { %1469 = vrot.lane.b32.xlu1 %v398_v36, %s13841_s18 }
 0x16f   : > { %1467 = vrot.lane.b32.xlu0 %v397_v37, %s13841_s18 }
 0x19b   : > { %v1522_v1 = vpop.permute.xlu0 %1521 }
 0x19c   : > { %v1568_v38 = vmul.f32 %v1522_v1, %v14327_v61 }
 0x19e   : > { %1601 = vrot.lane.b32.xlu1 %v1568_v38, %s13841_s18 }
 0x19f   : > { %v1520_v39 = vpop.permute.xlu0 %1519 }
 0x1a0   : > { %v1567_v40 = vmul.f32 %v1520_v39, %v14339_v12 }
 0x1a2   : > { %v1526_v41 = vpop.permute.xlu1 %1525  ;;  %1599 = vrot.lane.b32.xlu0 %v1567_v40, %s13841_s18 }
 0x1a3   : > { %v1570_v24 = vmul.f32 %v1526_v41, %v14345_v0  ;;  %v1440_v44 = vpop.permute.xlu0 %1439 }
 0x1a4   : > { %v1487_v41 = vmul.f32 %v1440_v44, %v14339_v12 }
 0x1a5   : > { %1605 = vrot.lane.b32.xlu1 %v1570_v24, %s13841_s18 }
 0x1a6   : > { %v1524_v28 = vpop.permute.xlu1 %1523 }
 0x1a7   : > { %v1569_v43 = vmul.f32 %v1524_v28, %v14353_v29 }
 0x1a9   : > { %1603 = vrot.lane.b32.xlu0 %v1569_v43, %s13841_s18 }
 0x1aa   : > { %v1442_v45 = vpop.permute.xlu1 %1441 }
 0x1ab   : > { %v1488_v1 = vmul.f32 %v1442_v45, %v14327_v61 }
 0x1ac   : > { %v1528_v46 = vpop.permute.xlu0 %1527 }
 0x1ad   : > { %v1571_v47 = vmul.f32 %v1528_v46, %v14361_v27 }
 0x1ae   : > { %v1530_v32 = vpop.permute.xlu1 %1529 }
 0x1af   : > { %v1572_v48 = vmul.f32 %v1530_v32, %v14367_v42  ;;  %1607 = vrot.lane.b32.xlu0 %v1571_v47, %s13841_s18 }
 0x1b1   : > { %1609 = vrot.lane.b32.xlu1 %v1572_v48, %s13841_s18 }
 0x1b3   : > { %v1534_v49 = vpop.permute.xlu1 %1533 }
 0x1b4   : > { %v1574_v51 = vmul.f32 %v1534_v49, %v14373_v50 }
 0x1b5   : > { %v1532_v52 = vpop.permute.xlu0 %1531 }
 0x1b6   : > { %v1573_v2 = vmul.f32 %v1532_v52, %v14379_v53  ;;  %1613 = vrot.lane.b32.xlu1 %v1574_v51, %s13841_s18 }
 0x1b7   : > { %v1538_v30 = vpop.permute.xlu1 %1537 }
 0x1b8   : > { %1611 = vrot.lane.b32.xlu0 %v1573_v2, %s13841_s18  ;;  %v1576_v35 = vmul.f32 %v1538_v30, %v14385_v56 }
 0x1b9   : > { %v1536_v54 = vpop.permute.xlu0 %1535 }
 0x1ba   : > { %v1575_v57 = vmul.f32 %v1536_v54, %v14391_v3  ;;  %1617 = vrot.lane.b32.xlu1 %v1576_v35, %s13841_s18 }
 0x1bb   : > { %v1542_v58 = vpop.permute.xlu1 %1541 }
 0x1bc   : > { %1615 = vrot.lane.b32.xlu0 %v1575_v57, %s13841_s18  ;;  %v1578_v59 = vmul.f32 %v1542_v58, %v14397_v4 }
 0x1bd   : > { %v1540_v31 = vpop.permute.xlu0 %1539 }
 0x1be   : > { %v1577_v60 = vmul.f32 %v1540_v31, %v14403_v7  ;;  %1621 = vrot.lane.b32.xlu1 %v1578_v59, %s13841_s18 }
 0x1bf   : > { %v1546_v62 = vpop.permute.xlu1 %1545 }
 0x1c0   : > { %1619 = vrot.lane.b32.xlu0 %v1577_v60, %s13841_s18  ;;  %v1580_v63 = vmul.f32 %v1546_v62, %v14409_v10 }
 0x1c1   : > { %v1544_v6 = vpop.permute.xlu0 %1543 }
 0x1c2   : > { %v1579_v8 = vmul.f32 %v1544_v6, %v14415_v13  ;;  %1625 = vrot.lane.b32.xlu1 %v1580_v63, %s13841_s18 }
 0x1c3   : > { %v1550_v9 = vpop.permute.xlu1 %1549 }
 0x1c4   : > { %1623 = vrot.lane.b32.xlu0 %v1579_v8, %s13841_s18  ;;  %v1582_v11 = vmul.f32 %v1550_v9, %v14421_v15 }
 0x1c5   : > { %v1548_v14 = vpop.permute.xlu0 %1547 }
 0x1c6   : > { %v1581_v17 = vmul.f32 %v1548_v14, %v14427_v16  ;;  %1629 = vrot.lane.b32.xlu1 %v1582_v11, %s13841_s18 }
 0x1c7   : > { %v1446_v18 = vpop.permute.xlu1 %1445 }
 0x1c8   : > { %1627 = vrot.lane.b32.xlu0 %v1581_v17, %s13841_s18  ;;  %v1490_v28 = vmul.f32 %v1446_v18, %v14345_v0 }
 0x1c9   : > { %v1444_v19 = vpop.permute.xlu0 %1443 }
 0x1ca   : > { %v1489_v45 = vmul.f32 %v1444_v19, %v14353_v29 }
 0x1cb   : > { %v1450_v20 = vpop.permute.xlu1 %1449 }
 0x1cc   : > { %v1492_v51 = vmul.f32 %v1450_v20, %v14367_v42 }
 0x1cd   : > { %v1448_v21 = vpop.permute.xlu0 %1447 }
 0x1ce   : > { %v1491_v49 = vmul.f32 %v1448_v21, %v14361_v27 }
 0x1cf   : > { %v1454_v22 = vpop.permute.xlu1 %1453 }
 0x1d0   : > { %v1494_v58 = vmul.f32 %v1454_v22, %v14373_v50 }
 0x1d1   : > { %v1452_v23 = vpop.permute.xlu0 %1451 }
 0x1d2   : > { %v1493_v31 = vmul.f32 %v1452_v23, %v14379_v53 }
 0x1d3   : > { %v1458_v25 = vpop.permute.xlu1 %1457 }
 0x1d4   : > { %v1496_v6 = vmul.f32 %v1458_v25, %v14385_v56 }
 0x1d5   : > { %v1456_v5 = vpop.permute.xlu0 %1455 }
 0x1d6   : > { %v1495_v11 = vmul.f32 %v1456_v5, %v14391_v3 }
 0x1d7   : > { %v1462_v33 = vpop.permute.xlu1 %1461 }
 0x1d8   : > { %v1498_v18 = vmul.f32 %v1462_v33, %v14397_v4 }
 0x1d9   : > { %v1460_v26 = vpop.permute.xlu0 %1459 }
 0x1da   : > { %v1497_v21 = vmul.f32 %v1460_v26, %v14403_v7 }
 0x1db   : > { %v1466_v34 = vpop.permute.xlu1 %1465 }
 0x1dd   : > { %v14491_v36 = vpop.permute.xlu0 %1463 }
 0x1de   : > { %v1499_v26 = vmul.f32 %v14491_v36, %v14415_v13 }
 0x1df   : > { %v14493_v37 = vpop.permute.xlu1 %1469 }
 0x1e1   : > { %v14496_v38 = vpop.permute.xlu0 %1467 }
 0x210   : > { %v1602_v39 = vpop.permute.xlu1 %1601 }
 0x211   : > { %v14498_v40 = vadd.f32 %v1602_v39, %v1488_v1  ;;  %v1500_v1 = vmul.f32 %v1466_v34, %v14409_v10  ;;  %v1502_v34 = vmul.f32 %v14493_v37, %v14421_v15 }
 0x213   : > { %13009 = vtanh.f32 %v14498_v40 }
 0x214   : > { %v1600_v24 = vpop.permute.xlu0 %1599 }
 0x215   : > { %v14503_v43 = vadd.f32 %v1600_v24, %v1487_v41 }
 0x217   : > { %v1606_v46 = vpop.permute.xlu1 %1605  ;;  %13011 = vtanh.f32 %v14503_v43 }
 0x218   : > { %v14505_v47 = vadd.f32 %v1606_v46, %v1490_v28 }
 0x21a   : > { %13013 = vtanh.f32 %v14505_v47 }
 0x21b   : > { %v1604_v32 = vpop.permute.xlu0 %1603 }
 0x21c   : > { %v14510_v48 = vadd.f32 %v1604_v32, %v1489_v45  ;;  %v1501_v32 = vmul.f32 %v14496_v38, %v14427_v16 }
 0x21e   : > { %13015 = vtanh.f32 %v14510_v48 }
 0x220   : > { %v13010_v44 = vpop.eup %13009 }
 0x221   : > { %v1608_v52 = vpop.permute.xlu0 %1607  ;;  %1697 = vrot.lane.b32.xlu1 %v13010_v44, %s13840_s14 }
 0x222   : > { %v14516_v2 = vadd.f32 %v1608_v52, %v1491_v49 }
 0x223   : > { %v1610_v30 = vpop.permute.xlu1 %1609 }
 0x224   : > { %v14518_v35 = vadd.f32 %v1610_v30, %v1492_v51  ;;  %v13012_v54 = vpop.eup %13011  ;;  %13017 = vtanh.f32 %v14516_v2 }
 0x225   : > { %1695 = vrot.lane.b32.xlu0 %v13012_v54, %s13840_s14 }
 0x226   : > { %13019 = vtanh.f32 %v14518_v35 }
 0x227   : > { %v13014_v57 = vpop.eup %13013 }
 0x228   : > { %v1614_v59 = vpop.permute.xlu1 %1613  ;;  %1701 = vrot.lane.b32.xlu1 %v13014_v57, %s13840_s14 }
 0x229   : > { %v14526_v60 = vadd.f32 %v1614_v59, %v1494_v58 }
 0x22a   : > { %v1612_v62 = vpop.permute.xlu0 %1611 }
 0x22b   : > { %v13016_v63 = vpop.eup %13015  ;;  %v14529_v8 = vadd.f32 %v1612_v62, %v1493_v31  ;;  %13021 = vtanh.f32 %v14526_v60  ;;  %v1759_v31 = vld [vmem:[%s13931_s19 + $0x1] sm:$0x1]  ;;  %v1760_v62 = vld [vmem:[%s13931_s19 + $0x9] sm:$0x1] }
 0x22c   : > { %v1618_v9 = vpop.permute.xlu1 %1617  ;;  %1699 = vrot.lane.b32.xlu0 %v13016_v63, %s13840_s14  ;;  %v1761_v63 = vld [vmem:[%s13931_s19 + $0x11] sm:$0x1] }
 0x22d   : > { %13023 = vtanh.f32 %v14529_v8  ;;  %v14535_v14 = vadd.f32 %v1618_v9, %v1496_v6  ;;  %v1762_v6 = vld [vmem:[%s13931_s19 + $0x19] sm:$0x1]  ;;  %v1763_v9 = vld [vmem:[%s13931_s19 + $0x21] sm:$0x1] }
 0x22e   : > { %v1616_v17 = vpop.permute.xlu0 %1615 }
 0x22f   : > { %v14538_v19 = vadd.f32 %v1616_v17, %v1495_v11  ;;  %13025 = vtanh.f32 %v14535_v14  ;;  %v1764_v11 = vld [vmem:[%s13931_s19 + $0x29] sm:$0x1]  ;;  %v1765_v17 = vld [vmem:[%s13931_s19 + $0x31] sm:$0x1] }
 0x230   : > { %v1622_v20 = vpop.permute.xlu1 %1621 }
 0x231   : > { %13027 = vtanh.f32 %v14538_v19  ;;  %v14543_v22 = vadd.f32 %v1622_v20, %v1498_v18  ;;  %v13018_v23 = vpop.eup %13017  ;;  %v1766_v18 = vld [vmem:[%s13931_s19 + $0x39] sm:$0x1]  ;;  %v2015_v20 = vrot.slane %v1760_v62, 7  ;;  %v1775_v62 = vld [vmem:[%s13931_s19 + $0x81] sm:$0x1] }
 0x232   : > { %v1620_v25 = vpop.permute.xlu0 %1619  ;;  %1703 = vrot.lane.b32.xlu0 %v13018_v23, %s13840_s14  ;;  %v2019_v23 = vrot.slane %v1762_v6, 5 }
 0x233   : > { %v13020_v5 = vpop.eup %13019  ;;  %v14546_v39 = vadd.f32 %v1620_v25, %v1497_v21  ;;  %13029 = vtanh.f32 %v14543_v22  ;;  %v2017_v21 = vrot.slane %v1761_v63, 6  ;;  %v2021_v25 = vrot.slane %v1763_v9, 4 }
 0x234   : > { %v1626_v33 = vpop.permute.xlu1 %1625  ;;  %1705 = vrot.lane.b32.xlu1 %v13020_v5, %s13840_s14  ;;  %v2023_v5 = vrot.slane %v1764_v11, 3 }
 0x235   : > { %13031 = vtanh.f32 %v14546_v39  ;;  %v14554_v41 = vadd.f32 %v1626_v33, %v1500_v1  ;;  %v1767_v1 = vld [vmem:[%s13931_s19 + $0x41] sm:$0x1]  ;;  %v2016_v33 = vsel %vm662_vm0, %v2015_v20, %v1759_v31 }
 0x236   : > { %v1624_v24 = vpop.permute.xlu0 %1623 }
 0x237   : > { %v14558_v28 = vadd.f32 %v1624_v24, %v1499_v26  ;;  %13033 = vtanh.f32 %v14554_v41  ;;  %v2025_v26 = vrot.slane %v1765_v17, 2  ;;  %v2027_v24 = vrot.slane %v1766_v18, 1  ;;  %v1776_v17 = vld [vmem:[%s13931_s19 + $0x89] sm:$0x1]  ;;  %v1777_v18 = vld [vmem:[%s13931_s19 + $0x91] sm:$0x1] }
 0x238   : > { %v13022_v46 = vpop.eup %13021  ;;  %v1630_v45 = vpop.permute.xlu1 %1629 }
 0x239   : > { %13035 = vtanh.f32 %v14558_v28  ;;  %v14564_v36 = vadd.f32 %v1630_v45, %v1502_v34  ;;  %1709 = vrot.lane.b32.xlu1 %v13022_v46, %s13840_s14  ;;  %v1768_v34 = vld [vmem:[%s13931_s19 + $0x49] sm:$0x1]  ;;  %v1769_v46 = vld [vmem:[%s13931_s19 + $0x51] sm:$0x1]  ;;  %v2018_v45 = vsel %vm665_vm1, %v2017_v21, %v2016_v33 }
 0x23a   : > { %v13024_v44 = vpop.eup %13023  ;;  %v1628_v49 = vpop.permute.xlu0 %1627  ;;  %v1780_v33 = vld [vmem:[%s13931_s19 + $0xa9] sm:$0x1] }
 0x23b   : > { %v14567_v51 = vadd.f32 %v1628_v49, %v1501_v32  ;;  %1707 = vrot.lane.b32.xlu0 %v13024_v44, %s13840_s14  ;;  %13037 = vtanh.f32 %v14564_v36  ;;  %v1770_v32 = vld [vmem:[%s13931_s19 + $0x59] sm:$0x1]  ;;  %v1771_v44 = vld [vmem:[%s13931_s19 + $0x61] sm:$0x1]  ;;  %v1772_v49 = vld [vmem:[%s13931_s19 + $0x69] sm:$0x1] }
 0x23c   : > { %v13026_v37 = vpop.eup %13025  ;;  %v2037_v31 = vrot.slane %v1772_v49, 3 }
 0x23d   : > { %13039 = vtanh.f32 %v14567_v51  ;;  %1713 = vrot.lane.b32.xlu1 %v13026_v37, %s13840_s14  ;;  %v2020_v37 = vsel %vm668_vm2, %v2019_v23, %v2018_v45  ;;  %v1778_v23 = vld [vmem:[%s13931_s19 + $0x99] sm:$0x1]  ;;  %v2043_v45 = vrot.slane %v1776_v17, 7 }
 0x23e   : > { %v13028_v38 = vpop.eup %13027  ;;  %v2047_v49 = vrot.slane %v1778_v23, 5  ;;  %v1789_v23 = vld [vmem:[%s13931_s19 + $0xf1] sm:$0x1] }
 0x23f   : > { %1711 = vrot.lane.b32.xlu0 %v13028_v38, %s13840_s14  ;;  %v1773_v38 = vld [vmem:[%s13931_s19 + $0x71] sm:$0x1] }
 0x240   : > { %v13030_v52 = vpop.eup %13029  ;;  %v2039_v9 = vrot.slane %v1773_v38, 2  ;;  %v2051_v38 = vrot.slane %v1780_v33, 3 }
 0x241   : > { %1717 = vrot.lane.b32.xlu1 %v13030_v52, %s13840_s14  ;;  %v1774_v52 = vld [vmem:[%s13931_s19 + $0x79] sm:$0x1] }
 0x242   : > { %v13032_v30 = vpop.eup %13031  ;;  %v2041_v11 = vrot.slane %v1774_v52, 1  ;;  %v1783_v52 = vld [vmem:[%s13931_s19 + $0xc1] sm:$0x1] }
 0x243   : > { %1715 = vrot.lane.b32.xlu0 %v13032_v30, %s13840_s14  ;;  %v2029_v30 = vrot.slane %v1768_v34, 7 }
 0x244   : > { %v13034_v54 = vpop.eup %13033 }
 0x245   : > { %1721 = vrot.lane.b32.xlu1 %v13034_v54, %s13840_s14  ;;  %v2031_v54 = vrot.slane %v1769_v46, 6  ;;  %v2030_v6 = vsel %vm662_vm0, %v2029_v30, %v1767_v1  ;;  %v1782_v1 = vld [vmem:[%s13931_s19 + $0xb9] sm:$0x1] }
 0x246   : > { %v13036_v57 = vpop.eup %13035  ;;  %v2055_v17 = vrot.slane %v1782_v1, 1  ;;  %v1792_v1 = vld [vmem:[%s13931_s19 + $0x109] sm:$0x1] }
 0x247   : > { %1719 = vrot.lane.b32.xlu0 %v13036_v57, %s13840_s14  ;;  %v2022_v57 = vsel %vm671_vm3, %v2021_v25, %v2020_v37  ;;  %v2032_v21 = vsel %vm665_vm1, %v2031_v54, %v2030_v6  ;;  %v1779_v25 = vld [vmem:[%s13931_s19 + $0xa1] sm:$0x1]  ;;  %v2044_v54 = vsel %vm662_vm0, %v2043_v45, %v1775_v62  ;;  %v1788_v62 = vld [vmem:[%s13931_s19 + $0xe9] sm:$0x1] }
 0x248   : > { %v13038_v58 = vpop.eup %13037  ;;  %v2024_v63 = vsel %vm674_vm4, %v2023_v5, %v2022_v57  ;;  %v1781_v5 = vld [vmem:[%s13931_s19 + $0xb1] sm:$0x1]  ;;  %v2049_v37 = vrot.slane %v1779_v25, 4  ;;  %v1790_v25 = vld [vmem:[%s13931_s19 + $0xf9] sm:$0x1] }
 0x249   : > { %1725 = vrot.lane.b32.xlu1 %v13038_v58, %s13840_s14  ;;  %v2033_v58 = vrot.slane %v1770_v32, 5  ;;  %v2026_v20 = vsel %vm677_vm5, %v2025_v26, %v2024_v63  ;;  %v2045_v32 = vrot.slane %v1777_v18, 6  ;;  %v2053_v57 = vrot.slane %v1781_v5, 2  ;;  %v1785_v63 = vld [vmem:[%s13931_s19 + $0xd1] sm:$0x1] }
 0x24a   : > { %v13040_v59 = vpop.eup %13039  ;;  %v2028_v34 = vsel %vm680_vm6, %v2027_v24, %v2026_v20  ;;  %v1786_v18 = vld [vmem:[%s13931_s19 + $0xd9] sm:$0x1]  ;;  %v1787_v20 = vld [vmem:[%s13931_s19 + $0xe1] sm:$0x1] }
 0x24b   : > { %1723 = vrot.lane.b32.xlu0 %v13040_v59, %s13840_s14  ;;  %v2035_v59 = vrot.slane %v1771_v44, 4  ;;  %v2034_v46 = vsel %vm668_vm2, %v2033_v58, %v2032_v21  ;;  %12455 = vmatprep.mubr.msk.f32.mxu0 %vm892_vm7, %v2028_v34  ;;  %v1784_v58 = vld [vmem:[%s13931_s19 + $0xc9] sm:$0x1]  ;;  %v2061_v5 = vrot.slane %v1786_v18, 5 }
 0x24c   : > { %v2057_v21 = vrot.slane %v1784_v58, 7  ;;  %v2067_v58 = vrot.slane %v1789_v23, 2 }
 0x24d   : > { %v2036_v26 = vsel %vm671_vm3, %v2035_v59, %v2034_v46  ;;  %v2046_v59 = vsel %vm665_vm1, %v2045_v32, %v2044_v54  ;;  %v2059_v46 = vrot.slane %v1785_v63, 6  ;;  %v1795_v63 = vld [vmem:[%s13931_s19 + $0x121] sm:$0x1] }
 0x24e   : > { %v2038_v30 = vsel %vm674_vm4, %v2037_v31, %v2036_v26  ;;  %v2048_v31 = vsel %vm668_vm2, %v2047_v49, %v2046_v59  ;;  %v2058_v34 = vsel %vm662_vm0, %v2057_v21, %v1783_v52  ;;  %v2065_v26 = vrot.slane %v1788_v62, 3  ;;  %v1791_v49 = vld [vmem:[%s13931_s19 + $0x101] sm:$0x1]  ;;  %v1798_v21 = vld [vmem:[%s13931_s19 + $0x139] sm:$0x1] }
 0x24f   : > { %v2040_v6 = vsel %vm677_vm5, %v2039_v9, %v2038_v30  ;;  %v2050_v33 = vsel %vm671_vm3, %v2049_v37, %v2048_v31  ;;  %v13777_v37 = vld [vmem:[%s18800_s1 + $0x18] sm:$0xff]  ;;  %v2060_v54 = vsel %vm665_vm1, %v2059_v46, %v2058_v34 }
 0x250   : > { %v2052_v32 = vsel %vm674_vm4, %v2051_v38, %v2050_v33  ;;  %v1796_v38 = vld [vmem:[%s13931_s19 + $0x129] sm:$0x1] }
 0x251   : > { %v2054_v30 = vsel %vm677_vm5, %v2053_v57, %v2052_v32  ;;  %v2062_v57 = vsel %vm668_vm2, %v2061_v5, %v2060_v54  ;;  %v2079_v34 = vrot.slane %v1796_v38, 3  ;;  %v1800_v5 = vld [vmem:[%s13931_s19 + $0x149] sm:$0x1]  ;;  %v1805_v38 = vld [vmem:[%s13931_s19 + $0x171] sm:$0x1] }
 0x252   : > { %v2056_v18 = vsel %vm680_vm6, %v2055_v17, %v2054_v30  ;;  %v13779_v17 = vld [vmem:[%s18800_s1 + $0x8] sm:$0xff] }
 0x293   : > { %v1698_v44 = vpop.permute.xlu1 %1697 }
 0x294   : > { %v1744_v24 = vmul.f32 %v1698_v44, %v14327_v61  ;;  %v2042_v61 = vsel %vm680_vm6, %v2041_v11, %v2040_v6  ;;  %v1793_v11 = vld [vmem:[%s13931_s19 + $0x111] sm:$0x1]  ;;  %v2063_v44 = vrot.slane %v1787_v20, 4 }
 0x295   : > { %12456 = vmatmul.mubr.msk.f32.vlgmr.msra.gmra.mxu0 %vm892_vm7, %v2042_v61  ;;  %v13778_v6 = vld [vmem:[%s18800_s1 + $0x10] sm:$0xff]  ;;  %v2071_v61 = vrot.slane %v1792_v1, 7  ;;  %v2073_v62 = vrot.slane %v1793_v11, 6 }
 0x296   : > { %2434 = vrot.lane.b32.xlu1 %v1744_v24, %s13841_s18  ;;  %v1794_v24 = vld [vmem:[%s13931_s19 + $0x119] sm:$0x1]  ;;  %12512 = vmatpush3.msra.mxu0 %v13777_v37  ;;  %v1797_v20 = vld [vmem:[%s13931_s19 + $0x131] sm:$0x1]  ;;  %v2064_v31 = vsel %vm671_vm3, %v2063_v44, %v2062_v57  ;;  %v2083_v44 = vrot.slane %v1798_v21, 1 }
 0x297   : > { %v1696_v9 = vpop.permute.xlu0 %1695  ;;  %12513 = vmatprep.subr.mxu0 %v13778_v6  ;;  %12458 = vmatprep.mubr.msk.f32.mxu0 %vm892_vm7, %v2056_v18  ;;  %v2075_v23 = vrot.slane %v1794_v24, 5  ;;  %v2072_v33 = vsel %vm662_vm0, %v2071_v61, %v1791_v49  ;;  %v2081_v46 = vrot.slane %v1797_v20, 2  ;;  %v1801_v1 = vld [vmem:[%s13931_s19 + $0x151] sm:$0x1]  ;;  %v1802_v24 = vld [vmem:[%s13931_s19 + $0x159] sm:$0x1] }
 0x298   : > { %v1743_v45 = vmul.f32 %v1696_v9, %v14339_v12  ;;  %v2069_v12 = vrot.slane %v1790_v25, 1  ;;  %12514 = vmatpush3.msra.mxu0 %v13778_v6  ;;  %v2077_v25 = vrot.slane %v1795_v63, 4  ;;  %v2066_v9 = vsel %vm674_vm4, %v2065_v26, %v2064_v31  ;;  %v13780_v49 = vld [vmem:[%s18800_s1] sm:$0xff]  ;;  %v1806_v6 = vld [vmem:[%s13931_s19 + $0x179] sm:$0x1] }
 0x299   : > { %12515 = vmatprep.subr.mxu0 %v13779_v17  ;;  %v2074_v32 = vsel %vm665_vm1, %v2073_v62, %v2072_v33  ;;  %v2085_v26 = vrot.slane %v1800_v5, 7  ;;  %v2087_v57 = vrot.slane %v1801_v1, 6  ;;  %v2089_v20 = vrot.slane %v1802_v24, 5  ;;  %v1808_v21 = vld [vmem:[%s13931_s19 + $0x189] sm:$0x1] }
 0x29a   : > { %v1702_v52 = vpop.permute.xlu1 %1701  ;;  %2432 = vrot.lane.b32.xlu0 %v1743_v45, %s13841_s18  ;;  %12516 = vmatpush3.msra.mxu0 %v13779_v17  ;;  %v2068_v45 = vsel %vm677_vm5, %v2067_v58, %v2066_v9  ;;  %v2076_v63 = vsel %vm668_vm2, %v2075_v23, %v2074_v32  ;;  %v1804_v58 = vld [vmem:[%s13931_s19 + $0x169] sm:$0x1]  ;;  %v2095_v62 = vrot.slane %v1805_v38, 2  ;;  %v1809_v23 = vld [vmem:[%s13931_s19 + $0x191] sm:$0x1]  ;;  %v2097_v17 = vrot.slane %v1806_v6, 1 }
 0x29b   : > { %v1746_v59 = vmul.f32 %v1702_v52, %v14345_v0  ;;  %v1799_v0 = vld [vmem:[%s13931_s19 + $0x141] sm:$0x1]  ;;  %12517 = vmatprep.subr.mxu0 %v13780_v49  ;;  %v2070_v54 = vsel %vm680_vm6, %v2069_v12, %v2068_v45  ;;  %v2093_v31 = vrot.slane %v1804_v58, 3  ;;  %v1810_v9 = vld [vmem:[%s13931_s19 + $0x199] sm:$0x1]  ;;  %v2099_v5 = vrot.slane %v1808_v21, 7 }
 0x29c   : > { %v1803_v52 = vld [vmem:[%s13931_s19 + $0x161] sm:$0x1]  ;;  %12518 = vmatpush3.msra.mxu0 %v13780_v49  ;;  %v2086_v18 = vsel %vm662_vm0, %v2085_v26, %v1799_v0  ;;  %v1814_v45 = vld [vmem:[%s13931_s19 + $0x1b9] sm:$0x1]  ;;  %v2101_v24 = vrot.slane %v1809_v23, 6 }
 0x29d   : > { %2438 = vrot.lane.b32.xlu1 %v1746_v59, %s13841_s18  ;;  %12459 = vmatmul.mubr.msk.f32.gmra.mxu0 %vm892_vm7, %v2070_v54  ;;  %v2078_v59 = vsel %vm671_vm3, %v2077_v25, %v2076_v63  ;;  %v2091_v61 = vrot.slane %v1803_v52, 4  ;;  %v2088_v0 = vsel %vm665_vm1, %v2087_v57, %v2086_v18  ;;  %v1811_v33 = vld [vmem:[%s13931_s19 + $0x1a1] sm:$0x1]  ;;  %v2103_v52 = vrot.slane %v1810_v9, 5  ;;  %v1816_v26 = vld [vmem:[%s13931_s19 + $0x1c9] sm:$0x1] }
 0x29e   : > { %v1700_v11 = vpop.permute.xlu0 %1699  ;;  %12575 = vmatprep.subr.mxu0 %v13777_v37  ;;  %v2080_v12 = vsel %vm674_vm4, %v2079_v34, %v2078_v59  ;;  %v2090_v1 = vsel %vm668_vm2, %v2089_v20, %v2088_v0  ;;  %v1812_v34 = vld [vmem:[%s13931_s19 + $0x1a9] sm:$0x1]  ;;  %v1815_v58 = vld [vmem:[%s13931_s19 + $0x1c1] sm:$0x1]  ;;  %v1817_v38 = vld [vmem:[%s13931_s19 + $0x1d1] sm:$0x1] }
 0x29f   : > { %v1745_v30 = vmul.f32 %v1700_v11, %v14353_v29  ;;  %v1807_v29 = vld [vmem:[%s13931_s19 + $0x181] sm:$0x1]  ;;  %v2082_v25 = vsel %vm677_vm5, %v2081_v46, %v2080_v12  ;;  %v1813_v11 = vld [vmem:[%s13931_s19 + $0x1b1] sm:$0x1]  ;;  %v2092_v46 = vsel %vm671_vm3, %v2091_v61, %v2090_v1  ;;  %v2107_v54 = vrot.slane %v1812_v34, 3 }
 0x2a0   : > { %v2084_v37 = vsel %vm680_vm6, %v2083_v44, %v2082_v25  ;;  %v2100_v32 = vsel %vm662_vm0, %v2099_v5, %v1807_v29  ;;  %v2094_v44 = vsel %vm674_vm4, %v2093_v31, %v2092_v46  ;;  %v2109_v63 = vrot.slane %v1813_v11, 2  ;;  %v1818_v29 = vld [vmem:[%s13931_s19 + $0x1d9] sm:$0x1]  ;;  %v1819_v21 = vld [vmem:[%s13931_s19 + $0x1e1] sm:$0x1] }
 0x2a1   : > { %2436 = vrot.lane.b32.xlu0 %v1745_v30, %s13841_s18  ;;  %12461 = vmatprep.mubr.msk.f32.mxu0 %vm892_vm7, %v2084_v37  ;;  %v2105_v30 = vrot.slane %v1811_v33, 4  ;;  %v2096_v18 = vsel %vm677_vm5, %v2095_v62, %v2094_v44  ;;  %v2102_v57 = vsel %vm665_vm1, %v2101_v24, %v2100_v32  ;;  %v2111_v20 = vrot.slane %v1814_v45, 1  ;;  %v1820_v23 = vld [vmem:[%s13931_s19 + $0x1e9] sm:$0x1]  ;;  %v1821_v25 = vld [vmem:[%s13931_s19 + $0x1f1] sm:$0x1] }
 0x2a2   : > { %v2098_v61 = vsel %vm680_vm6, %v2097_v17, %v2096_v18  ;;  %v2104_v31 = vsel %vm668_vm2, %v2103_v52, %v2102_v57  ;;  %v1822_v0 = vld [vmem:[%s13931_s19 + $0x1f9] sm:$0x1]  ;;  %v2113_v62 = vrot.slane %v1816_v26, 7  ;;  %v2115_v9 = vrot.slane %v1817_v38, 6  ;;  %v1824_v34 = vld [vmem:[%s13931_s19 + $0x209] sm:$0x1] }
 0x2a3   : > { %12462 = vmatmul.mubr.msk.f32.gmra.mxu0 %vm892_vm7, %v2098_v61  ;;  %v2117_v33 = vrot.slane %v1818_v29, 5  ;;  %v2119_v5 = vrot.slane %v1819_v21, 4  ;;  %v2121_v37 = vrot.slane %v1820_v23, 3  ;;  %v2123_v1 = vrot.slane %v1821_v25, 2  ;;  %v1825_v32 = vld [vmem:[%s13931_s19 + $0x211] sm:$0x1] }
 0x2a4   : > { %v1704_v49 = vpop.permute.xlu0 %1703  ;;  %v2114_v45 = vsel %vm662_vm0, %v2113_v62, %v1815_v58  ;;  %v2125_v46 = vrot.slane %v1822_v0, 1  ;;  %v1826_v24 = vld [vmem:[%s13931_s19 + $0x219] sm:$0x1]  ;;  %v2127_v52 = vrot.slane %v1824_v34, 7  ;;  %v1829_v38 = vld [vmem:[%s13931_s19 + $0x231] sm:$0x1] }
 0x2a5   : > { %v1747_v6 = vmul.f32 %v1704_v49, %v14361_v27  ;;  %v2106_v27 = vsel %vm671_vm3, %v2105_v30, %v2104_v31  ;;  %v2116_v44 = vsel %vm665_vm1, %v2115_v9, %v2114_v45  ;;  %v1827_v30 = vld [vmem:[%s13931_s19 + $0x221] sm:$0x1]  ;;  %v1830_v58 = vld [vmem:[%s13931_s19 + $0x239] sm:$0x1]  ;;  %v2129_v18 = vrot.slane %v1825_v32, 6 }
 0x2a6   : > { %v1706_v59 = vpop.permute.xlu1 %1705  ;;  %v2108_v17 = vsel %vm674_vm4, %v2107_v54, %v2106_v27  ;;  %v1828_v54 = vld [vmem:[%s13931_s19 + $0x229] sm:$0x1]  ;;  %v1831_v57 = vld [vmem:[%s13931_s19 + $0x241] sm:$0x1]  ;;  %v2131_v21 = vrot.slane %v1826_v24, 5  ;;  %v2137_v0 = vrot.slane %v1829_v38, 2 }
 0x2a7   : > { %v1748_v12 = vmul.f32 %v1706_v59, %v14367_v42  ;;  %2440 = vrot.lane.b32.xlu0 %v1747_v6, %s13841_s18  ;;  %v1823_v42 = vld [vmem:[%s13931_s19 + $0x201] sm:$0x1]  ;;  %v2110_v11 = vsel %vm677_vm5, %v2109_v63, %v2108_v17  ;;  %v2118_v63 = vsel %vm668_vm2, %v2117_v33, %v2116_v44  ;;  %v2135_v61 = vrot.slane %v1828_v54, 3  ;;  %v1833_v27 = vld [vmem:[%s13931_s19 + $0x251] sm:$0x1] }
 0x2a8   : > { %v2112_v49 = vsel %vm680_vm6, %v2111_v20, %v2110_v11  ;;  %v2128_v59 = vsel %vm662_vm0, %v2127_v52, %v1823_v42  ;;  %v2120_v29 = vsel %vm671_vm3, %v2119_v5, %v2118_v63  ;;  %v1834_v62 = vld [vmem:[%s13931_s19 + $0x259] sm:$0x1]  ;;  %v2139_v17 = vrot.slane %v1830_v58, 1  ;;  %v1835_v5 = vld [vmem:[%s13931_s19 + $0x261] sm:$0x1] }
 0x2a9   : > { %2442 = vrot.lane.b32.xlu1 %v1748_v12, %s13841_s18  ;;  %12464 = vmatprep.mubr.msk.f32.mxu0 %vm892_vm7, %v2112_v49  ;;  %v2133_v12 = vrot.slane %v1827_v30, 4  ;;  %v2122_v23 = vsel %vm674_vm4, %v2121_v37, %v2120_v29  ;;  %v2130_v25 = vsel %vm665_vm1, %v2129_v18, %v2128_v59  ;;  %v1837_v32 = vld [vmem:[%s13931_s19 + $0x271] sm:$0x1]  ;;  %v1838_v24 = vld [vmem:[%s13931_s19 + $0x279] sm:$0x1]  ;;  %v2145_v44 = vrot.slane %v1834_v62, 5 }
 0x2aa   : > { %v2124_v33 = vsel %vm677_vm5, %v2123_v1, %v2122_v23  ;;  %v2132_v42 = vsel %vm668_vm2, %v2131_v21, %v2130_v25  ;;  %v2143_v1 = vrot.slane %v1833_v27, 6  ;;  %v2147_v30 = vrot.slane %v1835_v5, 4  ;;  %v1841_v58 = vld [vmem:[%s13931_s19 + $0x291] sm:$0x1]  ;;  %v1842_v59 = vld [vmem:[%s13931_s19 + $0x299] sm:$0x1] }
 0x2ab   : > { %v1710_v26 = vpop.permute.xlu1 %1709  ;;  %v2126_v11 = vsel %vm680_vm6, %v2125_v46, %v2124_v33  ;;  %v2134_v45 = vsel %vm671_vm3, %v2133_v12, %v2132_v42  ;;  %v1840_v46 = vld [vmem:[%s13931_s19 + $0x289] sm:$0x1]  ;;  %v2151_v29 = vrot.slane %v1837_v32, 2  ;;  %v2153_v21 = vrot.slane %v1838_v24, 1  ;;  %v1846_v23 = vld [vmem:[%s13931_s19 + $0x2b9] sm:$0x1] }
 0x2ac   : > { %v1750_v6 = vmul.f32 %v1710_v26, %v14373_v50  ;;  %v1832_v50 = vld [vmem:[%s13931_s19 + $0x249] sm:$0x1]  ;;  %12465 = vmatmul.mubr.msk.f32.gmra.mxu0 %vm892_vm7, %v2126_v11  ;;  %v2136_v26 = vsel %vm674_vm4, %v2135_v61, %v2134_v45  ;;  %v2155_v25 = vrot.slane %v1840_v46, 7  ;;  %v1849_v11 = vld [vmem:[%s13931_s19 + $0x2d1] sm:$0x1] }
 0x2ad   : > { %v1708_v20 = vpop.permute.xlu0 %1707  ;;  %v2141_v34 = vrot.slane %v1832_v50, 7  ;;  %v2138_v38 = vsel %vm677_vm5, %v2137_v0, %v2136_v26  ;;  %v1844_v12 = vld [vmem:[%s13931_s19 + $0x2a9] sm:$0x1]  ;;  %v2157_v0 = vrot.slane %v1841_v58, 6  ;;  %v1854_v46 = vld [vmem:[%s13931_s19 + $0x2f9] sm:$0x1] }
 0x2ae   : > { %v1749_v31 = vmul.f32 %v1708_v20, %v14379_v53  ;;  %2446 = vrot.lane.b32.xlu1 %v1750_v6, %s13841_s18  ;;  %v1836_v53 = vld [vmem:[%s13931_s19 + $0x269] sm:$0x1]  ;;  %v2163_v42 = vrot.slane %v1844_v12, 3 }
 0x2af   : > { %v1714_v9 = vpop.permute.xlu1 %1713  ;;  %v2142_v49 = vsel %vm662_vm0, %v2141_v34, %v1831_v57  ;;  %v2149_v63 = vrot.slane %v1836_v53, 3  ;;  %v2140_v57 = vsel %vm680_vm6, %v2139_v17, %v2138_v38  ;;  %v1847_v17 = vld [vmem:[%s13931_s19 + $0x2c1] sm:$0x1] }
 0x2b0   : > { %2444 = vrot.lane.b32.xlu0 %v1749_v31, %s13841_s18  ;;  %v1752_v37 = vmul.f32 %v1714_v9, %v14385_v56  ;;  %v1839_v56 = vld [vmem:[%s13931_s19 + $0x281] sm:$0x1]  ;;  %v2144_v6 = vsel %vm665_vm1, %v2143_v1, %v2142_v49  ;;  %12467 = vmatprep.mubr.msk.f32.mxu0 %vm892_vm7, %v2140_v57  ;;  %v1845_v31 = vld [vmem:[%s13931_s19 + $0x2b1] sm:$0x1]  ;;  %v2159_v9 = vrot.slane %v1842_v59, 5  ;;  %v2167_v1 = vrot.slane %v1846_v23, 1 }
 0x2b1   : > { %v1712_v52 = vpop.permute.xlu0 %1711  ;;  %v2146_v20 = vsel %vm668_vm2, %v2145_v44, %v2144_v6  ;;  %v2156_v53 = vsel %vm662_vm0, %v2155_v25, %v1839_v56  ;;  %v2165_v34 = vrot.slane %v1845_v31, 2  ;;  %v1853_v56 = vld [vmem:[%s13931_s19 + $0x2f1] sm:$0x1]  ;;  %v1855_v59 = vld [vmem:[%s13931_s19 + $0x301] sm:$0x1]  ;;  %v2181_v23 = vrot.slane %v1854_v46, 1 }
 0x2b2   : > { %v1751_v54 = vmul.f32 %v1712_v52, %v14391_v3  ;;  %2450 = vrot.lane.b32.xlu1 %v1752_v37, %s13841_s18  ;;  %v1843_v3 = vld [vmem:[%s13931_s19 + $0x2a1] sm:$0x1]  ;;  %v2148_v50 = vsel %vm671_vm3, %v2147_v30, %v2146_v20  ;;  %v1848_v37 = vld [vmem:[%s13931_s19 + $0x2c9] sm:$0x1]  ;;  %v2158_v24 = vsel %vm665_vm1, %v2157_v0, %v2156_v53  ;;  %v2179_v31 = vrot.slane %v1853_v56, 2 }
 0x2b3   : > { %v1718_v18 = vpop.permute.xlu1 %1717  ;;  %v2150_v62 = vsel %vm674_vm4, %v2149_v63, %v2148_v50  ;;  %v2161_v33 = vrot.slane %v1843_v3, 4  ;;  %v1851_v52 = vld [vmem:[%s13931_s19 + $0x2e1] sm:$0x1]  ;;  %v2169_v26 = vrot.slane %v1848_v37, 7  ;;  %v2160_v44 = vsel %vm668_vm2, %v2159_v9, %v2158_v24  ;;  %v1852_v30 = vld [vmem:[%s13931_s19 + $0x2e9] sm:$0x1] }
 0x2b4   : > { %2448 = vrot.lane.b32.xlu0 %v1751_v54, %s13841_s18  ;;  %v1754_v61 = vmul.f32 %v1718_v18, %v14397_v4  ;;  %v2152_v5 = vsel %vm677_vm5, %v2151_v29, %v2150_v62  ;;  %v2171_v63 = vrot.slane %v1849_v11, 6  ;;  %v2175_v20 = vrot.slane %v1851_v52, 4  ;;  %v1858_v3 = vld [vmem:[%s13931_s19 + $0x319] sm:$0x1]  ;;  %v1859_v25 = vld [vmem:[%s13931_s19 + $0x321] sm:$0x1] }
 0x2b5   : > { %v1716_v27 = vpop.permute.xlu0 %1715  ;;  %v2154_v32 = vsel %vm680_vm6, %v2153_v21, %v2152_v5  ;;  %v2162_v38 = vsel %vm671_vm3, %v2161_v33, %v2160_v44  ;;  %v2170_v6 = vsel %vm662_vm0, %v2169_v26, %v1847_v17  ;;  %v2177_v29 = vrot.slane %v1852_v30, 3  ;;  %v1857_v21 = vld [vmem:[%s13931_s19 + $0x311] sm:$0x1]  ;;  %v1860_v0 = vld [vmem:[%s13931_s19 + $0x329] sm:$0x1] }
 0x2b6   : > { %v1753_v4 = vmul.f32 %v1716_v27, %v14403_v7  ;;  %2454 = vrot.lane.b32.xlu1 %v1754_v61, %s13841_s18  ;;  %v1850_v7 = vld [vmem:[%s13931_s19 + $0x2d9] sm:$0x1]  ;;  %12468 = vmatmul.mubr.msk.f32.gmra.mxu0 %vm892_vm7, %v2154_v32  ;;  %v2164_v57 = vsel %vm674_vm4, %v2163_v42, %v2162_v38  ;;  %v2172_v50 = vsel %vm665_vm1, %v2171_v63, %v2170_v6  ;;  %v1861_v9 = vld [vmem:[%s13931_s19 + $0x331] sm:$0x1]  ;;  %v2185_v5 = vrot.slane %v1857_v21, 6 }
 0x2b7   : > { %v1722_v45 = vpop.permute.xlu1 %1721  ;;  %v2173_v58 = vrot.slane %v1850_v7, 5  ;;  %v2166_v61 = vsel %vm677_vm5, %v2165_v34, %v2164_v57  ;;  %v1862_v33 = vld [vmem:[%s13931_s19 + $0x339] sm:$0x1]  ;;  %v2187_v53 = vrot.slane %v1858_v3, 5  ;;  %v1863_v32 = vld [vmem:[%s13931_s19 + $0x341] sm:$0x1] }
 0x2b8   : > { %2452 = vrot.lane.b32.xlu0 %v1753_v4, %s13841_s18  ;;  %v1756_v49 = vmul.f32 %v1722_v45, %v14409_v10  ;;  %v1856_v10 = vld [vmem:[%s13931_s19 + $0x309] sm:$0x1]  ;;  %v2168_v27 = vsel %vm680_vm6, %v2167_v1, %v2166_v61  ;;  %v2191_v45 = vrot.slane %v1860_v0, 3  ;;  %v1865_v1 = vld [vmem:[%s13931_s19 + $0x351] sm:$0x1]  ;;  %v2193_v26 = vrot.slane %v1861_v9, 2 }
 0x2b9   : > { %v1720_v54 = vpop.permute.xlu0 %1719  ;;  %v2174_v62 = vsel %vm668_vm2, %v2173_v58, %v2172_v50  ;;  %v2183_v42 = vrot.slane %v1856_v10, 7  ;;  %12470 = vmatprep.mubr.msk.f32.mxu0 %vm892_vm7, %v2168_v27  ;;  %v1864_v24 = vld [vmem:[%s13931_s19 + $0x349] sm:$0x1]  ;;  %v1867_v44 = vld [vmem:[%s13931_s19 + $0x361] sm:$0x1]  ;;  %v2199_v58 = vrot.slane %v1865_v1, 6 }
 0x2ba   : > { %v1755_v18 = vmul.f32 %v1720_v54, %v14415_v13  ;;  %2458 = vrot.lane.b32.xlu1 %v1756_v49, %s13841_s18  ;;  %v2176_v4 = vsel %vm671_vm3, %v2175_v20, %v2174_v62  ;;  %v1866_v49 = vld [vmem:[%s13931_s19 + $0x359] sm:$0x1]  ;;  %v1868_v46 = vld [vmem:[%s13931_s19 + $0x369] sm:$0x1]  ;;  %v1869_v54 = vld [vmem:[%s13931_s19 + $0x371] sm:$0x1] }
 0x2bb   : > { %v1726_v12 = vpop.permute.xlu1 %1725  ;;  %v2178_v37 = vsel %vm674_vm4, %v2177_v29, %v2176_v4  ;;  %v2184_v11 = vsel %vm662_vm0, %v2183_v42, %v1855_v59  ;;  %v1870_v38 = vld [vmem:[%s13931_s19 + $0x379] sm:$0x1]  ;;  %v2197_v63 = vrot.slane %v1864_v24, 7  ;;  %v2201_v59 = vrot.slane %v1866_v49, 5  ;;  %v1871_v10 = vld [vmem:[%s13931_s19 + $0x381] sm:$0x1] }
 0x2bc   : > { %2456 = vrot.lane.b32.xlu0 %v1755_v18, %s13841_s18  ;;  %v1758_v13 = vmul.f32 %v1726_v12, %v14421_v15  ;;  %v2189_v15 = vrot.slane %v1859_v25, 4  ;;  %v2180_v7 = vsel %vm677_vm5, %v2179_v31, %v2178_v37  ;;  %v2186_v52 = vsel %vm665_vm1, %v2185_v5, %v2184_v11  ;;  %v1872_v21 = vld [vmem:[%s13931_s19 + $0x389] sm:$0x1]  ;;  %v1873_v50 = vld [vmem:[%s13931_s19 + $0x391] sm:$0x1] }
 0x2bd   : > { %v1724_v17 = vpop.permute.xlu0 %1723  ;;  %v2182_v30 = vsel %vm680_vm6, %v2181_v23, %v2180_v7  ;;  %v2188_v56 = vsel %vm668_vm2, %v2187_v53, %v2186_v52  ;;  %v2203_v57 = vrot.slane %v1867_v44, 4  ;;  %v2205_v20 = vrot.slane %v1868_v46, 3  ;;  %v1874_v31 = vld [vmem:[%s13931_s19 + $0x399] sm:$0x1]  ;;  %v1876_v27 = vld [vmem:[%s13931_s19 + $0x3a9] sm:$0x1] }
 0x2be   : > { %v1757_v34 = vmul.f32 %v1724_v17, %v14427_v16  ;;  %2462 = vrot.lane.b32.xlu1 %v1758_v13, %s13841_s18  ;;  %v2195_v16 = vrot.slane %v1862_v33, 1  ;;  %12471 = vmatmul.mubr.msk.f32.gmra.mxu0 %vm892_vm7, %v2182_v30  ;;  %v2190_v6 = vsel %vm671_vm3, %v2189_v15, %v2188_v56  ;;  %v2207_v29 = vrot.slane %v1869_v54, 2  ;;  %v1875_v13 = vld [vmem:[%s13931_s19 + $0x3a1] sm:$0x1]  ;;  %v1877_v62 = vld [vmem:[%s13931_s19 + $0x3b1] sm:$0x1] }
 0x2bf   : > { %v2192_v18 = vsel %vm674_vm4, %v2191_v45, %v2190_v6  ;;  %v2198_v12 = vsel %vm662_vm0, %v2197_v63, %v1863_v32  ;;  %v2209_v61 = vrot.slane %v1870_v38, 1  ;;  %v2211_v23 = vrot.slane %v1872_v21, 7  ;;  %v1878_v33 = vld [vmem:[%s13931_s19 + $0x3b9] sm:$0x1]  ;;  %v1879_v5 = vld [vmem:[%s13931_s19 + $0x3c1] sm:$0x1] }
 0x2c0   : > { %2460 = vrot.lane.b32.xlu0 %v1757_v34, %s13841_s18  ;;  %v2194_v3 = vsel %vm677_vm5, %v2193_v26, %v2192_v18  ;;  %v2200_v0 = vsel %vm665_vm1, %v2199_v58, %v2198_v12  ;;  %v2213_v17 = vrot.slane %v1873_v50, 6  ;;  %v2215_v4 = vrot.slane %v1874_v31, 5  ;;  %v1880_v11 = vld [vmem:[%s13931_s19 + $0x3c9] sm:$0x1]  ;;  %v1881_v1 = vld [vmem:[%s13931_s19 + $0x3d1] sm:$0x1] }
 0x2c1   : > { %v2196_v25 = vsel %vm680_vm6, %v2195_v16, %v2194_v3  ;;  %v2202_v9 = vsel %vm668_vm2, %v2201_v59, %v2200_v0  ;;  %v2212_v42 = vsel %vm662_vm0, %v2211_v23, %v1871_v10  ;;  %v2217_v15 = vrot.slane %v1875_v13, 4  ;;  %v1882_v7 = vld [vmem:[%s13931_s19 + $0x3d9] sm:$0x1]  ;;  %v1883_v49 = vld [vmem:[%s13931_s19 + $0x3e1] sm:$0x1]  ;;  %v13782_v13 = vld [vmem:[%s18801_s2 + $0x10] sm:$0xff] }
 0x2c2   : > { %12473 = vmatprep.mubr.msk.f32.mxu0 %vm892_vm7, %v2196_v25  ;;  %v2204_v53 = vsel %vm671_vm3, %v2203_v57, %v2202_v9  ;;  %v2219_v34 = vrot.slane %v1876_v27, 3  ;;  %v2221_v37 = vrot.slane %v1877_v62, 2  ;;  %v2214_v32 = vsel %vm665_vm1, %v2213_v17, %v2212_v42  ;;  %v1884_v44 = vld [vmem:[%s13931_s19 + $0x3e9] sm:$0x1]  ;;  %v1885_v30 = vld [vmem:[%s13931_s19 + $0x3f1] sm:$0x1] }
 0x2c3   : > { %v2206_v45 = vsel %vm674_vm4, %v2205_v20, %v2204_v53  ;;  %v2223_v24 = vrot.slane %v1878_v33, 1  ;;  %v2225_v52 = vrot.slane %v1880_v11, 7  ;;  %v2216_v16 = vsel %vm668_vm2, %v2215_v4, %v2214_v32  ;;  %v1886_v54 = vld [vmem:[%s13931_s19 + $0x3f9] sm:$0x1]  ;;  %v13783_v62 = vld [vmem:[%s18801_s2 + $0x8] sm:$0xff]  ;;  %v13784_v33 = vld [vmem:[%s18801_s2] sm:$0xff] }
 0x2c4   : > { %v2208_v26 = vsel %vm677_vm5, %v2207_v29, %v2206_v45  ;;  %v2218_v46 = vsel %vm671_vm3, %v2217_v15, %v2216_v16  ;;  %v2227_v6 = vrot.slane %v1881_v1, 6  ;;  %v2229_v58 = vrot.slane %v1882_v7, 5  ;;  %v13781_v0 = vld [vmem:[%s18801_s2 + $0x18] sm:$0xff] }
 0x2c5   : > { %v2210_v56 = vsel %vm680_vm6, %v2209_v61, %v2208_v26  ;;  %v2226_v38 = vsel %vm662_vm0, %v2225_v52, %v1879_v5  ;;  %v2220_v63 = vsel %vm674_vm4, %v2219_v34, %v2218_v46  ;;  %v2231_v59 = vrot.slane %v1883_v49, 4 }
 0x2c6   : > { %12474 = vmatmul.mubr.msk.f32.gmra.mxu0 %vm892_vm7, %v2210_v56  ;;  %v2233_v10 = vrot.slane %v1884_v44, 3  ;;  %v2222_v18 = vsel %vm677_vm5, %v2221_v37, %v2220_v63  ;;  %v2228_v57 = vsel %vm665_vm1, %v2227_v6, %v2226_v38  ;;  %v2235_v20 = vrot.slane %v1885_v30, 2  ;;  %v14911_v44 = vld [vmem:[%s18802_s3] ss:$0 sm:$0xff] }
 0x2c7   : > { %v2224_v29 = vsel %vm680_vm6, %v2223_v24, %v2222_v18  ;;  %v2230_v21 = vsel %vm668_vm2, %v2229_v58, %v2228_v57  ;;  %v2237_v3 = vrot.slane %v1886_v54, 1 }
 0x2c8   : > { %12476 = vmatprep.mubr.msk.f32.mxu0 %vm892_vm7, %v2224_v29  ;;  %v2232_v12 = vsel %vm671_vm3, %v2231_v59, %v2230_v21 }
 0x2c9   : > { %v2234_v61 = vsel %vm674_vm4, %v2233_v10, %v2232_v12 }
 0x2ca   : > { %v2236_v50 = vsel %vm677_vm5, %v2235_v20, %v2234_v61 }
 0x2cb   : > { %v2238_v31 = vsel %vm680_vm6, %v2237_v3, %v2236_v50 }
 0x2cc   : > { %12477 = vmatmul.mubr.msk.f32.gmra.mxu0 %vm892_vm7, %v2238_v31 }
 0x308   : > { %v2435_v25 = vpop.permute.xlu1 %2434 }
 0x30c   : > { %v2433_v23 = vpop.permute.xlu0 %2432 }
 0x30d   : > { %12487 = vmatprep.mubr.msk.f32.mxu1 %vm892_vm7, %v2433_v23 }
 0x30e   : > { %12488 = vmatmul.mubr.msk.f32.vlgmr.msra.gmra.mxu1 %vm892_vm7, %v2435_v25 }
 0x30f   : > { %12544 = vmatpush3.msra.mxu1 %v13781_v0  ;;  %v2439_v9 = vpop.permute.xlu1 %2438 }
 0x310   : > { %12545 = vmatprep.subr.mxu1 %v13782_v13 }
 0x311   : > { %12546 = vmatpush3.msra.mxu1 %v13782_v13 }
 0x312   : > { %12547 = vmatprep.subr.mxu1 %v13783_v62 }
 0x313   : > { %v2437_v27 = vpop.permute.xlu0 %2436  ;;  %12548 = vmatpush3.msra.mxu1 %v13783_v62 }
 0x314   : > { %12490 = vmatprep.mubr.msk.f32.mxu1 %vm892_vm7, %v2437_v27  ;;  %12549 = vmatprep.subr.mxu1 %v13784_v33 }
 0x315   : > { %12491 = vmatmul.mubr.msk.f32.gmra.mxu1 %vm892_vm7, %v2439_v9 }
 0x316   : > { %12550 = vmatpush3.msra.mxu1 %v13784_v33 }
 0x317   : > { %12607 = vmatprep.subr.mxu1 %v13781_v0 }
 0x319   : > { %v2441_v42 = vpop.permute.xlu0 %2440 }
 0x31a   : > { %12493 = vmatprep.mubr.msk.f32.mxu1 %vm892_vm7, %v2441_v42 }
 0x31b   : > { %v2443_v17 = vpop.permute.xlu1 %2442 }
 0x31c   : > { %12494 = vmatmul.mubr.msk.f32.gmra.mxu1 %vm892_vm7, %v2443_v17 }
 0x320   : > { %v2447_v4 = vpop.permute.xlu1 %2446 }
 0x322   : > { %v2445_v5 = vpop.permute.xlu0 %2444 }
 0x323   : > { %12496 = vmatprep.mubr.msk.f32.mxu1 %vm892_vm7, %v2445_v5 }
 0x324   : > { %12497 = vmatmul.mubr.msk.f32.gmra.mxu1 %vm892_vm7, %v2447_v4  ;;  %v2451_v53 = vpop.permute.xlu1 %2450 }
 0x326   : > { %v2449_v15 = vpop.permute.xlu0 %2448 }
 0x327   : > { %12499 = vmatprep.mubr.msk.f32.mxu1 %vm892_vm7, %v2449_v15 }
 0x328   : > { %12500 = vmatmul.mubr.msk.f32.gmra.mxu1 %vm892_vm7, %v2451_v53  ;;  %v2455_v34 = vpop.permute.xlu1 %2454 }
 0x32a   : > { %v2453_v37 = vpop.permute.xlu0 %2452 }
 0x32b   : > { %12502 = vmatprep.mubr.msk.f32.mxu1 %vm892_vm7, %v2453_v37 }
 0x32c   : > { %12503 = vmatmul.mubr.msk.f32.gmra.mxu1 %vm892_vm7, %v2455_v34  ;;  %v2459_v11 = vpop.permute.xlu1 %2458 }
 0x32e   : > { %v2457_v45 = vpop.permute.xlu0 %2456 }
 0x32f   : > { %12505 = vmatprep.mubr.msk.f32.mxu1 %vm892_vm7, %v2457_v45 }
 0x330   : > { %12506 = vmatmul.mubr.msk.f32.gmra.mxu1 %vm892_vm7, %v2459_v11  ;;  %v2463_v32 = vpop.permute.xlu1 %2462 }
 0x332   : > { %v2461_v24 = vpop.permute.xlu0 %2460 }
 0x333   : > { %12508 = vmatprep.mubr.msk.f32.mxu1 %vm892_vm7, %v2461_v24 }
 0x334   : > { %12509 = vmatmul.mubr.msk.f32.gmra.mxu1 %vm892_vm7, %v2463_v32 }
 0x355   : > { %v12457_v1 = vpop.f32.mrf.mxu0 }
 0x356   : > { %v2343_v30 = vadd.f32 %v14911_v44, %v12457_v1 }
 0x357   : > { %v2337_v7 = vpop.f32.mrf.mxu0 }
 0x358   : > { %v2338_v54 = vadd.f32 %v14911_v44, %v2337_v7 }
 0x35d   : > { %v12460_v52 = vpop.f32.mrf.mxu0 }
 0x35e   : > { %v2353_v59 = vadd.f32 %v14911_v44, %v12460_v52 }
 0x35f   : > { %v2347_v26 = vpop.f32.mrf.mxu0 }
 0x360   : > { %v2348_v57 = vadd.f32 %v14911_v44, %v2347_v26 }
 0x363   : > { %v12463_v16 = vpop.f32.mrf.mxu0 }
 0x364   : > { %v2363_v31 = vadd.f32 %v14911_v44, %v12463_v16 }
 0x365   : > { %v2357_v49 = vpop.f32.mrf.mxu0 }
 0x366   : > { %v2358_v25 = vadd.f32 %v14911_v44, %v2357_v49 }
 0x36c   : > { %v12466_v56 = vpop.f32.mrf.mxu0 }
 0x36d   : > { %v2373_v4 = vadd.f32 %v14911_v44, %v12466_v56 }
 0x36e   : > { %v2367_v6 = vpop.f32.mrf.mxu0 }
 0x36f   : > { %v2368_v34 = vadd.f32 %v14911_v44, %v2367_v6 }
 0x376   : > { %v12469_v20 = vpop.f32.mrf.mxu0 }
 0x377   : > { %v2383_v24 = vadd.f32 %v14911_v44, %v12469_v20 }
 0x378   : > { %v2377_v50 = vpop.f32.mrf.mxu0 }
 0x379   : > { %v2378_v16 = vadd.f32 %v14911_v44, %v2377_v50 }
 0x37e   : > { %v12472_v13 = vpop.f32.mrf.mxu0 }
 0x37f   : > { %v2393_v6 = vadd.f32 %v14911_v44, %v12472_v13 }
 0x380   : > { %v2387_v42 = vpop.f32.mrf.mxu0 }
 0x386   : > { %v12475_v45 = vpop.f32.mrf.mxu0 }
 0x388   : > { %v2397_v56 = vpop.f32.mrf.mxu0 }
 0x389   : > { %v2398_v50 = vadd.f32 %v14911_v44, %v2397_v56 }
 0x38c   : > { %v12478_v20 = vpop.f32.mrf.mxu0 }
 0x3ce   : > { %v12489_v46 = vpop.f32.mrf.mxu1 }
 0x3cf   : > { %v2642_v38 = vadd.f32 %v12489_v46, %v2343_v30 }
 0x3d0   : > { %v2562_v63 = vpop.f32.mrf.mxu1 }
 0x3d1   : > { %v11609_v58 = vmul.f32 -1.442695, %v2642_v38  ;;  %v2641_v10 = vadd.f32 %v2562_v63, %v2338_v54 }
 0x3d3   : > { %13041 = vpow2.f32 %v11609_v58  ;;  %v11608_v18 = vmul.f32 -1.442695, %v2641_v10 }
 0x3d5   : > { %v12492_v29 = vpop.f32.mrf.mxu1  ;;  %13043 = vpow2.f32 %v11608_v18  ;;  %v2388_v18 = vadd.f32 %v14911_v44, %v2387_v42 }
 0x3d6   : > { %v2644_v21 = vadd.f32 %v12492_v29, %v2353_v59 }
 0x3d7   : > { %v2572_v3 = vpop.f32.mrf.mxu1 }
 0x3d8   : > { %v11611_v12 = vmul.f32 -1.442695, %v2644_v21  ;;  %v2643_v61 = vadd.f32 %v2572_v3, %v2348_v57  ;;  %v2403_v3 = vadd.f32 %v14911_v44, %v12475_v45 }
 0x3da   : > { %13045 = vpow2.f32 %v11611_v12  ;;  %v11610_v23 = vmul.f32 -1.442695, %v2643_v61 }
 0x3dc   : > { %13047 = vpow2.f32 %v11610_v23  ;;  %v12495_v0 = vpop.f32.mrf.mxu1 }
 0x3dd   : > { %v2646_v27 = vadd.f32 %v12495_v0, %v2363_v31 }
 0x3de   : > { %v2582_v62 = vpop.f32.mrf.mxu1 }
 0x3df   : > { %v11613_v9 = vmul.f32 -1.442695, %v2646_v27  ;;  %v2645_v33 = vadd.f32 %v2582_v62, %v2358_v25  ;;  %v2413_v27 = vadd.f32 %v14911_v44, %v12478_v20  ;;  %v2407_v62 = vpop.f32.mrf.mxu0 }
 0x3e0   : > { %v13042_v17 = vpop.eup %13041 }
 0x3e1   : > { %13049 = vpow2.f32 %v11613_v9  ;;  %v11612_v5 = vmul.f32 -1.442695, %v2645_v33  ;;  %v2706_v53 = vadd.f32 1.0, %v13042_v17 }
 0x3e2   : > { %v13044_v15 = vpop.eup %13043 }
 0x3e3   : > { %13051 = vpow2.f32 %v11612_v5  ;;  %v2705_v37 = vadd.f32 1.0, %v13044_v15 }
 0x3e4   : > { %13053 = vrcp.f32 %v2706_v53  ;;  %v12498_v11 = vpop.f32.mrf.mxu1 }
 0x3e5   : > { %v2648_v32 = vadd.f32 %v12498_v11, %v2373_v4  ;;  %13055 = vrcp.f32 %v2705_v37  ;;  %v2408_v37 = vadd.f32 %v14911_v44, %v2407_v62 }
 0x3e6   : > { %v2592_v1 = vpop.f32.mrf.mxu1 }
 0x3e7   : > { %v13046_v7 = vpop.eup %13045  ;;  %v11615_v52 = vmul.f32 -1.442695, %v2648_v32  ;;  %v2647_v26 = vadd.f32 %v2592_v1, %v2368_v34 }
 0x3e8   : > { %v2708_v49 = vadd.f32 1.0, %v13046_v7  ;;  %v12501_v30 = vpop.f32.mrf.mxu1 }
 0x3e9   : > { %v13048_v46 = vpop.eup %13047  ;;  %13057 = vpow2.f32 %v11615_v52  ;;  %v11614_v54 = vmul.f32 -1.442695, %v2647_v26  ;;  %v2650_v38 = vadd.f32 %v12501_v30, %v2383_v24 }
 0x3ea   : > { %13059 = vrcp.f32 %v2708_v49  ;;  %v2707_v63 = vadd.f32 1.0, %v13048_v46  ;;  %v2602_v58 = vpop.f32.mrf.mxu1 }
 0x3eb   : > { %13061 = vpow2.f32 %v11614_v54  ;;  %v11617_v59 = vmul.f32 -1.442695, %v2650_v38  ;;  %v2649_v10 = vadd.f32 %v2602_v58, %v2378_v16 }
 0x3ec   : > { %13063 = vrcp.f32 %v2707_v63  ;;  %v12504_v57 = vpop.f32.mrf.mxu1 }
 0x3ed   : > { %13065 = vpow2.f32 %v11617_v59  ;;  %v11616_v29 = vmul.f32 -1.442695, %v2649_v10  ;;  %v2652_v21 = vadd.f32 %v12504_v57, %v2393_v6 }
 0x3ee   : > { %v13050_v12 = vpop.eup %13049  ;;  %v2612_v61 = vpop.f32.mrf.mxu1 }
 0x3ef   : > { %v2710_v31 = vadd.f32 1.0, %v13050_v12  ;;  %13067 = vpow2.f32 %v11616_v29  ;;  %v11619_v23 = vmul.f32 -1.442695, %v2652_v21  ;;  %v2651_v25 = vadd.f32 %v2612_v61, %v2388_v18 }
 0x3f0   : > { %v13052_v0 = vpop.eup %13051  ;;  %v12507_v13 = vpop.f32.mrf.mxu1 }
 0x3f1   : > { %v13054_v9 = vpop.eup %13053  ;;  %13069 = vrcp.f32 %v2710_v31  ;;  %v2709_v33 = vadd.f32 1.0, %v13052_v0  ;;  %v11618_v42 = vmul.f32 -1.442695, %v2651_v25  ;;  %v2654_v17 = vadd.f32 %v12507_v13, %v2403_v3 }
 0x3f2   : > { %13071 = vpow2.f32 %v11619_v23  ;;  %v2622_v4 = vpop.f32.mrf.mxu1  ;;  %v2754_v5 = vmul.f32 2.0, %v13054_v9  ;;  %v13056_v53 = vpop.eup %13055 }
 0x3f3   : > { %13073 = vrcp.f32 %v2709_v33  ;;  %v11621_v15 = vmul.f32 -1.442695, %v2654_v17  ;;  %v2653_v34 = vadd.f32 %v2622_v4, %v2398_v50  ;;  %v2753_v32 = vmul.f32 2.0, %v13056_v53 }
 0x3f4   : > { %13075 = vpow2.f32 %v11618_v42  ;;  %v12510_v11 = vpop.f32.mrf.mxu1  ;;  %v11625_v45 = vadd.f32 -1.0, %v2754_v5 }
 0x3f5   : > { %13077 = vpow2.f32 %v11621_v15  ;;  %v11620_v24 = vmul.f32 -1.442695, %v2653_v34  ;;  %v2656_v1 = vadd.f32 %v12510_v11, %v2413_v27  ;;  %v11624_v16 = vadd.f32 -1.0, %v2753_v32 }
 0x3f6   : > { %v13058_v7 = vpop.eup %13057  ;;  %v2632_v52 = vpop.f32.mrf.mxu1  ;;  %v14931_v26 = vsel %vm14321_vm10, %v11625_v45, %v13054_v9 }
 0x3f7   : > { %v13060_v49 = vpop.eup %13059  ;;  %v2712_v30 = vadd.f32 1.0, %v13058_v7  ;;  %13079 = vpow2.f32 %v11620_v24  ;;  %v11623_v56 = vmul.f32 -1.442695, %v2656_v1  ;;  %v2655_v46 = vadd.f32 %v2632_v52, %v2408_v37  ;;  %2835 = vrot.lane.b32.xlu1 %v14931_v26, %s13840_s14 }
 0x3f8   : > { %v13062_v44 = vpop.eup %13061  ;;  %v14937_v54 = vsel %vm14321_vm10, %v11624_v16, %v13056_v53  ;;  %v2756_v38 = vmul.f32 2.0, %v13060_v49 }
 0x3f9   : > { %v13064_v6 = vpop.eup %13063  ;;  %13081 = vrcp.f32 %v2712_v30  ;;  %v2711_v63 = vadd.f32 1.0, %v13062_v44  ;;  %v11622_v58 = vmul.f32 -1.442695, %v2655_v46  ;;  %2833 = vrot.lane.b32.xlu0 %v14937_v54, %s13840_s14 }
 0x3fa   : > { %v13066_v59 = vpop.eup %13065  ;;  %13083 = vpow2.f32 %v11623_v56  ;;  %v11627_v10 = vadd.f32 -1.0, %v2756_v38  ;;  %v2755_v18 = vmul.f32 2.0, %v13064_v6 }
 0x3fb   : > { %13085 = vrcp.f32 %v2711_v63  ;;  %v2714_v57 = vadd.f32 1.0, %v13066_v59 }
 0x3fc   : > { %v13068_v20 = vpop.eup %13067  ;;  %13087 = vpow2.f32 %v11622_v58  ;;  %v14943_v29 = vsel %vm14321_vm10, %v11627_v10, %v13060_v49  ;;  %v11626_v21 = vadd.f32 -1.0, %v2755_v18 }
 0x3fd   : > { %13089 = vrcp.f32 %v2714_v57  ;;  %v2713_v3 = vadd.f32 1.0, %v13068_v20  ;;  %2839 = vrot.lane.b32.xlu1 %v14943_v29, %s13840_s14 }
 0x3fe   : > { %v13070_v12 = vpop.eup %13069  ;;  %v14949_v61 = vsel %vm14321_vm10, %v11626_v21, %v13064_v6 }
 0x3ff   : > { %v13072_v50 = vpop.eup %13071  ;;  %13091 = vrcp.f32 %v2713_v3  ;;  %2837 = vrot.lane.b32.xlu0 %v14949_v61, %s13840_s14  ;;  %v2758_v31 = vmul.f32 2.0, %v13070_v12 }
 0x400   : > { %v13074_v23 = vpop.eup %13073  ;;  %v2716_v25 = vadd.f32 1.0, %v13072_v50 }
 0x401   : > { %v13076_v0 = vpop.eup %13075  ;;  %v11629_v13 = vadd.f32 -1.0, %v2758_v31  ;;  %v2757_v27 = vmul.f32 2.0, %v13074_v23 }
 0x402   : > { %v13078_v62 = vpop.eup %13077  ;;  %13093 = vrcp.f32 %v2716_v25  ;;  %v2715_v9 = vadd.f32 1.0, %v13076_v0 }
 0x403   : > { %v2718_v33 = vadd.f32 1.0, %v13078_v62  ;;  %v14955_v42 = vsel %vm14321_vm10, %v11629_v13, %v13070_v12  ;;  %v11628_v17 = vadd.f32 -1.0, %v2757_v27 }
 0x404   : > { %v13080_v4 = vpop.eup %13079  ;;  %13095 = vrcp.f32 %v2715_v9  ;;  %2843 = vrot.lane.b32.xlu1 %v14955_v42, %s13840_s14 }
 0x405   : > { %13097 = vrcp.f32 %v2718_v33  ;;  %v2717_v5 = vadd.f32 1.0, %v13080_v4  ;;  %v14961_v53 = vsel %vm14321_vm10, %v11628_v17, %v13074_v23 }
 0x406   : > { %v13082_v15 = vpop.eup %13081  ;;  %2841 = vrot.lane.b32.xlu0 %v14961_v53, %s13840_s14 }
 0x407   : > { %v13084_v34 = vpop.eup %13083  ;;  %13099 = vrcp.f32 %v2717_v5  ;;  %v2760_v37 = vmul.f32 2.0, %v13082_v15 }
 0x408   : > { %v13086_v11 = vpop.eup %13085  ;;  %v2720_v45 = vadd.f32 1.0, %v13084_v34 }
 0x409   : > { %v13088_v32 = vpop.eup %13087  ;;  %v11631_v24 = vadd.f32 -1.0, %v2760_v37  ;;  %v2759_v1 = vmul.f32 2.0, %v13086_v11 }
 0x40a   : > { %v13090_v7 = vpop.eup %13089  ;;  %13101 = vrcp.f32 %v2720_v45  ;;  %v2719_v52 = vadd.f32 1.0, %v13088_v32 }
 0x40b   : > { %v14967_v16 = vsel %vm14321_vm10, %v11631_v24, %v13082_v15  ;;  %v11630_v49 = vadd.f32 -1.0, %v2759_v1  ;;  %v2762_v30 = vmul.f32 2.0, %v13090_v7 }
 0x40c   : > { %v13092_v56 = vpop.eup %13091  ;;  %13103 = vrcp.f32 %v2719_v52  ;;  %2847 = vrot.lane.b32.xlu1 %v14967_v16, %s13840_s14 }
 0x40d   : > { %v14973_v46 = vsel %vm14321_vm10, %v11630_v49, %v13086_v11  ;;  %v11633_v44 = vadd.f32 -1.0, %v2762_v30  ;;  %v2761_v38 = vmul.f32 2.0, %v13092_v56 }
 0x40e   : > { %2845 = vrot.lane.b32.xlu0 %v14973_v46, %s13840_s14 }
 0x40f   : > { %v13094_v6 = vpop.eup %13093  ;;  %v14979_v63 = vsel %vm14321_vm10, %v11633_v44, %v13090_v7  ;;  %v11632_v58 = vadd.f32 -1.0, %v2761_v38 }
 0x410   : > { %2851 = vrot.lane.b32.xlu1 %v14979_v63, %s13840_s14  ;;  %v2764_v59 = vmul.f32 2.0, %v13094_v6 }
 0x411   : > { %v13096_v10 = vpop.eup %13095  ;;  %v14985_v18 = vsel %vm14321_vm10, %v11632_v58, %v13092_v56 }
 0x412   : > { %v13098_v57 = vpop.eup %13097  ;;  %2849 = vrot.lane.b32.xlu0 %v14985_v18, %s13840_s14  ;;  %v11635_v20 = vadd.f32 -1.0, %v2764_v59  ;;  %v2763_v21 = vmul.f32 2.0, %v13096_v10 }
 0x413   : > { %v2766_v3 = vmul.f32 2.0, %v13098_v57 }
 0x414   : > { %v13100_v12 = vpop.eup %13099  ;;  %v14991_v50 = vsel %vm14321_vm10, %v11635_v20, %v13094_v6  ;;  %v11634_v31 = vadd.f32 -1.0, %v2763_v21 }
 0x415   : > { %2855 = vrot.lane.b32.xlu1 %v14991_v50, %s13840_s14  ;;  %v11637_v23 = vadd.f32 -1.0, %v2766_v3  ;;  %v2765_v25 = vmul.f32 2.0, %v13100_v12 }
 0x416   : > { %v14997_v0 = vsel %vm14321_vm10, %v11634_v31, %v13096_v10 }
 0x417   : > { %v13102_v13 = vpop.eup %13101  ;;  %2853 = vrot.lane.b32.xlu0 %v14997_v0, %s13840_s14  ;;  %v15003_v27 = vsel %vm14321_vm10, %v11637_v23, %v13098_v57  ;;  %v11636_v62 = vadd.f32 -1.0, %v2765_v25 }
 0x418   : > { %v2768_v9 = vmul.f32 2.0, %v13102_v13 }
 0x419   : > { %v13104_v33 = vpop.eup %13103  ;;  %2859 = vrot.lane.b32.xlu1 %v15003_v27, %s13840_s14  ;;  %v15009_v17 = vsel %vm14321_vm10, %v11636_v62, %v13100_v12 }
 0x41a   : > { %v11639_v4 = vadd.f32 -1.0, %v2768_v9  ;;  %v2767_v5 = vmul.f32 2.0, %v13104_v33 }
 0x41b   : > { %2857 = vrot.lane.b32.xlu0 %v15009_v17, %s13840_s14 }
 0x41c   : > { %v15015_v15 = vsel %vm14321_vm10, %v11639_v4, %v13102_v13  ;;  %v11638_v34 = vadd.f32 -1.0, %v2767_v5 }
 0x41d   : > { %2863 = vrot.lane.b32.xlu1 %v15015_v15, %s13840_s14 }
 0x41e   : > { %v15021_v37 = vsel %vm14321_vm10, %v11638_v34, %v13104_v33 }
 0x41f   : > { %2861 = vrot.lane.b32.xlu0 %v15021_v37, %s13840_s14 }
 0x469   : > { %v2836_v11 = vpop.permute.xlu1 %2835 }
 0x46a   : > { %v2882_v45 = vmul.f32 %v2836_v11, %v14931_v26 }
 0x46b   : > { %v2834_v32 = vpop.permute.xlu0 %2833 }
 0x46c   : > { %v2881_v24 = vmul.f32 %v2834_v32, %v14937_v54  ;;  %2915 = vrot.lane.b32.xlu1 %v2882_v45, %s13841_s18  ;;  %v2802_v45 = vmul.f32 %v14931_v26, %v14498_v40  ;;  %v2803_v40 = vmul.f32 %v14949_v61, %v14510_v48 }
 0x46e   : > { %2913 = vrot.lane.b32.xlu0 %v2881_v24, %s13841_s18 }
 0x46f   : > { %v2840_v1 = vpop.permute.xlu1 %2839 }
 0x470   : > { %v2884_v7 = vmul.f32 %v2840_v1, %v14943_v29  ;;  %v2801_v1 = vmul.f32 %v14937_v54, %v14503_v43 }
 0x471   : > { %v2838_v52 = vpop.permute.xlu0 %2837 }
 0x472   : > { %v2883_v49 = vmul.f32 %v2838_v52, %v14949_v61  ;;  %2919 = vrot.lane.b32.xlu1 %v2884_v7, %s13841_s18 }
 0x474   : > { %2917 = vrot.lane.b32.xlu0 %v2883_v49, %s13841_s18  ;;  %v2804_v49 = vmul.f32 %v14943_v29, %v14505_v47  ;;  %v2805_v47 = vmul.f32 %v14961_v53, %v14516_v2  ;;  %v2807_v2 = vmul.f32 %v14973_v46, %v14529_v8  ;;  %v2809_v8 = vmul.f32 %v14985_v18, %v14538_v19 }
 0x475   : > { %v2811_v19 = vmul.f32 %v14997_v0, %v14546_v39 }
 0x476   : > { %v2844_v30 = vpop.permute.xlu1 %2843 }
 0x477   : > { %v2886_v56 = vmul.f32 %v2844_v30, %v14955_v42 }
 0x478   : > { %v2842_v44 = vpop.permute.xlu0 %2841 }
 0x479   : > { %v2885_v38 = vmul.f32 %v2842_v44, %v14961_v53  ;;  %2923 = vrot.lane.b32.xlu1 %v2886_v56, %s13841_s18 }
 0x47b   : > { %2921 = vrot.lane.b32.xlu0 %v2885_v38, %s13841_s18  ;;  %v2806_v38 = vmul.f32 %v14955_v42, %v14518_v35  ;;  %v2808_v35 = vmul.f32 %v14967_v16, %v14526_v60 }
 0x47e   : > { %v2848_v6 = vpop.permute.xlu1 %2847 }
 0x47f   : > { %v2888_v58 = vmul.f32 %v2848_v6, %v14967_v16 }
 0x480   : > { %v2846_v59 = vpop.permute.xlu0 %2845 }
 0x481   : > { %v2887_v10 = vmul.f32 %v2846_v59, %v14973_v46  ;;  %2927 = vrot.lane.b32.xlu1 %v2888_v58, %s13841_s18 }
 0x482   : > { %v2852_v57 = vpop.permute.xlu1 %2851 }
 0x483   : > { %v2890_v20 = vmul.f32 %v2852_v57, %v14979_v63  ;;  %2925 = vrot.lane.b32.xlu0 %v2887_v10, %s13841_s18 }
 0x484   : > { %v2850_v21 = vpop.permute.xlu0 %2849 }
 0x485   : > { %v2889_v3 = vmul.f32 %v2850_v21, %v14985_v18  ;;  %2931 = vrot.lane.b32.xlu1 %v2890_v20, %s13841_s18 }
 0x487   : > { %v2856_v12 = vpop.permute.xlu1 %2855  ;;  %2929 = vrot.lane.b32.xlu0 %v2889_v3, %s13841_s18 }
 0x488   : > { %v2892_v31 = vmul.f32 %v2856_v12, %v14991_v50 }
 0x489   : > { %v2854_v23 = vpop.permute.xlu0 %2853 }
 0x48a   : > { %v2891_v25 = vmul.f32 %v2854_v23, %v14997_v0  ;;  %2935 = vrot.lane.b32.xlu1 %v2892_v31, %s13841_s18 }
 0x48b   : > { %v2860_v13 = vpop.permute.xlu1 %2859 }
 0x48c   : > { %v2894_v62 = vmul.f32 %v2860_v13, %v15003_v27  ;;  %2933 = vrot.lane.b32.xlu0 %v2891_v25, %s13841_s18  ;;  %v2810_v25 = vmul.f32 %v14979_v63, %v14535_v14 }
 0x48d   : > { %v2858_v9 = vpop.permute.xlu0 %2857 }
 0x48e   : > { %v2893_v33 = vmul.f32 %v2858_v9, %v15009_v17  ;;  %2939 = vrot.lane.b32.xlu1 %v2894_v62, %s13841_s18 }
 0x48f   : > { %v2864_v4 = vpop.permute.xlu1 %2863 }
 0x490   : > { %v2896_v5 = vmul.f32 %v2864_v4, %v15015_v15  ;;  %2937 = vrot.lane.b32.xlu0 %v2893_v33, %s13841_s18  ;;  %v2812_v4 = vmul.f32 %v14991_v50, %v14543_v22  ;;  %v2814_v22 = vmul.f32 %v15003_v27, %v14554_v41 }
 0x491   : > { %v2862_v34 = vpop.permute.xlu0 %2861 }
 0x492   : > { %v2895_v11 = vmul.f32 %v2862_v34, %v15021_v37  ;;  %2943 = vrot.lane.b32.xlu1 %v2896_v5, %s13841_s18 }
 0x494   : > { %2941 = vrot.lane.b32.xlu0 %v2895_v11, %s13841_s18 }
 0x4de   : > { %v2916_v32 = vpop.permute.xlu1 %2915 }
 0x4df   : > { %v15059_v24 = vadd.f32 %v2916_v32, %v2802_v45 }
 0x4e0   : > { %v2914_v7 = vpop.permute.xlu0 %2913 }
 0x4e1   : > { %13105 = vtanh.f32 %v15059_v24  ;;  %v15064_v52 = vadd.f32 %v2914_v7, %v2801_v1  ;;  %v2813_v7 = vmul.f32 %v15009_v17, %v14558_v28  ;;  %v2815_v28 = vmul.f32 %v15021_v37, %v14567_v51 }
 0x4e3   : > { %13107 = vtanh.f32 %v15064_v52 }
 0x4e4   : > { %v2920_v30 = vpop.permute.xlu1 %2919 }
 0x4e5   : > { %v15069_v56 = vadd.f32 %v2920_v30, %v2804_v49 }
 0x4e6   : > { %v2918_v44 = vpop.permute.xlu0 %2917 }
 0x4e7   : > { %13109 = vtanh.f32 %v15069_v56  ;;  %v15074_v43 = vadd.f32 %v2918_v44, %v2803_v40  ;;  %v2816_v40 = vmul.f32 %v15015_v15, %v14564_v36 }
 0x4e9   : > { %13111 = vtanh.f32 %v15074_v43 }
 0x4eb   : > { %v2924_v6 = vpop.permute.xlu1 %2923 }
 0x4ec   : > { %v15079_v58 = vadd.f32 %v2924_v6, %v2806_v38 }
 0x4ed   : > { %v2922_v59 = vpop.permute.xlu0 %2921 }
 0x4ee   : > { %v13106_v10 = vpop.eup %13105  ;;  %13113 = vtanh.f32 %v15079_v58  ;;  %v15084_v48 = vadd.f32 %v2922_v59, %v2805_v47 }
 0x4ef   : > { %3011 = vrot.lane.b32.xlu1 %v13106_v10, %s13840_s14  ;;  %v3073_v10 = vld [vmem:[%s13931_s19 + $0x2] sm:$0x1] }
 0x4f0   : > { %v13108_v57 = vpop.eup %13107  ;;  %13115 = vtanh.f32 %v15084_v48 }
 0x4f1   : > { %3009 = vrot.lane.b32.xlu0 %v13108_v57, %s13840_s14  ;;  %v3074_v57 = vld [vmem:[%s13931_s19 + $0xa] sm:$0x1] }
 0x4f3   : > { %v2928_v20 = vpop.permute.xlu1 %2927 }
 0x4f4   : > { %v13110_v21 = vpop.eup %13109  ;;  %v15091_v3 = vadd.f32 %v2928_v20, %v2808_v35  ;;  %v3075_v35 = vld [vmem:[%s13931_s19 + $0x12] sm:$0x1]  ;;  %v3076_v20 = vld [vmem:[%s13931_s19 + $0x1a] sm:$0x1] }
 0x4f5   : > { %v2926_v12 = vpop.permute.xlu0 %2925  ;;  %3015 = vrot.lane.b32.xlu1 %v13110_v21, %s13840_s14  ;;  %v3077_v21 = vld [vmem:[%s13931_s19 + $0x22] sm:$0x1] }
 0x4f6   : > { %v13112_v31 = vpop.eup %13111  ;;  %13117 = vtanh.f32 %v15091_v3  ;;  %v15097_v23 = vadd.f32 %v2926_v12, %v2807_v2  ;;  %v3078_v2 = vld [vmem:[%s13931_s19 + $0x2a] sm:$0x1] }
 0x4f7   : > { %v2932_v13 = vpop.permute.xlu1 %2931  ;;  %3013 = vrot.lane.b32.xlu0 %v13112_v31, %s13840_s14  ;;  %v3079_v31 = vld [vmem:[%s13931_s19 + $0x32] sm:$0x1] }
 0x4f8   : > { %13119 = vtanh.f32 %v15097_v23  ;;  %v15103_v60 = vadd.f32 %v2932_v13, %v2810_v25  ;;  %v3329_v25 = vrot.slane %v3074_v57, 7  ;;  %v3331_v13 = vrot.slane %v3075_v35, 6 }
 0x4f9   : > { %v2930_v62 = vpop.permute.xlu0 %2929 }
 0x4fa   : > { %13121 = vtanh.f32 %v15103_v60  ;;  %v15108_v9 = vadd.f32 %v2930_v62, %v2809_v8  ;;  %v3080_v8 = vld [vmem:[%s13931_s19 + $0x3a] sm:$0x1]  ;;  %v3333_v62 = vrot.slane %v3076_v20, 5 }
 0x4fb   : > { %v13114_v33 = vpop.eup %13113 }
 0x4fc   : > { %13123 = vtanh.f32 %v15108_v9  ;;  %v2936_v14 = vpop.permute.xlu1 %2935  ;;  %3019 = vrot.lane.b32.xlu1 %v13114_v33, %s13840_s14  ;;  %v3335_v33 = vrot.slane %v3077_v21, 4 }
 0x4fd   : > { %v13116_v5 = vpop.eup %13115  ;;  %v15114_v34 = vadd.f32 %v2936_v14, %v2812_v4  ;;  %v3337_v4 = vrot.slane %v3078_v2, 3  ;;  %v3339_v14 = vrot.slane %v3079_v31, 2 }
 0x4fe   : > { %v2934_v11 = vpop.permute.xlu0 %2933  ;;  %3017 = vrot.lane.b32.xlu0 %v13116_v5, %s13840_s14 }
 0x4ff   : > { %13125 = vtanh.f32 %v15114_v34  ;;  %v15120_v45 = vadd.f32 %v2934_v11, %v2811_v19  ;;  %v3330_v19 = vsel %vm662_vm0, %v3329_v25, %v3073_v10  ;;  %v3081_v11 = vld [vmem:[%s13931_s19 + $0x42] sm:$0x1]  ;;  %v3088_v10 = vld [vmem:[%s13931_s19 + $0x7a] sm:$0x1] }
 0x500   : > { %v2940_v32 = vpop.permute.xlu1 %2939 }
 0x501   : > { %13127 = vtanh.f32 %v15120_v45  ;;  %v15125_v1 = vadd.f32 %v2940_v32, %v2814_v22  ;;  %v3082_v22 = vld [vmem:[%s13931_s19 + $0x4a] sm:$0x1]  ;;  %v3083_v32 = vld [vmem:[%s13931_s19 + $0x52] sm:$0x1] }
 0x502   : > { %v2938_v49 = vpop.permute.xlu0 %2937 }
 0x503   : > { %v13118_v39 = vpop.eup %13117  ;;  %13129 = vtanh.f32 %v15125_v1  ;;  %v15130_v30 = vadd.f32 %v2938_v49, %v2813_v7  ;;  %v3332_v7 = vsel %vm665_vm1, %v3331_v13, %v3330_v19  ;;  %v3084_v49 = vld [vmem:[%s13931_s19 + $0x5a] sm:$0x1] }
 0x504   : > { %v2944_v44 = vpop.permute.xlu1 %2943  ;;  %3023 = vrot.lane.b32.xlu1 %v13118_v39, %s13840_s14  ;;  %v3085_v39 = vld [vmem:[%s13931_s19 + $0x62] sm:$0x1]  ;;  %v3347_v57 = vrot.slane %v3084_v49, 5 }
 0x505   : > { %v13120_v41 = vpop.eup %13119  ;;  %13131 = vtanh.f32 %v15130_v30  ;;  %v15136_v38 = vadd.f32 %v2944_v44, %v2816_v40  ;;  %v3086_v40 = vld [vmem:[%s13931_s19 + $0x6a] sm:$0x1]  ;;  %v3349_v35 = vrot.slane %v3085_v39, 4  ;;  %v13789_v49 = vld [vmem:[%s18800_s1] sm:$0xff] }
 0x506   : > { %v2942_v6 = vpop.permute.xlu0 %2941  ;;  %3021 = vrot.lane.b32.xlu0 %v13120_v41, %s13840_s14  ;;  %v3334_v41 = vsel %vm668_vm2, %v3333_v62, %v3332_v7  ;;  %v13788_v7 = vld [vmem:[%s18800_s1 + $0x8] sm:$0xff]  ;;  %v3089_v39 = vld [vmem:[%s13931_s19 + $0x82] sm:$0x1] }
 0x507   : > { %v13122_v36 = vpop.eup %13121  ;;  %13133 = vtanh.f32 %v15136_v38  ;;  %v15142_v47 = vadd.f32 %v2942_v6, %v2815_v28  ;;  %v3341_v28 = vrot.slane %v3080_v8, 1  ;;  %v3087_v6 = vld [vmem:[%s13931_s19 + $0x72] sm:$0x1] }
 0x508   : > { %3027 = vrot.lane.b32.xlu1 %v13122_v36, %s13840_s14  ;;  %v3343_v36 = vrot.slane %v3082_v22, 7  ;;  %v3353_v13 = vrot.slane %v3087_v6, 2  ;;  %v13786_v22 = vld [vmem:[%s18800_s1 + $0x18] sm:$0xff]  ;;  %v3094_v6 = vld [vmem:[%s13931_s19 + $0xaa] sm:$0x1] }
 0x509   : > { %v13124_v59 = vpop.eup %13123  ;;  %13135 = vtanh.f32 %v15142_v47 }
 0x50a   : > { %3025 = vrot.lane.b32.xlu0 %v13124_v59, %s13840_s14  ;;  %v3345_v59 = vrot.slane %v3083_v32, 6  ;;  %v3344_v2 = vsel %vm662_vm0, %v3343_v36, %v3081_v11  ;;  %v13787_v32 = vld [vmem:[%s18800_s1 + $0x10] sm:$0xff] }
 0x50b   : > { %v3095_v36 = vld [vmem:[%s13931_s19 + $0xb2] sm:$0x1] }
 0x50c   : > { %v13126_v51 = vpop.eup %13125  ;;  %v3346_v25 = vsel %vm665_vm1, %v3345_v59, %v3344_v2  ;;  %v3096_v59 = vld [vmem:[%s13931_s19 + $0xba] sm:$0x1] }
 0x50d   : > { %3031 = vrot.lane.b32.xlu1 %v13126_v51, %s13840_s14  ;;  %v3336_v51 = vsel %vm671_vm3, %v3335_v33, %v3334_v41  ;;  %v3348_v33 = vsel %vm668_vm2, %v3347_v57, %v3346_v25  ;;  %v3092_v41 = vld [vmem:[%s13931_s19 + $0x9a] sm:$0x1]  ;;  %v3098_v25 = vld [vmem:[%s13931_s19 + $0xca] sm:$0x1] }
 0x50e   : > { %v13128_v12 = vpop.eup %13127  ;;  %v3338_v21 = vsel %vm674_vm4, %v3337_v4, %v3336_v51  ;;  %v3350_v4 = vsel %vm671_vm3, %v3349_v35, %v3348_v33  ;;  %v3361_v57 = vrot.slane %v3092_v41, 5  ;;  %v3100_v33 = vld [vmem:[%s13931_s19 + $0xda] sm:$0x1] }
 0x50f   : > { %3029 = vrot.lane.b32.xlu0 %v13128_v12, %s13840_s14  ;;  %v3351_v12 = vrot.slane %v3086_v40, 3  ;;  %v3340_v31 = vsel %vm677_vm5, %v3339_v14, %v3338_v21  ;;  %v3090_v40 = vld [vmem:[%s13931_s19 + $0x8a] sm:$0x1]  ;;  %v3097_v21 = vld [vmem:[%s13931_s19 + $0xc2] sm:$0x1] }
 0x510   : > { %v13130_v5 = vpop.eup %13129  ;;  %v3342_v62 = vsel %vm680_vm6, %v3341_v28, %v3340_v31  ;;  %v3093_v28 = vld [vmem:[%s13931_s19 + $0xa2] sm:$0x1]  ;;  %v3357_v51 = vrot.slane %v3090_v40, 7  ;;  %v3369_v31 = vrot.slane %v3096_v59, 1  ;;  %v3375_v40 = vrot.slane %v3100_v33, 5 }
 0x511   : > { %3035 = vrot.lane.b32.xlu1 %v13130_v5, %s13840_s14  ;;  %v3355_v5 = vrot.slane %v3088_v10, 1  ;;  %12519 = vmatprep.mubr.msk.f32.mxu0 %vm892_vm7, %v3342_v62  ;;  %v3352_v19 = vsel %vm674_vm4, %v3351_v12, %v3350_v4  ;;  %v3363_v35 = vrot.slane %v3093_v28, 4  ;;  %v3367_v12 = vrot.slane %v3095_v36, 2  ;;  %v3102_v4 = vld [vmem:[%s13931_s19 + $0xea] sm:$0x1] }
 0x512   : > { %v13132_v44 = vpop.eup %13131  ;;  %v3354_v14 = vsel %vm677_vm5, %v3353_v13, %v3352_v19  ;;  %v3358_v2 = vsel %vm662_vm0, %v3357_v51, %v3089_v39  ;;  %v3099_v13 = vld [vmem:[%s13931_s19 + $0xd2] sm:$0x1]  ;;  %v3379_v41 = vrot.slane %v3102_v4, 3  ;;  %v3105_v28 = vld [vmem:[%s13931_s19 + $0x102] sm:$0x1] }
 0x513   : > { %3033 = vrot.lane.b32.xlu0 %v13132_v44, %s13840_s14  ;;  %v3356_v11 = vsel %vm680_vm6, %v3355_v5, %v3354_v14  ;;  %v3091_v44 = vld [vmem:[%s13931_s19 + $0x92] sm:$0x1]  ;;  %v3101_v5 = vld [vmem:[%s13931_s19 + $0xe2] sm:$0x1]  ;;  %v3106_v51 = vld [vmem:[%s13931_s19 + $0x10a] sm:$0x1] }
 0x514   : > { %v13134_v20 = vpop.eup %13133  ;;  %12520 = vmatmul.mubr.msk.f32.vlgmr.msra.gmra.mxu0 %vm892_vm7, %v3356_v11  ;;  %v3359_v10 = vrot.slane %v3091_v44, 6  ;;  %v3103_v11 = vld [vmem:[%s13931_s19 + $0xf2] sm:$0x1]  ;;  %v3377_v44 = vrot.slane %v3101_v5, 4  ;;  %v3112_v33 = vld [vmem:[%s13931_s19 + $0x13a] sm:$0x1] }
 0x515   : > { %3039 = vrot.lane.b32.xlu1 %v13134_v20, %s13840_s14  ;;  %12576 = vmatpush3.msra.mxu0 %v13786_v22  ;;  %v3365_v20 = vrot.slane %v3094_v6, 3  ;;  %v3381_v59 = vrot.slane %v3103_v11, 2  ;;  %v3113_v11 = vld [vmem:[%s13931_s19 + $0x142] sm:$0x1] }
 0x516   : > { %v13136_v8 = vpop.eup %13135  ;;  %12577 = vmatprep.subr.mxu0 %v13787_v32  ;;  %v3360_v62 = vsel %vm665_vm1, %v3359_v10, %v3358_v2  ;;  %v3107_v10 = vld [vmem:[%s13931_s19 + $0x112] sm:$0x1] }
 0x517   : > { %3037 = vrot.lane.b32.xlu0 %v13136_v8, %s13840_s14  ;;  %12578 = vmatpush3.msra.mxu0 %v13787_v32  ;;  %v3362_v14 = vsel %vm668_vm2, %v3361_v57, %v3360_v62  ;;  %v3371_v32 = vrot.slane %v3098_v25, 7  ;;  %v3108_v25 = vld [vmem:[%s13931_s19 + $0x11a] sm:$0x1]  ;;  %v3111_v62 = vld [vmem:[%s13931_s19 + $0x132] sm:$0x1] }
 0x518   : > { %12579 = vmatprep.subr.mxu0 %v13788_v7  ;;  %v3364_v39 = vsel %vm671_vm3, %v3363_v35, %v3362_v14  ;;  %v3389_v14 = vrot.slane %v3108_v25, 5  ;;  %v3120_v25 = vld [vmem:[%s13931_s19 + $0x17a] sm:$0x1] }
 0x519   : > { %12580 = vmatpush3.msra.mxu0 %v13788_v7  ;;  %v3373_v7 = vrot.slane %v3099_v13, 6  ;;  %v3372_v36 = vsel %vm662_vm0, %v3371_v32, %v3097_v21  ;;  %v3385_v13 = vrot.slane %v3106_v51, 7  ;;  %v3110_v21 = vld [vmem:[%s13931_s19 + $0x12a] sm:$0x1]  ;;  %v3117_v51 = vld [vmem:[%s13931_s19 + $0x162] sm:$0x1] }
 0x51a   : > { %12581 = vmatprep.subr.mxu0 %v13789_v49 }
 0x51b   : > { %12582 = vmatpush3.msra.mxu0 %v13789_v49  ;;  %v3374_v35 = vsel %vm665_vm1, %v3373_v7, %v3372_v36  ;;  %v3386_v4 = vsel %vm662_vm0, %v3385_v13, %v3105_v28  ;;  %v3397_v36 = vrot.slane %v3112_v33, 1 }
 0x51c   : > { %12639 = vmatprep.subr.mxu0 %v13786_v22  ;;  %v3104_v22 = vld [vmem:[%s13931_s19 + $0xfa] sm:$0x1] }
 0x51d   : > { %v3383_v2 = vrot.slane %v3104_v22, 1 }
 0x561   : > { %v3012_v8 = vpop.permute.xlu1 %3011 }
 0x562   : > { %v3058_v19 = vmul.f32 %v3012_v8, %v14931_v26  ;;  %v3366_v26 = vsel %vm674_vm4, %v3365_v20, %v3364_v39  ;;  %v3376_v8 = vsel %vm668_vm2, %v3375_v40, %v3374_v35  ;;  %v3115_v39 = vld [vmem:[%s13931_s19 + $0x152] sm:$0x1]  ;;  %v3116_v40 = vld [vmem:[%s13931_s19 + $0x15a] sm:$0x1] }
 0x563   : > { %v3010_v49 = vpop.permute.xlu0 %3009  ;;  %v3368_v57 = vsel %vm677_vm5, %v3367_v12, %v3366_v26  ;;  %v3378_v5 = vsel %vm671_vm3, %v3377_v44, %v3376_v8  ;;  %v3395_v26 = vrot.slane %v3111_v62, 2  ;;  %v3119_v35 = vld [vmem:[%s13931_s19 + $0x172] sm:$0x1]  ;;  %v3401_v13 = vrot.slane %v3115_v39, 6  ;;  %v3121_v8 = vld [vmem:[%s13931_s19 + $0x182] sm:$0x1] }
 0x564   : > { %v3057_v6 = vmul.f32 %v3010_v49, %v14937_v54  ;;  %3748 = vrot.lane.b32.xlu1 %v3058_v19, %s13841_s18  ;;  %v3109_v54 = vld [vmem:[%s13931_s19 + $0x122] sm:$0x1]  ;;  %v3370_v20 = vsel %vm680_vm6, %v3369_v31, %v3368_v57  ;;  %v3387_v19 = vrot.slane %v3107_v10, 6  ;;  %v3114_v31 = vld [vmem:[%s13931_s19 + $0x14a] sm:$0x1]  ;;  %v3380_v32 = vsel %vm674_vm4, %v3379_v41, %v3378_v5 }
 0x565   : > { %12522 = vmatprep.mubr.msk.f32.mxu0 %vm892_vm7, %v3370_v20  ;;  %v3391_v7 = vrot.slane %v3109_v54, 4  ;;  %v3393_v49 = vrot.slane %v3110_v21, 3  ;;  %v3382_v44 = vsel %vm677_vm5, %v3381_v59, %v3380_v32  ;;  %v3118_v10 = vld [vmem:[%s13931_s19 + $0x16a] sm:$0x1]  ;;  %v3399_v59 = vrot.slane %v3114_v31, 7 }
 0x566   : > { %3746 = vrot.lane.b32.xlu0 %v3057_v6, %s13841_s18  ;;  %v3388_v28 = vsel %vm665_vm1, %v3387_v19, %v3386_v4  ;;  %v3384_v41 = vsel %vm680_vm6, %v3383_v2, %v3382_v44  ;;  %v3403_v20 = vrot.slane %v3116_v40, 5  ;;  %v3407_v62 = vrot.slane %v3118_v10, 3  ;;  %v3123_v5 = vld [vmem:[%s13931_s19 + $0x192] sm:$0x1]  ;;  %v3124_v31 = vld [vmem:[%s13931_s19 + $0x19a] sm:$0x1] }
 0x567   : > { %v3016_v12 = vpop.permute.xlu1 %3015  ;;  %v3390_v57 = vsel %vm668_vm2, %v3389_v14, %v3388_v28  ;;  %12523 = vmatmul.mubr.msk.f32.gmra.mxu0 %vm892_vm7, %v3384_v41  ;;  %v3400_v21 = vsel %vm662_vm0, %v3399_v59, %v3113_v11  ;;  %v3409_v33 = vrot.slane %v3119_v35, 2  ;;  %v3411_v14 = vrot.slane %v3120_v25, 1  ;;  %v3126_v39 = vld [vmem:[%s13931_s19 + $0x1aa] sm:$0x1]  ;;  %v3127_v40 = vld [vmem:[%s13931_s19 + $0x1b2] sm:$0x1] }
 0x568   : > { %v3060_v22 = vmul.f32 %v3016_v12, %v14943_v29  ;;  %v3392_v54 = vsel %vm671_vm3, %v3391_v7, %v3390_v57  ;;  %v3122_v12 = vld [vmem:[%s13931_s19 + $0x18a] sm:$0x1]  ;;  %v3402_v19 = vsel %vm665_vm1, %v3401_v13, %v3400_v21  ;;  %v3129_v10 = vld [vmem:[%s13931_s19 + $0x1c2] sm:$0x1]  ;;  %v3417_v57 = vrot.slane %v3124_v31, 5 }
 0x569   : > { %v3014_v6 = vpop.permute.xlu0 %3013  ;;  %v3394_v2 = vsel %vm674_vm4, %v3393_v49, %v3392_v54  ;;  %v3413_v32 = vrot.slane %v3122_v12, 7  ;;  %v3404_v11 = vsel %vm668_vm2, %v3403_v20, %v3402_v19  ;;  %v3421_v25 = vrot.slane %v3126_v39, 3  ;;  %v3134_v12 = vld [vmem:[%s13931_s19 + $0x1ea] sm:$0x1] }
 0x56a   : > { %v3059_v29 = vmul.f32 %v3014_v6, %v14949_v61  ;;  %3752 = vrot.lane.b32.xlu1 %v3060_v22, %s13841_s18  ;;  %v3405_v61 = vrot.slane %v3117_v51, 4  ;;  %v3396_v4 = vsel %vm677_vm5, %v3395_v26, %v3394_v2  ;;  %v3125_v22 = vld [vmem:[%s13931_s19 + $0x1a2] sm:$0x1]  ;;  %v3128_v6 = vld [vmem:[%s13931_s19 + $0x1ba] sm:$0x1]  ;;  %v3415_v51 = vrot.slane %v3123_v5, 6 }
 0x56b   : > { %v3398_v49 = vsel %vm680_vm6, %v3397_v36, %v3396_v4  ;;  %v3414_v26 = vsel %vm662_vm0, %v3413_v32, %v3121_v8  ;;  %v3419_v35 = vrot.slane %v3125_v22, 4  ;;  %v3423_v20 = vrot.slane %v3127_v40, 2  ;;  %v3133_v8 = vld [vmem:[%s13931_s19 + $0x1e2] sm:$0x1]  ;;  %v3135_v5 = vld [vmem:[%s13931_s19 + $0x1f2] sm:$0x1] }
 0x56c   : > { %3750 = vrot.lane.b32.xlu0 %v3059_v29, %s13841_s18  ;;  %12525 = vmatprep.mubr.msk.f32.mxu0 %vm892_vm7, %v3398_v49  ;;  %v3406_v28 = vsel %vm671_vm3, %v3405_v61, %v3404_v11  ;;  %v3130_v29 = vld [vmem:[%s13931_s19 + $0x1ca] sm:$0x1]  ;;  %v3416_v13 = vsel %vm665_vm1, %v3415_v51, %v3414_v26  ;;  %v3132_v61 = vld [vmem:[%s13931_s19 + $0x1da] sm:$0x1]  ;;  %v3437_v49 = vrot.slane %v3135_v5, 2 }
 0x56d   : > { %v3408_v41 = vsel %vm674_vm4, %v3407_v62, %v3406_v28  ;;  %v3418_v21 = vsel %vm668_vm2, %v3417_v57, %v3416_v13  ;;  %v3425_v62 = vrot.slane %v3128_v6, 1  ;;  %v3136_v4 = vld [vmem:[%s13931_s19 + $0x1fa] sm:$0x1]  ;;  %v3431_v31 = vrot.slane %v3132_v61, 5  ;;  %v3137_v11 = vld [vmem:[%s13931_s19 + $0x202] sm:$0x1] }
 0x56e   : > { %v3020_v7 = vpop.permute.xlu1 %3019  ;;  %v3410_v54 = vsel %vm677_vm5, %v3409_v33, %v3408_v41  ;;  %v3420_v33 = vsel %vm671_vm3, %v3419_v35, %v3418_v21  ;;  %v3138_v39 = vld [vmem:[%s13931_s19 + $0x20a] sm:$0x1]  ;;  %v3139_v28 = vld [vmem:[%s13931_s19 + $0x212] sm:$0x1]  ;;  %v3140_v26 = vld [vmem:[%s13931_s19 + $0x21a] sm:$0x1] }
 0x56f   : > { %v3062_v44 = vmul.f32 %v3020_v7, %v14955_v42  ;;  %v3131_v42 = vld [vmem:[%s13931_s19 + $0x1d2] sm:$0x1]  ;;  %v3412_v2 = vsel %vm680_vm6, %v3411_v14, %v3410_v54  ;;  %v3433_v14 = vrot.slane %v3133_v8, 4  ;;  %v3422_v22 = vsel %vm674_vm4, %v3421_v25, %v3420_v33  ;;  %v3141_v41 = vld [vmem:[%s13931_s19 + $0x222] sm:$0x1] }
 0x570   : > { %v3018_v36 = vpop.permute.xlu0 %3017  ;;  %12526 = vmatmul.mubr.msk.f32.gmra.mxu0 %vm892_vm7, %v3412_v2  ;;  %v3429_v19 = vrot.slane %v3131_v42, 6  ;;  %v3435_v7 = vrot.slane %v3134_v12, 3  ;;  %v3424_v40 = vsel %vm677_vm5, %v3423_v20, %v3422_v22  ;;  %v3441_v51 = vrot.slane %v3138_v39, 7  ;;  %v3142_v57 = vld [vmem:[%s13931_s19 + $0x22a] sm:$0x1] }
 0x571   : > { %v3061_v59 = vmul.f32 %v3018_v36, %v14961_v53  ;;  %3756 = vrot.lane.b32.xlu1 %v3062_v44, %s13841_s18  ;;  %v3427_v53 = vrot.slane %v3130_v29, 7  ;;  %v3439_v44 = vrot.slane %v3136_v4, 1  ;;  %v3426_v36 = vsel %vm680_vm6, %v3425_v62, %v3424_v40  ;;  %v3143_v35 = vld [vmem:[%s13931_s19 + $0x232] sm:$0x1]  ;;  %v3145_v20 = vld [vmem:[%s13931_s19 + $0x242] sm:$0x1] }
 0x572   : > { %12528 = vmatprep.mubr.msk.f32.mxu0 %vm892_vm7, %v3426_v36  ;;  %v3442_v54 = vsel %vm662_vm0, %v3441_v51, %v3137_v11  ;;  %v3443_v13 = vrot.slane %v3139_v28, 6  ;;  %v3445_v2 = vrot.slane %v3140_v26, 5  ;;  %v3447_v21 = vrot.slane %v3141_v41, 4  ;;  %v3147_v4 = vld [vmem:[%s13931_s19 + $0x252] sm:$0x1] }
 0x573   : > { %3754 = vrot.lane.b32.xlu0 %v3061_v59, %s13841_s18  ;;  %v3428_v32 = vsel %vm662_vm0, %v3427_v53, %v3129_v10  ;;  %v3144_v59 = vld [vmem:[%s13931_s19 + $0x23a] sm:$0x1]  ;;  %v3449_v62 = vrot.slane %v3142_v57, 3  ;;  %v3451_v33 = vrot.slane %v3143_v35, 2  ;;  %v3151_v40 = vld [vmem:[%s13931_s19 + $0x272] sm:$0x1] }
 0x574   : > { %v3430_v6 = vsel %vm665_vm1, %v3429_v19, %v3428_v32  ;;  %v3444_v53 = vsel %vm665_vm1, %v3443_v13, %v3442_v54  ;;  %v3148_v19 = vld [vmem:[%s13931_s19 + $0x25a] sm:$0x1]  ;;  %v3453_v32 = vrot.slane %v3144_v59, 1  ;;  %v3154_v41 = vld [vmem:[%s13931_s19 + $0x28a] sm:$0x1] }
 0x575   : > { %v3432_v10 = vsel %vm668_vm2, %v3431_v31, %v3430_v6  ;;  %v3446_v22 = vsel %vm668_vm2, %v3445_v2, %v3444_v53  ;;  %v3152_v6 = vld [vmem:[%s13931_s19 + $0x27a] sm:$0x1]  ;;  %v3459_v28 = vrot.slane %v3148_v19, 5  ;;  %v3155_v59 = vld [vmem:[%s13931_s19 + $0x292] sm:$0x1]  ;;  %v3469_v2 = vrot.slane %v3154_v41, 7 }
 0x576   : > { %v3024_v29 = vpop.permute.xlu1 %3023  ;;  %v3434_v42 = vsel %vm671_vm3, %v3433_v14, %v3432_v10  ;;  %v3448_v39 = vsel %vm671_vm3, %v3447_v21, %v3446_v22  ;;  %v3153_v10 = vld [vmem:[%s13931_s19 + $0x282] sm:$0x1]  ;;  %v3156_v54 = vld [vmem:[%s13931_s19 + $0x29a] sm:$0x1]  ;;  %v3162_v22 = vld [vmem:[%s13931_s19 + $0x2ca] sm:$0x1] }
 0x577   : > { %v3064_v25 = vmul.f32 %v3024_v29, %v14967_v16  ;;  %v3436_v8 = vsel %vm674_vm4, %v3435_v7, %v3434_v42  ;;  %v3146_v16 = vld [vmem:[%s13931_s19 + $0x24a] sm:$0x1]  ;;  %v3149_v7 = vld [vmem:[%s13931_s19 + $0x262] sm:$0x1]  ;;  %v3450_v51 = vsel %vm674_vm4, %v3449_v62, %v3448_v39  ;;  %v3465_v42 = vrot.slane %v3151_v40, 2 }
 0x578   : > { %v3022_v61 = vpop.permute.xlu0 %3021  ;;  %v3438_v5 = vsel %vm677_vm5, %v3437_v49, %v3436_v8  ;;  %v3455_v11 = vrot.slane %v3146_v16, 7  ;;  %v3452_v35 = vsel %vm677_vm5, %v3451_v33, %v3450_v51  ;;  %v3157_v8 = vld [vmem:[%s13931_s19 + $0x2a2] sm:$0x1]  ;;  %v3159_v16 = vld [vmem:[%s13931_s19 + $0x2b2] sm:$0x1]  ;;  %v3473_v53 = vrot.slane %v3156_v54, 5 }
 0x579   : > { %v3063_v12 = vmul.f32 %v3022_v61, %v14973_v46  ;;  %3760 = vrot.lane.b32.xlu1 %v3064_v25, %s13841_s18  ;;  %v3440_v14 = vsel %vm680_vm6, %v3439_v44, %v3438_v5  ;;  %v3150_v46 = vld [vmem:[%s13931_s19 + $0x26a] sm:$0x1]  ;;  %v3457_v44 = vrot.slane %v3147_v4, 6  ;;  %v3454_v13 = vsel %vm680_vm6, %v3453_v32, %v3452_v35  ;;  %v3163_v39 = vld [vmem:[%s13931_s19 + $0x2d2] sm:$0x1] }
 0x57a   : > { %v3028_v31 = vpop.permute.xlu1 %3027  ;;  %12529 = vmatmul.mubr.msk.f32.gmra.mxu0 %vm892_vm7, %v3440_v14  ;;  %v3456_v29 = vsel %vm662_vm0, %v3455_v11, %v3145_v20  ;;  %v3463_v36 = vrot.slane %v3150_v46, 3  ;;  %v3467_v61 = vrot.slane %v3152_v6, 1  ;;  %v3471_v5 = vrot.slane %v3155_v59, 6  ;;  %v3161_v14 = vld [vmem:[%s13931_s19 + $0x2c2] sm:$0x1] }
 0x57b   : > { %v3066_v49 = vmul.f32 %v3028_v31, %v14979_v63  ;;  %3758 = vrot.lane.b32.xlu0 %v3063_v12, %s13841_s18  ;;  %v3461_v63 = vrot.slane %v3149_v7, 4  ;;  %v3458_v25 = vsel %vm665_vm1, %v3457_v44, %v3456_v29  ;;  %12531 = vmatprep.mubr.msk.f32.mxu0 %vm892_vm7, %v3454_v13  ;;  %v3160_v12 = vld [vmem:[%s13931_s19 + $0x2ba] sm:$0x1]  ;;  %v3470_v19 = vsel %vm662_vm0, %v3469_v2, %v3153_v10  ;;  %v3166_v51 = vld [vmem:[%s13931_s19 + $0x2ea] sm:$0x1] }
 0x57c   : > { %v3026_v26 = vpop.permute.xlu0 %3025  ;;  %v3460_v20 = vsel %vm668_vm2, %v3459_v28, %v3458_v25  ;;  %v3475_v31 = vrot.slane %v3157_v8, 4  ;;  %v3472_v46 = vsel %vm665_vm1, %v3471_v5, %v3470_v19  ;;  %v3481_v28 = vrot.slane %v3160_v12, 1  ;;  %v3168_v10 = vld [vmem:[%s13931_s19 + $0x2fa] sm:$0x1]  ;;  %v3169_v59 = vld [vmem:[%s13931_s19 + $0x302] sm:$0x1] }
 0x57d   : > { %v3065_v57 = vmul.f32 %v3026_v26, %v14985_v18  ;;  %3764 = vrot.lane.b32.xlu1 %v3066_v49, %s13841_s18  ;;  %v3158_v18 = vld [vmem:[%s13931_s19 + $0x2aa] sm:$0x1]  ;;  %v3462_v62 = vsel %vm671_vm3, %v3461_v63, %v3460_v20  ;;  %v3479_v49 = vrot.slane %v3159_v16, 2  ;;  %v3474_v44 = vsel %vm668_vm2, %v3473_v53, %v3472_v46  ;;  %v3165_v26 = vld [vmem:[%s13931_s19 + $0x2e2] sm:$0x1] }
 0x57e   : > { %v3464_v4 = vsel %vm674_vm4, %v3463_v36, %v3462_v62  ;;  %v3477_v11 = vrot.slane %v3158_v18, 3  ;;  %v3476_v63 = vsel %vm671_vm3, %v3475_v31, %v3474_v44  ;;  %v3167_v36 = vld [vmem:[%s13931_s19 + $0x2f2] sm:$0x1]  ;;  %v3485_v41 = vrot.slane %v3163_v39, 6  ;;  %v3170_v54 = vld [vmem:[%s13931_s19 + $0x30a] sm:$0x1] }
 0x57f   : > { %v3032_v21 = vpop.permute.xlu1 %3031  ;;  %3762 = vrot.lane.b32.xlu0 %v3065_v57, %s13841_s18  ;;  %v3466_v7 = vsel %vm677_vm5, %v3465_v42, %v3464_v4  ;;  %v3489_v42 = vrot.slane %v3165_v26, 4  ;;  %v3491_v8 = vrot.slane %v3166_v51, 3  ;;  %v3493_v18 = vrot.slane %v3167_v36, 2  ;;  %v3172_v2 = vld [vmem:[%s13931_s19 + $0x31a] sm:$0x1] }
 0x580   : > { %v3068_v33 = vmul.f32 %v3032_v21, %v14991_v50  ;;  %v3164_v50 = vld [vmem:[%s13931_s19 + $0x2da] sm:$0x1]  ;;  %v3468_v6 = vsel %vm680_vm6, %v3467_v61, %v3466_v7  ;;  %v3478_v35 = vsel %vm674_vm4, %v3477_v11, %v3476_v63  ;;  %v3495_v12 = vrot.slane %v3168_v10, 1  ;;  %v3173_v5 = vld [vmem:[%s13931_s19 + $0x322] sm:$0x1] }
 0x581   : > { %v3030_v32 = vpop.permute.xlu0 %3029  ;;  %12532 = vmatmul.mubr.msk.f32.gmra.mxu0 %vm892_vm7, %v3468_v6  ;;  %v3487_v25 = vrot.slane %v3164_v50, 5  ;;  %v3480_v20 = vsel %vm677_vm5, %v3479_v49, %v3478_v35  ;;  %v3174_v53 = vld [vmem:[%s13931_s19 + $0x32a] sm:$0x1]  ;;  %v3175_v19 = vld [vmem:[%s13931_s19 + $0x332] sm:$0x1]  ;;  %v3501_v7 = vrot.slane %v3172_v2, 5 }
 0x582   : > { %v3067_v40 = vmul.f32 %v3030_v32, %v14997_v0  ;;  %3768 = vrot.lane.b32.xlu1 %v3068_v33, %s13841_s18  ;;  %v3483_v0 = vrot.slane %v3162_v22, 7  ;;  %v3482_v62 = vsel %vm680_vm6, %v3481_v28, %v3480_v20  ;;  %v3176_v31 = vld [vmem:[%s13931_s19 + $0x33a] sm:$0x1]  ;;  %v3503_v46 = vrot.slane %v3173_v5, 4  ;;  %v3177_v11 = vld [vmem:[%s13931_s19 + $0x342] sm:$0x1] }
 0x583   : > { %v3036_v29 = vpop.permute.xlu1 %3035  ;;  %12534 = vmatprep.mubr.msk.f32.mxu0 %vm892_vm7, %v3482_v62  ;;  %v3178_v49 = vld [vmem:[%s13931_s19 + $0x34a] sm:$0x1]  ;;  %v3505_v6 = vrot.slane %v3174_v53, 3  ;;  %v3507_v44 = vrot.slane %v3175_v19, 2  ;;  %v3180_v28 = vld [vmem:[%s13931_s19 + $0x35a] sm:$0x1] }
 0x584   : > { %v3070_v57 = vmul.f32 %v3036_v29, %v15003_v27  ;;  %3766 = vrot.lane.b32.xlu0 %v3067_v40, %s13841_s18  ;;  %v3484_v61 = vsel %vm662_vm0, %v3483_v0, %v3161_v14  ;;  %v3171_v27 = vld [vmem:[%s13931_s19 + $0x312] sm:$0x1]  ;;  %v3509_v63 = vrot.slane %v3176_v31, 1  ;;  %v3181_v36 = vld [vmem:[%s13931_s19 + $0x362] sm:$0x1] }
 0x585   : > { %v3034_v13 = vpop.permute.xlu0 %3033  ;;  %v3486_v16 = vsel %vm665_vm1, %v3485_v41, %v3484_v61  ;;  %v3499_v14 = vrot.slane %v3171_v27, 6  ;;  %v3182_v10 = vld [vmem:[%s13931_s19 + $0x36a] sm:$0x1]  ;;  %v3184_v35 = vld [vmem:[%s13931_s19 + $0x37a] sm:$0x1] }
 0x586   : > { %v3069_v21 = vmul.f32 %v3034_v13, %v15009_v17  ;;  %3772 = vrot.lane.b32.xlu1 %v3070_v57, %s13841_s18  ;;  %v3488_v4 = vsel %vm668_vm2, %v3487_v25, %v3486_v16  ;;  %v3497_v17 = vrot.slane %v3170_v54, 7  ;;  %v3183_v57 = vld [vmem:[%s13931_s19 + $0x372] sm:$0x1]  ;;  %v3511_v25 = vrot.slane %v3178_v49, 7  ;;  %v3185_v20 = vld [vmem:[%s13931_s19 + $0x382] sm:$0x1] }
 0x587   : > { %v3040_v33 = vpop.permute.xlu1 %3039  ;;  %v3490_v32 = vsel %vm671_vm3, %v3489_v42, %v3488_v4  ;;  %v3517_v54 = vrot.slane %v3181_v36, 4  ;;  %v3519_v13 = vrot.slane %v3182_v10, 3  ;;  %v3523_v27 = vrot.slane %v3184_v35, 1  ;;  %v3186_v2 = vld [vmem:[%s13931_s19 + $0x38a] sm:$0x1] }
 0x588   : > { %v3072_v22 = vmul.f32 %v3040_v33, %v15015_v15  ;;  %3770 = vrot.lane.b32.xlu0 %v3069_v21, %s13841_s18  ;;  %v3492_v50 = vsel %vm674_vm4, %v3491_v8, %v3490_v32  ;;  %v3498_v40 = vsel %vm662_vm0, %v3497_v17, %v3169_v59  ;;  %v3179_v15 = vld [vmem:[%s13931_s19 + $0x352] sm:$0x1]  ;;  %v3515_v59 = vrot.slane %v3180_v28, 5  ;;  %v3189_v5 = vld [vmem:[%s13931_s19 + $0x3a2] sm:$0x1] }
 0x589   : > { %v3038_v39 = vpop.permute.xlu0 %3037  ;;  %v3494_v51 = vsel %vm677_vm5, %v3493_v18, %v3492_v50  ;;  %v3500_v29 = vsel %vm665_vm1, %v3499_v14, %v3498_v40  ;;  %v3512_v8 = vsel %vm662_vm0, %v3511_v25, %v3177_v11  ;;  %v3521_v18 = vrot.slane %v3183_v57, 2  ;;  %v3187_v21 = vld [vmem:[%s13931_s19 + $0x392] sm:$0x1]  ;;  %v3190_v53 = vld [vmem:[%s13931_s19 + $0x3aa] sm:$0x1] }
 0x58a   : > { %v3071_v26 = vmul.f32 %v3038_v39, %v15021_v37  ;;  %3776 = vrot.lane.b32.xlu1 %v3072_v22, %s13841_s18  ;;  %v3496_v0 = vsel %vm680_vm6, %v3495_v12, %v3494_v51  ;;  %v3502_v41 = vsel %vm668_vm2, %v3501_v7, %v3500_v29  ;;  %v3513_v37 = vrot.slane %v3179_v15, 6  ;;  %v3188_v12 = vld [vmem:[%s13931_s19 + $0x39a] sm:$0x1]  ;;  %v3191_v19 = vld [vmem:[%s13931_s19 + $0x3b2] sm:$0x1] }
 0x58b   : > { %12535 = vmatmul.mubr.msk.f32.gmra.mxu0 %vm892_vm7, %v3496_v0  ;;  %v3504_v42 = vsel %vm671_vm3, %v3503_v46, %v3502_v41  ;;  %v3192_v31 = vld [vmem:[%s13931_s19 + $0x3ba] sm:$0x1]  ;;  %v3525_v17 = vrot.slane %v3186_v2, 7  ;;  %v3527_v14 = vrot.slane %v3187_v21, 6  ;;  %v3529_v32 = vrot.slane %v3188_v12, 5 }
 0x58c   : > { %3774 = vrot.lane.b32.xlu0 %v3071_v26, %s13841_s18  ;;  %v3506_v61 = vsel %vm674_vm4, %v3505_v6, %v3504_v42  ;;  %v3514_v16 = vsel %vm665_vm1, %v3513_v37, %v3512_v8  ;;  %v3531_v7 = vrot.slane %v3189_v5, 4  ;;  %v3533_v46 = vrot.slane %v3190_v53, 3  ;;  %v3193_v11 = vld [vmem:[%s13931_s19 + $0x3c2] sm:$0x1]  ;;  %v3194_v6 = vld [vmem:[%s13931_s19 + $0x3ca] sm:$0x1] }
 0x58d   : > { %v3508_v62 = vsel %vm677_vm5, %v3507_v44, %v3506_v61  ;;  %v3516_v4 = vsel %vm668_vm2, %v3515_v59, %v3514_v16  ;;  %v3526_v39 = vsel %vm662_vm0, %v3525_v17, %v3185_v20  ;;  %v3535_v50 = vrot.slane %v3191_v19, 2  ;;  %v3195_v44 = vld [vmem:[%s13931_s19 + $0x3d2] sm:$0x1]  ;;  %v3196_v26 = vld [vmem:[%s13931_s19 + $0x3da] sm:$0x1]  ;;  %v13792_v19 = vld [vmem:[%s18801_s2 + $0x8] sm:$0xff] }
 0x58e   : > { %v3510_v33 = vsel %vm680_vm6, %v3509_v63, %v3508_v62  ;;  %v3518_v22 = vsel %vm671_vm3, %v3517_v54, %v3516_v4  ;;  %v3537_v40 = vrot.slane %v3192_v31, 1  ;;  %v3528_v28 = vsel %vm665_vm1, %v3527_v14, %v3526_v39  ;;  %v3197_v51 = vld [vmem:[%s13931_s19 + $0x3e2] sm:$0x1]  ;;  %v3198_v29 = vld [vmem:[%s13931_s19 + $0x3ea] sm:$0x1]  ;;  %v13790_v53 = vld [vmem:[%s18801_s2 + $0x18] sm:$0xff] }
 0x58f   : > { %12537 = vmatprep.mubr.msk.f32.mxu0 %vm892_vm7, %v3510_v33  ;;  %v3520_v49 = vsel %vm674_vm4, %v3519_v13, %v3518_v22  ;;  %v3530_v36 = vsel %vm668_vm2, %v3529_v32, %v3528_v28  ;;  %v3199_v10 = vld [vmem:[%s13931_s19 + $0x3f2] sm:$0x1]  ;;  %v3539_v0 = vrot.slane %v3194_v6, 7  ;;  %v3541_v41 = vrot.slane %v3195_v44, 6  ;;  %v3200_v35 = vld [vmem:[%s13931_s19 + $0x3fa] sm:$0x1] }
 0x590   : > { %v3522_v15 = vsel %vm677_vm5, %v3521_v18, %v3520_v49  ;;  %v3532_v57 = vsel %vm671_vm3, %v3531_v7, %v3530_v36  ;;  %v3543_v25 = vrot.slane %v3196_v26, 5  ;;  %v3545_v37 = vrot.slane %v3197_v51, 4  ;;  %v13791_v33 = vld [vmem:[%s18801_s2 + $0x10] sm:$0xff]  ;;  %v13793_v17 = vld [vmem:[%s18801_s2] sm:$0xff] }
 0x591   : > { %v3524_v63 = vsel %vm680_vm6, %v3523_v27, %v3522_v15  ;;  %v3534_v42 = vsel %vm674_vm4, %v3533_v46, %v3532_v57  ;;  %v3540_v59 = vsel %vm662_vm0, %v3539_v0, %v3193_v11  ;;  %v3547_v54 = vrot.slane %v3198_v29, 3  ;;  %v15484_v36 = vld [vmem:[%s18802_s3] ss:$0 sm:$0xff] }
 0x592   : > { %12538 = vmatmul.mubr.msk.f32.gmra.mxu0 %vm892_vm7, %v3524_v63  ;;  %v3536_v13 = vsel %vm677_vm5, %v3535_v50, %v3534_v42  ;;  %v3542_v20 = vsel %vm665_vm1, %v3541_v41, %v3540_v59  ;;  %v3549_v61 = vrot.slane %v3199_v10, 2  ;;  %v3551_v27 = vrot.slane %v3200_v35, 1 }
 0x593   : > { %v3538_v8 = vsel %vm680_vm6, %v3537_v40, %v3536_v13  ;;  %v3544_v18 = vsel %vm668_vm2, %v3543_v25, %v3542_v20 }
 0x594   : > { %12540 = vmatprep.mubr.msk.f32.mxu0 %vm892_vm7, %v3538_v8  ;;  %v3546_v2 = vsel %vm671_vm3, %v3545_v37, %v3544_v18 }
 0x595   : > { %v3548_v21 = vsel %vm674_vm4, %v3547_v54, %v3546_v2 }
 0x596   : > { %v3550_v62 = vsel %vm677_vm5, %v3549_v61, %v3548_v21 }
 0x597   : > { %v3552_v16 = vsel %vm680_vm6, %v3551_v27, %v3550_v62 }
 0x598   : > { %12541 = vmatmul.mubr.msk.f32.gmra.mxu0 %vm892_vm7, %v3552_v16 }
 0x5d4   : > { %v12521_v15 = vpop.f32.mrf.mxu0 }
 0x5d5   : > { %v3657_v10 = vadd.f32 %v15484_v36, %v12521_v15 }
 0x5d6   : > { %v3749_v5 = vpop.permute.xlu1 %3748  ;;  %v3651_v28 = vpop.f32.mrf.mxu0 }
 0x5d7   : > { %v3652_v57 = vadd.f32 %v15484_v36, %v3651_v28 }
 0x5d8   : > { %v3747_v12 = vpop.permute.xlu0 %3746 }
 0x5d9   : > { %12551 = vmatprep.mubr.msk.f32.mxu1 %vm892_vm7, %v3747_v12 }
 0x5da   : > { %12552 = vmatmul.mubr.msk.f32.vlgmr.msra.gmra.mxu1 %vm892_vm7, %v3749_v5 }
 0x5db   : > { %12608 = vmatpush3.msra.mxu1 %v13790_v53 }
 0x5dc   : > { %12609 = vmatprep.subr.mxu1 %v13791_v33  ;;  %v3753_v31 = vpop.permute.xlu1 %3752 }
 0x5dd   : > { %12610 = vmatpush3.msra.mxu1 %v13791_v33 }
 0x5de   : > { %v3751_v4 = vpop.permute.xlu0 %3750  ;;  %12611 = vmatprep.subr.mxu1 %v13792_v19 }
 0x5df   : > { %12554 = vmatprep.mubr.msk.f32.mxu1 %vm892_vm7, %v3751_v4  ;;  %12612 = vmatpush3.msra.mxu1 %v13792_v19 }
 0x5e0   : > { %12555 = vmatmul.mubr.msk.f32.gmra.mxu1 %vm892_vm7, %v3753_v31  ;;  %12613 = vmatprep.subr.mxu1 %v13793_v17 }
 0x5e1   : > { %12614 = vmatpush3.msra.mxu1 %v13793_v17 }
 0x5e2   : > { %12671 = vmatprep.subr.mxu1 %v13790_v53 }
 0x5e3   : > { %v3757_v14 = vpop.permute.xlu1 %3756 }
 0x5e5   : > { %v3755_v22 = vpop.permute.xlu0 %3754 }
 0x5e6   : > { %12557 = vmatprep.mubr.msk.f32.mxu1 %vm892_vm7, %v3755_v22 }
 0x5e7   : > { %12558 = vmatmul.mubr.msk.f32.gmra.mxu1 %vm892_vm7, %v3757_v14 }
 0x5eb   : > { %v3761_v32 = vpop.permute.xlu1 %3760 }
 0x5ed   : > { %v3759_v7 = vpop.permute.xlu0 %3758 }
 0x5ee   : > { %12560 = vmatprep.mubr.msk.f32.mxu1 %vm892_vm7, %v3759_v7 }
 0x5ef   : > { %v3765_v46 = vpop.permute.xlu1 %3764  ;;  %12561 = vmatmul.mubr.msk.f32.gmra.mxu1 %vm892_vm7, %v3761_v32 }
 0x5f1   : > { %v3763_v11 = vpop.permute.xlu0 %3762 }
 0x5f2   : > { %12563 = vmatprep.mubr.msk.f32.mxu1 %vm892_vm7, %v3763_v11 }
 0x5f3   : > { %12564 = vmatmul.mubr.msk.f32.gmra.mxu1 %vm892_vm7, %v3765_v46 }
 0x5f4   : > { %v3769_v49 = vpop.permute.xlu1 %3768 }
 0x5f6   : > { %v3767_v39 = vpop.permute.xlu0 %3766 }
 0x5f7   : > { %12566 = vmatprep.mubr.msk.f32.mxu1 %vm892_vm7, %v3767_v39 }
 0x5f8   : > { %12567 = vmatmul.mubr.msk.f32.gmra.mxu1 %vm892_vm7, %v3769_v49  ;;  %v3773_v50 = vpop.permute.xlu1 %3772 }
 0x5fa   : > { %v3771_v40 = vpop.permute.xlu0 %3770 }
 0x5fb   : > { %12569 = vmatprep.mubr.msk.f32.mxu1 %vm892_vm7, %v3771_v40 }
 0x5fc   : > { %12570 = vmatmul.mubr.msk.f32.gmra.mxu1 %vm892_vm7, %v3773_v50  ;;  %v3777_v44 = vpop.permute.xlu1 %3776 }
 0x5fe   : > { %v3775_v6 = vpop.permute.xlu0 %3774 }
 0x5ff   : > { %12572 = vmatprep.mubr.msk.f32.mxu1 %vm892_vm7, %v3775_v6 }
 0x600   : > { %12573 = vmatmul.mubr.msk.f32.gmra.mxu1 %vm892_vm7, %v3777_v44 }
 0x627   : > { %v12524_v26 = vpop.f32.mrf.mxu0 }
 0x628   : > { %v3667_v59 = vadd.f32 %v15484_v36, %v12524_v26 }
 0x629   : > { %v3661_v51 = vpop.f32.mrf.mxu0 }
 0x62a   : > { %v3662_v20 = vadd.f32 %v15484_v36, %v3661_v51 }
 0x630   : > { %v12527_v29 = vpop.f32.mrf.mxu0 }
 0x631   : > { %v3677_v16 = vadd.f32 %v15484_v36, %v12527_v29 }
 0x632   : > { %v3671_v63 = vpop.f32.mrf.mxu0 }
 0x633   : > { %v3672_v5 = vadd.f32 %v15484_v36, %v3671_v63 }
 0x63a   : > { %v12530_v0 = vpop.f32.mrf.mxu0 }
 0x63b   : > { %v3687_v32 = vadd.f32 %v15484_v36, %v12530_v0 }
 0x63c   : > { %v3681_v25 = vpop.f32.mrf.mxu0 }
 0x63d   : > { %v3682_v49 = vadd.f32 %v15484_v36, %v3681_v25 }
 0x641   : > { %v12533_v61 = vpop.f32.mrf.mxu0 }
 0x642   : > { %v3697_v44 = vadd.f32 %v15484_v36, %v12533_v61 }
 0x643   : > { %v3691_v62 = vpop.f32.mrf.mxu0 }
 0x644   : > { %v3692_v29 = vadd.f32 %v15484_v36, %v3691_v62 }
 0x64b   : > { %v12536_v33 = vpop.f32.mrf.mxu0 }
 0x64d   : > { %v3701_v14 = vpop.f32.mrf.mxu0 }
 0x652   : > { %v12539_v40 = vpop.f32.mrf.mxu0 }
 0x654   : > { %v3711_v0 = vpop.f32.mrf.mxu0 }
 0x69a   : > { %v12553_v41 = vpop.f32.mrf.mxu1 }
 0x69b   : > { %v3956_v35 = vadd.f32 %v12553_v41, %v3657_v10 }
 0x69c   : > { %v3876_v37 = vpop.f32.mrf.mxu1 }
 0x69d   : > { %v11673_v42 = vmul.f32 -1.442695, %v3956_v35  ;;  %v3955_v54 = vadd.f32 %v3876_v37, %v3652_v57  ;;  %v3707_v37 = vadd.f32 %v15484_v36, %v12536_v33 }
 0x69f   : > { %13137 = vpow2.f32 %v11673_v42  ;;  %v11672_v13 = vmul.f32 -1.442695, %v3955_v54 }
 0x6a0   : > { %v12556_v8 = vpop.f32.mrf.mxu1 }
 0x6a1   : > { %13139 = vpow2.f32 %v11672_v13  ;;  %v3958_v18 = vadd.f32 %v12556_v8, %v3667_v59  ;;  %v3702_v13 = vadd.f32 %v15484_v36, %v3701_v14 }
 0x6a2   : > { %v3886_v27 = vpop.f32.mrf.mxu1 }
 0x6a3   : > { %v11675_v2 = vmul.f32 -1.442695, %v3958_v18  ;;  %v3957_v21 = vadd.f32 %v3886_v27, %v3662_v20  ;;  %v12542_v20 = vpop.f32.mrf.mxu0 }
 0x6a5   : > { %13141 = vpow2.f32 %v11675_v2  ;;  %v11674_v12 = vmul.f32 -1.442695, %v3957_v21  ;;  %v3717_v2 = vadd.f32 %v15484_v36, %v12539_v40  ;;  %v3721_v33 = vpop.f32.mrf.mxu0 }
 0x6a7   : > { %13143 = vpow2.f32 %v11674_v12  ;;  %v12559_v53 = vpop.f32.mrf.mxu1 }
 0x6a8   : > { %v3960_v4 = vadd.f32 %v12559_v53, %v3677_v16  ;;  %v3712_v53 = vadd.f32 %v15484_v36, %v3711_v0 }
 0x6a9   : > { %v3896_v19 = vpop.f32.mrf.mxu1 }
 0x6aa   : > { %v11677_v31 = vmul.f32 -1.442695, %v3960_v4  ;;  %v3959_v17 = vadd.f32 %v3896_v19, %v3672_v5 }
 0x6ac   : > { %v13138_v22 = vpop.eup %13137  ;;  %13145 = vpow2.f32 %v11677_v31  ;;  %v11676_v7 = vmul.f32 -1.442695, %v3959_v17  ;;  %v3727_v17 = vadd.f32 %v15484_v36, %v12542_v20 }
 0x6ad   : > { %v4020_v46 = vadd.f32 1.0, %v13138_v22 }
 0x6ae   : > { %v13140_v11 = vpop.eup %13139  ;;  %13147 = vpow2.f32 %v11676_v7 }
 0x6af   : > { %13149 = vrcp.f32 %v4020_v46  ;;  %v4019_v39 = vadd.f32 1.0, %v13140_v11  ;;  %v12562_v50 = vpop.f32.mrf.mxu1  ;;  %v3722_v11 = vadd.f32 %v15484_v36, %v3721_v33 }
 0x6b0   : > { %v3962_v6 = vadd.f32 %v12562_v50, %v3687_v32 }
 0x6b1   : > { %13151 = vrcp.f32 %v4019_v39  ;;  %v3906_v15 = vpop.f32.mrf.mxu1 }
 0x6b2   : > { %v13142_v28 = vpop.eup %13141  ;;  %v11679_v26 = vmul.f32 -1.442695, %v3962_v6  ;;  %v3961_v51 = vadd.f32 %v3906_v15, %v3682_v49 }
 0x6b3   : > { %v4022_v63 = vadd.f32 1.0, %v13142_v28  ;;  %v12565_v10 = vpop.f32.mrf.mxu1 }
 0x6b4   : > { %v13144_v41 = vpop.eup %13143  ;;  %13153 = vpow2.f32 %v11679_v26  ;;  %v11678_v57 = vmul.f32 -1.442695, %v3961_v51  ;;  %v3964_v35 = vadd.f32 %v12565_v10, %v3697_v44 }
 0x6b5   : > { %13155 = vrcp.f32 %v4022_v63  ;;  %v4021_v25 = vadd.f32 1.0, %v13144_v41  ;;  %v3916_v42 = vpop.f32.mrf.mxu1 }
 0x6b6   : > { %13157 = vpow2.f32 %v11678_v57  ;;  %v11681_v59 = vmul.f32 -1.442695, %v3964_v35  ;;  %v3963_v54 = vadd.f32 %v3916_v42, %v3692_v29 }
 0x6b7   : > { %13159 = vrcp.f32 %v4021_v25 }
 0x6b8   : > { %13161 = vpow2.f32 %v11681_v59  ;;  %v11680_v61 = vmul.f32 -1.442695, %v3963_v54  ;;  %v12568_v8 = vpop.f32.mrf.mxu1 }
 0x6b9   : > { %v13146_v18 = vpop.eup %13145  ;;  %v3966_v27 = vadd.f32 %v12568_v8, %v3707_v37 }
 0x6ba   : > { %v4024_v21 = vadd.f32 1.0, %v13146_v18  ;;  %13163 = vpow2.f32 %v11680_v61  ;;  %v3926_v62 = vpop.f32.mrf.mxu1 }
 0x6bb   : > { %v13148_v16 = vpop.eup %13147  ;;  %v11683_v12 = vmul.f32 -1.442695, %v3966_v27  ;;  %v3965_v5 = vadd.f32 %v3926_v62, %v3702_v13 }
 0x6bc   : > { %v13150_v4 = vpop.eup %13149  ;;  %13165 = vrcp.f32 %v4024_v21  ;;  %v4023_v19 = vadd.f32 1.0, %v13148_v16  ;;  %v12571_v31 = vpop.f32.mrf.mxu1 }
 0x6bd   : > { %13167 = vpow2.f32 %v11683_v12  ;;  %v11682_v14 = vmul.f32 -1.442695, %v3965_v5  ;;  %v3968_v22 = vadd.f32 %v12571_v31, %v3717_v2  ;;  %v4068_v32 = vmul.f32 2.0, %v13150_v4 }
 0x6be   : > { %v13152_v7 = vpop.eup %13151  ;;  %13169 = vrcp.f32 %v4023_v19  ;;  %v3936_v46 = vpop.f32.mrf.mxu1 }
 0x6bf   : > { %13171 = vpow2.f32 %v11682_v14  ;;  %v11685_v49 = vmul.f32 -1.442695, %v3968_v22  ;;  %v3967_v39 = vadd.f32 %v3936_v46, %v3712_v53  ;;  %v11689_v50 = vadd.f32 -1.0, %v4068_v32 }
 0x6c0   : > { %v12574_v40 = vpop.f32.mrf.mxu1  ;;  %v4067_v6 = vmul.f32 2.0, %v13152_v7 }
 0x6c1   : > { %v13154_v44 = vpop.eup %13153  ;;  %13173 = vpow2.f32 %v11685_v49  ;;  %v11684_v15 = vmul.f32 -1.442695, %v3967_v39  ;;  %v3970_v28 = vadd.f32 %v12574_v40, %v3727_v17  ;;  %v15504_v26 = vsel %vm14321_vm10, %v11689_v50, %v13150_v4 }
 0x6c2   : > { %v13156_v51 = vpop.eup %13155  ;;  %v4026_v29 = vadd.f32 1.0, %v13154_v44  ;;  %v3946_v63 = vpop.f32.mrf.mxu1  ;;  %4149 = vrot.lane.b32.xlu1 %v15504_v26, %s13840_s14  ;;  %v11688_v36 = vadd.f32 -1.0, %v4067_v6 }
 0x6c3   : > { %v13158_v10 = vpop.eup %13157  ;;  %13175 = vpow2.f32 %v11684_v15  ;;  %v11687_v0 = vmul.f32 -1.442695, %v3970_v28  ;;  %v3969_v41 = vadd.f32 %v3946_v63, %v3722_v11  ;;  %v4070_v57 = vmul.f32 2.0, %v13156_v51 }
 0x6c4   : > { %v13160_v35 = vpop.eup %13159  ;;  %13177 = vrcp.f32 %v4026_v29  ;;  %v4025_v25 = vadd.f32 1.0, %v13158_v10  ;;  %v15510_v37 = vsel %vm14321_vm10, %v11688_v36, %v13152_v7 }
 0x6c5   : > { %v13162_v42 = vpop.eup %13161  ;;  %13179 = vpow2.f32 %v11687_v0  ;;  %v11686_v59 = vmul.f32 -1.442695, %v3969_v41  ;;  %4147 = vrot.lane.b32.xlu0 %v15510_v37, %s13840_s14  ;;  %v11691_v54 = vadd.f32 -1.0, %v4070_v57  ;;  %v4069_v13 = vmul.f32 2.0, %v13160_v35 }
 0x6c6   : > { %13181 = vrcp.f32 %v4025_v25  ;;  %v4028_v20 = vadd.f32 1.0, %v13162_v42 }
 0x6c7   : > { %v13164_v61 = vpop.eup %13163  ;;  %13183 = vpow2.f32 %v11686_v59  ;;  %v15516_v8 = vsel %vm14321_vm10, %v11691_v54, %v13156_v51  ;;  %v11690_v18 = vadd.f32 -1.0, %v4069_v13 }
 0x6c8   : > { %13185 = vrcp.f32 %v4028_v20  ;;  %v4027_v27 = vadd.f32 1.0, %v13164_v61  ;;  %4153 = vrot.lane.b32.xlu1 %v15516_v8, %s13840_s14 }
 0x6c9   : > { %v13166_v2 = vpop.eup %13165  ;;  %v15522_v21 = vsel %vm14321_vm10, %v11690_v18, %v13160_v35 }
 0x6ca   : > { %v13168_v62 = vpop.eup %13167  ;;  %13187 = vrcp.f32 %v4027_v27  ;;  %4151 = vrot.lane.b32.xlu0 %v15522_v21, %s13840_s14  ;;  %v4072_v16 = vmul.f32 2.0, %v13166_v2 }
 0x6cb   : > { %v13170_v12 = vpop.eup %13169  ;;  %v4030_v5 = vadd.f32 1.0, %v13168_v62 }
 0x6cc   : > { %v13172_v53 = vpop.eup %13171  ;;  %v11693_v33 = vadd.f32 -1.0, %v4072_v16  ;;  %v4071_v4 = vmul.f32 2.0, %v13170_v12 }
 0x6cd   : > { %13189 = vrcp.f32 %v4030_v5  ;;  %v4029_v19 = vadd.f32 1.0, %v13172_v53 }
 0x6ce   : > { %v13174_v31 = vpop.eup %13173  ;;  %v15528_v17 = vsel %vm14321_vm10, %v11693_v33, %v13166_v2  ;;  %v11692_v14 = vadd.f32 -1.0, %v4071_v4 }
 0x6cf   : > { %13191 = vrcp.f32 %v4029_v19  ;;  %v4032_v22 = vadd.f32 1.0, %v13174_v31  ;;  %4157 = vrot.lane.b32.xlu1 %v15528_v17, %s13840_s14 }
 0x6d0   : > { %v13176_v32 = vpop.eup %13175  ;;  %v15534_v7 = vsel %vm14321_vm10, %v11692_v14, %v13170_v12 }
 0x6d1   : > { %v13178_v46 = vpop.eup %13177  ;;  %13193 = vrcp.f32 %v4032_v22  ;;  %v4031_v11 = vadd.f32 1.0, %v13176_v32  ;;  %4155 = vrot.lane.b32.xlu0 %v15534_v7, %s13840_s14 }
 0x6d2   : > { %v13180_v49 = vpop.eup %13179  ;;  %v4074_v39 = vmul.f32 2.0, %v13178_v46 }
 0x6d3   : > { %v13182_v50 = vpop.eup %13181  ;;  %13195 = vrcp.f32 %v4031_v11  ;;  %v4034_v40 = vadd.f32 1.0, %v13180_v49 }
 0x6d4   : > { %v13184_v6 = vpop.eup %13183  ;;  %v11695_v44 = vadd.f32 -1.0, %v4074_v39  ;;  %v4073_v15 = vmul.f32 2.0, %v13182_v50 }
 0x6d5   : > { %v13186_v28 = vpop.eup %13185  ;;  %13197 = vrcp.f32 %v4034_v40  ;;  %v4033_v51 = vadd.f32 1.0, %v13184_v6 }
 0x6d6   : > { %v15540_v29 = vsel %vm14321_vm10, %v11695_v44, %v13178_v46  ;;  %v11694_v63 = vadd.f32 -1.0, %v4073_v15  ;;  %v4076_v36 = vmul.f32 2.0, %v13186_v28 }
 0x6d7   : > { %v13188_v10 = vpop.eup %13187  ;;  %13199 = vrcp.f32 %v4033_v51  ;;  %4161 = vrot.lane.b32.xlu1 %v15540_v29, %s13840_s14 }
 0x6d8   : > { %v15546_v0 = vsel %vm14321_vm10, %v11694_v63, %v13182_v50  ;;  %v11697_v41 = vadd.f32 -1.0, %v4076_v36  ;;  %v4075_v57 = vmul.f32 2.0, %v13188_v10 }
 0x6d9   : > { %4159 = vrot.lane.b32.xlu0 %v15546_v0, %s13840_s14 }
 0x6da   : > { %v13190_v35 = vpop.eup %13189  ;;  %v15552_v25 = vsel %vm14321_vm10, %v11697_v41, %v13186_v28  ;;  %v11696_v42 = vadd.f32 -1.0, %v4075_v57 }
 0x6db   : > { %4165 = vrot.lane.b32.xlu1 %v15552_v25, %s13840_s14  ;;  %v4078_v59 = vmul.f32 2.0, %v13190_v35 }
 0x6dc   : > { %v13192_v54 = vpop.eup %13191  ;;  %v15558_v13 = vsel %vm14321_vm10, %v11696_v42, %v13188_v10 }
 0x6dd   : > { %4163 = vrot.lane.b32.xlu0 %v15558_v13, %s13840_s14  ;;  %v11699_v20 = vadd.f32 -1.0, %v4078_v59  ;;  %v4077_v61 = vmul.f32 2.0, %v13192_v54 }
 0x6de   : > { %v13194_v18 = vpop.eup %13193 }
 0x6df   : > { %v15564_v27 = vsel %vm14321_vm10, %v11699_v20, %v13190_v35  ;;  %v11698_v2 = vadd.f32 -1.0, %v4077_v61  ;;  %v4080_v62 = vmul.f32 2.0, %v13194_v18 }
 0x6e0   : > { %v13196_v16 = vpop.eup %13195  ;;  %4169 = vrot.lane.b32.xlu1 %v15564_v27, %s13840_s14 }
 0x6e1   : > { %v15570_v12 = vsel %vm14321_vm10, %v11698_v2, %v13192_v54  ;;  %v11701_v5 = vadd.f32 -1.0, %v4080_v62  ;;  %v4079_v53 = vmul.f32 2.0, %v13196_v16 }
 0x6e2   : > { %v13198_v33 = vpop.eup %13197  ;;  %4167 = vrot.lane.b32.xlu0 %v15570_v12, %s13840_s14 }
 0x6e3   : > { %v15576_v4 = vsel %vm14321_vm10, %v11701_v5, %v13194_v18  ;;  %v11700_v19 = vadd.f32 -1.0, %v4079_v53  ;;  %v4082_v31 = vmul.f32 2.0, %v13198_v33 }
 0x6e4   : > { %v13200_v14 = vpop.eup %13199  ;;  %4173 = vrot.lane.b32.xlu1 %v15576_v4, %s13840_s14 }
 0x6e5   : > { %v15582_v22 = vsel %vm14321_vm10, %v11700_v19, %v13196_v16  ;;  %v11703_v32 = vadd.f32 -1.0, %v4082_v31  ;;  %v4081_v46 = vmul.f32 2.0, %v13200_v14 }
 0x6e6   : > { %4171 = vrot.lane.b32.xlu0 %v15582_v22, %s13840_s14 }
 0x6e7   : > { %v15588_v11 = vsel %vm14321_vm10, %v11703_v32, %v13198_v33  ;;  %v11702_v49 = vadd.f32 -1.0, %v4081_v46 }
 0x6e8   : > { %4177 = vrot.lane.b32.xlu1 %v15588_v11, %s13840_s14 }
 0x6e9   : > { %v15594_v39 = vsel %vm14321_vm10, %v11702_v49, %v13200_v14 }
 0x6ea   : > { %4175 = vrot.lane.b32.xlu0 %v15594_v39, %s13840_s14 }
 0x734   : > { %v4150_v50 = vpop.permute.xlu1 %4149 }
 0x735   : > { %v4196_v40 = vmul.f32 %v4150_v50, %v15504_v26 }
 0x737   : > { %v4148_v6 = vpop.permute.xlu0 %4147  ;;  %4229 = vrot.lane.b32.xlu1 %v4196_v40, %s13841_s18  ;;  %v4116_v40 = vmul.f32 %v15504_v26, %v15059_v24  ;;  %v4117_v24 = vmul.f32 %v15522_v21, %v15074_v43 }
 0x738   : > { %v4195_v44 = vmul.f32 %v4148_v6, %v15510_v37 }
 0x73a   : > { %v4154_v15 = vpop.permute.xlu1 %4153  ;;  %4227 = vrot.lane.b32.xlu0 %v4195_v44, %s13841_s18 }
 0x73b   : > { %v4198_v28 = vmul.f32 %v4154_v15, %v15516_v8  ;;  %v4115_v15 = vmul.f32 %v15510_v37, %v15064_v52 }
 0x73c   : > { %v4152_v51 = vpop.permute.xlu0 %4151 }
 0x73d   : > { %v4197_v63 = vmul.f32 %v4152_v51, %v15522_v21  ;;  %4233 = vrot.lane.b32.xlu1 %v4198_v28, %s13841_s18 }
 0x73f   : > { %4231 = vrot.lane.b32.xlu0 %v4197_v63, %s13841_s18  ;;  %v4118_v63 = vmul.f32 %v15516_v8, %v15069_v56 }
 0x741   : > { %v4158_v36 = vpop.permute.xlu1 %4157 }
 0x742   : > { %v4200_v10 = vmul.f32 %v4158_v36, %v15528_v17 }
 0x743   : > { %v4156_v41 = vpop.permute.xlu0 %4155 }
 0x744   : > { %v4199_v57 = vmul.f32 %v4156_v41, %v15534_v7  ;;  %4237 = vrot.lane.b32.xlu1 %v4200_v10, %s13841_s18 }
 0x746   : > { %4235 = vrot.lane.b32.xlu0 %v4199_v57, %s13841_s18  ;;  %v4120_v57 = vmul.f32 %v15528_v17, %v15079_v58  ;;  %v4122_v58 = vmul.f32 %v15540_v29, %v15091_v3  ;;  %v4124_v3 = vmul.f32 %v15552_v25, %v15103_v60 }
 0x749   : > { %v4162_v35 = vpop.permute.xlu1 %4161 }
 0x74a   : > { %v4202_v42 = vmul.f32 %v4162_v35, %v15540_v29 }
 0x74b   : > { %v4160_v59 = vpop.permute.xlu0 %4159 }
 0x74c   : > { %v4201_v54 = vmul.f32 %v4160_v59, %v15546_v0  ;;  %4241 = vrot.lane.b32.xlu1 %v4202_v42, %s13841_s18  ;;  %v4119_v42 = vmul.f32 %v15534_v7, %v15084_v48  ;;  %v4121_v48 = vmul.f32 %v15546_v0, %v15097_v23  ;;  %v4123_v23 = vmul.f32 %v15558_v13, %v15108_v9 }
 0x74d   : > { %v4166_v20 = vpop.permute.xlu1 %4165  ;;  %v4125_v9 = vmul.f32 %v15570_v12, %v15120_v45 }
 0x74e   : > { %v4204_v61 = vmul.f32 %v4166_v20, %v15552_v25  ;;  %4239 = vrot.lane.b32.xlu0 %v4201_v54, %s13841_s18 }
 0x74f   : > { %v4164_v18 = vpop.permute.xlu0 %4163 }
 0x750   : > { %v4203_v2 = vmul.f32 %v4164_v18, %v15558_v13  ;;  %4245 = vrot.lane.b32.xlu1 %v4204_v61, %s13841_s18 }
 0x752   : > { %v4170_v62 = vpop.permute.xlu1 %4169  ;;  %4243 = vrot.lane.b32.xlu0 %v4203_v2, %s13841_s18 }
 0x753   : > { %v4206_v16 = vmul.f32 %v4170_v62, %v15564_v27 }
 0x754   : > { %v4168_v5 = vpop.permute.xlu0 %4167 }
 0x755   : > { %v4205_v53 = vmul.f32 %v4168_v5, %v15570_v12  ;;  %4249 = vrot.lane.b32.xlu1 %v4206_v16, %s13841_s18 }
 0x756   : > { %v4174_v33 = vpop.permute.xlu1 %4173 }
 0x757   : > { %v4208_v19 = vmul.f32 %v4174_v33, %v15576_v4  ;;  %4247 = vrot.lane.b32.xlu0 %v4205_v53, %s13841_s18 }
 0x758   : > { %v4172_v31 = vpop.permute.xlu0 %4171 }
 0x759   : > { %v4207_v14 = vmul.f32 %v4172_v31, %v15582_v22  ;;  %4253 = vrot.lane.b32.xlu1 %v4208_v19, %s13841_s18 }
 0x75a   : > { %v4178_v32 = vpop.permute.xlu1 %4177 }
 0x75b   : > { %v4210_v46 = vmul.f32 %v4178_v32, %v15588_v11  ;;  %4251 = vrot.lane.b32.xlu0 %v4207_v14, %s13841_s18  ;;  %v4126_v32 = vmul.f32 %v15564_v27, %v15114_v34  ;;  %v4128_v34 = vmul.f32 %v15576_v4, %v15125_v1 }
 0x75c   : > { %v4176_v49 = vpop.permute.xlu0 %4175 }
 0x75d   : > { %v4209_v50 = vmul.f32 %v4176_v49, %v15594_v39  ;;  %4257 = vrot.lane.b32.xlu1 %v4210_v46, %s13841_s18 }
 0x75f   : > { %4255 = vrot.lane.b32.xlu0 %v4209_v50, %s13841_s18 }
 0x7a9   : > { %v4230_v6 = vpop.permute.xlu1 %4229 }
 0x7aa   : > { %v15632_v44 = vadd.f32 %v4230_v6, %v4116_v40 }
 0x7ac   : > { %13201 = vtanh.f32 %v15632_v44  ;;  %v4228_v28 = vpop.permute.xlu0 %4227 }
 0x7ad   : > { %v15637_v51 = vadd.f32 %v4228_v28, %v4115_v15  ;;  %v4127_v28 = vmul.f32 %v15582_v22, %v15130_v30  ;;  %v4129_v30 = vmul.f32 %v15594_v39, %v15142_v47 }
 0x7af   : > { %13203 = vtanh.f32 %v15637_v51  ;;  %v4234_v36 = vpop.permute.xlu1 %4233 }
 0x7b0   : > { %v15642_v10 = vadd.f32 %v4234_v36, %v4118_v63 }
 0x7b1   : > { %v4232_v41 = vpop.permute.xlu0 %4231 }
 0x7b2   : > { %13205 = vtanh.f32 %v15642_v10  ;;  %v15647_v52 = vadd.f32 %v4232_v41, %v4117_v24  ;;  %v4130_v24 = vmul.f32 %v15588_v11, %v15136_v38 }
 0x7b4   : > { %13207 = vtanh.f32 %v15647_v52 }
 0x7b6   : > { %v4238_v35 = vpop.permute.xlu1 %4237 }
 0x7b7   : > { %v15652_v56 = vadd.f32 %v4238_v35, %v4120_v57 }
 0x7b8   : > { %v4236_v59 = vpop.permute.xlu0 %4235 }
 0x7b9   : > { %v13202_v54 = vpop.eup %13201  ;;  %13209 = vtanh.f32 %v15652_v56  ;;  %v15657_v43 = vadd.f32 %v4236_v59, %v4119_v42 }
 0x7ba   : > { %4325 = vrot.lane.b32.xlu1 %v13202_v54, %s13840_s14  ;;  %v4387_v54 = vld [vmem:[%s13931_s19 + $0x3] sm:$0x1] }
 0x7bb   : > { %13211 = vtanh.f32 %v15657_v43 }
 0x7bc   : > { %v13204_v20 = vpop.eup %13203 }
 0x7bd   : > { %4323 = vrot.lane.b32.xlu0 %v13204_v20, %s13840_s14  ;;  %v4388_v20 = vld [vmem:[%s13931_s19 + $0xb] sm:$0x1] }
 0x7be   : > { %v4242_v61 = vpop.permute.xlu1 %4241 }
 0x7bf   : > { %v13206_v18 = vpop.eup %13205  ;;  %v15664_v2 = vadd.f32 %v4242_v61, %v4122_v58  ;;  %v4389_v58 = vld [vmem:[%s13931_s19 + $0x13] sm:$0x1]  ;;  %v4390_v61 = vld [vmem:[%s13931_s19 + $0x1b] sm:$0x1] }
 0x7c0   : > { %v4240_v62 = vpop.permute.xlu0 %4239  ;;  %4329 = vrot.lane.b32.xlu1 %v13206_v18, %s13840_s14  ;;  %v4391_v18 = vld [vmem:[%s13931_s19 + $0x23] sm:$0x1] }
 0x7c1   : > { %v13208_v16 = vpop.eup %13207  ;;  %13213 = vtanh.f32 %v15664_v2  ;;  %v15670_v5 = vadd.f32 %v4240_v62, %v4121_v48  ;;  %v4392_v48 = vld [vmem:[%s13931_s19 + $0x2b] sm:$0x1] }
 0x7c2   : > { %v4246_v53 = vpop.permute.xlu1 %4245  ;;  %4327 = vrot.lane.b32.xlu0 %v13208_v16, %s13840_s14  ;;  %v4393_v16 = vld [vmem:[%s13931_s19 + $0x33] sm:$0x1] }
 0x7c3   : > { %13215 = vtanh.f32 %v15670_v5  ;;  %v15676_v33 = vadd.f32 %v4246_v53, %v4124_v3  ;;  %v4643_v3 = vrot.slane %v4388_v20, 7  ;;  %v4645_v53 = vrot.slane %v4389_v58, 6 }
 0x7c4   : > { %v4244_v19 = vpop.permute.xlu0 %4243 }
 0x7c5   : > { %13217 = vtanh.f32 %v15676_v33  ;;  %v15681_v31 = vadd.f32 %v4244_v19, %v4123_v23  ;;  %v4394_v23 = vld [vmem:[%s13931_s19 + $0x3b] sm:$0x1]  ;;  %v4647_v19 = vrot.slane %v4390_v61, 5 }
 0x7c6   : > { %v13210_v14 = vpop.eup %13209 }
 0x7c7   : > { %13219 = vtanh.f32 %v15681_v31  ;;  %v4250_v60 = vpop.permute.xlu1 %4249  ;;  %4333 = vrot.lane.b32.xlu1 %v13210_v14, %s13840_s14  ;;  %v4649_v14 = vrot.slane %v4391_v18, 4 }
 0x7c8   : > { %v13212_v46 = vpop.eup %13211  ;;  %v15687_v49 = vadd.f32 %v4250_v60, %v4126_v32  ;;  %v4651_v32 = vrot.slane %v4392_v48, 3  ;;  %v4653_v60 = vrot.slane %v4393_v16, 2 }
 0x7c9   : > { %v4248_v50 = vpop.permute.xlu0 %4247  ;;  %4331 = vrot.lane.b32.xlu0 %v13212_v46, %s13840_s14 }
 0x7ca   : > { %13221 = vtanh.f32 %v15687_v49  ;;  %v15693_v40 = vadd.f32 %v4248_v50, %v4125_v9  ;;  %v4644_v9 = vsel %vm662_vm0, %v4643_v3, %v4387_v54  ;;  %v4395_v50 = vld [vmem:[%s13931_s19 + $0x43] sm:$0x1]  ;;  %v4402_v54 = vld [vmem:[%s13931_s19 + $0x7b] sm:$0x1] }
 0x7cb   : > { %v4254_v6 = vpop.permute.xlu1 %4253 }
 0x7cc   : > { %13223 = vtanh.f32 %v15693_v40  ;;  %v15698_v15 = vadd.f32 %v4254_v6, %v4128_v34  ;;  %v4396_v34 = vld [vmem:[%s13931_s19 + $0x4b] sm:$0x1]  ;;  %v4397_v6 = vld [vmem:[%s13931_s19 + $0x53] sm:$0x1] }
 0x7cd   : > { %v4252_v63 = vpop.permute.xlu0 %4251 }
 0x7ce   : > { %v13214_v45 = vpop.eup %13213  ;;  %13225 = vtanh.f32 %v15698_v15  ;;  %v15703_v36 = vadd.f32 %v4252_v63, %v4127_v28  ;;  %v4646_v28 = vsel %vm665_vm1, %v4645_v53, %v4644_v9  ;;  %v4398_v63 = vld [vmem:[%s13931_s19 + $0x5b] sm:$0x1] }
 0x7cf   : > { %v4258_v41 = vpop.permute.xlu1 %4257  ;;  %4337 = vrot.lane.b32.xlu1 %v13214_v45, %s13840_s14  ;;  %v4399_v45 = vld [vmem:[%s13931_s19 + $0x63] sm:$0x1]  ;;  %v4661_v20 = vrot.slane %v4398_v63, 5 }
 0x7d0   : > { %v13216_v1 = vpop.eup %13215  ;;  %13227 = vtanh.f32 %v15703_v36  ;;  %v15709_v57 = vadd.f32 %v4258_v41, %v4130_v24  ;;  %v4400_v24 = vld [vmem:[%s13931_s19 + $0x6b] sm:$0x1]  ;;  %v4663_v58 = vrot.slane %v4399_v45, 4  ;;  %v13798_v63 = vld [vmem:[%s18800_s1] sm:$0xff] }
 0x7d1   : > { %v4256_v35 = vpop.permute.xlu0 %4255  ;;  %4335 = vrot.lane.b32.xlu0 %v13216_v1, %s13840_s14  ;;  %v4648_v1 = vsel %vm668_vm2, %v4647_v19, %v4646_v28  ;;  %v13797_v28 = vld [vmem:[%s18800_s1 + $0x8] sm:$0xff]  ;;  %v4403_v45 = vld [vmem:[%s13931_s19 + $0x83] sm:$0x1] }
 0x7d2   : > { %v13218_v38 = vpop.eup %13217  ;;  %13229 = vtanh.f32 %v15709_v57  ;;  %v15715_v42 = vadd.f32 %v4256_v35, %v4129_v30  ;;  %v4655_v30 = vrot.slane %v4394_v23, 1  ;;  %v4401_v35 = vld [vmem:[%s13931_s19 + $0x73] sm:$0x1] }
 0x7d3   : > { %4341 = vrot.lane.b32.xlu1 %v13218_v38, %s13840_s14  ;;  %v4657_v38 = vrot.slane %v4396_v34, 7  ;;  %v4667_v53 = vrot.slane %v4401_v35, 2  ;;  %v13795_v34 = vld [vmem:[%s18800_s1 + $0x18] sm:$0xff]  ;;  %v4408_v35 = vld [vmem:[%s13931_s19 + $0xab] sm:$0x1] }
 0x7d4   : > { %v13220_v59 = vpop.eup %13219  ;;  %13231 = vtanh.f32 %v15715_v42 }
 0x7d5   : > { %4339 = vrot.lane.b32.xlu0 %v13220_v59, %s13840_s14  ;;  %v4659_v59 = vrot.slane %v4397_v6, 6  ;;  %v4658_v48 = vsel %vm662_vm0, %v4657_v38, %v4395_v50  ;;  %v13796_v6 = vld [vmem:[%s18800_s1 + $0x10] sm:$0xff] }
 0x7d6   : > { %v4409_v38 = vld [vmem:[%s13931_s19 + $0xb3] sm:$0x1] }
 0x7d7   : > { %v13222_v47 = vpop.eup %13221  ;;  %v4660_v3 = vsel %vm665_vm1, %v4659_v59, %v4658_v48  ;;  %v4410_v59 = vld [vmem:[%s13931_s19 + $0xbb] sm:$0x1] }
 0x7d8   : > { %4345 = vrot.lane.b32.xlu1 %v13222_v47, %s13840_s14  ;;  %v4650_v47 = vsel %vm671_vm3, %v4649_v14, %v4648_v1  ;;  %v4662_v14 = vsel %vm668_vm2, %v4661_v20, %v4660_v3  ;;  %v4406_v1 = vld [vmem:[%s13931_s19 + $0x9b] sm:$0x1]  ;;  %v4412_v3 = vld [vmem:[%s13931_s19 + $0xcb] sm:$0x1] }
 0x7d9   : > { %v13224_v62 = vpop.eup %13223  ;;  %v4652_v18 = vsel %vm674_vm4, %v4651_v32, %v4650_v47  ;;  %v4664_v32 = vsel %vm671_vm3, %v4663_v58, %v4662_v14  ;;  %v4675_v20 = vrot.slane %v4406_v1, 5  ;;  %v4414_v14 = vld [vmem:[%s13931_s19 + $0xdb] sm:$0x1]  ;;  %v4419_v1 = vld [vmem:[%s13931_s19 + $0x103] sm:$0x1] }
 0x7da   : > { %4343 = vrot.lane.b32.xlu0 %v13224_v62, %s13840_s14  ;;  %v4665_v62 = vrot.slane %v4400_v24, 3  ;;  %v4654_v16 = vsel %vm677_vm5, %v4653_v60, %v4652_v18  ;;  %v4404_v24 = vld [vmem:[%s13931_s19 + $0x8b] sm:$0x1]  ;;  %v4411_v18 = vld [vmem:[%s13931_s19 + $0xc3] sm:$0x1] }
 0x7db   : > { %v13226_v46 = vpop.eup %13225  ;;  %v4656_v19 = vsel %vm680_vm6, %v4655_v30, %v4654_v16  ;;  %v4407_v30 = vld [vmem:[%s13931_s19 + $0xa3] sm:$0x1]  ;;  %v4671_v47 = vrot.slane %v4404_v24, 7  ;;  %v4683_v16 = vrot.slane %v4410_v59, 1 }
 0x7dc   : > { %4349 = vrot.lane.b32.xlu1 %v13226_v46, %s13840_s14  ;;  %v4669_v46 = vrot.slane %v4402_v54, 1  ;;  %12583 = vmatprep.mubr.msk.f32.mxu0 %vm892_vm7, %v4656_v19  ;;  %v4666_v9 = vsel %vm674_vm4, %v4665_v62, %v4664_v32  ;;  %v4677_v58 = vrot.slane %v4407_v30, 4  ;;  %v4681_v62 = vrot.slane %v4409_v38, 2  ;;  %v4416_v32 = vld [vmem:[%s13931_s19 + $0xeb] sm:$0x1] }
 0x7dd   : > { %v13228_v41 = vpop.eup %13227  ;;  %v4668_v60 = vsel %vm677_vm5, %v4667_v53, %v4666_v9  ;;  %v4672_v48 = vsel %vm662_vm0, %v4671_v47, %v4403_v45  ;;  %v4413_v53 = vld [vmem:[%s13931_s19 + $0xd3] sm:$0x1]  ;;  %v4689_v45 = vrot.slane %v4414_v14, 5  ;;  %v4420_v47 = vld [vmem:[%s13931_s19 + $0x10b] sm:$0x1] }
 0x7de   : > { %4347 = vrot.lane.b32.xlu0 %v13228_v41, %s13840_s14  ;;  %v4670_v50 = vsel %vm680_vm6, %v4669_v46, %v4668_v60  ;;  %v4405_v41 = vld [vmem:[%s13931_s19 + $0x93] sm:$0x1]  ;;  %v4415_v46 = vld [vmem:[%s13931_s19 + $0xe3] sm:$0x1] }
 0x7df   : > { %v13230_v61 = vpop.eup %13229  ;;  %12584 = vmatmul.mubr.msk.f32.vlgmr.msra.gmra.mxu0 %vm892_vm7, %v4670_v50  ;;  %v4673_v54 = vrot.slane %v4405_v41, 6  ;;  %v4417_v50 = vld [vmem:[%s13931_s19 + $0xf3] sm:$0x1]  ;;  %v4691_v24 = vrot.slane %v4415_v46, 4  ;;  %v4693_v41 = vrot.slane %v4416_v32, 3  ;;  %v4699_v46 = vrot.slane %v4420_v47, 7 }
 0x7e0   : > { %4353 = vrot.lane.b32.xlu1 %v13230_v61, %s13840_s14  ;;  %12640 = vmatpush3.msra.mxu0 %v13795_v34  ;;  %v4679_v61 = vrot.slane %v4408_v35, 3  ;;  %v4695_v38 = vrot.slane %v4417_v50, 2  ;;  %v4425_v14 = vld [vmem:[%s13931_s19 + $0x133] sm:$0x1]  ;;  %v4427_v50 = vld [vmem:[%s13931_s19 + $0x143] sm:$0x1] }
 0x7e1   : > { %v13232_v23 = vpop.eup %13231  ;;  %12641 = vmatprep.subr.mxu0 %v13796_v6  ;;  %v4674_v19 = vsel %vm665_vm1, %v4673_v54, %v4672_v48  ;;  %v4421_v54 = vld [vmem:[%s13931_s19 + $0x113] sm:$0x1] }
 0x7e2   : > { %4351 = vrot.lane.b32.xlu0 %v13232_v23, %s13840_s14  ;;  %12642 = vmatpush3.msra.mxu0 %v13796_v6  ;;  %v4676_v60 = vsel %vm668_vm2, %v4675_v20, %v4674_v19  ;;  %v4685_v6 = vrot.slane %v4412_v3, 7  ;;  %v4422_v3 = vld [vmem:[%s13931_s19 + $0x11b] sm:$0x1]  ;;  %v4701_v32 = vrot.slane %v4421_v54, 6 }
 0x7e3   : > { %12643 = vmatprep.subr.mxu0 %v13797_v28  ;;  %v4430_v54 = vld [vmem:[%s13931_s19 + $0x15b] sm:$0x1] }
 0x7e4   : > { %12644 = vmatpush3.msra.mxu0 %v13797_v28  ;;  %v4687_v28 = vrot.slane %v4413_v53, 6  ;;  %v4686_v35 = vsel %vm662_vm0, %v4685_v6, %v4411_v18  ;;  %v4423_v53 = vld [vmem:[%s13931_s19 + $0x123] sm:$0x1]  ;;  %v4426_v18 = vld [vmem:[%s13931_s19 + $0x13b] sm:$0x1] }
 0x7e5   : > { %12645 = vmatprep.subr.mxu0 %v13798_v63  ;;  %v4711_v47 = vrot.slane %v4426_v18, 1 }
 0x7e6   : > { %12646 = vmatpush3.msra.mxu0 %v13798_v63  ;;  %v4678_v63 = vsel %vm671_vm3, %v4677_v58, %v4676_v60  ;;  %v4688_v48 = vsel %vm665_vm1, %v4687_v28, %v4686_v35  ;;  %v4705_v60 = vrot.slane %v4423_v53, 4  ;;  %v4700_v28 = vsel %vm662_vm0, %v4699_v46, %v4419_v1 }
 0x7e7   : > { %12703 = vmatprep.subr.mxu0 %v13795_v34  ;;  %v4418_v34 = vld [vmem:[%s13931_s19 + $0xfb] sm:$0x1]  ;;  %v4702_v35 = vsel %vm665_vm1, %v4701_v32, %v4700_v28 }
 0x7e8   : > { %v4697_v59 = vrot.slane %v4418_v34, 1 }
 0x82c   : > { %v4326_v23 = vpop.permute.xlu1 %4325 }
 0x82d   : > { %v4372_v9 = vmul.f32 %v4326_v23, %v15504_v26  ;;  %v4680_v26 = vsel %vm674_vm4, %v4679_v61, %v4678_v63  ;;  %v4424_v23 = vld [vmem:[%s13931_s19 + $0x12b] sm:$0x1]  ;;  %v4690_v61 = vsel %vm668_vm2, %v4689_v45, %v4688_v48  ;;  %v4709_v63 = vrot.slane %v4425_v14, 2 }
 0x82e   : > { %v4682_v58 = vsel %vm677_vm5, %v4681_v62, %v4680_v26  ;;  %v4703_v62 = vrot.slane %v4422_v3, 5  ;;  %v4428_v45 = vld [vmem:[%s13931_s19 + $0x14b] sm:$0x1]  ;;  %v4433_v3 = vld [vmem:[%s13931_s19 + $0x173] sm:$0x1] }
 0x82f   : > { %v4324_v30 = vpop.permute.xlu0 %4323  ;;  %5062 = vrot.lane.b32.xlu1 %v4372_v9, %s13841_s18  ;;  %v4684_v19 = vsel %vm680_vm6, %v4683_v16, %v4682_v58  ;;  %v4707_v16 = vrot.slane %v4424_v23, 3  ;;  %v4432_v48 = vld [vmem:[%s13931_s19 + $0x16b] sm:$0x1]  ;;  %v4723_v32 = vrot.slane %v4433_v3, 2 }
 0x830   : > { %v4371_v20 = vmul.f32 %v4324_v30, %v15510_v37  ;;  %12586 = vmatprep.mubr.msk.f32.mxu0 %vm892_vm7, %v4684_v19  ;;  %v4692_v37 = vsel %vm671_vm3, %v4691_v24, %v4690_v61  ;;  %v4429_v30 = vld [vmem:[%s13931_s19 + $0x153] sm:$0x1]  ;;  %v4704_v58 = vsel %vm668_vm2, %v4703_v62, %v4702_v35  ;;  %v4435_v61 = vld [vmem:[%s13931_s19 + $0x183] sm:$0x1]  ;;  %v4436_v14 = vld [vmem:[%s13931_s19 + $0x18b] sm:$0x1] }
 0x831   : > { %v4694_v6 = vsel %vm674_vm4, %v4693_v41, %v4692_v37  ;;  %v4706_v53 = vsel %vm671_vm3, %v4705_v60, %v4704_v58  ;;  %v4715_v19 = vrot.slane %v4429_v30, 6  ;;  %v4721_v46 = vrot.slane %v4432_v48, 3  ;;  %v4440_v30 = vld [vmem:[%s13931_s19 + $0x1ab] sm:$0x1] }
 0x832   : > { %v4330_v9 = vpop.permute.xlu1 %4329  ;;  %5060 = vrot.lane.b32.xlu0 %v4371_v20, %s13841_s18  ;;  %v4696_v24 = vsel %vm677_vm5, %v4695_v38, %v4694_v6  ;;  %v4713_v20 = vrot.slane %v4428_v45, 7  ;;  %v4434_v38 = vld [vmem:[%s13931_s19 + $0x17b] sm:$0x1]  ;;  %v4727_v6 = vrot.slane %v4436_v14, 7  ;;  %v4735_v3 = vrot.slane %v4440_v30, 3 }
 0x833   : > { %v4374_v34 = vmul.f32 %v4330_v9, %v15516_v8  ;;  %v4431_v8 = vld [vmem:[%s13931_s19 + $0x163] sm:$0x1]  ;;  %v4698_v1 = vsel %vm680_vm6, %v4697_v59, %v4696_v24  ;;  %v4708_v59 = vsel %vm674_vm4, %v4707_v16, %v4706_v53  ;;  %v4437_v9 = vld [vmem:[%s13931_s19 + $0x193] sm:$0x1]  ;;  %v4725_v60 = vrot.slane %v4434_v38, 1 }
 0x834   : > { %v4328_v26 = vpop.permute.xlu0 %4327  ;;  %12587 = vmatmul.mubr.msk.f32.gmra.mxu0 %vm892_vm7, %v4698_v1  ;;  %v4714_v23 = vsel %vm662_vm0, %v4713_v20, %v4427_v50  ;;  %v4719_v18 = vrot.slane %v4431_v8, 4  ;;  %v4710_v37 = vsel %vm677_vm5, %v4709_v63, %v4708_v59  ;;  %v4438_v50 = vld [vmem:[%s13931_s19 + $0x19b] sm:$0x1]  ;;  %v4729_v8 = vrot.slane %v4437_v9, 6  ;;  %v4443_v20 = vld [vmem:[%s13931_s19 + $0x1c3] sm:$0x1] }
 0x835   : > { %v4373_v41 = vmul.f32 %v4328_v26, %v15522_v21  ;;  %5066 = vrot.lane.b32.xlu1 %v4374_v34, %s13841_s18  ;;  %v4717_v21 = vrot.slane %v4430_v54, 5  ;;  %v4716_v62 = vsel %vm665_vm1, %v4715_v19, %v4714_v23  ;;  %v4439_v34 = vld [vmem:[%s13931_s19 + $0x1a3] sm:$0x1]  ;;  %v4712_v45 = vsel %vm680_vm6, %v4711_v47, %v4710_v37  ;;  %v4441_v26 = vld [vmem:[%s13931_s19 + $0x1b3] sm:$0x1] }
 0x836   : > { %v4442_v24 = vld [vmem:[%s13931_s19 + $0x1bb] sm:$0x1]  ;;  %12589 = vmatprep.mubr.msk.f32.mxu0 %vm892_vm7, %v4712_v45  ;;  %v4728_v54 = vsel %vm662_vm0, %v4727_v6, %v4435_v61  ;;  %v4731_v58 = vrot.slane %v4438_v50, 5  ;;  %v4733_v48 = vrot.slane %v4439_v34, 4  ;;  %v4737_v19 = vrot.slane %v4441_v26, 2 }
 0x837   : > { %5064 = vrot.lane.b32.xlu0 %v4373_v41, %s13841_s18  ;;  %v4718_v16 = vsel %vm668_vm2, %v4717_v21, %v4716_v62  ;;  %v4444_v41 = vld [vmem:[%s13931_s19 + $0x1cb] sm:$0x1]  ;;  %v4730_v23 = vsel %vm665_vm1, %v4729_v8, %v4728_v54  ;;  %v4446_v21 = vld [vmem:[%s13931_s19 + $0x1db] sm:$0x1]  ;;  %v4447_v61 = vld [vmem:[%s13931_s19 + $0x1e3] sm:$0x1] }
 0x838   : > { %v4720_v63 = vsel %vm671_vm3, %v4719_v18, %v4718_v16  ;;  %v4732_v59 = vsel %vm668_vm2, %v4731_v58, %v4730_v23  ;;  %v4739_v18 = vrot.slane %v4442_v24, 1  ;;  %v4449_v9 = vld [vmem:[%s13931_s19 + $0x1f3] sm:$0x1]  ;;  %v4450_v37 = vld [vmem:[%s13931_s19 + $0x1fb] sm:$0x1]  ;;  %v4745_v50 = vrot.slane %v4446_v21, 5 }
 0x839   : > { %v4334_v28 = vpop.permute.xlu1 %4333  ;;  %v4722_v1 = vsel %vm674_vm4, %v4721_v46, %v4720_v63  ;;  %v4448_v46 = vld [vmem:[%s13931_s19 + $0x1eb] sm:$0x1]  ;;  %v4751_v45 = vrot.slane %v4449_v9, 2  ;;  %v4451_v16 = vld [vmem:[%s13931_s19 + $0x203] sm:$0x1] }
 0x83a   : > { %v4376_v35 = vmul.f32 %v4334_v28, %v15528_v17  ;;  %v4445_v17 = vld [vmem:[%s13931_s19 + $0x1d3] sm:$0x1]  ;;  %v4724_v53 = vsel %vm677_vm5, %v4723_v32, %v4722_v1  ;;  %v4734_v32 = vsel %vm671_vm3, %v4733_v48, %v4732_v59  ;;  %v4749_v28 = vrot.slane %v4448_v46, 3  ;;  %v4452_v30 = vld [vmem:[%s13931_s19 + $0x20b] sm:$0x1] }
 0x83b   : > { %v4332_v47 = vpop.permute.xlu0 %4331  ;;  %v4726_v14 = vsel %vm680_vm6, %v4725_v60, %v4724_v53  ;;  %v4743_v62 = vrot.slane %v4445_v17, 6  ;;  %v4747_v60 = vrot.slane %v4447_v61, 4  ;;  %v4736_v34 = vsel %vm674_vm4, %v4735_v3, %v4734_v32  ;;  %v4453_v63 = vld [vmem:[%s13931_s19 + $0x213] sm:$0x1]  ;;  %v4454_v54 = vld [vmem:[%s13931_s19 + $0x21b] sm:$0x1] }
 0x83c   : > { %v4375_v38 = vmul.f32 %v4332_v47, %v15534_v7  ;;  %5070 = vrot.lane.b32.xlu1 %v4376_v35, %s13841_s18  ;;  %v4741_v7 = vrot.slane %v4444_v41, 7  ;;  %12590 = vmatmul.mubr.msk.f32.gmra.mxu0 %vm892_vm7, %v4726_v14  ;;  %v4738_v26 = vsel %vm677_vm5, %v4737_v19, %v4736_v34  ;;  %v4753_v35 = vrot.slane %v4450_v37, 1  ;;  %v4455_v1 = vld [vmem:[%s13931_s19 + $0x223] sm:$0x1]  ;;  %v4456_v58 = vld [vmem:[%s13931_s19 + $0x22b] sm:$0x1] }
 0x83d   : > { %v4755_v8 = vrot.slane %v4452_v30, 7  ;;  %v4740_v47 = vsel %vm680_vm6, %v4739_v18, %v4738_v26  ;;  %v4457_v48 = vld [vmem:[%s13931_s19 + $0x233] sm:$0x1]  ;;  %v4757_v23 = vrot.slane %v4453_v63, 6  ;;  %v4459_v19 = vld [vmem:[%s13931_s19 + $0x243] sm:$0x1] }
 0x83e   : > { %5068 = vrot.lane.b32.xlu0 %v4375_v38, %s13841_s18  ;;  %v4742_v6 = vsel %vm662_vm0, %v4741_v7, %v4443_v20  ;;  %12592 = vmatprep.mubr.msk.f32.mxu0 %vm892_vm7, %v4740_v47  ;;  %v4458_v38 = vld [vmem:[%s13931_s19 + $0x23b] sm:$0x1]  ;;  %v4759_v14 = vrot.slane %v4454_v54, 5  ;;  %v4761_v59 = vrot.slane %v4455_v1, 4  ;;  %v4763_v18 = vrot.slane %v4456_v58, 3 }
 0x83f   : > { %v4744_v24 = vsel %vm665_vm1, %v4743_v62, %v4742_v6  ;;  %v4756_v53 = vsel %vm662_vm0, %v4755_v8, %v4451_v16  ;;  %v4765_v32 = vrot.slane %v4457_v48, 2  ;;  %v4461_v37 = vld [vmem:[%s13931_s19 + $0x253] sm:$0x1]  ;;  %v4462_v62 = vld [vmem:[%s13931_s19 + $0x25b] sm:$0x1]  ;;  %v4767_v6 = vrot.slane %v4458_v38, 1 }
 0x840   : > { %v4746_v20 = vsel %vm668_vm2, %v4745_v50, %v4744_v24  ;;  %v4758_v7 = vsel %vm665_vm1, %v4757_v23, %v4756_v53  ;;  %v4465_v26 = vld [vmem:[%s13931_s19 + $0x273] sm:$0x1]  ;;  %v4466_v24 = vld [vmem:[%s13931_s19 + $0x27b] sm:$0x1]  ;;  %v4773_v63 = vrot.slane %v4462_v62, 5 }
 0x841   : > { %v4338_v41 = vpop.permute.xlu1 %4337  ;;  %v4748_v17 = vsel %vm671_vm3, %v4747_v60, %v4746_v20  ;;  %v4760_v34 = vsel %vm668_vm2, %v4759_v14, %v4758_v7  ;;  %v4467_v20 = vld [vmem:[%s13931_s19 + $0x283] sm:$0x1]  ;;  %v4468_v1 = vld [vmem:[%s13931_s19 + $0x28b] sm:$0x1]  ;;  %v4469_v38 = vld [vmem:[%s13931_s19 + $0x293] sm:$0x1] }
 0x842   : > { %v4378_v3 = vmul.f32 %v4338_v41, %v15540_v29  ;;  %v4750_v61 = vsel %vm674_vm4, %v4749_v28, %v4748_v17  ;;  %v4460_v29 = vld [vmem:[%s13931_s19 + $0x24b] sm:$0x1]  ;;  %v4463_v28 = vld [vmem:[%s13931_s19 + $0x263] sm:$0x1]  ;;  %v4762_v30 = vsel %vm671_vm3, %v4761_v59, %v4760_v34  ;;  %v4779_v17 = vrot.slane %v4465_v26, 2 }
 0x843   : > { %v4336_v21 = vpop.permute.xlu0 %4335  ;;  %v4752_v9 = vsel %vm677_vm5, %v4751_v45, %v4750_v61  ;;  %v4769_v16 = vrot.slane %v4460_v29, 7  ;;  %v4764_v8 = vsel %vm674_vm4, %v4763_v18, %v4762_v30  ;;  %v4470_v53 = vld [vmem:[%s13931_s19 + $0x29b] sm:$0x1]  ;;  %v4471_v61 = vld [vmem:[%s13931_s19 + $0x2a3] sm:$0x1]  ;;  %v4783_v14 = vrot.slane %v4468_v1, 7 }
 0x844   : > { %v4377_v46 = vmul.f32 %v4336_v21, %v15546_v0  ;;  %5074 = vrot.lane.b32.xlu1 %v4378_v3, %s13841_s18  ;;  %v4754_v60 = vsel %vm680_vm6, %v4753_v35, %v4752_v9  ;;  %v4464_v0 = vld [vmem:[%s13931_s19 + $0x26b] sm:$0x1]  ;;  %v4771_v35 = vrot.slane %v4461_v37, 6  ;;  %v4766_v48 = vsel %vm677_vm5, %v4765_v32, %v4764_v8  ;;  %v4473_v29 = vld [vmem:[%s13931_s19 + $0x2b3] sm:$0x1] }
 0x845   : > { %v4342_v50 = vpop.permute.xlu1 %4341  ;;  %12593 = vmatmul.mubr.msk.f32.gmra.mxu0 %vm892_vm7, %v4754_v60  ;;  %v4770_v41 = vsel %vm662_vm0, %v4769_v16, %v4459_v19  ;;  %v4777_v47 = vrot.slane %v4464_v0, 3  ;;  %v4768_v23 = vsel %vm680_vm6, %v4767_v6, %v4766_v48  ;;  %v4781_v21 = vrot.slane %v4466_v24, 1  ;;  %v4475_v60 = vld [vmem:[%s13931_s19 + $0x2c3] sm:$0x1]  ;;  %v4476_v34 = vld [vmem:[%s13931_s19 + $0x2cb] sm:$0x1] }
 0x846   : > { %v4380_v45 = vmul.f32 %v4342_v50, %v15552_v25  ;;  %5072 = vrot.lane.b32.xlu0 %v4377_v46, %s13841_s18  ;;  %v4775_v25 = vrot.slane %v4463_v28, 4  ;;  %v4772_v3 = vsel %vm665_vm1, %v4771_v35, %v4770_v41  ;;  %12595 = vmatprep.mubr.msk.f32.mxu0 %vm892_vm7, %v4768_v23  ;;  %v4474_v46 = vld [vmem:[%s13931_s19 + $0x2bb] sm:$0x1]  ;;  %v4785_v9 = vrot.slane %v4469_v38, 6  ;;  %v4477_v30 = vld [vmem:[%s13931_s19 + $0x2d3] sm:$0x1] }
 0x847   : > { %v4340_v54 = vpop.permute.xlu0 %4339  ;;  %v4774_v19 = vsel %vm668_vm2, %v4773_v63, %v4772_v3  ;;  %v4787_v7 = vrot.slane %v4470_v53, 5  ;;  %v4784_v62 = vsel %vm662_vm0, %v4783_v14, %v4467_v20  ;;  %v4789_v50 = vrot.slane %v4471_v61, 4  ;;  %v4480_v8 = vld [vmem:[%s13931_s19 + $0x2eb] sm:$0x1]  ;;  %v4482_v20 = vld [vmem:[%s13931_s19 + $0x2fb] sm:$0x1] }
 0x848   : > { %v4379_v58 = vmul.f32 %v4340_v54, %v15558_v13  ;;  %5078 = vrot.lane.b32.xlu1 %v4380_v45, %s13841_s18  ;;  %v4472_v13 = vld [vmem:[%s13931_s19 + $0x2ab] sm:$0x1]  ;;  %v4776_v18 = vsel %vm671_vm3, %v4775_v25, %v4774_v19  ;;  %v4786_v0 = vsel %vm665_vm1, %v4785_v9, %v4784_v62  ;;  %v4793_v45 = vrot.slane %v4473_v29, 2  ;;  %v4479_v54 = vld [vmem:[%s13931_s19 + $0x2e3] sm:$0x1] }
 0x849   : > { %v4778_v37 = vsel %vm674_vm4, %v4777_v47, %v4776_v18  ;;  %v4791_v16 = vrot.slane %v4472_v13, 3  ;;  %v4788_v35 = vsel %vm668_vm2, %v4787_v7, %v4786_v0  ;;  %v4795_v63 = vrot.slane %v4474_v46, 1  ;;  %v4481_v47 = vld [vmem:[%s13931_s19 + $0x2f3] sm:$0x1]  ;;  %v4483_v38 = vld [vmem:[%s13931_s19 + $0x303] sm:$0x1] }
 0x84a   : > { %v4346_v59 = vpop.permute.xlu1 %4345  ;;  %5076 = vrot.lane.b32.xlu0 %v4379_v58, %s13841_s18  ;;  %v4780_v28 = vsel %vm677_vm5, %v4779_v17, %v4778_v37  ;;  %v4790_v25 = vsel %vm671_vm3, %v4789_v50, %v4788_v35  ;;  %v4799_v1 = vrot.slane %v4477_v30, 6  ;;  %v4803_v17 = vrot.slane %v4479_v54, 4  ;;  %v4484_v53 = vld [vmem:[%s13931_s19 + $0x30b] sm:$0x1]  ;;  %v4486_v14 = vld [vmem:[%s13931_s19 + $0x31b] sm:$0x1] }
 0x84b   : > { %v4382_v32 = vmul.f32 %v4346_v59, %v15564_v27  ;;  %v4478_v27 = vld [vmem:[%s13931_s19 + $0x2db] sm:$0x1]  ;;  %v4782_v24 = vsel %vm680_vm6, %v4781_v21, %v4780_v28  ;;  %v4792_v48 = vsel %vm674_vm4, %v4791_v16, %v4790_v25  ;;  %v4805_v61 = vrot.slane %v4480_v8, 3  ;;  %v4487_v9 = vld [vmem:[%s13931_s19 + $0x323] sm:$0x1] }
 0x84c   : > { %v4344_v6 = vpop.permute.xlu0 %4343  ;;  %12596 = vmatmul.mubr.msk.f32.gmra.mxu0 %vm892_vm7, %v4782_v24  ;;  %v4801_v3 = vrot.slane %v4478_v27, 5  ;;  %v4794_v19 = vsel %vm677_vm5, %v4793_v45, %v4792_v48  ;;  %v4807_v13 = vrot.slane %v4481_v47, 2  ;;  %v4809_v46 = vrot.slane %v4482_v20, 1  ;;  %v4488_v7 = vld [vmem:[%s13931_s19 + $0x32b] sm:$0x1] }
 0x84d   : > { %v4381_v26 = vmul.f32 %v4344_v6, %v15570_v12  ;;  %5082 = vrot.lane.b32.xlu1 %v4382_v32, %s13841_s18  ;;  %v4797_v12 = vrot.slane %v4476_v34, 7  ;;  %v4796_v18 = vsel %vm680_vm6, %v4795_v63, %v4794_v19  ;;  %v4489_v62 = vld [vmem:[%s13931_s19 + $0x333] sm:$0x1]  ;;  %v4490_v50 = vld [vmem:[%s13931_s19 + $0x33b] sm:$0x1]  ;;  %v4815_v28 = vrot.slane %v4486_v14, 5 }
 0x84e   : > { %v4350_v41 = vpop.permute.xlu1 %4349  ;;  %12598 = vmatprep.mubr.msk.f32.mxu0 %vm892_vm7, %v4796_v18  ;;  %v4817_v0 = vrot.slane %v4487_v9, 4  ;;  %v4491_v16 = vld [vmem:[%s13931_s19 + $0x343] sm:$0x1]  ;;  %v4492_v45 = vld [vmem:[%s13931_s19 + $0x34b] sm:$0x1]  ;;  %v4819_v24 = vrot.slane %v4488_v7, 3 }
 0x84f   : > { %v4384_v58 = vmul.f32 %v4350_v41, %v15576_v4  ;;  %5080 = vrot.lane.b32.xlu0 %v4381_v26, %s13841_s18  ;;  %v4798_v21 = vsel %vm662_vm0, %v4797_v12, %v4475_v60  ;;  %v4485_v4 = vld [vmem:[%s13931_s19 + $0x313] sm:$0x1]  ;;  %v4821_v35 = vrot.slane %v4489_v62, 2  ;;  %v4494_v63 = vld [vmem:[%s13931_s19 + $0x35b] sm:$0x1]  ;;  %v4823_v25 = vrot.slane %v4490_v50, 1 }
 0x850   : > { %v4348_v23 = vpop.permute.xlu0 %4347  ;;  %v4800_v29 = vsel %vm665_vm1, %v4799_v1, %v4798_v21  ;;  %v4813_v60 = vrot.slane %v4485_v4, 6  ;;  %v4495_v47 = vld [vmem:[%s13931_s19 + $0x363] sm:$0x1]  ;;  %v4496_v20 = vld [vmem:[%s13931_s19 + $0x36b] sm:$0x1] }
 0x851   : > { %v4383_v59 = vmul.f32 %v4348_v23, %v15582_v22  ;;  %5086 = vrot.lane.b32.xlu1 %v4384_v58, %s13841_s18  ;;  %v4802_v37 = vsel %vm668_vm2, %v4801_v3, %v4800_v29  ;;  %v4811_v22 = vrot.slane %v4484_v53, 7  ;;  %v4497_v58 = vld [vmem:[%s13931_s19 + $0x373] sm:$0x1]  ;;  %v4498_v48 = vld [vmem:[%s13931_s19 + $0x37b] sm:$0x1]  ;;  %v4825_v3 = vrot.slane %v4492_v45, 7 }
 0x852   : > { %v4354_v32 = vpop.permute.xlu1 %4353  ;;  %v4804_v6 = vsel %vm671_vm3, %v4803_v17, %v4802_v37  ;;  %v4831_v53 = vrot.slane %v4495_v47, 4  ;;  %v4833_v23 = vrot.slane %v4496_v20, 3  ;;  %v4499_v19 = vld [vmem:[%s13931_s19 + $0x383] sm:$0x1]  ;;  %v4837_v4 = vrot.slane %v4498_v48, 1 }
 0x853   : > { %v4386_v34 = vmul.f32 %v4354_v32, %v15588_v11  ;;  %5084 = vrot.lane.b32.xlu0 %v4383_v59, %s13841_s18  ;;  %v4806_v27 = vsel %vm674_vm4, %v4805_v61, %v4804_v6  ;;  %v4812_v26 = vsel %vm662_vm0, %v4811_v22, %v4483_v38  ;;  %v4493_v11 = vld [vmem:[%s13931_s19 + $0x353] sm:$0x1]  ;;  %v4829_v38 = vrot.slane %v4494_v63, 5  ;;  %v4500_v14 = vld [vmem:[%s13931_s19 + $0x38b] sm:$0x1] }
 0x854   : > { %v4352_v30 = vpop.permute.xlu0 %4351  ;;  %v4808_v8 = vsel %vm677_vm5, %v4807_v13, %v4806_v27  ;;  %v4814_v41 = vsel %vm665_vm1, %v4813_v60, %v4812_v26  ;;  %v4826_v61 = vsel %vm662_vm0, %v4825_v3, %v4491_v16  ;;  %v4835_v13 = vrot.slane %v4497_v58, 2  ;;  %v4501_v59 = vld [vmem:[%s13931_s19 + $0x393] sm:$0x1]  ;;  %v4503_v9 = vld [vmem:[%s13931_s19 + $0x3a3] sm:$0x1] }
 0x855   : > { %v4385_v54 = vmul.f32 %v4352_v30, %v15594_v39  ;;  %5090 = vrot.lane.b32.xlu1 %v4386_v34, %s13841_s18  ;;  %v4810_v12 = vsel %vm680_vm6, %v4809_v46, %v4808_v8  ;;  %v4816_v1 = vsel %vm668_vm2, %v4815_v28, %v4814_v41  ;;  %v4827_v39 = vrot.slane %v4493_v11, 6  ;;  %v4502_v46 = vld [vmem:[%s13931_s19 + $0x39b] sm:$0x1]  ;;  %v4504_v7 = vld [vmem:[%s13931_s19 + $0x3ab] sm:$0x1] }
 0x856   : > { %12599 = vmatmul.mubr.msk.f32.gmra.mxu0 %vm892_vm7, %v4810_v12  ;;  %v4818_v17 = vsel %vm671_vm3, %v4817_v0, %v4816_v1  ;;  %v4505_v62 = vld [vmem:[%s13931_s19 + $0x3b3] sm:$0x1]  ;;  %v4506_v50 = vld [vmem:[%s13931_s19 + $0x3bb] sm:$0x1]  ;;  %v4839_v22 = vrot.slane %v4500_v14, 7  ;;  %v4841_v60 = vrot.slane %v4501_v59, 6 }
 0x857   : > { %5088 = vrot.lane.b32.xlu0 %v4385_v54, %s13841_s18  ;;  %v4820_v21 = vsel %vm674_vm4, %v4819_v24, %v4818_v17  ;;  %v4828_v29 = vsel %vm665_vm1, %v4827_v39, %v4826_v61  ;;  %v4843_v6 = vrot.slane %v4502_v46, 5  ;;  %v4845_v28 = vrot.slane %v4503_v9, 4  ;;  %v4507_v16 = vld [vmem:[%s13931_s19 + $0x3c3] sm:$0x1]  ;;  %v4508_v24 = vld [vmem:[%s13931_s19 + $0x3cb] sm:$0x1] }
 0x858   : > { %v4822_v18 = vsel %vm677_vm5, %v4821_v35, %v4820_v21  ;;  %v4830_v37 = vsel %vm668_vm2, %v4829_v38, %v4828_v29  ;;  %v4847_v0 = vrot.slane %v4504_v7, 3  ;;  %v4840_v30 = vsel %vm662_vm0, %v4839_v22, %v4499_v19  ;;  %v4509_v35 = vld [vmem:[%s13931_s19 + $0x3d3] sm:$0x1]  ;;  %v4510_v54 = vld [vmem:[%s13931_s19 + $0x3db] sm:$0x1]  ;;  %v13802_v22 = vld [vmem:[%s18801_s2] sm:$0xff] }
 0x859   : > { %v4824_v32 = vsel %vm680_vm6, %v4823_v25, %v4822_v18  ;;  %v4832_v34 = vsel %vm671_vm3, %v4831_v53, %v4830_v37  ;;  %v4849_v27 = vrot.slane %v4505_v62, 2  ;;  %v4851_v26 = vrot.slane %v4506_v50, 1  ;;  %v4511_v8 = vld [vmem:[%s13931_s19 + $0x3e3] sm:$0x1]  ;;  %v4512_v41 = vld [vmem:[%s13931_s19 + $0x3eb] sm:$0x1] }
 0x85a   : > { %12601 = vmatprep.mubr.msk.f32.mxu0 %vm892_vm7, %v4824_v32  ;;  %v4834_v45 = vsel %vm674_vm4, %v4833_v23, %v4832_v34  ;;  %v4842_v63 = vsel %vm665_vm1, %v4841_v60, %v4840_v30  ;;  %v4513_v20 = vld [vmem:[%s13931_s19 + $0x3f3] sm:$0x1]  ;;  %v4853_v12 = vrot.slane %v4508_v24, 7  ;;  %v4855_v1 = vrot.slane %v4509_v35, 6  ;;  %v4514_v48 = vld [vmem:[%s13931_s19 + $0x3fb] sm:$0x1] }
 0x85b   : > { %v4836_v11 = vsel %vm677_vm5, %v4835_v13, %v4834_v45  ;;  %v4844_v47 = vsel %vm668_vm2, %v4843_v6, %v4842_v63  ;;  %v4857_v3 = vrot.slane %v4510_v54, 5  ;;  %v4859_v39 = vrot.slane %v4511_v8, 4  ;;  %v13799_v7 = vld [vmem:[%s18801_s2 + $0x18] sm:$0xff]  ;;  %v13800_v32 = vld [vmem:[%s18801_s2 + $0x10] sm:$0xff]  ;;  %v13801_v50 = vld [vmem:[%s18801_s2 + $0x8] sm:$0xff] }
 0x85c   : > { %v4838_v25 = vsel %vm680_vm6, %v4837_v4, %v4836_v11  ;;  %v4846_v58 = vsel %vm671_vm3, %v4845_v28, %v4844_v47  ;;  %v4854_v38 = vsel %vm662_vm0, %v4853_v12, %v4507_v16  ;;  %v4861_v53 = vrot.slane %v4512_v41, 3  ;;  %v16057_v47 = vld [vmem:[%s18802_s3] ss:$0 sm:$0xff] }
 0x85d   : > { %12602 = vmatmul.mubr.msk.f32.gmra.mxu0 %vm892_vm7, %v4838_v25  ;;  %v4848_v17 = vsel %vm674_vm4, %v4847_v0, %v4846_v58  ;;  %v4856_v19 = vsel %vm665_vm1, %v4855_v1, %v4854_v38  ;;  %v4863_v21 = vrot.slane %v4513_v20, 2  ;;  %v4865_v4 = vrot.slane %v4514_v48, 1 }
 0x85e   : > { %v4850_v23 = vsel %vm677_vm5, %v4849_v27, %v4848_v17  ;;  %v4858_v13 = vsel %vm668_vm2, %v4857_v3, %v4856_v19 }
 0x85f   : > { %v4852_v61 = vsel %vm680_vm6, %v4851_v26, %v4850_v23  ;;  %v4860_v14 = vsel %vm671_vm3, %v4859_v39, %v4858_v13 }
 0x860   : > { %12604 = vmatprep.mubr.msk.f32.mxu0 %vm892_vm7, %v4852_v61  ;;  %v4862_v59 = vsel %vm674_vm4, %v4861_v53, %v4860_v14 }
 0x861   : > { %v4864_v18 = vsel %vm677_vm5, %v4863_v21, %v4862_v59 }
 0x862   : > { %v4866_v29 = vsel %vm680_vm6, %v4865_v4, %v4864_v18 }
 0x863   : > { %12605 = vmatmul.mubr.msk.f32.gmra.mxu0 %vm892_vm7, %v4866_v29 }
 0x89f   : > { %v12585_v11 = vpop.f32.mrf.mxu0 }
 0x8a0   : > { %v4971_v20 = vadd.f32 %v16057_v47, %v12585_v11 }
 0x8a1   : > { %v5063_v46 = vpop.permute.xlu1 %5062  ;;  %v4965_v63 = vpop.f32.mrf.mxu0 }
 0x8a2   : > { %v4966_v58 = vadd.f32 %v16057_v47, %v4965_v63 }
 0x8a4   : > { %v5061_v9 = vpop.permute.xlu0 %5060 }
 0x8a5   : > { %12615 = vmatprep.mubr.msk.f32.mxu1 %vm892_vm7, %v5061_v9 }
 0x8a6   : > { %12616 = vmatmul.mubr.msk.f32.vlgmr.msra.gmra.mxu1 %vm892_vm7, %v5063_v46 }
 0x8a7   : > { %12672 = vmatpush3.msra.mxu1 %v13799_v7  ;;  %v5067_v62 = vpop.permute.xlu1 %5066 }
 0x8a8   : > { %12673 = vmatprep.subr.mxu1 %v13800_v32 }
 0x8a9   : > { %v5065_v37 = vpop.permute.xlu0 %5064  ;;  %12674 = vmatpush3.msra.mxu1 %v13800_v32 }
 0x8aa   : > { %12618 = vmatprep.mubr.msk.f32.mxu1 %vm892_vm7, %v5065_v37  ;;  %12675 = vmatprep.subr.mxu1 %v13801_v50 }
 0x8ab   : > { %12619 = vmatmul.mubr.msk.f32.gmra.mxu1 %vm892_vm7, %v5067_v62 }
 0x8ac   : > { %12676 = vmatpush3.msra.mxu1 %v13801_v50 }
 0x8ad   : > { %12677 = vmatprep.subr.mxu1 %v13802_v22 }
 0x8ae   : > { %12678 = vmatpush3.msra.mxu1 %v13802_v22  ;;  %v5071_v60 = vpop.permute.xlu1 %5070 }
 0x8af   : > { %12735 = vmatprep.subr.mxu1 %v13799_v7 }
 0x8b0   : > { %v5069_v34 = vpop.permute.xlu0 %5068 }
 0x8b1   : > { %12621 = vmatprep.mubr.msk.f32.mxu1 %vm892_vm7, %v5069_v34 }
 0x8b2   : > { %12622 = vmatmul.mubr.msk.f32.gmra.mxu1 %vm892_vm7, %v5071_v60 }
 0x8b6   : > { %v5075_v6 = vpop.permute.xlu1 %5074 }
 0x8b8   : > { %v5073_v28 = vpop.permute.xlu0 %5072 }
 0x8b9   : > { %12624 = vmatprep.mubr.msk.f32.mxu1 %vm892_vm7, %v5073_v28 }
 0x8ba   : > { %v5079_v0 = vpop.permute.xlu1 %5078  ;;  %12625 = vmatmul.mubr.msk.f32.gmra.mxu1 %vm892_vm7, %v5075_v6 }
 0x8bc   : > { %v5077_v16 = vpop.permute.xlu0 %5076 }
 0x8bd   : > { %12627 = vmatprep.mubr.msk.f32.mxu1 %vm892_vm7, %v5077_v16 }
 0x8be   : > { %12628 = vmatmul.mubr.msk.f32.gmra.mxu1 %vm892_vm7, %v5079_v0 }
 0x8bf   : > { %v5083_v45 = vpop.permute.xlu1 %5082 }
 0x8c1   : > { %v5081_v30 = vpop.permute.xlu0 %5080 }
 0x8c2   : > { %12630 = vmatprep.mubr.msk.f32.mxu1 %vm892_vm7, %v5081_v30 }
 0x8c3   : > { %12631 = vmatmul.mubr.msk.f32.gmra.mxu1 %vm892_vm7, %v5083_v45  ;;  %v5087_v27 = vpop.permute.xlu1 %5086 }
 0x8c5   : > { %v5085_v26 = vpop.permute.xlu0 %5084 }
 0x8c6   : > { %12633 = vmatprep.mubr.msk.f32.mxu1 %vm892_vm7, %v5085_v26 }
 0x8c7   : > { %12634 = vmatmul.mubr.msk.f32.gmra.mxu1 %vm892_vm7, %v5087_v27  ;;  %v5091_v35 = vpop.permute.xlu1 %5090 }
 0x8c9   : > { %v5089_v24 = vpop.permute.xlu0 %5088 }
 0x8ca   : > { %12636 = vmatprep.mubr.msk.f32.mxu1 %vm892_vm7, %v5089_v24 }
 0x8cb   : > { %12637 = vmatmul.mubr.msk.f32.gmra.mxu1 %vm892_vm7, %v5091_v35 }
 0x8f4   : > { %v12588_v54 = vpop.f32.mrf.mxu0 }
 0x8f5   : > { %v4981_v39 = vadd.f32 %v16057_v47, %v12588_v54 }
 0x8f6   : > { %v4975_v8 = vpop.f32.mrf.mxu0 }
 0x8f7   : > { %v4976_v23 = vadd.f32 %v16057_v47, %v4975_v8 }
 0x8fc   : > { %v12591_v41 = vpop.f32.mrf.mxu0 }
 0x8fd   : > { %v4991_v18 = vadd.f32 %v16057_v47, %v12591_v41 }
 0x8fe   : > { %v4985_v25 = vpop.f32.mrf.mxu0 }
 0x8ff   : > { %v4986_v9 = vadd.f32 %v16057_v47, %v4985_v25 }
 0x905   : > { %v12594_v12 = vpop.f32.mrf.mxu0 }
 0x906   : > { %v5001_v60 = vadd.f32 %v16057_v47, %v12594_v12 }
 0x907   : > { %v4995_v3 = vpop.f32.mrf.mxu0 }
 0x908   : > { %v4996_v16 = vadd.f32 %v16057_v47, %v4995_v3 }
 0x90c   : > { %v12597_v61 = vpop.f32.mrf.mxu0 }
 0x90d   : > { %v5011_v24 = vadd.f32 %v16057_v47, %v12597_v61 }
 0x90e   : > { %v5005_v29 = vpop.f32.mrf.mxu0 }
 0x90f   : > { %v5006_v41 = vadd.f32 %v16057_v47, %v5005_v29 }
 0x916   : > { %v12600_v37 = vpop.f32.mrf.mxu0 }
 0x918   : > { %v5015_v6 = vpop.f32.mrf.mxu0 }
 0x91d   : > { %v12603_v35 = vpop.f32.mrf.mxu0 }
 0x966   : > { %v12617_v1 = vpop.f32.mrf.mxu1 }
 0x967   : > { %v5270_v48 = vadd.f32 %v12617_v1, %v4971_v20 }
 0x968   : > { %v5190_v17 = vpop.f32.mrf.mxu1 }
 0x969   : > { %v11737_v38 = vmul.f32 -1.442695, %v5270_v48  ;;  %v5269_v53 = vadd.f32 %v5190_v17, %v4966_v58  ;;  %v5025_v48 = vpop.f32.mrf.mxu0 }
 0x96b   : > { %13233 = vpow2.f32 %v11737_v38  ;;  %v11736_v19 = vmul.f32 -1.442695, %v5269_v53  ;;  %v12620_v21 = vpop.f32.mrf.mxu1  ;;  %v12606_v61 = vpop.f32.mrf.mxu0 }
 0x96c   : > { %v5272_v13 = vadd.f32 %v12620_v21, %v4981_v39  ;;  %v5021_v39 = vadd.f32 %v16057_v47, %v12600_v37 }
 0x96d   : > { %13235 = vpow2.f32 %v11736_v19  ;;  %v5200_v4 = vpop.f32.mrf.mxu1 }
 0x96e   : > { %v11739_v14 = vmul.f32 -1.442695, %v5272_v13  ;;  %v5271_v59 = vadd.f32 %v5200_v4, %v4976_v23  ;;  %v5016_v23 = vadd.f32 %v16057_v47, %v5015_v6 }
 0x970   : > { %13237 = vpow2.f32 %v11739_v14  ;;  %v11738_v46 = vmul.f32 -1.442695, %v5271_v59  ;;  %v5031_v14 = vadd.f32 %v16057_v47, %v12603_v35 }
 0x972   : > { %13239 = vpow2.f32 %v11738_v46  ;;  %v12623_v7 = vpop.f32.mrf.mxu1 }
 0x973   : > { %v5274_v32 = vadd.f32 %v12623_v7, %v4991_v18  ;;  %v5026_v7 = vadd.f32 %v16057_v47, %v5025_v48 }
 0x974   : > { %v5210_v62 = vpop.f32.mrf.mxu1 }
 0x975   : > { %v11741_v50 = vmul.f32 -1.442695, %v5274_v32  ;;  %v5273_v22 = vadd.f32 %v5210_v62, %v4986_v9  ;;  %v5035_v62 = vpop.f32.mrf.mxu0 }
 0x977   : > { %13241 = vpow2.f32 %v11741_v50  ;;  %v11740_v34 = vmul.f32 -1.442695, %v5273_v22 }
 0x978   : > { %v13234_v28 = vpop.eup %13233 }
 0x979   : > { %v5334_v0 = vadd.f32 1.0, %v13234_v28  ;;  %13243 = vpow2.f32 %v11740_v34  ;;  %v5041_v34 = vadd.f32 %v16057_v47, %v12606_v61 }
 0x97a   : > { %v13236_v45 = vpop.eup %13235  ;;  %v12626_v30 = vpop.f32.mrf.mxu1 }
 0x97b   : > { %13245 = vrcp.f32 %v5334_v0  ;;  %v5333_v27 = vadd.f32 1.0, %v13236_v45  ;;  %v5276_v26 = vadd.f32 %v12626_v30, %v5001_v60  ;;  %v5036_v30 = vadd.f32 %v16057_v47, %v5035_v62 }
 0x97c   : > { %v5220_v11 = vpop.f32.mrf.mxu1 }
 0x97d   : > { %v13238_v63 = vpop.eup %13237  ;;  %13247 = vrcp.f32 %v5333_v27  ;;  %v11743_v54 = vmul.f32 -1.442695, %v5276_v26  ;;  %v5275_v8 = vadd.f32 %v5220_v11, %v4996_v16 }
 0x97e   : > { %v5336_v25 = vadd.f32 1.0, %v13238_v63  ;;  %v12629_v20 = vpop.f32.mrf.mxu1 }
 0x97f   : > { %v13240_v12 = vpop.eup %13239  ;;  %13249 = vpow2.f32 %v11743_v54  ;;  %v11742_v1 = vmul.f32 -1.442695, %v5275_v8  ;;  %v5278_v58 = vadd.f32 %v12629_v20, %v5011_v24 }
 0x980   : > { %13251 = vrcp.f32 %v5336_v25  ;;  %v5335_v3 = vadd.f32 1.0, %v13240_v12  ;;  %v5230_v17 = vpop.f32.mrf.mxu1 }
 0x981   : > { %13253 = vpow2.f32 %v11742_v1  ;;  %v11745_v38 = vmul.f32 -1.442695, %v5278_v58  ;;  %v5277_v53 = vadd.f32 %v5230_v17, %v5006_v41 }
 0x982   : > { %13255 = vrcp.f32 %v5335_v3 }
 0x983   : > { %13257 = vpow2.f32 %v11745_v38  ;;  %v11744_v19 = vmul.f32 -1.442695, %v5277_v53  ;;  %v12632_v21 = vpop.f32.mrf.mxu1 }
 0x984   : > { %v13242_v13 = vpop.eup %13241  ;;  %v5280_v4 = vadd.f32 %v12632_v21, %v5021_v39 }
 0x985   : > { %v5338_v59 = vadd.f32 1.0, %v13242_v13  ;;  %13259 = vpow2.f32 %v11744_v19  ;;  %v5240_v18 = vpop.f32.mrf.mxu1 }
 0x986   : > { %v13244_v29 = vpop.eup %13243  ;;  %v11747_v46 = vmul.f32 -1.442695, %v5280_v4  ;;  %v5279_v9 = vadd.f32 %v5240_v18, %v5016_v23 }
 0x987   : > { %13261 = vrcp.f32 %v5338_v59  ;;  %v5337_v32 = vadd.f32 1.0, %v13244_v29  ;;  %v12635_v37 = vpop.f32.mrf.mxu1 }
 0x988   : > { %v13246_v50 = vpop.eup %13245  ;;  %13263 = vpow2.f32 %v11747_v46  ;;  %v11746_v22 = vmul.f32 -1.442695, %v5279_v9  ;;  %v5282_v60 = vadd.f32 %v12635_v37, %v5031_v14 }
 0x989   : > { %13265 = vrcp.f32 %v5337_v32  ;;  %v5250_v6 = vpop.f32.mrf.mxu1  ;;  %v5382_v28 = vmul.f32 2.0, %v13246_v50 }
 0x98a   : > { %v13248_v0 = vpop.eup %13247  ;;  %13267 = vpow2.f32 %v11746_v22  ;;  %v11749_v16 = vmul.f32 -1.442695, %v5282_v60  ;;  %v5281_v45 = vadd.f32 %v5250_v6, %v5026_v7 }
 0x98b   : > { %v12638_v27 = vpop.f32.mrf.mxu1  ;;  %v11753_v26 = vadd.f32 -1.0, %v5382_v28  ;;  %v5381_v24 = vmul.f32 2.0, %v13248_v0 }
 0x98c   : > { %v13250_v35 = vpop.eup %13249  ;;  %13269 = vpow2.f32 %v11749_v16  ;;  %v11748_v11 = vmul.f32 -1.442695, %v5281_v45  ;;  %v5284_v63 = vadd.f32 %v12638_v27, %v5041_v34 }
 0x98d   : > { %v13252_v54 = vpop.eup %13251  ;;  %v5340_v8 = vadd.f32 1.0, %v13250_v35  ;;  %v5260_v41 = vpop.f32.mrf.mxu1  ;;  %v16077_v25 = vsel %vm14321_vm10, %v11753_v26, %v13246_v50  ;;  %v11752_v20 = vadd.f32 -1.0, %v5381_v24 }
 0x98e   : > { %v13254_v12 = vpop.eup %13253  ;;  %13271 = vpow2.f32 %v11748_v11  ;;  %v11751_v1 = vmul.f32 -1.442695, %v5284_v63  ;;  %v5283_v58 = vadd.f32 %v5260_v41, %v5036_v30  ;;  %5463 = vrot.lane.b32.xlu1 %v16077_v25, %s13840_s14  ;;  %v5384_v47 = vmul.f32 2.0, %v13252_v54 }
 0x98f   : > { %v13256_v48 = vpop.eup %13255  ;;  %13273 = vrcp.f32 %v5340_v8  ;;  %v5339_v3 = vadd.f32 1.0, %v13254_v12  ;;  %v16083_v39 = vsel %vm14321_vm10, %v11752_v20, %v13248_v0 }
 0x990   : > { %v13258_v17 = vpop.eup %13257  ;;  %13275 = vpow2.f32 %v11751_v1  ;;  %v11750_v38 = vmul.f32 -1.442695, %v5283_v58  ;;  %5461 = vrot.lane.b32.xlu0 %v16083_v39, %s13840_s14  ;;  %v11755_v53 = vadd.f32 -1.0, %v5384_v47  ;;  %v5383_v23 = vmul.f32 2.0, %v13256_v48 }
 0x991   : > { %13277 = vrcp.f32 %v5339_v3  ;;  %v5342_v19 = vadd.f32 1.0, %v13258_v17 }
 0x992   : > { %v13260_v21 = vpop.eup %13259  ;;  %13279 = vpow2.f32 %v11750_v38  ;;  %v16089_v61 = vsel %vm14321_vm10, %v11755_v53, %v13252_v54  ;;  %v11754_v13 = vadd.f32 -1.0, %v5383_v23 }
 0x993   : > { %13281 = vrcp.f32 %v5342_v19  ;;  %v5341_v4 = vadd.f32 1.0, %v13260_v21  ;;  %5467 = vrot.lane.b32.xlu1 %v16089_v61, %s13840_s14 }
 0x994   : > { %v13262_v14 = vpop.eup %13261  ;;  %v16095_v59 = vsel %vm14321_vm10, %v11754_v13, %v13256_v48 }
 0x995   : > { %v13264_v18 = vpop.eup %13263  ;;  %13283 = vrcp.f32 %v5341_v4  ;;  %5465 = vrot.lane.b32.xlu0 %v16095_v59, %s13840_s14  ;;  %v5386_v29 = vmul.f32 2.0, %v13262_v14 }
 0x996   : > { %v13266_v46 = vpop.eup %13265  ;;  %v5344_v9 = vadd.f32 1.0, %v13264_v18 }
 0x997   : > { %v13268_v7 = vpop.eup %13267  ;;  %v11757_v32 = vadd.f32 -1.0, %v5386_v29  ;;  %v5385_v37 = vmul.f32 2.0, %v13266_v46 }
 0x998   : > { %13285 = vrcp.f32 %v5344_v9  ;;  %v5343_v62 = vadd.f32 1.0, %v13268_v7 }
 0x999   : > { %v13270_v50 = vpop.eup %13269  ;;  %v16101_v22 = vsel %vm14321_vm10, %v11757_v32, %v13262_v14  ;;  %v11756_v60 = vadd.f32 -1.0, %v5385_v37 }
 0x99a   : > { %13287 = vrcp.f32 %v5343_v62  ;;  %v5346_v34 = vadd.f32 1.0, %v13270_v50  ;;  %5471 = vrot.lane.b32.xlu1 %v16101_v22, %s13840_s14 }
 0x99b   : > { %v13272_v6 = vpop.eup %13271  ;;  %v16107_v28 = vsel %vm14321_vm10, %v11756_v60, %v13266_v46 }
 0x99c   : > { %v13274_v0 = vpop.eup %13273  ;;  %13289 = vrcp.f32 %v5346_v34  ;;  %v5345_v16 = vadd.f32 1.0, %v13272_v6  ;;  %5469 = vrot.lane.b32.xlu0 %v16107_v28, %s13840_s14 }
 0x99d   : > { %v13276_v45 = vpop.eup %13275  ;;  %v5388_v30 = vmul.f32 2.0, %v13274_v0 }
 0x99e   : > { %v13278_v27 = vpop.eup %13277  ;;  %13291 = vrcp.f32 %v5345_v16  ;;  %v5348_v26 = vadd.f32 1.0, %v13276_v45 }
 0x99f   : > { %v13280_v24 = vpop.eup %13279  ;;  %v11759_v35 = vadd.f32 -1.0, %v5388_v30  ;;  %v5387_v11 = vmul.f32 2.0, %v13278_v27 }
 0x9a0   : > { %v13282_v63 = vpop.eup %13281  ;;  %13293 = vrcp.f32 %v5348_v26  ;;  %v5347_v54 = vadd.f32 1.0, %v13280_v24 }
 0x9a1   : > { %v16113_v8 = vsel %vm14321_vm10, %v11759_v35, %v13274_v0  ;;  %v11758_v41 = vadd.f32 -1.0, %v5387_v11  ;;  %v5390_v20 = vmul.f32 2.0, %v13282_v63 }
 0x9a2   : > { %v13284_v12 = vpop.eup %13283  ;;  %13295 = vrcp.f32 %v5347_v54  ;;  %5475 = vrot.lane.b32.xlu1 %v16113_v8, %s13840_s14 }
 0x9a3   : > { %v16119_v1 = vsel %vm14321_vm10, %v11758_v41, %v13278_v27  ;;  %v11761_v58 = vadd.f32 -1.0, %v5390_v20  ;;  %v5389_v47 = vmul.f32 2.0, %v13284_v12 }
 0x9a4   : > { %5473 = vrot.lane.b32.xlu0 %v16119_v1, %s13840_s14 }
 0x9a5   : > { %v13286_v48 = vpop.eup %13285  ;;  %v16125_v3 = vsel %vm14321_vm10, %v11761_v58, %v13282_v63  ;;  %v11760_v17 = vadd.f32 -1.0, %v5389_v47 }
 0x9a6   : > { %5479 = vrot.lane.b32.xlu1 %v16125_v3, %s13840_s14  ;;  %v5392_v38 = vmul.f32 2.0, %v13286_v48 }
 0x9a7   : > { %v13288_v53 = vpop.eup %13287  ;;  %v16131_v23 = vsel %vm14321_vm10, %v11760_v17, %v13284_v12 }
 0x9a8   : > { %5477 = vrot.lane.b32.xlu0 %v16131_v23, %s13840_s14  ;;  %v11763_v19 = vadd.f32 -1.0, %v5392_v38  ;;  %v5391_v21 = vmul.f32 2.0, %v13288_v53 }
 0x9a9   : > { %v13290_v13 = vpop.eup %13289 }
 0x9aa   : > { %v16137_v4 = vsel %vm14321_vm10, %v11763_v19, %v13286_v48  ;;  %v11762_v14 = vadd.f32 -1.0, %v5391_v21  ;;  %v5394_v18 = vmul.f32 2.0, %v13290_v13 }
 0x9ab   : > { %v13292_v29 = vpop.eup %13291  ;;  %5483 = vrot.lane.b32.xlu1 %v16137_v4, %s13840_s14 }
 0x9ac   : > { %v16143_v46 = vsel %vm14321_vm10, %v11762_v14, %v13288_v53  ;;  %v11765_v9 = vadd.f32 -1.0, %v5394_v18  ;;  %v5393_v7 = vmul.f32 2.0, %v13292_v29 }
 0x9ad   : > { %v13294_v32 = vpop.eup %13293  ;;  %5481 = vrot.lane.b32.xlu0 %v16143_v46, %s13840_s14 }
 0x9ae   : > { %v16149_v37 = vsel %vm14321_vm10, %v11765_v9, %v13290_v13  ;;  %v11764_v62 = vadd.f32 -1.0, %v5393_v7  ;;  %v5396_v50 = vmul.f32 2.0, %v13294_v32 }
 0x9af   : > { %v13296_v60 = vpop.eup %13295  ;;  %5487 = vrot.lane.b32.xlu1 %v16149_v37, %s13840_s14 }
 0x9b0   : > { %v16155_v34 = vsel %vm14321_vm10, %v11764_v62, %v13292_v29  ;;  %v11767_v6 = vadd.f32 -1.0, %v5396_v50  ;;  %v5395_v0 = vmul.f32 2.0, %v13296_v60 }
 0x9b1   : > { %5485 = vrot.lane.b32.xlu0 %v16155_v34, %s13840_s14 }
 0x9b2   : > { %v16161_v16 = vsel %vm14321_vm10, %v11767_v6, %v13294_v32  ;;  %v11766_v45 = vadd.f32 -1.0, %v5395_v0 }
 0x9b3   : > { %5491 = vrot.lane.b32.xlu1 %v16161_v16, %s13840_s14 }
 0x9b4   : > { %v16167_v30 = vsel %vm14321_vm10, %v11766_v45, %v13296_v60 }
 0x9b5   : > { %5489 = vrot.lane.b32.xlu0 %v16167_v30, %s13840_s14 }
 0xa00   : > { %v5464_v27 = vpop.permute.xlu1 %5463 }
 0xa01   : > { %v5510_v26 = vmul.f32 %v5464_v27, %v16077_v25 }
 0xa02   : > { %v5462_v24 = vpop.permute.xlu0 %5461 }
 0xa03   : > { %v5509_v35 = vmul.f32 %v5462_v24, %v16083_v39  ;;  %5543 = vrot.lane.b32.xlu1 %v5510_v26, %s13841_s18  ;;  %v5430_v26 = vmul.f32 %v16077_v25, %v15632_v44  ;;  %v5431_v44 = vmul.f32 %v16095_v59, %v15647_v52 }
 0xa05   : > { %v5468_v11 = vpop.permute.xlu1 %5467  ;;  %5541 = vrot.lane.b32.xlu0 %v5509_v35, %s13841_s18 }
 0xa06   : > { %v5512_v63 = vmul.f32 %v5468_v11, %v16089_v61  ;;  %v5429_v11 = vmul.f32 %v16083_v39, %v15637_v51 }
 0xa07   : > { %v5466_v54 = vpop.permute.xlu0 %5465 }
 0xa08   : > { %v5511_v41 = vmul.f32 %v5466_v54, %v16095_v59  ;;  %5547 = vrot.lane.b32.xlu1 %v5512_v63, %s13841_s18 }
 0xa0a   : > { %5545 = vrot.lane.b32.xlu0 %v5511_v41, %s13841_s18  ;;  %v5432_v41 = vmul.f32 %v16089_v61, %v15642_v10 }
 0xa0c   : > { %v5472_v20 = vpop.permute.xlu1 %5471 }
 0xa0d   : > { %v5514_v12 = vmul.f32 %v5472_v20, %v16101_v22 }
 0xa0e   : > { %v5470_v58 = vpop.permute.xlu0 %5469 }
 0xa0f   : > { %v5513_v47 = vmul.f32 %v5470_v58, %v16107_v28  ;;  %5551 = vrot.lane.b32.xlu1 %v5514_v12, %s13841_s18 }
 0xa11   : > { %5549 = vrot.lane.b32.xlu0 %v5513_v47, %s13841_s18  ;;  %v5434_v47 = vmul.f32 %v16101_v22, %v15652_v56  ;;  %v5436_v56 = vmul.f32 %v16113_v8, %v15664_v2  ;;  %v5438_v2 = vmul.f32 %v16125_v3, %v15676_v33 }
 0xa14   : > { %v5476_v48 = vpop.permute.xlu1 %5475 }
 0xa15   : > { %v5516_v17 = vmul.f32 %v5476_v48, %v16113_v8 }
 0xa16   : > { %v5474_v38 = vpop.permute.xlu0 %5473 }
 0xa17   : > { %v5515_v53 = vmul.f32 %v5474_v38, %v16119_v1  ;;  %5555 = vrot.lane.b32.xlu1 %v5516_v17, %s13841_s18  ;;  %v5433_v17 = vmul.f32 %v16107_v28, %v15657_v43  ;;  %v5435_v43 = vmul.f32 %v16119_v1, %v15670_v5  ;;  %v5437_v5 = vmul.f32 %v16131_v23, %v15681_v31 }
 0xa18   : > { %v5480_v19 = vpop.permute.xlu1 %5479  ;;  %v5439_v31 = vmul.f32 %v16143_v46, %v15693_v40 }
 0xa19   : > { %v5518_v21 = vmul.f32 %v5480_v19, %v16125_v3  ;;  %5553 = vrot.lane.b32.xlu0 %v5515_v53, %s13841_s18 }
 0xa1a   : > { %v5478_v13 = vpop.permute.xlu0 %5477 }
 0xa1b   : > { %v5517_v14 = vmul.f32 %v5478_v13, %v16131_v23  ;;  %5559 = vrot.lane.b32.xlu1 %v5518_v21, %s13841_s18 }
 0xa1d   : > { %v5484_v18 = vpop.permute.xlu1 %5483  ;;  %5557 = vrot.lane.b32.xlu0 %v5517_v14, %s13841_s18 }
 0xa1e   : > { %v5520_v29 = vmul.f32 %v5484_v18, %v16137_v4 }
 0xa1f   : > { %v5482_v9 = vpop.permute.xlu0 %5481 }
 0xa20   : > { %v5519_v7 = vmul.f32 %v5482_v9, %v16143_v46  ;;  %5563 = vrot.lane.b32.xlu1 %v5520_v29, %s13841_s18 }
 0xa21   : > { %v5488_v32 = vpop.permute.xlu1 %5487 }
 0xa22   : > { %v5522_v62 = vmul.f32 %v5488_v32, %v16149_v37  ;;  %5561 = vrot.lane.b32.xlu0 %v5519_v7, %s13841_s18 }
 0xa23   : > { %v5486_v50 = vpop.permute.xlu0 %5485 }
 0xa24   : > { %v5521_v60 = vmul.f32 %v5486_v50, %v16155_v34  ;;  %5567 = vrot.lane.b32.xlu1 %v5522_v62, %s13841_s18 }
 0xa25   : > { %v5492_v6 = vpop.permute.xlu1 %5491 }
 0xa26   : > { %v5524_v0 = vmul.f32 %v5492_v6, %v16161_v16  ;;  %5565 = vrot.lane.b32.xlu0 %v5521_v60, %s13841_s18  ;;  %v5440_v6 = vmul.f32 %v16137_v4, %v15687_v49  ;;  %v5442_v49 = vmul.f32 %v16149_v37, %v15698_v15 }
 0xa27   : > { %v5490_v45 = vpop.permute.xlu0 %5489 }
 0xa28   : > { %v5523_v27 = vmul.f32 %v5490_v45, %v16167_v30  ;;  %5571 = vrot.lane.b32.xlu1 %v5524_v0, %s13841_s18 }
 0xa2a   : > { %5569 = vrot.lane.b32.xlu0 %v5523_v27, %s13841_s18 }
 0xa75   : > { %v5544_v24 = vpop.permute.xlu1 %5543 }
 0xa76   : > { %v16205_v35 = vadd.f32 %v5544_v24, %v5430_v26 }
 0xa77   : > { %v5542_v63 = vpop.permute.xlu0 %5541 }
 0xa78   : > { %13297 = vtanh.f32 %v16205_v35  ;;  %v16210_v54 = vadd.f32 %v5542_v63, %v5429_v11  ;;  %v5441_v63 = vmul.f32 %v16155_v34, %v15703_v36  ;;  %v5443_v36 = vmul.f32 %v16167_v30, %v15715_v42 }
 0xa7a   : > { %13299 = vtanh.f32 %v16210_v54  ;;  %v5548_v20 = vpop.permute.xlu1 %5547 }
 0xa7b   : > { %v16215_v12 = vadd.f32 %v5548_v20, %v5432_v41 }
 0xa7c   : > { %v5546_v58 = vpop.permute.xlu0 %5545 }
 0xa7d   : > { %13301 = vtanh.f32 %v16215_v12  ;;  %v16220_v51 = vadd.f32 %v5546_v58, %v5431_v44  ;;  %v5444_v44 = vmul.f32 %v16161_v16, %v15709_v57 }
 0xa7f   : > { %13303 = vtanh.f32 %v16220_v51 }
 0xa81   : > { %v5552_v48 = vpop.permute.xlu1 %5551 }
 0xa82   : > { %v16225_v10 = vadd.f32 %v5552_v48, %v5434_v47 }
 0xa83   : > { %v5550_v38 = vpop.permute.xlu0 %5549 }
 0xa84   : > { %13305 = vtanh.f32 %v16225_v10  ;;  %v16230_v52 = vadd.f32 %v5550_v38, %v5433_v17 }
 0xa85   : > { %v13298_v53 = vpop.eup %13297 }
 0xa86   : > { %13307 = vtanh.f32 %v16230_v52  ;;  %5639 = vrot.lane.b32.xlu1 %v13298_v53, %s13840_s14  ;;  %v5701_v53 = vld [vmem:[%s13931_s19 + $0x4] sm:$0x1] }
 0xa87   : > { %v13300_v19 = vpop.eup %13299 }
 0xa88   : > { %5637 = vrot.lane.b32.xlu0 %v13300_v19, %s13840_s14  ;;  %v5702_v19 = vld [vmem:[%s13931_s19 + $0xc] sm:$0x1] }
 0xa89   : > { %v5556_v21 = vpop.permute.xlu1 %5555 }
 0xa8a   : > { %v13302_v13 = vpop.eup %13301  ;;  %v16237_v14 = vadd.f32 %v5556_v21, %v5436_v56  ;;  %v5703_v56 = vld [vmem:[%s13931_s19 + $0x14] sm:$0x1]  ;;  %v5704_v21 = vld [vmem:[%s13931_s19 + $0x1c] sm:$0x1] }
 0xa8b   : > { %v5554_v18 = vpop.permute.xlu0 %5553  ;;  %5643 = vrot.lane.b32.xlu1 %v13302_v13, %s13840_s14  ;;  %v5705_v13 = vld [vmem:[%s13931_s19 + $0x24] sm:$0x1] }
 0xa8c   : > { %v13304_v29 = vpop.eup %13303  ;;  %13309 = vtanh.f32 %v16237_v14  ;;  %v16243_v9 = vadd.f32 %v5554_v18, %v5435_v43  ;;  %v5706_v43 = vld [vmem:[%s13931_s19 + $0x2c] sm:$0x1] }
 0xa8d   : > { %v5560_v7 = vpop.permute.xlu1 %5559  ;;  %5641 = vrot.lane.b32.xlu0 %v13304_v29, %s13840_s14  ;;  %v5707_v29 = vld [vmem:[%s13931_s19 + $0x34] sm:$0x1] }
 0xa8e   : > { %13311 = vtanh.f32 %v16243_v9  ;;  %v16249_v32 = vadd.f32 %v5560_v7, %v5438_v2  ;;  %v5957_v2 = vrot.slane %v5702_v19, 7  ;;  %v5959_v7 = vrot.slane %v5703_v56, 6 }
 0xa8f   : > { %v5558_v62 = vpop.permute.xlu0 %5557 }
 0xa90   : > { %13313 = vtanh.f32 %v16249_v32  ;;  %v16254_v50 = vadd.f32 %v5558_v62, %v5437_v5  ;;  %v5708_v5 = vld [vmem:[%s13931_s19 + $0x3c] sm:$0x1]  ;;  %v5961_v62 = vrot.slane %v5704_v21, 5 }
 0xa91   : > { %v13306_v60 = vpop.eup %13305 }
 0xa92   : > { %13315 = vtanh.f32 %v16254_v50  ;;  %v5564_v33 = vpop.permute.xlu1 %5563  ;;  %5647 = vrot.lane.b32.xlu1 %v13306_v60, %s13840_s14  ;;  %v5963_v60 = vrot.slane %v5705_v13, 4 }
 0xa93   : > { %v13308_v0 = vpop.eup %13307  ;;  %v16260_v45 = vadd.f32 %v5564_v33, %v5440_v6  ;;  %v5965_v6 = vrot.slane %v5706_v43, 3  ;;  %v5967_v33 = vrot.slane %v5707_v29, 2 }
 0xa94   : > { %v5562_v27 = vpop.permute.xlu0 %5561  ;;  %5645 = vrot.lane.b32.xlu0 %v13308_v0, %s13840_s14 }
 0xa95   : > { %13317 = vtanh.f32 %v16260_v45  ;;  %v16266_v26 = vadd.f32 %v5562_v27, %v5439_v31  ;;  %v5958_v31 = vsel %vm662_vm0, %v5957_v2, %v5701_v53  ;;  %v5709_v27 = vld [vmem:[%s13931_s19 + $0x44] sm:$0x1]  ;;  %v5716_v53 = vld [vmem:[%s13931_s19 + $0x7c] sm:$0x1] }
 0xa96   : > { %v5568_v24 = vpop.permute.xlu1 %5567 }
 0xa97   : > { %13319 = vtanh.f32 %v16266_v26  ;;  %v16271_v11 = vadd.f32 %v5568_v24, %v5442_v49  ;;  %v5710_v49 = vld [vmem:[%s13931_s19 + $0x4c] sm:$0x1]  ;;  %v5711_v24 = vld [vmem:[%s13931_s19 + $0x54] sm:$0x1] }
 0xa98   : > { %v5566_v41 = vpop.permute.xlu0 %5565 }
 0xa99   : > { %v13310_v40 = vpop.eup %13309  ;;  %13321 = vtanh.f32 %v16271_v11  ;;  %v16276_v20 = vadd.f32 %v5566_v41, %v5441_v63  ;;  %v5960_v63 = vsel %vm665_vm1, %v5959_v7, %v5958_v31  ;;  %v5712_v41 = vld [vmem:[%s13931_s19 + $0x5c] sm:$0x1] }
 0xa9a   : > { %v5572_v58 = vpop.permute.xlu1 %5571  ;;  %5651 = vrot.lane.b32.xlu1 %v13310_v40, %s13840_s14  ;;  %v5713_v40 = vld [vmem:[%s13931_s19 + $0x64] sm:$0x1]  ;;  %v5975_v19 = vrot.slane %v5712_v41, 5 }
 0xa9b   : > { %v13312_v15 = vpop.eup %13311  ;;  %13323 = vtanh.f32 %v16276_v20  ;;  %v16282_v47 = vadd.f32 %v5572_v58, %v5444_v44  ;;  %v5714_v44 = vld [vmem:[%s13931_s19 + $0x6c] sm:$0x1]  ;;  %v5977_v56 = vrot.slane %v5713_v40, 4  ;;  %v13807_v41 = vld [vmem:[%s18800_s1] sm:$0xff] }
 0xa9c   : > { %v5570_v48 = vpop.permute.xlu0 %5569  ;;  %5649 = vrot.lane.b32.xlu0 %v13312_v15, %s13840_s14  ;;  %v5962_v15 = vsel %vm668_vm2, %v5961_v62, %v5960_v63  ;;  %v13806_v63 = vld [vmem:[%s18800_s1 + $0x8] sm:$0xff]  ;;  %v5717_v40 = vld [vmem:[%s13931_s19 + $0x84] sm:$0x1] }
 0xa9d   : > { %v13314_v57 = vpop.eup %13313  ;;  %13325 = vtanh.f32 %v16282_v47  ;;  %v16288_v17 = vadd.f32 %v5570_v48, %v5443_v36  ;;  %v5969_v36 = vrot.slane %v5708_v5, 1  ;;  %v5715_v48 = vld [vmem:[%s13931_s19 + $0x74] sm:$0x1] }
 0xa9e   : > { %5655 = vrot.lane.b32.xlu1 %v13314_v57, %s13840_s14  ;;  %v5971_v57 = vrot.slane %v5710_v49, 7  ;;  %v5981_v7 = vrot.slane %v5715_v48, 2  ;;  %v13804_v49 = vld [vmem:[%s18800_s1 + $0x18] sm:$0xff]  ;;  %v5722_v48 = vld [vmem:[%s13931_s19 + $0xac] sm:$0x1] }
 0xa9f   : > { %v13316_v38 = vpop.eup %13315  ;;  %13327 = vtanh.f32 %v16288_v17 }
 0xaa0   : > { %5653 = vrot.lane.b32.xlu0 %v13316_v38, %s13840_s14  ;;  %v5973_v38 = vrot.slane %v5711_v24, 6  ;;  %v5972_v43 = vsel %vm662_vm0, %v5971_v57, %v5709_v27  ;;  %v13805_v24 = vld [vmem:[%s18800_s1 + $0x10] sm:$0xff] }
 0xaa1   : > { %v5723_v57 = vld [vmem:[%s13931_s19 + $0xb4] sm:$0x1] }
 0xaa2   : > { %v13318_v42 = vpop.eup %13317  ;;  %v5974_v2 = vsel %vm665_vm1, %v5973_v38, %v5972_v43  ;;  %v5724_v38 = vld [vmem:[%s13931_s19 + $0xbc] sm:$0x1] }
 0xaa3   : > { %5659 = vrot.lane.b32.xlu1 %v13318_v42, %s13840_s14  ;;  %v5964_v42 = vsel %vm671_vm3, %v5963_v60, %v5962_v15  ;;  %v5976_v60 = vsel %vm668_vm2, %v5975_v19, %v5974_v2  ;;  %v5720_v15 = vld [vmem:[%s13931_s19 + $0x9c] sm:$0x1]  ;;  %v5726_v2 = vld [vmem:[%s13931_s19 + $0xcc] sm:$0x1] }
 0xaa4   : > { %v13320_v18 = vpop.eup %13319  ;;  %v5966_v13 = vsel %vm674_vm4, %v5965_v6, %v5964_v42  ;;  %v5978_v6 = vsel %vm671_vm3, %v5977_v56, %v5976_v60  ;;  %v5989_v19 = vrot.slane %v5720_v15, 5  ;;  %v5729_v60 = vld [vmem:[%s13931_s19 + $0xe4] sm:$0x1]  ;;  %v5734_v15 = vld [vmem:[%s13931_s19 + $0x10c] sm:$0x1] }
 0xaa5   : > { %5657 = vrot.lane.b32.xlu0 %v13320_v18, %s13840_s14  ;;  %v5979_v18 = vrot.slane %v5714_v44, 3  ;;  %v5968_v29 = vsel %vm677_vm5, %v5967_v33, %v5966_v13  ;;  %v5718_v44 = vld [vmem:[%s13931_s19 + $0x8c] sm:$0x1]  ;;  %v5725_v13 = vld [vmem:[%s13931_s19 + $0xc4] sm:$0x1] }
 0xaa6   : > { %v13322_v0 = vpop.eup %13321  ;;  %v5970_v62 = vsel %vm680_vm6, %v5969_v36, %v5968_v29  ;;  %v5721_v36 = vld [vmem:[%s13931_s19 + $0xa4] sm:$0x1]  ;;  %v5985_v42 = vrot.slane %v5718_v44, 7  ;;  %v5997_v29 = vrot.slane %v5724_v38, 1  ;;  %v6005_v44 = vrot.slane %v5729_v60, 4 }
 0xaa7   : > { %5663 = vrot.lane.b32.xlu1 %v13322_v0, %s13840_s14  ;;  %v5983_v0 = vrot.slane %v5716_v53, 1  ;;  %12647 = vmatprep.mubr.msk.f32.mxu0 %vm892_vm7, %v5970_v62  ;;  %v5980_v31 = vsel %vm674_vm4, %v5979_v18, %v5978_v6  ;;  %v5991_v56 = vrot.slane %v5721_v36, 4  ;;  %v5995_v18 = vrot.slane %v5723_v57, 2  ;;  %v5728_v62 = vld [vmem:[%s13931_s19 + $0xdc] sm:$0x1] }
 0xaa8   : > { %v13324_v58 = vpop.eup %13323  ;;  %v5982_v33 = vsel %vm677_vm5, %v5981_v7, %v5980_v31  ;;  %v5986_v43 = vsel %vm662_vm0, %v5985_v42, %v5717_v40  ;;  %v5727_v7 = vld [vmem:[%s13931_s19 + $0xd4] sm:$0x1]  ;;  %v6003_v40 = vrot.slane %v5728_v62, 5  ;;  %v5740_v60 = vld [vmem:[%s13931_s19 + $0x13c] sm:$0x1] }
 0xaa9   : > { %5661 = vrot.lane.b32.xlu0 %v13324_v58, %s13840_s14  ;;  %v5984_v27 = vsel %vm680_vm6, %v5983_v0, %v5982_v33  ;;  %v5719_v58 = vld [vmem:[%s13931_s19 + $0x94] sm:$0x1]  ;;  %v5730_v0 = vld [vmem:[%s13931_s19 + $0xec] sm:$0x1] }
 0xaaa   : > { %v13326_v21 = vpop.eup %13325  ;;  %12648 = vmatmul.mubr.msk.f32.vlgmr.msra.gmra.mxu0 %vm892_vm7, %v5984_v27  ;;  %v5987_v53 = vrot.slane %v5719_v58, 6  ;;  %v5731_v33 = vld [vmem:[%s13931_s19 + $0xf4] sm:$0x1]  ;;  %v5732_v27 = vld [vmem:[%s13931_s19 + $0xfc] sm:$0x1]  ;;  %v6007_v38 = vrot.slane %v5730_v0, 3 }
 0xaab   : > { %5667 = vrot.lane.b32.xlu1 %v13326_v21, %s13840_s14  ;;  %12704 = vmatpush3.msra.mxu0 %v13804_v49  ;;  %v5993_v21 = vrot.slane %v5722_v48, 3  ;;  %v5733_v58 = vld [vmem:[%s13931_s19 + $0x104] sm:$0x1]  ;;  %v6009_v42 = vrot.slane %v5731_v33, 2  ;;  %v5739_v62 = vld [vmem:[%s13931_s19 + $0x134] sm:$0x1] }
 0xaac   : > { %v13328_v5 = vpop.eup %13327  ;;  %12705 = vmatprep.subr.mxu0 %v13805_v24  ;;  %v6013_v0 = vrot.slane %v5734_v15, 7  ;;  %v5743_v15 = vld [vmem:[%s13931_s19 + $0x154] sm:$0x1] }
 0xaad   : > { %5665 = vrot.lane.b32.xlu0 %v13328_v5, %s13840_s14  ;;  %12706 = vmatpush3.msra.mxu0 %v13805_v24  ;;  %v5988_v5 = vsel %vm665_vm1, %v5987_v53, %v5986_v43  ;;  %v6001_v24 = vrot.slane %v5727_v7, 6  ;;  %v5735_v53 = vld [vmem:[%s13931_s19 + $0x114] sm:$0x1]  ;;  %v5737_v7 = vld [vmem:[%s13931_s19 + $0x124] sm:$0x1] }
 0xaae   : > { %12707 = vmatprep.subr.mxu0 %v13806_v63  ;;  %v5990_v31 = vsel %vm668_vm2, %v5989_v19, %v5988_v5  ;;  %v5736_v19 = vld [vmem:[%s13931_s19 + $0x11c] sm:$0x1]  ;;  %v5738_v5 = vld [vmem:[%s13931_s19 + $0x12c] sm:$0x1]  ;;  %v6019_v33 = vrot.slane %v5737_v7, 4 }
 0xaaf   : > { %12708 = vmatpush3.msra.mxu0 %v13806_v63 }
 0xab0   : > { %12709 = vmatprep.subr.mxu0 %v13807_v41 }
 0xab1   : > { %12710 = vmatpush3.msra.mxu0 %v13807_v41  ;;  %v5992_v41 = vsel %vm671_vm3, %v5991_v56, %v5990_v31  ;;  %v6017_v31 = vrot.slane %v5736_v19, 5 }
 0xab2   : > { %12767 = vmatprep.subr.mxu0 %v13804_v49  ;;  %v5999_v49 = vrot.slane %v5726_v2, 7  ;;  %v5994_v48 = vsel %vm674_vm4, %v5993_v21, %v5992_v41  ;;  %v6011_v2 = vrot.slane %v5732_v27, 1  ;;  %v5741_v27 = vld [vmem:[%s13931_s19 + $0x144] sm:$0x1]  ;;  %v6023_v41 = vrot.slane %v5739_v62, 2 }
 0xab3   : > { %v5996_v56 = vsel %vm677_vm5, %v5995_v18, %v5994_v48  ;;  %v5750_v62 = vld [vmem:[%s13931_s19 + $0x18c] sm:$0x1] }
 0xab4   : > { %v6000_v57 = vsel %vm662_vm0, %v5999_v49, %v5725_v13  ;;  %v5998_v21 = vsel %vm680_vm6, %v5997_v29, %v5996_v56  ;;  %v6021_v29 = vrot.slane %v5738_v5, 3  ;;  %v5746_v56 = vld [vmem:[%s13931_s19 + $0x16c] sm:$0x1] }
 0xab5   : > { %v6002_v43 = vsel %vm665_vm1, %v6001_v24, %v6000_v57  ;;  %12650 = vmatprep.mubr.msk.f32.mxu0 %vm892_vm7, %v5998_v21  ;;  %v6025_v57 = vrot.slane %v5740_v60, 1  ;;  %v6029_v21 = vrot.slane %v5743_v15, 6  ;;  %v5754_v15 = vld [vmem:[%s13931_s19 + $0x1ac] sm:$0x1] }
 0xab6   : > { %v6004_v13 = vsel %vm668_vm2, %v6003_v40, %v6002_v43  ;;  %v5742_v40 = vld [vmem:[%s13931_s19 + $0x14c] sm:$0x1]  ;;  %v5747_v43 = vld [vmem:[%s13931_s19 + $0x174] sm:$0x1] }
 0xab7   : > { %v6006_v18 = vsel %vm671_vm3, %v6005_v44, %v6004_v13  ;;  %v6027_v19 = vrot.slane %v5742_v40, 7  ;;  %v5749_v13 = vld [vmem:[%s13931_s19 + $0x184] sm:$0x1] }
 0xab8   : > { %v6008_v24 = vsel %vm674_vm4, %v6007_v38, %v6006_v18 }
 0xab9   : > { %v6010_v44 = vsel %vm677_vm5, %v6009_v42, %v6008_v24  ;;  %v5748_v42 = vld [vmem:[%s13931_s19 + $0x17c] sm:$0x1]  ;;  %v6028_v5 = vsel %vm662_vm0, %v6027_v19, %v5741_v27  ;;  %v6041_v24 = vrot.slane %v5750_v62, 7  ;;  %v5757_v19 = vld [vmem:[%s13931_s19 + $0x1c4] sm:$0x1] }
 0xaba   : > { %v5752_v27 = vld [vmem:[%s13931_s19 + $0x19c] sm:$0x1] }
 0xaf8   : > { %v5640_v6 = vpop.permute.xlu1 %5639 }
 0xaf9   : > { %v5686_v63 = vmul.f32 %v5640_v6, %v16077_v25 }
 0xafa   : > { %v5638_v36 = vpop.permute.xlu0 %5637 }
 0xafb   : > { %v5685_v25 = vmul.f32 %v5638_v36, %v16083_v39  ;;  %6376 = vrot.lane.b32.xlu1 %v5686_v63, %s13841_s18  ;;  %v6015_v39 = vrot.slane %v5735_v53, 6  ;;  %v6014_v63 = vsel %vm662_vm0, %v6013_v0, %v5733_v58  ;;  %v5744_v53 = vld [vmem:[%s13931_s19 + $0x15c] sm:$0x1]  ;;  %v6012_v58 = vsel %vm680_vm6, %v6011_v2, %v6010_v44 }
 0xafc   : > { %12651 = vmatmul.mubr.msk.f32.gmra.mxu0 %vm892_vm7, %v6012_v58  ;;  %v6035_v0 = vrot.slane %v5746_v56, 3  ;;  %v5756_v44 = vld [vmem:[%s13931_s19 + $0x1bc] sm:$0x1] }
 0xafd   : > { %v5644_v6 = vpop.permute.xlu1 %5643  ;;  %6374 = vrot.lane.b32.xlu0 %v5685_v25, %s13841_s18  ;;  %v6016_v48 = vsel %vm665_vm1, %v6015_v39, %v6014_v63  ;;  %v6037_v39 = vrot.slane %v5747_v43, 2  ;;  %v6049_v43 = vrot.slane %v5754_v15, 3  ;;  %v5766_v15 = vld [vmem:[%s13931_s19 + $0x20c] sm:$0x1] }
 0xafe   : > { %v5688_v49 = vmul.f32 %v5644_v6, %v16089_v61  ;;  %v5745_v61 = vld [vmem:[%s13931_s19 + $0x164] sm:$0x1]  ;;  %v6018_v25 = vsel %vm668_vm2, %v6017_v31, %v6016_v48  ;;  %v5751_v6 = vld [vmem:[%s13931_s19 + $0x194] sm:$0x1]  ;;  %v6030_v31 = vsel %vm665_vm1, %v6029_v21, %v6028_v5 }
 0xaff   : > { %v5642_v36 = vpop.permute.xlu0 %5641  ;;  %v6020_v7 = vsel %vm671_vm3, %v6019_v33, %v6018_v25  ;;  %v6033_v60 = vrot.slane %v5745_v61, 4  ;;  %v6039_v33 = vrot.slane %v5748_v42, 1  ;;  %v6043_v61 = vrot.slane %v5751_v6, 6  ;;  %v5763_v6 = vld [vmem:[%s13931_s19 + $0x1f4] sm:$0x1] }
 0xb00   : > { %v5687_v38 = vmul.f32 %v5642_v36, %v16095_v59  ;;  %6380 = vrot.lane.b32.xlu1 %v5688_v49, %s13841_s18  ;;  %v6031_v59 = vrot.slane %v5744_v53, 5  ;;  %v6022_v2 = vsel %vm674_vm4, %v6021_v29, %v6020_v7  ;;  %v5753_v49 = vld [vmem:[%s13931_s19 + $0x1a4] sm:$0x1]  ;;  %v5755_v36 = vld [vmem:[%s13931_s19 + $0x1b4] sm:$0x1]  ;;  %v6042_v53 = vsel %vm662_vm0, %v6041_v24, %v5749_v13 }
 0xb01   : > { %v6024_v18 = vsel %vm677_vm5, %v6023_v41, %v6022_v2  ;;  %v6045_v25 = vrot.slane %v5752_v27, 5  ;;  %v6047_v56 = vrot.slane %v5753_v49, 4  ;;  %v6044_v5 = vsel %vm665_vm1, %v6043_v61, %v6042_v53  ;;  %v5761_v13 = vld [vmem:[%s13931_s19 + $0x1e4] sm:$0x1]  ;;  %v5768_v53 = vld [vmem:[%s13931_s19 + $0x21c] sm:$0x1] }
 0xb02   : > { %6378 = vrot.lane.b32.xlu0 %v5687_v38, %s13841_s18  ;;  %v6026_v40 = vsel %vm680_vm6, %v6025_v57, %v6024_v18  ;;  %v6032_v29 = vsel %vm668_vm2, %v6031_v59, %v6030_v31  ;;  %v5758_v38 = vld [vmem:[%s13931_s19 + $0x1cc] sm:$0x1]  ;;  %v6051_v21 = vrot.slane %v5755_v36, 2  ;;  %v5760_v59 = vld [vmem:[%s13931_s19 + $0x1dc] sm:$0x1]  ;;  %v6069_v61 = vrot.slane %v5766_v15, 7 }
 0xb03   : > { %12653 = vmatprep.mubr.msk.f32.mxu0 %vm892_vm7, %v6026_v40  ;;  %v6034_v41 = vsel %vm671_vm3, %v6033_v60, %v6032_v29  ;;  %v6046_v2 = vsel %vm668_vm2, %v6045_v25, %v6044_v5  ;;  %v6053_v60 = vrot.slane %v5756_v44, 1  ;;  %v5764_v18 = vld [vmem:[%s13931_s19 + $0x1fc] sm:$0x1]  ;;  %v6059_v27 = vrot.slane %v5760_v59, 5  ;;  %v5765_v29 = vld [vmem:[%s13931_s19 + $0x204] sm:$0x1] }
 0xb04   : > { %v5648_v63 = vpop.permute.xlu1 %5647  ;;  %v6036_v58 = vsel %vm674_vm4, %v6035_v0, %v6034_v41  ;;  %v5762_v0 = vld [vmem:[%s13931_s19 + $0x1ec] sm:$0x1]  ;;  %v6065_v40 = vrot.slane %v5763_v6, 2  ;;  %v5767_v41 = vld [vmem:[%s13931_s19 + $0x214] sm:$0x1] }
 0xb05   : > { %v5690_v48 = vmul.f32 %v5648_v63, %v16101_v22  ;;  %v5759_v22 = vld [vmem:[%s13931_s19 + $0x1d4] sm:$0x1]  ;;  %v6038_v7 = vsel %vm677_vm5, %v6037_v39, %v6036_v58  ;;  %v6048_v39 = vsel %vm671_vm3, %v6047_v56, %v6046_v2  ;;  %v6063_v63 = vrot.slane %v5762_v0, 3  ;;  %v5769_v58 = vld [vmem:[%s13931_s19 + $0x224] sm:$0x1] }
 0xb06   : > { %v5646_v57 = vpop.permute.xlu0 %5645  ;;  %v6040_v62 = vsel %vm680_vm6, %v6039_v33, %v6038_v7  ;;  %v6057_v31 = vrot.slane %v5759_v22, 6  ;;  %v6061_v33 = vrot.slane %v5761_v13, 4  ;;  %v6050_v49 = vsel %vm674_vm4, %v6049_v43, %v6048_v39  ;;  %v5770_v25 = vld [vmem:[%s13931_s19 + $0x22c] sm:$0x1]  ;;  %v5771_v56 = vld [vmem:[%s13931_s19 + $0x234] sm:$0x1] }
 0xb07   : > { %v5689_v42 = vmul.f32 %v5646_v57, %v16107_v28  ;;  %6384 = vrot.lane.b32.xlu1 %v5690_v48, %s13841_s18  ;;  %v6055_v28 = vrot.slane %v5758_v38, 7  ;;  %12654 = vmatmul.mubr.msk.f32.gmra.mxu0 %vm892_vm7, %v6040_v62  ;;  %v6052_v36 = vsel %vm677_vm5, %v6051_v21, %v6050_v49  ;;  %v6067_v48 = vrot.slane %v5764_v18, 1  ;;  %v5773_v21 = vld [vmem:[%s13931_s19 + $0x244] sm:$0x1]  ;;  %v5775_v18 = vld [vmem:[%s13931_s19 + $0x254] sm:$0x1] }
 0xb08   : > { %v6054_v57 = vsel %vm680_vm6, %v6053_v60, %v6052_v36  ;;  %v6070_v7 = vsel %vm662_vm0, %v6069_v61, %v5765_v29  ;;  %v6071_v5 = vrot.slane %v5767_v41, 6  ;;  %v6073_v62 = vrot.slane %v5768_v53, 5  ;;  %v5779_v36 = vld [vmem:[%s13931_s19 + $0x274] sm:$0x1] }
 0xb09   : > { %6382 = vrot.lane.b32.xlu0 %v5689_v42, %s13841_s18  ;;  %v6056_v24 = vsel %vm662_vm0, %v6055_v28, %v5757_v19  ;;  %12656 = vmatprep.mubr.msk.f32.mxu0 %vm892_vm7, %v6054_v57  ;;  %v5772_v42 = vld [vmem:[%s13931_s19 + $0x23c] sm:$0x1]  ;;  %v6075_v2 = vrot.slane %v5769_v58, 4  ;;  %v6077_v60 = vrot.slane %v5770_v25, 3  ;;  %v6079_v39 = vrot.slane %v5771_v56, 2 }
 0xb0a   : > { %v6058_v44 = vsel %vm665_vm1, %v6057_v31, %v6056_v24  ;;  %v6072_v28 = vsel %vm665_vm1, %v6071_v5, %v6070_v7  ;;  %v5776_v31 = vld [vmem:[%s13931_s19 + $0x25c] sm:$0x1]  ;;  %v6081_v24 = vrot.slane %v5772_v42, 1  ;;  %v5782_v58 = vld [vmem:[%s13931_s19 + $0x28c] sm:$0x1] }
 0xb0b   : > { %v6060_v19 = vsel %vm668_vm2, %v6059_v27, %v6058_v44  ;;  %v6074_v49 = vsel %vm668_vm2, %v6073_v62, %v6072_v28  ;;  %v5780_v44 = vld [vmem:[%s13931_s19 + $0x27c] sm:$0x1]  ;;  %v6087_v41 = vrot.slane %v5776_v31, 5  ;;  %v5783_v42 = vld [vmem:[%s13931_s19 + $0x294] sm:$0x1]  ;;  %v6097_v62 = vrot.slane %v5782_v58, 7 }
 0xb0c   : > { %v5652_v38 = vpop.permute.xlu1 %5651  ;;  %v6062_v22 = vsel %vm671_vm3, %v6061_v33, %v6060_v19  ;;  %v6076_v15 = vsel %vm671_vm3, %v6075_v2, %v6074_v49  ;;  %v5781_v19 = vld [vmem:[%s13931_s19 + $0x284] sm:$0x1]  ;;  %v5784_v7 = vld [vmem:[%s13931_s19 + $0x29c] sm:$0x1]  ;;  %v5790_v49 = vld [vmem:[%s13931_s19 + $0x2cc] sm:$0x1] }
 0xb0d   : > { %v5692_v43 = vmul.f32 %v5652_v38, %v16113_v8  ;;  %v6064_v13 = vsel %vm674_vm4, %v6063_v63, %v6062_v22  ;;  %v5774_v8 = vld [vmem:[%s13931_s19 + $0x24c] sm:$0x1]  ;;  %v5777_v63 = vld [vmem:[%s13931_s19 + $0x264] sm:$0x1]  ;;  %v6078_v61 = vsel %vm674_vm4, %v6077_v60, %v6076_v15  ;;  %v6093_v22 = vrot.slane %v5779_v36, 2 }
 0xb0e   : > { %v5650_v59 = vpop.permute.xlu0 %5649  ;;  %v6066_v6 = vsel %vm677_vm5, %v6065_v40, %v6064_v13  ;;  %v6083_v29 = vrot.slane %v5774_v8, 7  ;;  %v6080_v56 = vsel %vm677_vm5, %v6079_v39, %v6078_v61  ;;  %v5785_v13 = vld [vmem:[%s13931_s19 + $0x2a4] sm:$0x1]  ;;  %v5787_v8 = vld [vmem:[%s13931_s19 + $0x2b4] sm:$0x1]  ;;  %v6101_v28 = vrot.slane %v5784_v7, 5 }
 0xb0f   : > { %v5691_v0 = vmul.f32 %v5650_v59, %v16119_v1  ;;  %6388 = vrot.lane.b32.xlu1 %v5692_v43, %s13841_s18  ;;  %v6068_v33 = vsel %vm680_vm6, %v6067_v48, %v6066_v6  ;;  %v5778_v1 = vld [vmem:[%s13931_s19 + $0x26c] sm:$0x1]  ;;  %v6085_v48 = vrot.slane %v5775_v18, 6  ;;  %v6082_v5 = vsel %vm680_vm6, %v6081_v24, %v6080_v56  ;;  %v5791_v15 = vld [vmem:[%s13931_s19 + $0x2d4] sm:$0x1] }
 0xb10   : > { %v5656_v27 = vpop.permute.xlu1 %5655  ;;  %12657 = vmatmul.mubr.msk.f32.gmra.mxu0 %vm892_vm7, %v6068_v33  ;;  %v6084_v38 = vsel %vm662_vm0, %v6083_v29, %v5773_v21  ;;  %v6091_v57 = vrot.slane %v5778_v1, 3  ;;  %v6095_v59 = vrot.slane %v5780_v44, 1  ;;  %v6099_v6 = vrot.slane %v5783_v42, 6  ;;  %v5789_v33 = vld [vmem:[%s13931_s19 + $0x2c4] sm:$0x1] }
 0xb11   : > { %v5694_v40 = vmul.f32 %v5656_v27, %v16125_v3  ;;  %6386 = vrot.lane.b32.xlu0 %v5691_v0, %s13841_s18  ;;  %v6089_v3 = vrot.slane %v5777_v63, 4  ;;  %v6086_v43 = vsel %vm665_vm1, %v6085_v48, %v6084_v38  ;;  %12659 = vmatprep.mubr.msk.f32.mxu0 %vm892_vm7, %v6082_v5  ;;  %v5788_v0 = vld [vmem:[%s13931_s19 + $0x2bc] sm:$0x1]  ;;  %v6098_v31 = vsel %vm662_vm0, %v6097_v62, %v5781_v19  ;;  %v5794_v61 = vld [vmem:[%s13931_s19 + $0x2ec] sm:$0x1] }
 0xb12   : > { %v5654_v53 = vpop.permute.xlu0 %5653  ;;  %v6088_v21 = vsel %vm668_vm2, %v6087_v41, %v6086_v43  ;;  %v6103_v27 = vrot.slane %v5785_v13, 4  ;;  %v6100_v1 = vsel %vm665_vm1, %v6099_v6, %v6098_v31  ;;  %v6109_v41 = vrot.slane %v5788_v0, 1  ;;  %v5796_v19 = vld [vmem:[%s13931_s19 + $0x2fc] sm:$0x1]  ;;  %v5797_v42 = vld [vmem:[%s13931_s19 + $0x304] sm:$0x1] }
 0xb13   : > { %v5693_v25 = vmul.f32 %v5654_v53, %v16131_v23  ;;  %6392 = vrot.lane.b32.xlu1 %v5694_v40, %s13841_s18  ;;  %v5786_v23 = vld [vmem:[%s13931_s19 + $0x2ac] sm:$0x1]  ;;  %v6090_v60 = vsel %vm671_vm3, %v6089_v3, %v6088_v21  ;;  %v6107_v40 = vrot.slane %v5787_v8, 2  ;;  %v6102_v48 = vsel %vm668_vm2, %v6101_v28, %v6100_v1  ;;  %v5793_v53 = vld [vmem:[%s13931_s19 + $0x2e4] sm:$0x1] }
 0xb14   : > { %v6092_v18 = vsel %vm674_vm4, %v6091_v57, %v6090_v60  ;;  %v6105_v29 = vrot.slane %v5786_v23, 3  ;;  %v6104_v3 = vsel %vm671_vm3, %v6103_v27, %v6102_v48  ;;  %v5795_v57 = vld [vmem:[%s13931_s19 + $0x2f4] sm:$0x1]  ;;  %v6113_v58 = vrot.slane %v5791_v15, 6  ;;  %v5798_v7 = vld [vmem:[%s13931_s19 + $0x30c] sm:$0x1] }
 0xb15   : > { %v5660_v2 = vpop.permute.xlu1 %5659  ;;  %6390 = vrot.lane.b32.xlu0 %v5693_v25, %s13841_s18  ;;  %v6094_v63 = vsel %vm677_vm5, %v6093_v22, %v6092_v18  ;;  %v6117_v22 = vrot.slane %v5793_v53, 4  ;;  %v6119_v13 = vrot.slane %v5794_v61, 3  ;;  %v6121_v23 = vrot.slane %v5795_v57, 2  ;;  %v5800_v62 = vld [vmem:[%s13931_s19 + $0x31c] sm:$0x1] }
 0xb16   : > { %v5696_v39 = vmul.f32 %v5660_v2, %v16137_v4  ;;  %v5792_v4 = vld [vmem:[%s13931_s19 + $0x2dc] sm:$0x1]  ;;  %v6096_v44 = vsel %vm680_vm6, %v6095_v59, %v6094_v63  ;;  %v6106_v56 = vsel %vm674_vm4, %v6105_v29, %v6104_v3  ;;  %v6123_v0 = vrot.slane %v5796_v19, 1  ;;  %v5801_v6 = vld [vmem:[%s13931_s19 + $0x324] sm:$0x1] }
 0xb17   : > { %v5658_v24 = vpop.permute.xlu0 %5657  ;;  %12660 = vmatmul.mubr.msk.f32.gmra.mxu0 %vm892_vm7, %v6096_v44  ;;  %v6115_v43 = vrot.slane %v5792_v4, 5  ;;  %v6108_v21 = vsel %vm677_vm5, %v6107_v40, %v6106_v56  ;;  %v5802_v28 = vld [vmem:[%s13931_s19 + $0x32c] sm:$0x1]  ;;  %v5803_v31 = vld [vmem:[%s13931_s19 + $0x334] sm:$0x1]  ;;  %v6129_v63 = vrot.slane %v5800_v62, 5 }
 0xb18   : > { %v5695_v36 = vmul.f32 %v5658_v24, %v16143_v46  ;;  %6396 = vrot.lane.b32.xlu1 %v5696_v39, %s13841_s18  ;;  %v6111_v46 = vrot.slane %v5790_v49, 7  ;;  %v6110_v60 = vsel %vm680_vm6, %v6109_v41, %v6108_v21  ;;  %v5804_v27 = vld [vmem:[%s13931_s19 + $0x33c] sm:$0x1]  ;;  %v6131_v1 = vrot.slane %v5801_v6, 4  ;;  %v5805_v29 = vld [vmem:[%s13931_s19 + $0x344] sm:$0x1] }
 0xb19   : > { %v5664_v38 = vpop.permute.xlu1 %5663  ;;  %12662 = vmatprep.mubr.msk.f32.mxu0 %vm892_vm7, %v6110_v60  ;;  %v5806_v40 = vld [vmem:[%s13931_s19 + $0x34c] sm:$0x1]  ;;  %v6133_v44 = vrot.slane %v5802_v28, 3  ;;  %v6135_v48 = vrot.slane %v5803_v31, 2  ;;  %v5808_v41 = vld [vmem:[%s13931_s19 + $0x35c] sm:$0x1] }
 0xb1a   : > { %v5698_v25 = vmul.f32 %v5664_v38, %v16149_v37  ;;  %6394 = vrot.lane.b32.xlu0 %v5695_v36, %s13841_s18  ;;  %v6112_v59 = vsel %vm662_vm0, %v6111_v46, %v5789_v33  ;;  %v5799_v37 = vld [vmem:[%s13931_s19 + $0x314] sm:$0x1]  ;;  %v6137_v3 = vrot.slane %v5804_v27, 1  ;;  %v5809_v57 = vld [vmem:[%s13931_s19 + $0x364] sm:$0x1] }
 0xb1b   : > { %v5662_v5 = vpop.permute.xlu0 %5661  ;;  %v6114_v8 = vsel %vm665_vm1, %v6113_v58, %v6112_v59  ;;  %v6127_v33 = vrot.slane %v5799_v37, 6  ;;  %v5810_v19 = vld [vmem:[%s13931_s19 + $0x36c] sm:$0x1]  ;;  %v5812_v56 = vld [vmem:[%s13931_s19 + $0x37c] sm:$0x1] }
 0xb1c   : > { %v5697_v2 = vmul.f32 %v5662_v5, %v16155_v34  ;;  %6400 = vrot.lane.b32.xlu1 %v5698_v25, %s13841_s18  ;;  %v6116_v18 = vsel %vm668_vm2, %v6115_v43, %v6114_v8  ;;  %v6125_v34 = vrot.slane %v5798_v7, 7  ;;  %v5811_v25 = vld [vmem:[%s13931_s19 + $0x374] sm:$0x1]  ;;  %v6139_v43 = vrot.slane %v5806_v40, 7  ;;  %v5813_v21 = vld [vmem:[%s13931_s19 + $0x384] sm:$0x1] }
 0xb1d   : > { %v5668_v39 = vpop.permute.xlu1 %5667  ;;  %v6118_v24 = vsel %vm671_vm3, %v6117_v22, %v6116_v18  ;;  %v6145_v7 = vrot.slane %v5809_v57, 4  ;;  %v6147_v5 = vrot.slane %v5810_v19, 3  ;;  %v6151_v37 = vrot.slane %v5812_v56, 1  ;;  %v5814_v62 = vld [vmem:[%s13931_s19 + $0x38c] sm:$0x1] }
 0xb1e   : > { %v5700_v49 = vmul.f32 %v5668_v39, %v16161_v16  ;;  %6398 = vrot.lane.b32.xlu0 %v5697_v2, %s13841_s18  ;;  %v6120_v4 = vsel %vm674_vm4, %v6119_v13, %v6118_v24  ;;  %v6126_v36 = vsel %vm662_vm0, %v6125_v34, %v5797_v42  ;;  %v5807_v16 = vld [vmem:[%s13931_s19 + $0x354] sm:$0x1]  ;;  %v6143_v42 = vrot.slane %v5808_v41, 5  ;;  %v5817_v6 = vld [vmem:[%s13931_s19 + $0x3a4] sm:$0x1] }
 0xb1f   : > { %v5666_v15 = vpop.permute.xlu0 %5665  ;;  %v6122_v61 = vsel %vm677_vm5, %v6121_v23, %v6120_v4  ;;  %v6128_v38 = vsel %vm665_vm1, %v6127_v33, %v6126_v36  ;;  %v6140_v13 = vsel %vm662_vm0, %v6139_v43, %v5805_v29  ;;  %v6149_v23 = vrot.slane %v5811_v25, 2  ;;  %v5815_v2 = vld [vmem:[%s13931_s19 + $0x394] sm:$0x1]  ;;  %v5818_v28 = vld [vmem:[%s13931_s19 + $0x3ac] sm:$0x1] }
 0xb20   : > { %v5699_v53 = vmul.f32 %v5666_v15, %v16167_v30  ;;  %6404 = vrot.lane.b32.xlu1 %v5700_v49, %s13841_s18  ;;  %v6124_v46 = vsel %vm680_vm6, %v6123_v0, %v6122_v61  ;;  %v6130_v58 = vsel %vm668_vm2, %v6129_v63, %v6128_v38  ;;  %v6141_v30 = vrot.slane %v5807_v16, 6  ;;  %v5816_v0 = vld [vmem:[%s13931_s19 + $0x39c] sm:$0x1]  ;;  %v5819_v31 = vld [vmem:[%s13931_s19 + $0x3b4] sm:$0x1] }
 0xb21   : > { %12663 = vmatmul.mubr.msk.f32.gmra.mxu0 %vm892_vm7, %v6124_v46  ;;  %v6132_v22 = vsel %vm671_vm3, %v6131_v1, %v6130_v58  ;;  %v5820_v27 = vld [vmem:[%s13931_s19 + $0x3bc] sm:$0x1]  ;;  %v6153_v34 = vrot.slane %v5814_v62, 7  ;;  %v6155_v33 = vrot.slane %v5815_v2, 6  ;;  %v6157_v24 = vrot.slane %v5816_v0, 5 }
 0xb22   : > { %6402 = vrot.lane.b32.xlu0 %v5699_v53, %s13841_s18  ;;  %v6134_v59 = vsel %vm674_vm4, %v6133_v44, %v6132_v22  ;;  %v6142_v8 = vsel %vm665_vm1, %v6141_v30, %v6140_v13  ;;  %v6159_v63 = vrot.slane %v5817_v6, 4  ;;  %v6161_v1 = vrot.slane %v5818_v28, 3  ;;  %v5821_v29 = vld [vmem:[%s13931_s19 + $0x3c4] sm:$0x1]  ;;  %v5822_v44 = vld [vmem:[%s13931_s19 + $0x3cc] sm:$0x1] }
 0xb23   : > { %v6136_v60 = vsel %vm677_vm5, %v6135_v48, %v6134_v59  ;;  %v6144_v18 = vsel %vm668_vm2, %v6143_v42, %v6142_v8  ;;  %v6154_v15 = vsel %vm662_vm0, %v6153_v34, %v5813_v21  ;;  %v6163_v4 = vrot.slane %v5819_v31, 2  ;;  %v5823_v48 = vld [vmem:[%s13931_s19 + $0x3d4] sm:$0x1]  ;;  %v5824_v53 = vld [vmem:[%s13931_s19 + $0x3dc] sm:$0x1]  ;;  %v13811_v34 = vld [vmem:[%s18801_s2] sm:$0xff] }
 0xb24   : > { %v6138_v39 = vsel %vm680_vm6, %v6137_v3, %v6136_v60  ;;  %v6146_v49 = vsel %vm671_vm3, %v6145_v7, %v6144_v18  ;;  %v6165_v36 = vrot.slane %v5820_v27, 1  ;;  %v6156_v41 = vsel %vm665_vm1, %v6155_v33, %v6154_v15  ;;  %v5825_v61 = vld [vmem:[%s13931_s19 + $0x3e4] sm:$0x1]  ;;  %v5826_v38 = vld [vmem:[%s13931_s19 + $0x3ec] sm:$0x1]  ;;  %v13808_v28 = vld [vmem:[%s18801_s2 + $0x18] sm:$0xff] }
 0xb25   : > { %12665 = vmatprep.mubr.msk.f32.mxu0 %vm892_vm7, %v6138_v39  ;;  %v6148_v40 = vsel %vm674_vm4, %v6147_v5, %v6146_v49  ;;  %v6158_v57 = vsel %vm668_vm2, %v6157_v24, %v6156_v41  ;;  %v5827_v19 = vld [vmem:[%s13931_s19 + $0x3f4] sm:$0x1]  ;;  %v6167_v46 = vrot.slane %v5822_v44, 7  ;;  %v6169_v58 = vrot.slane %v5823_v48, 6  ;;  %v5828_v56 = vld [vmem:[%s13931_s19 + $0x3fc] sm:$0x1] }
 0xb26   : > { %v6150_v16 = vsel %vm677_vm5, %v6149_v23, %v6148_v40  ;;  %v6160_v25 = vsel %vm671_vm3, %v6159_v63, %v6158_v57  ;;  %v6171_v43 = vrot.slane %v5824_v53, 5  ;;  %v6173_v30 = vrot.slane %v5825_v61, 4  ;;  %v13809_v39 = vld [vmem:[%s18801_s2 + $0x10] sm:$0xff]  ;;  %v13810_v27 = vld [vmem:[%s18801_s2 + $0x8] sm:$0xff]  ;;  %v16630_v57 = vld [vmem:[%s18802_s3] ss:$0 sm:$0xff] }
 0xb27   : > { %v6152_v3 = vsel %vm680_vm6, %v6151_v37, %v6150_v16  ;;  %v6162_v22 = vsel %vm674_vm4, %v6161_v1, %v6160_v25  ;;  %v6168_v42 = vsel %vm662_vm0, %v6167_v46, %v5821_v29  ;;  %v6175_v7 = vrot.slane %v5826_v38, 3 }
 0xb28   : > { %12666 = vmatmul.mubr.msk.f32.gmra.mxu0 %vm892_vm7, %v6152_v3  ;;  %v6164_v5 = vsel %vm677_vm5, %v6163_v4, %v6162_v22  ;;  %v6170_v21 = vsel %vm665_vm1, %v6169_v58, %v6168_v42  ;;  %v6177_v59 = vrot.slane %v5827_v19, 2  ;;  %v6179_v37 = vrot.slane %v5828_v56, 1 }
 0xb29   : > { %v6166_v13 = vsel %vm680_vm6, %v6165_v36, %v6164_v5  ;;  %v6172_v23 = vsel %vm668_vm2, %v6171_v43, %v6170_v21 }
 0xb2a   : > { %12668 = vmatprep.mubr.msk.f32.mxu0 %vm892_vm7, %v6166_v13  ;;  %v6174_v62 = vsel %vm671_vm3, %v6173_v30, %v6172_v23 }
 0xb2b   : > { %v6176_v2 = vsel %vm674_vm4, %v6175_v7, %v6174_v62 }
 0xb2c   : > { %v6178_v60 = vsel %vm677_vm5, %v6177_v59, %v6176_v2 }
 0xb2d   : > { %v6180_v8 = vsel %vm680_vm6, %v6179_v37, %v6178_v60 }
 0xb2e   : > { %12669 = vmatmul.mubr.msk.f32.gmra.mxu0 %vm892_vm7, %v6180_v8 }
 0xb6a   : > { %v12649_v16 = vpop.f32.mrf.mxu0 }
 0xb6b   : > { %v6285_v19 = vadd.f32 %v16630_v57, %v12649_v16 }
 0xb6c   : > { %v6279_v41 = vpop.f32.mrf.mxu0 }
 0xb6d   : > { %v6377_v0 = vpop.permute.xlu1 %6376  ;;  %v6280_v25 = vadd.f32 %v16630_v57, %v6279_v41 }
 0xb6f   : > { %v6375_v6 = vpop.permute.xlu0 %6374 }
 0xb70   : > { %12679 = vmatprep.mubr.msk.f32.mxu1 %vm892_vm7, %v6375_v6 }
 0xb71   : > { %12680 = vmatmul.mubr.msk.f32.vlgmr.msra.gmra.mxu1 %vm892_vm7, %v6377_v0 }
 0xb72   : > { %12736 = vmatpush3.msra.mxu1 %v13808_v28  ;;  %v6381_v31 = vpop.permute.xlu1 %6380 }
 0xb73   : > { %12737 = vmatprep.subr.mxu1 %v13809_v39 }
 0xb74   : > { %v6379_v18 = vpop.permute.xlu0 %6378  ;;  %12738 = vmatpush3.msra.mxu1 %v13809_v39 }
 0xb75   : > { %12682 = vmatprep.mubr.msk.f32.mxu1 %vm892_vm7, %v6379_v18  ;;  %12739 = vmatprep.subr.mxu1 %v13810_v27 }
 0xb76   : > { %12683 = vmatmul.mubr.msk.f32.gmra.mxu1 %vm892_vm7, %v6381_v31 }
 0xb77   : > { %12740 = vmatpush3.msra.mxu1 %v13810_v27 }
 0xb78   : > { %12741 = vmatprep.subr.mxu1 %v13811_v34 }
 0xb79   : > { %12742 = vmatpush3.msra.mxu1 %v13811_v34  ;;  %v6385_v33 = vpop.permute.xlu1 %6384 }
 0xb7a   : > { %12799 = vmatprep.subr.mxu1 %v13808_v28 }
 0xb7b   : > { %v6383_v49 = vpop.permute.xlu0 %6382 }
 0xb7c   : > { %12685 = vmatprep.mubr.msk.f32.mxu1 %vm892_vm7, %v6383_v49 }
 0xb7d   : > { %12686 = vmatmul.mubr.msk.f32.gmra.mxu1 %vm892_vm7, %v6385_v33 }
 0xb81   : > { %v6389_v24 = vpop.permute.xlu1 %6388 }
 0xb83   : > { %v6387_v63 = vpop.permute.xlu0 %6386 }
 0xb84   : > { %12688 = vmatprep.mubr.msk.f32.mxu1 %vm892_vm7, %v6387_v63 }
 0xb85   : > { %v6393_v1 = vpop.permute.xlu1 %6392  ;;  %12689 = vmatmul.mubr.msk.f32.gmra.mxu1 %vm892_vm7, %v6389_v24 }
 0xb87   : > { %v6391_v29 = vpop.permute.xlu0 %6390 }
 0xb88   : > { %12691 = vmatprep.mubr.msk.f32.mxu1 %vm892_vm7, %v6391_v29 }
 0xb89   : > { %12692 = vmatmul.mubr.msk.f32.gmra.mxu1 %vm892_vm7, %v6393_v1 }
 0xb8a   : > { %v6397_v40 = vpop.permute.xlu1 %6396 }
 0xb8c   : > { %v6395_v15 = vpop.permute.xlu0 %6394 }
 0xb8d   : > { %12694 = vmatprep.mubr.msk.f32.mxu1 %vm892_vm7, %v6395_v15 }
 0xb8e   : > { %12695 = vmatmul.mubr.msk.f32.gmra.mxu1 %vm892_vm7, %v6397_v40  ;;  %v6401_v4 = vpop.permute.xlu1 %6400 }
 0xb90   : > { %v6399_v36 = vpop.permute.xlu0 %6398 }
 0xb91   : > { %12697 = vmatprep.mubr.msk.f32.mxu1 %vm892_vm7, %v6399_v36 }
 0xb92   : > { %12698 = vmatmul.mubr.msk.f32.gmra.mxu1 %vm892_vm7, %v6401_v4  ;;  %v6405_v48 = vpop.permute.xlu1 %6404 }
 0xb94   : > { %v6403_v44 = vpop.permute.xlu0 %6402 }
 0xb95   : > { %12700 = vmatprep.mubr.msk.f32.mxu1 %vm892_vm7, %v6403_v44 }
 0xb96   : > { %12701 = vmatmul.mubr.msk.f32.gmra.mxu1 %vm892_vm7, %v6405_v48 }
 0xbbc   : > { %v12652_v53 = vpop.f32.mrf.mxu0 }
 0xbbd   : > { %v6295_v30 = vadd.f32 %v16630_v57, %v12652_v53 }
 0xbbe   : > { %v6289_v61 = vpop.f32.mrf.mxu0 }
 0xbbf   : > { %v6290_v5 = vadd.f32 %v16630_v57, %v6289_v61 }
 0xbc7   : > { %v12655_v38 = vpop.f32.mrf.mxu0 }
 0xbc8   : > { %v6305_v60 = vadd.f32 %v16630_v57, %v12655_v38 }
 0xbc9   : > { %v6299_v3 = vpop.f32.mrf.mxu0 }
 0xbca   : > { %v6300_v6 = vadd.f32 %v16630_v57, %v6299_v3 }
 0xbd0   : > { %v12658_v46 = vpop.f32.mrf.mxu0 }
 0xbd1   : > { %v6315_v33 = vadd.f32 %v16630_v57, %v12658_v46 }
 0xbd2   : > { %v6309_v43 = vpop.f32.mrf.mxu0 }
 0xbd3   : > { %v6310_v29 = vadd.f32 %v16630_v57, %v6309_v43 }
 0xbd7   : > { %v12661_v13 = vpop.f32.mrf.mxu0 }
 0xbd8   : > { %v6325_v44 = vadd.f32 %v16630_v57, %v12661_v13 }
 0xbd9   : > { %v6319_v8 = vpop.f32.mrf.mxu0 }
 0xbda   : > { %v6320_v38 = vadd.f32 %v16630_v57, %v6319_v8 }
 0xbe1   : > { %v12664_v18 = vpop.f32.mrf.mxu0 }
 0xbe3   : > { %v6329_v24 = vpop.f32.mrf.mxu0 }
 0xbe8   : > { %v12667_v48 = vpop.f32.mrf.mxu0 }
 0xc31   : > { %v12681_v58 = vpop.f32.mrf.mxu1 }
 0xc32   : > { %v6584_v56 = vadd.f32 %v12681_v58, %v6285_v19 }
 0xc33   : > { %v6504_v22 = vpop.f32.mrf.mxu1 }
 0xc34   : > { %v11801_v42 = vmul.f32 -1.442695, %v6584_v56  ;;  %v6583_v7 = vadd.f32 %v6504_v22, %v6280_v25  ;;  %v6339_v56 = vpop.f32.mrf.mxu0 }
 0xc36   : > { %13329 = vpow2.f32 %v11801_v42  ;;  %v11800_v21 = vmul.f32 -1.442695, %v6583_v7  ;;  %v12684_v59 = vpop.f32.mrf.mxu1  ;;  %v12670_v13 = vpop.f32.mrf.mxu0 }
 0xc37   : > { %v6586_v23 = vadd.f32 %v12684_v59, %v6295_v30  ;;  %v6335_v30 = vadd.f32 %v16630_v57, %v12664_v18 }
 0xc38   : > { %13331 = vpow2.f32 %v11800_v21  ;;  %v6514_v37 = vpop.f32.mrf.mxu1 }
 0xc39   : > { %v11803_v62 = vmul.f32 -1.442695, %v6586_v23  ;;  %v6585_v2 = vadd.f32 %v6514_v37, %v6290_v5  ;;  %v6330_v5 = vadd.f32 %v16630_v57, %v6329_v24 }
 0xc3b   : > { %13333 = vpow2.f32 %v11803_v62  ;;  %v11802_v0 = vmul.f32 -1.442695, %v6585_v2  ;;  %v6345_v62 = vadd.f32 %v16630_v57, %v12667_v48 }
 0xc3d   : > { %13335 = vpow2.f32 %v11802_v0  ;;  %v12687_v28 = vpop.f32.mrf.mxu1 }
 0xc3e   : > { %v6588_v39 = vadd.f32 %v12687_v28, %v6305_v60  ;;  %v6340_v28 = vadd.f32 %v16630_v57, %v6339_v56 }
 0xc3f   : > { %v6524_v31 = vpop.f32.mrf.mxu1 }
 0xc40   : > { %v11805_v27 = vmul.f32 -1.442695, %v6588_v39  ;;  %v6587_v34 = vadd.f32 %v6524_v31, %v6300_v6  ;;  %v6349_v31 = vpop.f32.mrf.mxu0 }
 0xc42   : > { %13337 = vpow2.f32 %v11805_v27  ;;  %v11804_v49 = vmul.f32 -1.442695, %v6587_v34 }
 0xc43   : > { %v13330_v63 = vpop.eup %13329 }
 0xc44   : > { %v6648_v1 = vadd.f32 1.0, %v13330_v63  ;;  %13339 = vpow2.f32 %v11804_v49  ;;  %v6355_v49 = vadd.f32 %v16630_v57, %v12670_v13 }
 0xc45   : > { %v13332_v40 = vpop.eup %13331  ;;  %v12690_v15 = vpop.f32.mrf.mxu1 }
 0xc46   : > { %13341 = vrcp.f32 %v6648_v1  ;;  %v6647_v4 = vadd.f32 1.0, %v13332_v40  ;;  %v6590_v36 = vadd.f32 %v12690_v15, %v6315_v33  ;;  %v6350_v15 = vadd.f32 %v16630_v57, %v6349_v31 }
 0xc47   : > { %v6534_v16 = vpop.f32.mrf.mxu1 }
 0xc48   : > { %v13334_v41 = vpop.eup %13333  ;;  %13343 = vrcp.f32 %v6647_v4  ;;  %v11807_v53 = vmul.f32 -1.442695, %v6590_v36  ;;  %v6589_v61 = vadd.f32 %v6534_v16, %v6310_v29 }
 0xc49   : > { %v6650_v3 = vadd.f32 1.0, %v13334_v41  ;;  %v12693_v19 = vpop.f32.mrf.mxu1 }
 0xc4a   : > { %v13336_v46 = vpop.eup %13335  ;;  %13345 = vpow2.f32 %v11807_v53  ;;  %v11806_v58 = vmul.f32 -1.442695, %v6589_v61  ;;  %v6592_v25 = vadd.f32 %v12693_v19, %v6325_v44 }
 0xc4b   : > { %13347 = vrcp.f32 %v6650_v3  ;;  %v6649_v43 = vadd.f32 1.0, %v13336_v46  ;;  %v6544_v22 = vpop.f32.mrf.mxu1 }
 0xc4c   : > { %13349 = vpow2.f32 %v11806_v58  ;;  %v11809_v42 = vmul.f32 -1.442695, %v6592_v25  ;;  %v6591_v7 = vadd.f32 %v6544_v22, %v6320_v38 }
 0xc4d   : > { %13351 = vrcp.f32 %v6649_v43 }
 0xc4e   : > { %13353 = vpow2.f32 %v11809_v42  ;;  %v11808_v21 = vmul.f32 -1.442695, %v6591_v7  ;;  %v12696_v59 = vpop.f32.mrf.mxu1 }
 0xc4f   : > { %v13338_v23 = vpop.eup %13337  ;;  %v6594_v37 = vadd.f32 %v12696_v59, %v6335_v30 }
 0xc50   : > { %v6652_v2 = vadd.f32 1.0, %v13338_v23  ;;  %13355 = vpow2.f32 %v11808_v21  ;;  %v6554_v60 = vpop.f32.mrf.mxu1 }
 0xc51   : > { %v13340_v8 = vpop.eup %13339  ;;  %v11811_v0 = vmul.f32 -1.442695, %v6594_v37  ;;  %v6593_v6 = vadd.f32 %v6554_v60, %v6330_v5 }
 0xc52   : > { %13357 = vrcp.f32 %v6652_v2  ;;  %v6651_v39 = vadd.f32 1.0, %v13340_v8  ;;  %v12699_v18 = vpop.f32.mrf.mxu1 }
 0xc53   : > { %v13342_v27 = vpop.eup %13341  ;;  %13359 = vpow2.f32 %v11811_v0  ;;  %v11810_v34 = vmul.f32 -1.442695, %v6593_v6  ;;  %v6596_v33 = vadd.f32 %v12699_v18, %v6345_v62 }
 0xc54   : > { %13361 = vrcp.f32 %v6651_v39  ;;  %v6564_v24 = vpop.f32.mrf.mxu1  ;;  %v6696_v63 = vmul.f32 2.0, %v13342_v27 }
 0xc55   : > { %v13344_v1 = vpop.eup %13343  ;;  %13363 = vpow2.f32 %v11810_v34  ;;  %v11813_v29 = vmul.f32 -1.442695, %v6596_v33  ;;  %v6595_v40 = vadd.f32 %v6564_v24, %v6340_v28 }
 0xc56   : > { %v12702_v4 = vpop.f32.mrf.mxu1  ;;  %v11817_v36 = vadd.f32 -1.0, %v6696_v63  ;;  %v6695_v44 = vmul.f32 2.0, %v13344_v1 }
 0xc57   : > { %v13346_v48 = vpop.eup %13345  ;;  %13365 = vpow2.f32 %v11813_v29  ;;  %v11812_v16 = vmul.f32 -1.442695, %v6595_v40  ;;  %v6598_v41 = vadd.f32 %v12702_v4, %v6355_v49 }
 0xc58   : > { %v13348_v53 = vpop.eup %13347  ;;  %v6654_v61 = vadd.f32 1.0, %v13346_v48  ;;  %v6574_v38 = vpop.f32.mrf.mxu1  ;;  %v16650_v3 = vsel %vm14321_vm10, %v11817_v36, %v13342_v27  ;;  %v11816_v19 = vadd.f32 -1.0, %v6695_v44 }
 0xc59   : > { %v13350_v46 = vpop.eup %13349  ;;  %13367 = vpow2.f32 %v11812_v16  ;;  %v11815_v58 = vmul.f32 -1.442695, %v6598_v41  ;;  %v6597_v25 = vadd.f32 %v6574_v38, %v6350_v15  ;;  %6777 = vrot.lane.b32.xlu1 %v16650_v3, %s13840_s14  ;;  %v6698_v57 = vmul.f32 2.0, %v13348_v53 }
 0xc5a   : > { %v13352_v56 = vpop.eup %13351  ;;  %13369 = vrcp.f32 %v6654_v61  ;;  %v6653_v43 = vadd.f32 1.0, %v13350_v46  ;;  %v16656_v30 = vsel %vm14321_vm10, %v11816_v19, %v13344_v1 }
 0xc5b   : > { %v13354_v22 = vpop.eup %13353  ;;  %13371 = vpow2.f32 %v11815_v58  ;;  %v11814_v42 = vmul.f32 -1.442695, %v6597_v25  ;;  %6775 = vrot.lane.b32.xlu0 %v16656_v30, %s13840_s14  ;;  %v11819_v7 = vadd.f32 -1.0, %v6698_v57  ;;  %v6697_v5 = vmul.f32 2.0, %v13352_v56 }
 0xc5c   : > { %13373 = vrcp.f32 %v6653_v43  ;;  %v6656_v21 = vadd.f32 1.0, %v13354_v22 }
 0xc5d   : > { %v13356_v59 = vpop.eup %13355  ;;  %13375 = vpow2.f32 %v11814_v42  ;;  %v16662_v13 = vsel %vm14321_vm10, %v11819_v7, %v13348_v53  ;;  %v11818_v23 = vadd.f32 -1.0, %v6697_v5 }
 0xc5e   : > { %13377 = vrcp.f32 %v6656_v21  ;;  %v6655_v37 = vadd.f32 1.0, %v13356_v59  ;;  %6781 = vrot.lane.b32.xlu1 %v16662_v13, %s13840_s14 }
 0xc5f   : > { %v13358_v62 = vpop.eup %13357  ;;  %v16668_v2 = vsel %vm14321_vm10, %v11818_v23, %v13352_v56 }
 0xc60   : > { %v13360_v60 = vpop.eup %13359  ;;  %13379 = vrcp.f32 %v6655_v37  ;;  %6779 = vrot.lane.b32.xlu0 %v16668_v2, %s13840_s14  ;;  %v6700_v8 = vmul.f32 2.0, %v13358_v62 }
 0xc61   : > { %v13362_v0 = vpop.eup %13361  ;;  %v6658_v6 = vadd.f32 1.0, %v13360_v60 }
 0xc62   : > { %v13364_v28 = vpop.eup %13363  ;;  %v11821_v39 = vadd.f32 -1.0, %v6700_v8  ;;  %v6699_v18 = vmul.f32 2.0, %v13362_v0 }
 0xc63   : > { %13381 = vrcp.f32 %v6658_v6  ;;  %v6657_v31 = vadd.f32 1.0, %v13364_v28 }
 0xc64   : > { %v13366_v27 = vpop.eup %13365  ;;  %v16674_v34 = vsel %vm14321_vm10, %v11821_v39, %v13358_v62  ;;  %v11820_v33 = vadd.f32 -1.0, %v6699_v18 }
 0xc65   : > { %13383 = vrcp.f32 %v6657_v31  ;;  %v6660_v49 = vadd.f32 1.0, %v13366_v27  ;;  %6785 = vrot.lane.b32.xlu1 %v16674_v34, %s13840_s14 }
 0xc66   : > { %v13368_v24 = vpop.eup %13367  ;;  %v16680_v63 = vsel %vm14321_vm10, %v11820_v33, %v13362_v0 }
 0xc67   : > { %v13370_v1 = vpop.eup %13369  ;;  %13385 = vrcp.f32 %v6660_v49  ;;  %v6659_v29 = vadd.f32 1.0, %v13368_v24  ;;  %6783 = vrot.lane.b32.xlu0 %v16680_v63, %s13840_s14 }
 0xc68   : > { %v13372_v40 = vpop.eup %13371  ;;  %v6702_v15 = vmul.f32 2.0, %v13370_v1 }
 0xc69   : > { %v13374_v4 = vpop.eup %13373  ;;  %13387 = vrcp.f32 %v6659_v29  ;;  %v6662_v36 = vadd.f32 1.0, %v13372_v40 }
 0xc6a   : > { %v13376_v44 = vpop.eup %13375  ;;  %v11823_v48 = vadd.f32 -1.0, %v6702_v15  ;;  %v6701_v16 = vmul.f32 2.0, %v13374_v4 }
 0xc6b   : > { %v13378_v41 = vpop.eup %13377  ;;  %13389 = vrcp.f32 %v6662_v36  ;;  %v6661_v53 = vadd.f32 1.0, %v13376_v44 }
 0xc6c   : > { %v16686_v61 = vsel %vm14321_vm10, %v11823_v48, %v13370_v1  ;;  %v11822_v38 = vadd.f32 -1.0, %v6701_v16  ;;  %v6704_v19 = vmul.f32 2.0, %v13378_v41 }
 0xc6d   : > { %v13380_v46 = vpop.eup %13379  ;;  %13391 = vrcp.f32 %v6661_v53  ;;  %6789 = vrot.lane.b32.xlu1 %v16686_v61, %s13840_s14 }
 0xc6e   : > { %v16692_v58 = vsel %vm14321_vm10, %v11822_v38, %v13374_v4  ;;  %v11825_v25 = vadd.f32 -1.0, %v6704_v19  ;;  %v6703_v57 = vmul.f32 2.0, %v13380_v46 }
 0xc6f   : > { %6787 = vrot.lane.b32.xlu0 %v16692_v58, %s13840_s14 }
 0xc70   : > { %v13382_v56 = vpop.eup %13381  ;;  %v16698_v43 = vsel %vm14321_vm10, %v11825_v25, %v13378_v41  ;;  %v11824_v22 = vadd.f32 -1.0, %v6703_v57 }
 0xc71   : > { %6793 = vrot.lane.b32.xlu1 %v16698_v43, %s13840_s14  ;;  %v6706_v42 = vmul.f32 2.0, %v13382_v56 }
 0xc72   : > { %v13384_v7 = vpop.eup %13383  ;;  %v16704_v5 = vsel %vm14321_vm10, %v11824_v22, %v13380_v46 }
 0xc73   : > { %6791 = vrot.lane.b32.xlu0 %v16704_v5, %s13840_s14  ;;  %v11827_v21 = vadd.f32 -1.0, %v6706_v42  ;;  %v6705_v59 = vmul.f32 2.0, %v13384_v7 }
 0xc74   : > { %v13386_v23 = vpop.eup %13385 }
 0xc75   : > { %v16710_v37 = vsel %vm14321_vm10, %v11827_v21, %v13382_v56  ;;  %v11826_v62 = vadd.f32 -1.0, %v6705_v59  ;;  %v6708_v60 = vmul.f32 2.0, %v13386_v23 }
 0xc76   : > { %v13388_v8 = vpop.eup %13387  ;;  %6797 = vrot.lane.b32.xlu1 %v16710_v37, %s13840_s14 }
 0xc77   : > { %v16716_v0 = vsel %vm14321_vm10, %v11826_v62, %v13384_v7  ;;  %v11829_v6 = vadd.f32 -1.0, %v6708_v60  ;;  %v6707_v28 = vmul.f32 2.0, %v13388_v8 }
 0xc78   : > { %v13390_v39 = vpop.eup %13389  ;;  %6795 = vrot.lane.b32.xlu0 %v16716_v0, %s13840_s14 }
 0xc79   : > { %v16722_v18 = vsel %vm14321_vm10, %v11829_v6, %v13386_v23  ;;  %v11828_v31 = vadd.f32 -1.0, %v6707_v28  ;;  %v6710_v27 = vmul.f32 2.0, %v13390_v39 }
 0xc7a   : > { %v13392_v33 = vpop.eup %13391  ;;  %6801 = vrot.lane.b32.xlu1 %v16722_v18, %s13840_s14 }
 0xc7b   : > { %v16728_v49 = vsel %vm14321_vm10, %v11828_v31, %v13388_v8  ;;  %v11831_v24 = vadd.f32 -1.0, %v6710_v27  ;;  %v6709_v1 = vmul.f32 2.0, %v13392_v33 }
 0xc7c   : > { %6799 = vrot.lane.b32.xlu0 %v16728_v49, %s13840_s14 }
 0xc7d   : > { %v16734_v29 = vsel %vm14321_vm10, %v11831_v24, %v13390_v39  ;;  %v11830_v40 = vadd.f32 -1.0, %v6709_v1 }
 0xc7e   : > { %6805 = vrot.lane.b32.xlu1 %v16734_v29, %s13840_s14 }
 0xc7f   : > { %v16740_v15 = vsel %vm14321_vm10, %v11830_v40, %v13392_v33 }
 0xc80   : > { %6803 = vrot.lane.b32.xlu0 %v16740_v15, %s13840_s14 }
 0xccb   : > { %v6778_v4 = vpop.permute.xlu1 %6777 }
 0xccc   : > { %v6824_v36 = vmul.f32 %v6778_v4, %v16650_v3 }
 0xccd   : > { %v6776_v44 = vpop.permute.xlu0 %6775 }
 0xcce   : > { %v6823_v48 = vmul.f32 %v6776_v44, %v16656_v30  ;;  %6857 = vrot.lane.b32.xlu1 %v6824_v36, %s13841_s18  ;;  %v6744_v36 = vmul.f32 %v16650_v3, %v16205_v35  ;;  %v6745_v35 = vmul.f32 %v16668_v2, %v16220_v51 }
 0xcd0   : > { %v6782_v16 = vpop.permute.xlu1 %6781  ;;  %6855 = vrot.lane.b32.xlu0 %v6823_v48, %s13841_s18 }
 0xcd1   : > { %v6826_v41 = vmul.f32 %v6782_v16, %v16662_v13  ;;  %v6743_v16 = vmul.f32 %v16656_v30, %v16210_v54 }
 0xcd2   : > { %v6780_v53 = vpop.permute.xlu0 %6779 }
 0xcd3   : > { %v6825_v38 = vmul.f32 %v6780_v53, %v16668_v2  ;;  %6861 = vrot.lane.b32.xlu1 %v6826_v41, %s13841_s18 }
 0xcd5   : > { %6859 = vrot.lane.b32.xlu0 %v6825_v38, %s13841_s18  ;;  %v6746_v38 = vmul.f32 %v16662_v13, %v16215_v12 }
 0xcd7   : > { %v6786_v19 = vpop.permute.xlu1 %6785 }
 0xcd8   : > { %v6828_v46 = vmul.f32 %v6786_v19, %v16674_v34 }
 0xcd9   : > { %v6784_v25 = vpop.permute.xlu0 %6783 }
 0xcda   : > { %v6827_v57 = vmul.f32 %v6784_v25, %v16680_v63  ;;  %6865 = vrot.lane.b32.xlu1 %v6828_v46, %s13841_s18 }
 0xcdc   : > { %6863 = vrot.lane.b32.xlu0 %v6827_v57, %s13841_s18  ;;  %v6748_v57 = vmul.f32 %v16674_v34, %v16225_v10  ;;  %v6750_v10 = vmul.f32 %v16686_v61, %v16237_v14  ;;  %v6752_v14 = vmul.f32 %v16698_v43, %v16249_v32 }
 0xcdf   : > { %v6790_v56 = vpop.permute.xlu1 %6789 }
 0xce0   : > { %v6830_v22 = vmul.f32 %v6790_v56, %v16686_v61 }
 0xce1   : > { %v6788_v42 = vpop.permute.xlu0 %6787 }
 0xce2   : > { %v6829_v7 = vmul.f32 %v6788_v42, %v16692_v58  ;;  %6869 = vrot.lane.b32.xlu1 %v6830_v22, %s13841_s18  ;;  %v6747_v22 = vmul.f32 %v16680_v63, %v16230_v52  ;;  %v6749_v52 = vmul.f32 %v16692_v58, %v16243_v9  ;;  %v6751_v9 = vmul.f32 %v16704_v5, %v16254_v50 }
 0xce3   : > { %v6794_v21 = vpop.permute.xlu1 %6793  ;;  %v6753_v50 = vmul.f32 %v16716_v0, %v16266_v26 }
 0xce4   : > { %v6832_v59 = vmul.f32 %v6794_v21, %v16698_v43  ;;  %6867 = vrot.lane.b32.xlu0 %v6829_v7, %s13841_s18 }
 0xce5   : > { %v6792_v23 = vpop.permute.xlu0 %6791 }
 0xce6   : > { %v6831_v62 = vmul.f32 %v6792_v23, %v16704_v5  ;;  %6873 = vrot.lane.b32.xlu1 %v6832_v59, %s13841_s18 }
 0xce8   : > { %v6798_v60 = vpop.permute.xlu1 %6797  ;;  %6871 = vrot.lane.b32.xlu0 %v6831_v62, %s13841_s18 }
 0xce9   : > { %v6834_v8 = vmul.f32 %v6798_v60, %v16710_v37 }
 0xcea   : > { %v6796_v6 = vpop.permute.xlu0 %6795 }
 0xceb   : > { %v6833_v28 = vmul.f32 %v6796_v6, %v16716_v0  ;;  %6877 = vrot.lane.b32.xlu1 %v6834_v8, %s13841_s18 }
 0xcec   : > { %v6802_v39 = vpop.permute.xlu1 %6801 }
 0xced   : > { %v6836_v31 = vmul.f32 %v6802_v39, %v16722_v18  ;;  %6875 = vrot.lane.b32.xlu0 %v6833_v28, %s13841_s18 }
 0xcee   : > { %v6800_v27 = vpop.permute.xlu0 %6799 }
 0xcef   : > { %v6835_v33 = vmul.f32 %v6800_v27, %v16728_v49  ;;  %6881 = vrot.lane.b32.xlu1 %v6836_v31, %s13841_s18 }
 0xcf0   : > { %v6806_v24 = vpop.permute.xlu1 %6805 }
 0xcf1   : > { %v6838_v1 = vmul.f32 %v6806_v24, %v16734_v29  ;;  %6879 = vrot.lane.b32.xlu0 %v6835_v33, %s13841_s18  ;;  %v6754_v24 = vmul.f32 %v16710_v37, %v16260_v45  ;;  %v6756_v45 = vmul.f32 %v16722_v18, %v16271_v11 }
 0xcf2   : > { %v6804_v40 = vpop.permute.xlu0 %6803 }
 0xcf3   : > { %v6837_v4 = vmul.f32 %v6804_v40, %v16740_v15  ;;  %6885 = vrot.lane.b32.xlu1 %v6838_v1, %s13841_s18 }
 0xcf5   : > { %6883 = vrot.lane.b32.xlu0 %v6837_v4, %s13841_s18 }
 0xd40   : > { %v6858_v44 = vpop.permute.xlu1 %6857 }
 0xd41   : > { %v16778_v48 = vadd.f32 %v6858_v44, %v6744_v36 }
 0xd42   : > { %v6856_v41 = vpop.permute.xlu0 %6855 }
 0xd43   : > { %13393 = vtanh.f32 %v16778_v48  ;;  %v16783_v53 = vadd.f32 %v6856_v41, %v6743_v16  ;;  %v6755_v41 = vmul.f32 %v16728_v49, %v16276_v20  ;;  %v6757_v20 = vmul.f32 %v16740_v15, %v16288_v17 }
 0xd45   : > { %13395 = vtanh.f32 %v16783_v53  ;;  %v6862_v19 = vpop.permute.xlu1 %6861 }
 0xd46   : > { %v16788_v46 = vadd.f32 %v6862_v19, %v6746_v38 }
 0xd47   : > { %v6860_v25 = vpop.permute.xlu0 %6859 }
 0xd48   : > { %13397 = vtanh.f32 %v16788_v46  ;;  %v16793_v54 = vadd.f32 %v6860_v25, %v6745_v35  ;;  %v6758_v35 = vmul.f32 %v16734_v29, %v16282_v47 }
 0xd4a   : > { %13399 = vtanh.f32 %v16793_v54 }
 0xd4c   : > { %v6866_v56 = vpop.permute.xlu1 %6865 }
 0xd4d   : > { %v16798_v12 = vadd.f32 %v6866_v56, %v6748_v57 }
 0xd4e   : > { %v6864_v42 = vpop.permute.xlu0 %6863 }
 0xd4f   : > { %13401 = vtanh.f32 %v16798_v12  ;;  %v16803_v51 = vadd.f32 %v6864_v42, %v6747_v22 }
 0xd50   : > { %v13394_v7 = vpop.eup %13393 }
 0xd51   : > { %13403 = vtanh.f32 %v16803_v51  ;;  %6953 = vrot.lane.b32.xlu1 %v13394_v7, %s13840_s14  ;;  %v7015_v7 = vld [vmem:[%s13931_s19 + $0x5] sm:$0x1] }
 0xd52   : > { %v13396_v21 = vpop.eup %13395 }
 0xd53   : > { %6951 = vrot.lane.b32.xlu0 %v13396_v21, %s13840_s14  ;;  %v7016_v21 = vld [vmem:[%s13931_s19 + $0xd] sm:$0x1] }
 0xd54   : > { %v6870_v59 = vpop.permute.xlu1 %6869 }
 0xd55   : > { %v13398_v23 = vpop.eup %13397  ;;  %v16810_v62 = vadd.f32 %v6870_v59, %v6750_v10  ;;  %v7017_v10 = vld [vmem:[%s13931_s19 + $0x15] sm:$0x1]  ;;  %v7018_v59 = vld [vmem:[%s13931_s19 + $0x1d] sm:$0x1] }
 0xd56   : > { %v6868_v60 = vpop.permute.xlu0 %6867  ;;  %6957 = vrot.lane.b32.xlu1 %v13398_v23, %s13840_s14  ;;  %v7019_v23 = vld [vmem:[%s13931_s19 + $0x25] sm:$0x1] }
 0xd57   : > { %v13400_v8 = vpop.eup %13399  ;;  %13405 = vtanh.f32 %v16810_v62  ;;  %v16816_v6 = vadd.f32 %v6868_v60, %v6749_v52  ;;  %v7020_v52 = vld [vmem:[%s13931_s19 + $0x2d] sm:$0x1] }
 0xd58   : > { %v6874_v28 = vpop.permute.xlu1 %6873  ;;  %6955 = vrot.lane.b32.xlu0 %v13400_v8, %s13840_s14  ;;  %v7021_v8 = vld [vmem:[%s13931_s19 + $0x35] sm:$0x1] }
 0xd59   : > { %13407 = vtanh.f32 %v16816_v6  ;;  %v16822_v39 = vadd.f32 %v6874_v28, %v6752_v14  ;;  %v7271_v14 = vrot.slane %v7016_v21, 7  ;;  %v7273_v28 = vrot.slane %v7017_v10, 6 }
 0xd5a   : > { %v6872_v31 = vpop.permute.xlu0 %6871 }
 0xd5b   : > { %13409 = vtanh.f32 %v16822_v39  ;;  %v16827_v27 = vadd.f32 %v6872_v31, %v6751_v9  ;;  %v7022_v9 = vld [vmem:[%s13931_s19 + $0x3d] sm:$0x1]  ;;  %v7275_v31 = vrot.slane %v7018_v59, 5 }
 0xd5c   : > { %v13402_v33 = vpop.eup %13401 }
 0xd5d   : > { %13411 = vtanh.f32 %v16827_v27  ;;  %v6878_v32 = vpop.permute.xlu1 %6877  ;;  %6961 = vrot.lane.b32.xlu1 %v13402_v33, %s13840_s14  ;;  %v7277_v33 = vrot.slane %v7019_v23, 4 }
 0xd5e   : > { %v13404_v1 = vpop.eup %13403  ;;  %v16833_v40 = vadd.f32 %v6878_v32, %v6754_v24  ;;  %v7279_v24 = vrot.slane %v7020_v52, 3  ;;  %v7281_v32 = vrot.slane %v7021_v8, 2 }
 0xd5f   : > { %v6876_v4 = vpop.permute.xlu0 %6875  ;;  %6959 = vrot.lane.b32.xlu0 %v13404_v1, %s13840_s14 }
 0xd60   : > { %13413 = vtanh.f32 %v16833_v40  ;;  %v16839_v36 = vadd.f32 %v6876_v4, %v6753_v50  ;;  %v7272_v50 = vsel %vm662_vm0, %v7271_v14, %v7015_v7  ;;  %v7023_v4 = vld [vmem:[%s13931_s19 + $0x45] sm:$0x1]  ;;  %v7030_v7 = vld [vmem:[%s13931_s19 + $0x7d] sm:$0x1] }
 0xd61   : > { %v6882_v44 = vpop.permute.xlu1 %6881 }
 0xd62   : > { %13415 = vtanh.f32 %v16839_v36  ;;  %v16844_v16 = vadd.f32 %v6882_v44, %v6756_v45  ;;  %v7024_v45 = vld [vmem:[%s13931_s19 + $0x4d] sm:$0x1]  ;;  %v7025_v44 = vld [vmem:[%s13931_s19 + $0x55] sm:$0x1] }
 0xd63   : > { %v6880_v38 = vpop.permute.xlu0 %6879 }
 0xd64   : > { %v13406_v26 = vpop.eup %13405  ;;  %13417 = vtanh.f32 %v16844_v16  ;;  %v16849_v19 = vadd.f32 %v6880_v38, %v6755_v41  ;;  %v7274_v41 = vsel %vm665_vm1, %v7273_v28, %v7272_v50  ;;  %v7026_v38 = vld [vmem:[%s13931_s19 + $0x5d] sm:$0x1] }
 0xd65   : > { %v6886_v25 = vpop.permute.xlu1 %6885  ;;  %6965 = vrot.lane.b32.xlu1 %v13406_v26, %s13840_s14  ;;  %v7027_v26 = vld [vmem:[%s13931_s19 + $0x65] sm:$0x1]  ;;  %v7289_v21 = vrot.slane %v7026_v38, 5 }
 0xd66   : > { %v13408_v11 = vpop.eup %13407  ;;  %13419 = vtanh.f32 %v16849_v19  ;;  %v16855_v57 = vadd.f32 %v6886_v25, %v6758_v35  ;;  %v7028_v35 = vld [vmem:[%s13931_s19 + $0x6d] sm:$0x1]  ;;  %v7291_v10 = vrot.slane %v7027_v26, 4  ;;  %v13816_v38 = vld [vmem:[%s18800_s1] sm:$0xff] }
 0xd67   : > { %v6884_v56 = vpop.permute.xlu0 %6883  ;;  %6963 = vrot.lane.b32.xlu0 %v13408_v11, %s13840_s14  ;;  %v7276_v11 = vsel %vm668_vm2, %v7275_v31, %v7274_v41  ;;  %v13815_v41 = vld [vmem:[%s18800_s1 + $0x8] sm:$0xff]  ;;  %v7031_v26 = vld [vmem:[%s13931_s19 + $0x85] sm:$0x1] }
 0xd68   : > { %v13410_v47 = vpop.eup %13409  ;;  %13421 = vtanh.f32 %v16855_v57  ;;  %v16861_v22 = vadd.f32 %v6884_v56, %v6757_v20  ;;  %v7283_v20 = vrot.slane %v7022_v9, 1  ;;  %v7029_v56 = vld [vmem:[%s13931_s19 + $0x75] sm:$0x1] }
 0xd69   : > { %6969 = vrot.lane.b32.xlu1 %v13410_v47, %s13840_s14  ;;  %v7285_v47 = vrot.slane %v7024_v45, 7  ;;  %v7295_v28 = vrot.slane %v7029_v56, 2  ;;  %v13813_v45 = vld [vmem:[%s18800_s1 + $0x18] sm:$0xff]  ;;  %v7036_v56 = vld [vmem:[%s13931_s19 + $0xad] sm:$0x1] }
 0xd6a   : > { %v13412_v42 = vpop.eup %13411  ;;  %13423 = vtanh.f32 %v16861_v22 }
 0xd6b   : > { %6967 = vrot.lane.b32.xlu0 %v13412_v42, %s13840_s14  ;;  %v7287_v42 = vrot.slane %v7025_v44, 6  ;;  %v7286_v52 = vsel %vm662_vm0, %v7285_v47, %v7023_v4  ;;  %v13814_v44 = vld [vmem:[%s18800_s1 + $0x10] sm:$0xff] }
 0xd6c   : > { %v7037_v47 = vld [vmem:[%s13931_s19 + $0xb5] sm:$0x1] }
 0xd6d   : > { %v13414_v17 = vpop.eup %13413  ;;  %v7288_v14 = vsel %vm665_vm1, %v7287_v42, %v7286_v52  ;;  %v7038_v42 = vld [vmem:[%s13931_s19 + $0xbd] sm:$0x1] }
 0xd6e   : > { %6973 = vrot.lane.b32.xlu1 %v13414_v17, %s13840_s14  ;;  %v7278_v17 = vsel %vm671_vm3, %v7277_v33, %v7276_v11  ;;  %v7290_v33 = vsel %vm668_vm2, %v7289_v21, %v7288_v14  ;;  %v7034_v11 = vld [vmem:[%s13931_s19 + $0x9d] sm:$0x1]  ;;  %v7040_v14 = vld [vmem:[%s13931_s19 + $0xcd] sm:$0x1] }
 0xd6f   : > { %v13416_v60 = vpop.eup %13415  ;;  %v7280_v23 = vsel %vm674_vm4, %v7279_v24, %v7278_v17  ;;  %v7292_v24 = vsel %vm671_vm3, %v7291_v10, %v7290_v33  ;;  %v7303_v21 = vrot.slane %v7034_v11, 5  ;;  %v7043_v33 = vld [vmem:[%s13931_s19 + $0xe5] sm:$0x1]  ;;  %v7048_v11 = vld [vmem:[%s13931_s19 + $0x10d] sm:$0x1] }
 0xd70   : > { %6971 = vrot.lane.b32.xlu0 %v13416_v60, %s13840_s14  ;;  %v7293_v60 = vrot.slane %v7028_v35, 3  ;;  %v7282_v8 = vsel %vm677_vm5, %v7281_v32, %v7280_v23  ;;  %v7032_v35 = vld [vmem:[%s13931_s19 + $0x8d] sm:$0x1]  ;;  %v7039_v23 = vld [vmem:[%s13931_s19 + $0xc5] sm:$0x1] }
 0xd71   : > { %v13418_v1 = vpop.eup %13417  ;;  %v7284_v31 = vsel %vm680_vm6, %v7283_v20, %v7282_v8  ;;  %v7035_v20 = vld [vmem:[%s13931_s19 + $0xa5] sm:$0x1]  ;;  %v7299_v17 = vrot.slane %v7032_v35, 7  ;;  %v7311_v8 = vrot.slane %v7038_v42, 1  ;;  %v7319_v35 = vrot.slane %v7043_v33, 4 }
 0xd72   : > { %6977 = vrot.lane.b32.xlu1 %v13418_v1, %s13840_s14  ;;  %v7297_v1 = vrot.slane %v7030_v7, 1  ;;  %12711 = vmatprep.mubr.msk.f32.mxu0 %vm892_vm7, %v7284_v31  ;;  %v7294_v50 = vsel %vm674_vm4, %v7293_v60, %v7292_v24  ;;  %v7305_v10 = vrot.slane %v7035_v20, 4  ;;  %v7309_v60 = vrot.slane %v7037_v47, 2  ;;  %v7042_v31 = vld [vmem:[%s13931_s19 + $0xdd] sm:$0x1] }
 0xd73   : > { %v13420_v25 = vpop.eup %13419  ;;  %v7296_v32 = vsel %vm677_vm5, %v7295_v28, %v7294_v50  ;;  %v7300_v52 = vsel %vm662_vm0, %v7299_v17, %v7031_v26  ;;  %v7041_v28 = vld [vmem:[%s13931_s19 + $0xd5] sm:$0x1]  ;;  %v7317_v26 = vrot.slane %v7042_v31, 5  ;;  %v7054_v33 = vld [vmem:[%s13931_s19 + $0x13d] sm:$0x1] }
 0xd74   : > { %6975 = vrot.lane.b32.xlu0 %v13420_v25, %s13840_s14  ;;  %v7298_v4 = vsel %vm680_vm6, %v7297_v1, %v7296_v32  ;;  %v7033_v25 = vld [vmem:[%s13931_s19 + $0x95] sm:$0x1]  ;;  %v7044_v1 = vld [vmem:[%s13931_s19 + $0xed] sm:$0x1] }
 0xd75   : > { %v13422_v59 = vpop.eup %13421  ;;  %12712 = vmatmul.mubr.msk.f32.vlgmr.msra.gmra.mxu0 %vm892_vm7, %v7298_v4  ;;  %v7301_v7 = vrot.slane %v7033_v25, 6  ;;  %v7045_v32 = vld [vmem:[%s13931_s19 + $0xf5] sm:$0x1]  ;;  %v7046_v4 = vld [vmem:[%s13931_s19 + $0xfd] sm:$0x1]  ;;  %v7321_v42 = vrot.slane %v7044_v1, 3 }
 0xd76   : > { %6981 = vrot.lane.b32.xlu1 %v13422_v59, %s13840_s14  ;;  %12768 = vmatpush3.msra.mxu0 %v13813_v45  ;;  %v7307_v59 = vrot.slane %v7036_v56, 3  ;;  %v7047_v25 = vld [vmem:[%s13931_s19 + $0x105] sm:$0x1]  ;;  %v7323_v17 = vrot.slane %v7045_v32, 2  ;;  %v7053_v31 = vld [vmem:[%s13931_s19 + $0x135] sm:$0x1] }
 0xd77   : > { %v13424_v9 = vpop.eup %13423  ;;  %12769 = vmatprep.subr.mxu0 %v13814_v44  ;;  %v7327_v1 = vrot.slane %v7048_v11, 7  ;;  %v7057_v11 = vld [vmem:[%s13931_s19 + $0x155] sm:$0x1] }
 0xd78   : > { %6979 = vrot.lane.b32.xlu0 %v13424_v9, %s13840_s14  ;;  %12770 = vmatpush3.msra.mxu0 %v13814_v44  ;;  %v7302_v9 = vsel %vm665_vm1, %v7301_v7, %v7300_v52  ;;  %v7315_v44 = vrot.slane %v7041_v28, 6  ;;  %v7049_v7 = vld [vmem:[%s13931_s19 + $0x115] sm:$0x1]  ;;  %v7051_v28 = vld [vmem:[%s13931_s19 + $0x125] sm:$0x1] }
 0xd79   : > { %12771 = vmatprep.subr.mxu0 %v13815_v41  ;;  %v7304_v50 = vsel %vm668_vm2, %v7303_v21, %v7302_v9  ;;  %v7050_v21 = vld [vmem:[%s13931_s19 + $0x11d] sm:$0x1]  ;;  %v7052_v9 = vld [vmem:[%s13931_s19 + $0x12d] sm:$0x1]  ;;  %v7333_v32 = vrot.slane %v7051_v28, 4 }
 0xd7a   : > { %12772 = vmatpush3.msra.mxu0 %v13815_v41 }
 0xd7b   : > { %12773 = vmatprep.subr.mxu0 %v13816_v38 }
 0xd7c   : > { %12774 = vmatpush3.msra.mxu0 %v13816_v38  ;;  %v7306_v38 = vsel %vm671_vm3, %v7305_v10, %v7304_v50  ;;  %v7331_v50 = vrot.slane %v7050_v21, 5 }
 0xd7d   : > { %12831 = vmatprep.subr.mxu0 %v13813_v45  ;;  %v7313_v45 = vrot.slane %v7040_v14, 7  ;;  %v7308_v56 = vsel %vm674_vm4, %v7307_v59, %v7306_v38  ;;  %v7325_v14 = vrot.slane %v7046_v4, 1  ;;  %v7055_v4 = vld [vmem:[%s13931_s19 + $0x145] sm:$0x1]  ;;  %v7337_v38 = vrot.slane %v7053_v31, 2 }
 0xd7e   : > { %v7310_v10 = vsel %vm677_vm5, %v7309_v60, %v7308_v56  ;;  %v7064_v31 = vld [vmem:[%s13931_s19 + $0x18d] sm:$0x1] }
 0xd7f   : > { %v7314_v47 = vsel %vm662_vm0, %v7313_v45, %v7039_v23  ;;  %v7312_v59 = vsel %vm680_vm6, %v7311_v8, %v7310_v10  ;;  %v7335_v8 = vrot.slane %v7052_v9, 3  ;;  %v7060_v10 = vld [vmem:[%s13931_s19 + $0x16d] sm:$0x1] }
 0xd80   : > { %v7316_v52 = vsel %vm665_vm1, %v7315_v44, %v7314_v47  ;;  %12714 = vmatprep.mubr.msk.f32.mxu0 %vm892_vm7, %v7312_v59  ;;  %v7339_v47 = vrot.slane %v7054_v33, 1  ;;  %v7343_v59 = vrot.slane %v7057_v11, 6  ;;  %v7068_v11 = vld [vmem:[%s13931_s19 + $0x1ad] sm:$0x1] }
 0xd81   : > { %v7318_v23 = vsel %vm668_vm2, %v7317_v26, %v7316_v52  ;;  %v7056_v26 = vld [vmem:[%s13931_s19 + $0x14d] sm:$0x1]  ;;  %v7061_v52 = vld [vmem:[%s13931_s19 + $0x175] sm:$0x1] }
 0xd82   : > { %v7320_v60 = vsel %vm671_vm3, %v7319_v35, %v7318_v23  ;;  %v7341_v21 = vrot.slane %v7056_v26, 7  ;;  %v7063_v23 = vld [vmem:[%s13931_s19 + $0x185] sm:$0x1] }
 0xd83   : > { %v7322_v44 = vsel %vm674_vm4, %v7321_v42, %v7320_v60 }
 0xd84   : > { %v7324_v35 = vsel %vm677_vm5, %v7323_v17, %v7322_v44  ;;  %v7062_v17 = vld [vmem:[%s13931_s19 + $0x17d] sm:$0x1]  ;;  %v7342_v9 = vsel %vm662_vm0, %v7341_v21, %v7055_v4  ;;  %v7355_v44 = vrot.slane %v7064_v31, 7  ;;  %v7071_v21 = vld [vmem:[%s13931_s19 + $0x1c5] sm:$0x1] }
 0xd85   : > { %v7066_v4 = vld [vmem:[%s13931_s19 + $0x19d] sm:$0x1] }
 0xdc3   : > { %v6954_v24 = vpop.permute.xlu1 %6953 }
 0xdc4   : > { %v7000_v41 = vmul.f32 %v6954_v24, %v16650_v3 }
 0xdc5   : > { %v6952_v20 = vpop.permute.xlu0 %6951 }
 0xdc6   : > { %v6999_v3 = vmul.f32 %v6952_v20, %v16656_v30  ;;  %7690 = vrot.lane.b32.xlu1 %v7000_v41, %s13841_s18  ;;  %v7329_v30 = vrot.slane %v7049_v7, 6  ;;  %v7328_v41 = vsel %vm662_vm0, %v7327_v1, %v7047_v25  ;;  %v7058_v7 = vld [vmem:[%s13931_s19 + $0x15d] sm:$0x1]  ;;  %v7326_v25 = vsel %vm680_vm6, %v7325_v14, %v7324_v35 }
 0xdc7   : > { %12715 = vmatmul.mubr.msk.f32.gmra.mxu0 %vm892_vm7, %v7326_v25  ;;  %v7349_v1 = vrot.slane %v7060_v10, 3  ;;  %v7070_v35 = vld [vmem:[%s13931_s19 + $0x1bd] sm:$0x1] }
 0xdc8   : > { %v6958_v24 = vpop.permute.xlu1 %6957  ;;  %7688 = vrot.lane.b32.xlu0 %v6999_v3, %s13841_s18  ;;  %v7330_v56 = vsel %vm665_vm1, %v7329_v30, %v7328_v41  ;;  %v7351_v30 = vrot.slane %v7061_v52, 2  ;;  %v7363_v52 = vrot.slane %v7068_v11, 3  ;;  %v7080_v11 = vld [vmem:[%s13931_s19 + $0x20d] sm:$0x1] }
 0xdc9   : > { %v7002_v45 = vmul.f32 %v6958_v24, %v16662_v13  ;;  %v7059_v13 = vld [vmem:[%s13931_s19 + $0x165] sm:$0x1]  ;;  %v7332_v3 = vsel %vm668_vm2, %v7331_v50, %v7330_v56  ;;  %v7065_v24 = vld [vmem:[%s13931_s19 + $0x195] sm:$0x1]  ;;  %v7344_v50 = vsel %vm665_vm1, %v7343_v59, %v7342_v9 }
 0xdca   : > { %v6956_v20 = vpop.permute.xlu0 %6955  ;;  %v7334_v28 = vsel %vm671_vm3, %v7333_v32, %v7332_v3  ;;  %v7347_v33 = vrot.slane %v7059_v13, 4  ;;  %v7353_v32 = vrot.slane %v7062_v17, 1  ;;  %v7357_v13 = vrot.slane %v7065_v24, 6  ;;  %v7077_v24 = vld [vmem:[%s13931_s19 + $0x1f5] sm:$0x1] }
 0xdcb   : > { %v7001_v42 = vmul.f32 %v6956_v20, %v16668_v2  ;;  %7694 = vrot.lane.b32.xlu1 %v7002_v45, %s13841_s18  ;;  %v7345_v2 = vrot.slane %v7058_v7, 5  ;;  %v7336_v14 = vsel %vm674_vm4, %v7335_v8, %v7334_v28  ;;  %v7067_v45 = vld [vmem:[%s13931_s19 + $0x1a5] sm:$0x1]  ;;  %v7069_v20 = vld [vmem:[%s13931_s19 + $0x1b5] sm:$0x1]  ;;  %v7356_v7 = vsel %vm662_vm0, %v7355_v44, %v7063_v23 }
 0xdcc   : > { %v7338_v60 = vsel %vm677_vm5, %v7337_v38, %v7336_v14  ;;  %v7359_v3 = vrot.slane %v7066_v4, 5  ;;  %v7361_v10 = vrot.slane %v7067_v45, 4  ;;  %v7358_v9 = vsel %vm665_vm1, %v7357_v13, %v7356_v7  ;;  %v7075_v23 = vld [vmem:[%s13931_s19 + $0x1e5] sm:$0x1]  ;;  %v7082_v7 = vld [vmem:[%s13931_s19 + $0x21d] sm:$0x1] }
 0xdcd   : > { %7692 = vrot.lane.b32.xlu0 %v7001_v42, %s13841_s18  ;;  %v7340_v26 = vsel %vm680_vm6, %v7339_v47, %v7338_v60  ;;  %v7346_v8 = vsel %vm668_vm2, %v7345_v2, %v7344_v50  ;;  %v7072_v42 = vld [vmem:[%s13931_s19 + $0x1cd] sm:$0x1]  ;;  %v7365_v59 = vrot.slane %v7069_v20, 2  ;;  %v7074_v2 = vld [vmem:[%s13931_s19 + $0x1dd] sm:$0x1]  ;;  %v7383_v13 = vrot.slane %v7080_v11, 7 }
 0xdce   : > { %12717 = vmatprep.mubr.msk.f32.mxu0 %vm892_vm7, %v7340_v26  ;;  %v7348_v38 = vsel %vm671_vm3, %v7347_v33, %v7346_v8  ;;  %v7360_v14 = vsel %vm668_vm2, %v7359_v3, %v7358_v9  ;;  %v7367_v33 = vrot.slane %v7070_v35, 1  ;;  %v7078_v60 = vld [vmem:[%s13931_s19 + $0x1fd] sm:$0x1]  ;;  %v7373_v4 = vrot.slane %v7074_v2, 5  ;;  %v7079_v8 = vld [vmem:[%s13931_s19 + $0x205] sm:$0x1] }
 0xdcf   : > { %v6962_v41 = vpop.permute.xlu1 %6961  ;;  %v7350_v25 = vsel %vm674_vm4, %v7349_v1, %v7348_v38  ;;  %v7076_v1 = vld [vmem:[%s13931_s19 + $0x1ed] sm:$0x1]  ;;  %v7379_v26 = vrot.slane %v7077_v24, 2  ;;  %v7081_v38 = vld [vmem:[%s13931_s19 + $0x215] sm:$0x1] }
 0xdd0   : > { %v7004_v56 = vmul.f32 %v6962_v41, %v16674_v34  ;;  %v7073_v34 = vld [vmem:[%s13931_s19 + $0x1d5] sm:$0x1]  ;;  %v7352_v28 = vsel %vm677_vm5, %v7351_v30, %v7350_v25  ;;  %v7362_v30 = vsel %vm671_vm3, %v7361_v10, %v7360_v14  ;;  %v7377_v41 = vrot.slane %v7076_v1, 3  ;;  %v7083_v25 = vld [vmem:[%s13931_s19 + $0x225] sm:$0x1] }
 0xdd1   : > { %v6960_v47 = vpop.permute.xlu0 %6959  ;;  %v7354_v31 = vsel %vm680_vm6, %v7353_v32, %v7352_v28  ;;  %v7371_v50 = vrot.slane %v7073_v34, 6  ;;  %v7375_v32 = vrot.slane %v7075_v23, 4  ;;  %v7364_v45 = vsel %vm674_vm4, %v7363_v52, %v7362_v30  ;;  %v7084_v3 = vld [vmem:[%s13931_s19 + $0x22d] sm:$0x1]  ;;  %v7085_v10 = vld [vmem:[%s13931_s19 + $0x235] sm:$0x1] }
 0xdd2   : > { %v7003_v17 = vmul.f32 %v6960_v47, %v16680_v63  ;;  %7698 = vrot.lane.b32.xlu1 %v7004_v56, %s13841_s18  ;;  %v7369_v63 = vrot.slane %v7072_v42, 7  ;;  %12718 = vmatmul.mubr.msk.f32.gmra.mxu0 %vm892_vm7, %v7354_v31  ;;  %v7366_v20 = vsel %vm677_vm5, %v7365_v59, %v7364_v45  ;;  %v7381_v56 = vrot.slane %v7078_v60, 1  ;;  %v7087_v59 = vld [vmem:[%s13931_s19 + $0x245] sm:$0x1]  ;;  %v7089_v60 = vld [vmem:[%s13931_s19 + $0x255] sm:$0x1] }
 0xdd3   : > { %v7368_v47 = vsel %vm680_vm6, %v7367_v33, %v7366_v20  ;;  %v7384_v28 = vsel %vm662_vm0, %v7383_v13, %v7079_v8  ;;  %v7385_v9 = vrot.slane %v7081_v38, 6  ;;  %v7387_v31 = vrot.slane %v7082_v7, 5  ;;  %v7093_v20 = vld [vmem:[%s13931_s19 + $0x275] sm:$0x1] }
 0xdd4   : > { %7696 = vrot.lane.b32.xlu0 %v7003_v17, %s13841_s18  ;;  %v7370_v44 = vsel %vm662_vm0, %v7369_v63, %v7071_v21  ;;  %12720 = vmatprep.mubr.msk.f32.mxu0 %vm892_vm7, %v7368_v47  ;;  %v7086_v17 = vld [vmem:[%s13931_s19 + $0x23d] sm:$0x1]  ;;  %v7389_v14 = vrot.slane %v7083_v25, 4  ;;  %v7391_v33 = vrot.slane %v7084_v3, 3  ;;  %v7393_v30 = vrot.slane %v7085_v10, 2 }
 0xdd5   : > { %v7372_v35 = vsel %vm665_vm1, %v7371_v50, %v7370_v44  ;;  %v7386_v63 = vsel %vm665_vm1, %v7385_v9, %v7384_v28  ;;  %v7090_v50 = vld [vmem:[%s13931_s19 + $0x25d] sm:$0x1]  ;;  %v7395_v44 = vrot.slane %v7086_v17, 1  ;;  %v7096_v25 = vld [vmem:[%s13931_s19 + $0x28d] sm:$0x1] }
 0xdd6   : > { %v7374_v21 = vsel %vm668_vm2, %v7373_v4, %v7372_v35  ;;  %v7388_v45 = vsel %vm668_vm2, %v7387_v31, %v7386_v63  ;;  %v7094_v35 = vld [vmem:[%s13931_s19 + $0x27d] sm:$0x1]  ;;  %v7401_v38 = vrot.slane %v7090_v50, 5  ;;  %v7097_v17 = vld [vmem:[%s13931_s19 + $0x295] sm:$0x1]  ;;  %v7411_v31 = vrot.slane %v7096_v25, 7 }
 0xdd7   : > { %v6966_v42 = vpop.permute.xlu1 %6965  ;;  %v7376_v34 = vsel %vm671_vm3, %v7375_v32, %v7374_v21  ;;  %v7390_v11 = vsel %vm671_vm3, %v7389_v14, %v7388_v45  ;;  %v7095_v21 = vld [vmem:[%s13931_s19 + $0x285] sm:$0x1]  ;;  %v7098_v28 = vld [vmem:[%s13931_s19 + $0x29d] sm:$0x1]  ;;  %v7104_v45 = vld [vmem:[%s13931_s19 + $0x2cd] sm:$0x1] }
 0xdd8   : > { %v7006_v52 = vmul.f32 %v6966_v42, %v16686_v61  ;;  %v7378_v23 = vsel %vm674_vm4, %v7377_v41, %v7376_v34  ;;  %v7088_v61 = vld [vmem:[%s13931_s19 + $0x24d] sm:$0x1]  ;;  %v7091_v41 = vld [vmem:[%s13931_s19 + $0x265] sm:$0x1]  ;;  %v7392_v13 = vsel %vm674_vm4, %v7391_v33, %v7390_v11  ;;  %v7407_v34 = vrot.slane %v7093_v20, 2 }
 0xdd9   : > { %v6964_v2 = vpop.permute.xlu0 %6963  ;;  %v7380_v24 = vsel %vm677_vm5, %v7379_v26, %v7378_v23  ;;  %v7397_v8 = vrot.slane %v7088_v61, 7  ;;  %v7394_v10 = vsel %vm677_vm5, %v7393_v30, %v7392_v13  ;;  %v7099_v23 = vld [vmem:[%s13931_s19 + $0x2a5] sm:$0x1]  ;;  %v7101_v61 = vld [vmem:[%s13931_s19 + $0x2b5] sm:$0x1]  ;;  %v7415_v63 = vrot.slane %v7098_v28, 5 }
 0xdda   : > { %v7005_v1 = vmul.f32 %v6964_v2, %v16692_v58  ;;  %7702 = vrot.lane.b32.xlu1 %v7006_v52, %s13841_s18  ;;  %v7382_v32 = vsel %vm680_vm6, %v7381_v56, %v7380_v24  ;;  %v7092_v58 = vld [vmem:[%s13931_s19 + $0x26d] sm:$0x1]  ;;  %v7399_v56 = vrot.slane %v7089_v60, 6  ;;  %v7396_v9 = vsel %vm680_vm6, %v7395_v44, %v7394_v10  ;;  %v7105_v11 = vld [vmem:[%s13931_s19 + $0x2d5] sm:$0x1] }
 0xddb   : > { %v6970_v4 = vpop.permute.xlu1 %6969  ;;  %12721 = vmatmul.mubr.msk.f32.gmra.mxu0 %vm892_vm7, %v7382_v32  ;;  %v7398_v42 = vsel %vm662_vm0, %v7397_v8, %v7087_v59  ;;  %v7405_v47 = vrot.slane %v7092_v58, 3  ;;  %v7409_v2 = vrot.slane %v7094_v35, 1  ;;  %v7413_v24 = vrot.slane %v7097_v17, 6  ;;  %v7103_v32 = vld [vmem:[%s13931_s19 + $0x2c5] sm:$0x1] }
 0xddc   : > { %v7008_v26 = vmul.f32 %v6970_v4, %v16698_v43  ;;  %7700 = vrot.lane.b32.xlu0 %v7005_v1, %s13841_s18  ;;  %v7403_v43 = vrot.slane %v7091_v41, 4  ;;  %v7400_v52 = vsel %vm665_vm1, %v7399_v56, %v7398_v42  ;;  %12723 = vmatprep.mubr.msk.f32.mxu0 %vm892_vm7, %v7396_v9  ;;  %v7102_v1 = vld [vmem:[%s13931_s19 + $0x2bd] sm:$0x1]  ;;  %v7412_v50 = vsel %vm662_vm0, %v7411_v31, %v7095_v21  ;;  %v7108_v13 = vld [vmem:[%s13931_s19 + $0x2ed] sm:$0x1] }
 0xddd   : > { %v6968_v7 = vpop.permute.xlu0 %6967  ;;  %v7402_v59 = vsel %vm668_vm2, %v7401_v38, %v7400_v52  ;;  %v7417_v4 = vrot.slane %v7099_v23, 4  ;;  %v7414_v58 = vsel %vm665_vm1, %v7413_v24, %v7412_v50  ;;  %v7423_v38 = vrot.slane %v7102_v1, 1  ;;  %v7110_v21 = vld [vmem:[%s13931_s19 + $0x2fd] sm:$0x1]  ;;  %v7111_v17 = vld [vmem:[%s13931_s19 + $0x305] sm:$0x1] }
 0xdde   : > { %v7007_v3 = vmul.f32 %v6968_v7, %v16704_v5  ;;  %7706 = vrot.lane.b32.xlu1 %v7008_v26, %s13841_s18  ;;  %v7100_v5 = vld [vmem:[%s13931_s19 + $0x2ad] sm:$0x1]  ;;  %v7404_v33 = vsel %vm671_vm3, %v7403_v43, %v7402_v59  ;;  %v7421_v26 = vrot.slane %v7101_v61, 2  ;;  %v7416_v56 = vsel %vm668_vm2, %v7415_v63, %v7414_v58  ;;  %v7107_v7 = vld [vmem:[%s13931_s19 + $0x2e5] sm:$0x1] }
 0xddf   : > { %v7406_v60 = vsel %vm674_vm4, %v7405_v47, %v7404_v33  ;;  %v7419_v8 = vrot.slane %v7100_v5, 3  ;;  %v7418_v43 = vsel %vm671_vm3, %v7417_v4, %v7416_v56  ;;  %v7109_v47 = vld [vmem:[%s13931_s19 + $0x2f5] sm:$0x1]  ;;  %v7427_v25 = vrot.slane %v7105_v11, 6  ;;  %v7112_v28 = vld [vmem:[%s13931_s19 + $0x30d] sm:$0x1] }
 0xde0   : > { %v6974_v14 = vpop.permute.xlu1 %6973  ;;  %7704 = vrot.lane.b32.xlu0 %v7007_v3, %s13841_s18  ;;  %v7408_v41 = vsel %vm677_vm5, %v7407_v34, %v7406_v60  ;;  %v7431_v34 = vrot.slane %v7107_v7, 4  ;;  %v7433_v23 = vrot.slane %v7108_v13, 3  ;;  %v7435_v5 = vrot.slane %v7109_v47, 2  ;;  %v7114_v31 = vld [vmem:[%s13931_s19 + $0x31d] sm:$0x1] }
 0xde1   : > { %v7010_v30 = vmul.f32 %v6974_v14, %v16710_v37  ;;  %v7106_v37 = vld [vmem:[%s13931_s19 + $0x2dd] sm:$0x1]  ;;  %v7410_v35 = vsel %vm680_vm6, %v7409_v2, %v7408_v41  ;;  %v7420_v10 = vsel %vm674_vm4, %v7419_v8, %v7418_v43  ;;  %v7437_v1 = vrot.slane %v7110_v21, 1  ;;  %v7115_v24 = vld [vmem:[%s13931_s19 + $0x325] sm:$0x1] }
 0xde2   : > { %v6972_v44 = vpop.permute.xlu0 %6971  ;;  %12724 = vmatmul.mubr.msk.f32.gmra.mxu0 %vm892_vm7, %v7410_v35  ;;  %v7429_v52 = vrot.slane %v7106_v37, 5  ;;  %v7422_v59 = vsel %vm677_vm5, %v7421_v26, %v7420_v10  ;;  %v7116_v63 = vld [vmem:[%s13931_s19 + $0x32d] sm:$0x1]  ;;  %v7117_v50 = vld [vmem:[%s13931_s19 + $0x335] sm:$0x1]  ;;  %v7443_v41 = vrot.slane %v7114_v31, 5 }
 0xde3   : > { %v7009_v20 = vmul.f32 %v6972_v44, %v16716_v0  ;;  %7710 = vrot.lane.b32.xlu1 %v7010_v30, %s13841_s18  ;;  %v7425_v0 = vrot.slane %v7104_v45, 7  ;;  %v7424_v33 = vsel %vm680_vm6, %v7423_v38, %v7422_v59  ;;  %v7118_v4 = vld [vmem:[%s13931_s19 + $0x33d] sm:$0x1]  ;;  %v7445_v58 = vrot.slane %v7115_v24, 4  ;;  %v7119_v8 = vld [vmem:[%s13931_s19 + $0x345] sm:$0x1] }
 0xde4   : > { %v6978_v42 = vpop.permute.xlu1 %6977  ;;  %12726 = vmatprep.mubr.msk.f32.mxu0 %vm892_vm7, %v7424_v33  ;;  %v7120_v26 = vld [vmem:[%s13931_s19 + $0x34d] sm:$0x1]  ;;  %v7447_v35 = vrot.slane %v7116_v63, 3  ;;  %v7449_v56 = vrot.slane %v7117_v50, 2  ;;  %v7122_v38 = vld [vmem:[%s13931_s19 + $0x35d] sm:$0x1] }
 0xde5   : > { %v7012_v3 = vmul.f32 %v6978_v42, %v16722_v18  ;;  %7708 = vrot.lane.b32.xlu0 %v7009_v20, %s13841_s18  ;;  %v7426_v2 = vsel %vm662_vm0, %v7425_v0, %v7103_v32  ;;  %v7113_v18 = vld [vmem:[%s13931_s19 + $0x315] sm:$0x1]  ;;  %v7451_v43 = vrot.slane %v7118_v4, 1  ;;  %v7123_v47 = vld [vmem:[%s13931_s19 + $0x365] sm:$0x1] }
 0xde6   : > { %v6976_v9 = vpop.permute.xlu0 %6975  ;;  %v7428_v61 = vsel %vm665_vm1, %v7427_v25, %v7426_v2  ;;  %v7441_v32 = vrot.slane %v7113_v18, 6  ;;  %v7124_v21 = vld [vmem:[%s13931_s19 + $0x36d] sm:$0x1]  ;;  %v7126_v10 = vld [vmem:[%s13931_s19 + $0x37d] sm:$0x1] }
 0xde7   : > { %v7011_v14 = vmul.f32 %v6976_v9, %v16728_v49  ;;  %7714 = vrot.lane.b32.xlu1 %v7012_v3, %s13841_s18  ;;  %v7430_v60 = vsel %vm668_vm2, %v7429_v52, %v7428_v61  ;;  %v7439_v49 = vrot.slane %v7112_v28, 7  ;;  %v7125_v3 = vld [vmem:[%s13931_s19 + $0x375] sm:$0x1]  ;;  %v7453_v52 = vrot.slane %v7120_v26, 7  ;;  %v7127_v59 = vld [vmem:[%s13931_s19 + $0x385] sm:$0x1] }
 0xde8   : > { %v6982_v30 = vpop.permute.xlu1 %6981  ;;  %v7432_v44 = vsel %vm671_vm3, %v7431_v34, %v7430_v60  ;;  %v7459_v28 = vrot.slane %v7123_v47, 4  ;;  %v7461_v9 = vrot.slane %v7124_v21, 3  ;;  %v7465_v18 = vrot.slane %v7126_v10, 1  ;;  %v7128_v31 = vld [vmem:[%s13931_s19 + $0x38d] sm:$0x1] }
 0xde9   : > { %v7014_v45 = vmul.f32 %v6982_v30, %v16734_v29  ;;  %7712 = vrot.lane.b32.xlu0 %v7011_v14, %s13841_s18  ;;  %v7434_v37 = vsel %vm674_vm4, %v7433_v23, %v7432_v44  ;;  %v7440_v20 = vsel %vm662_vm0, %v7439_v49, %v7111_v17  ;;  %v7121_v29 = vld [vmem:[%s13931_s19 + $0x355] sm:$0x1]  ;;  %v7457_v17 = vrot.slane %v7122_v38, 5  ;;  %v7131_v24 = vld [vmem:[%s13931_s19 + $0x3a5] sm:$0x1] }
 0xdea   : > { %v6980_v11 = vpop.permute.xlu0 %6979  ;;  %v7436_v13 = vsel %vm677_vm5, %v7435_v5, %v7434_v37  ;;  %v7442_v42 = vsel %vm665_vm1, %v7441_v32, %v7440_v20  ;;  %v7454_v23 = vsel %vm662_vm0, %v7453_v52, %v7119_v8  ;;  %v7463_v5 = vrot.slane %v7125_v3, 2  ;;  %v7129_v14 = vld [vmem:[%s13931_s19 + $0x395] sm:$0x1]  ;;  %v7132_v63 = vld [vmem:[%s13931_s19 + $0x3ad] sm:$0x1] }
 0xdeb   : > { %v7013_v7 = vmul.f32 %v6980_v11, %v16740_v15  ;;  %7718 = vrot.lane.b32.xlu1 %v7014_v45, %s13841_s18  ;;  %v7438_v0 = vsel %vm680_vm6, %v7437_v1, %v7436_v13  ;;  %v7444_v25 = vsel %vm668_vm2, %v7443_v41, %v7442_v42  ;;  %v7455_v15 = vrot.slane %v7121_v29, 6  ;;  %v7130_v1 = vld [vmem:[%s13931_s19 + $0x39d] sm:$0x1]  ;;  %v7133_v50 = vld [vmem:[%s13931_s19 + $0x3b5] sm:$0x1] }
 0xdec   : > { %12727 = vmatmul.mubr.msk.f32.gmra.mxu0 %vm892_vm7, %v7438_v0  ;;  %v7446_v34 = vsel %vm671_vm3, %v7445_v58, %v7444_v25  ;;  %v7134_v4 = vld [vmem:[%s13931_s19 + $0x3bd] sm:$0x1]  ;;  %v7467_v49 = vrot.slane %v7128_v31, 7  ;;  %v7469_v32 = vrot.slane %v7129_v14, 6  ;;  %v7471_v44 = vrot.slane %v7130_v1, 5 }
 0xded   : > { %7716 = vrot.lane.b32.xlu0 %v7013_v7, %s13841_s18  ;;  %v7448_v2 = vsel %vm674_vm4, %v7447_v35, %v7446_v34  ;;  %v7456_v61 = vsel %vm665_vm1, %v7455_v15, %v7454_v23  ;;  %v7473_v41 = vrot.slane %v7131_v24, 4  ;;  %v7475_v58 = vrot.slane %v7132_v63, 3  ;;  %v7135_v8 = vld [vmem:[%s13931_s19 + $0x3c5] sm:$0x1]  ;;  %v7136_v35 = vld [vmem:[%s13931_s19 + $0x3cd] sm:$0x1] }
 0xdee   : > { %v7450_v33 = vsel %vm677_vm5, %v7449_v56, %v7448_v2  ;;  %v7458_v60 = vsel %vm668_vm2, %v7457_v17, %v7456_v61  ;;  %v7468_v11 = vsel %vm662_vm0, %v7467_v49, %v7127_v59  ;;  %v7477_v37 = vrot.slane %v7133_v50, 2  ;;  %v7137_v56 = vld [vmem:[%s13931_s19 + $0x3d5] sm:$0x1]  ;;  %v7138_v7 = vld [vmem:[%s13931_s19 + $0x3dd] sm:$0x1]  ;;  %v13820_v49 = vld [vmem:[%s18801_s2] sm:$0xff] }
 0xdef   : > { %v7452_v30 = vsel %vm680_vm6, %v7451_v43, %v7450_v33  ;;  %v7460_v45 = vsel %vm671_vm3, %v7459_v28, %v7458_v60  ;;  %v7479_v20 = vrot.slane %v7134_v4, 1  ;;  %v7470_v38 = vsel %vm665_vm1, %v7469_v32, %v7468_v11  ;;  %v7139_v13 = vld [vmem:[%s13931_s19 + $0x3e5] sm:$0x1]  ;;  %v7140_v42 = vld [vmem:[%s13931_s19 + $0x3ed] sm:$0x1]  ;;  %v13817_v63 = vld [vmem:[%s18801_s2 + $0x18] sm:$0xff] }
 0xdf0   : > { %12729 = vmatprep.mubr.msk.f32.mxu0 %vm892_vm7, %v7452_v30  ;;  %v7462_v26 = vsel %vm674_vm4, %v7461_v9, %v7460_v45  ;;  %v7472_v47 = vsel %vm668_vm2, %v7471_v44, %v7470_v38  ;;  %v7141_v21 = vld [vmem:[%s13931_s19 + $0x3f5] sm:$0x1]  ;;  %v7481_v0 = vrot.slane %v7136_v35, 7  ;;  %v7483_v25 = vrot.slane %v7137_v56, 6  ;;  %v7142_v10 = vld [vmem:[%s13931_s19 + $0x3fd] sm:$0x1] }
 0xdf1   : > { %v7464_v29 = vsel %vm677_vm5, %v7463_v5, %v7462_v26  ;;  %v7474_v3 = vsel %vm671_vm3, %v7473_v41, %v7472_v47  ;;  %v7485_v52 = vrot.slane %v7138_v7, 5  ;;  %v7487_v15 = vrot.slane %v7139_v13, 4  ;;  %v13818_v30 = vld [vmem:[%s18801_s2 + $0x10] sm:$0xff]  ;;  %v13819_v4 = vld [vmem:[%s18801_s2 + $0x8] sm:$0xff]  ;;  %v17203_v47 = vld [vmem:[%s18802_s3] ss:$0 sm:$0xff] }
 0xdf2   : > { %v7466_v43 = vsel %vm680_vm6, %v7465_v18, %v7464_v29  ;;  %v7476_v34 = vsel %vm674_vm4, %v7475_v58, %v7474_v3  ;;  %v7482_v17 = vsel %vm662_vm0, %v7481_v0, %v7135_v8  ;;  %v7489_v28 = vrot.slane %v7140_v42, 3 }
 0xdf3   : > { %12730 = vmatmul.mubr.msk.f32.gmra.mxu0 %vm892_vm7, %v7466_v43  ;;  %v7478_v9 = vsel %vm677_vm5, %v7477_v37, %v7476_v34  ;;  %v7484_v59 = vsel %vm665_vm1, %v7483_v25, %v7482_v17  ;;  %v7491_v2 = vrot.slane %v7141_v21, 2  ;;  %v7493_v18 = vrot.slane %v7142_v10, 1 }
 0xdf4   : > { %v7480_v23 = vsel %vm680_vm6, %v7479_v20, %v7478_v9  ;;  %v7486_v5 = vsel %vm668_vm2, %v7485_v52, %v7484_v59 }
 0xdf5   : > { %12732 = vmatprep.mubr.msk.f32.mxu0 %vm892_vm7, %v7480_v23  ;;  %v7488_v31 = vsel %vm671_vm3, %v7487_v15, %v7486_v5 }
 0xdf6   : > { %v7490_v14 = vsel %vm674_vm4, %v7489_v28, %v7488_v31 }
 0xdf7   : > { %v7492_v33 = vsel %vm677_vm5, %v7491_v2, %v7490_v14 }
 0xdf8   : > { %v7494_v61 = vsel %vm680_vm6, %v7493_v18, %v7492_v33 }
 0xdf9   : > { %12733 = vmatmul.mubr.msk.f32.gmra.mxu0 %vm892_vm7, %v7494_v61 }
 0xe35   : > { %v12713_v29 = vpop.f32.mrf.mxu0 }
 0xe36   : > { %v7599_v21 = vadd.f32 %v17203_v47, %v12713_v29 }
 0xe37   : > { %v7593_v38 = vpop.f32.mrf.mxu0 }
 0xe38   : > { %v7691_v1 = vpop.permute.xlu1 %7690  ;;  %v7594_v3 = vadd.f32 %v17203_v47, %v7593_v38 }
 0xe3a   : > { %v7689_v24 = vpop.permute.xlu0 %7688 }
 0xe3b   : > { %12743 = vmatprep.mubr.msk.f32.mxu1 %vm892_vm7, %v7689_v24 }
 0xe3c   : > { %12744 = vmatmul.mubr.msk.f32.vlgmr.msra.gmra.mxu1 %vm892_vm7, %v7691_v1 }
 0xe3d   : > { %12800 = vmatpush3.msra.mxu1 %v13817_v63  ;;  %v7695_v50 = vpop.permute.xlu1 %7694 }
 0xe3e   : > { %12801 = vmatprep.subr.mxu1 %v13818_v30 }
 0xe3f   : > { %v7693_v60 = vpop.permute.xlu0 %7692  ;;  %12802 = vmatpush3.msra.mxu1 %v13818_v30 }
 0xe40   : > { %12746 = vmatprep.mubr.msk.f32.mxu1 %vm892_vm7, %v7693_v60  ;;  %12803 = vmatprep.subr.mxu1 %v13819_v4 }
 0xe41   : > { %12747 = vmatmul.mubr.msk.f32.gmra.mxu1 %vm892_vm7, %v7695_v50 }
 0xe42   : > { %12804 = vmatpush3.msra.mxu1 %v13819_v4 }
 0xe43   : > { %12805 = vmatprep.subr.mxu1 %v13820_v49 }
 0xe44   : > { %12806 = vmatpush3.msra.mxu1 %v13820_v49  ;;  %v7699_v32 = vpop.permute.xlu1 %7698 }
 0xe45   : > { %12863 = vmatprep.subr.mxu1 %v13817_v63 }
 0xe46   : > { %v7697_v45 = vpop.permute.xlu0 %7696 }
 0xe47   : > { %12749 = vmatprep.mubr.msk.f32.mxu1 %vm892_vm7, %v7697_v45 }
 0xe48   : > { %12750 = vmatmul.mubr.msk.f32.gmra.mxu1 %vm892_vm7, %v7699_v32 }
 0xe4c   : > { %v7703_v44 = vpop.permute.xlu1 %7702 }
 0xe4e   : > { %v7701_v41 = vpop.permute.xlu0 %7700 }
 0xe4f   : > { %12752 = vmatprep.mubr.msk.f32.mxu1 %vm892_vm7, %v7701_v41 }
 0xe50   : > { %v7707_v58 = vpop.permute.xlu1 %7706  ;;  %12753 = vmatmul.mubr.msk.f32.gmra.mxu1 %vm892_vm7, %v7703_v44 }
 0xe52   : > { %v7705_v8 = vpop.permute.xlu0 %7704 }
 0xe53   : > { %12755 = vmatprep.mubr.msk.f32.mxu1 %vm892_vm7, %v7705_v8 }
 0xe54   : > { %12756 = vmatmul.mubr.msk.f32.gmra.mxu1 %vm892_vm7, %v7707_v58 }
 0xe55   : > { %v7711_v26 = vpop.permute.xlu1 %7710 }
 0xe57   : > { %v7709_v11 = vpop.permute.xlu0 %7708 }
 0xe58   : > { %12758 = vmatprep.mubr.msk.f32.mxu1 %vm892_vm7, %v7709_v11 }
 0xe59   : > { %12759 = vmatmul.mubr.msk.f32.gmra.mxu1 %vm892_vm7, %v7711_v26  ;;  %v7715_v37 = vpop.permute.xlu1 %7714 }
 0xe5b   : > { %v7713_v20 = vpop.permute.xlu0 %7712 }
 0xe5c   : > { %12761 = vmatprep.mubr.msk.f32.mxu1 %vm892_vm7, %v7713_v20 }
 0xe5d   : > { %12762 = vmatmul.mubr.msk.f32.gmra.mxu1 %vm892_vm7, %v7715_v37  ;;  %v7719_v56 = vpop.permute.xlu1 %7718 }
 0xe5f   : > { %v7717_v35 = vpop.permute.xlu0 %7716 }
 0xe60   : > { %12764 = vmatprep.mubr.msk.f32.mxu1 %vm892_vm7, %v7717_v35 }
 0xe61   : > { %12765 = vmatmul.mubr.msk.f32.gmra.mxu1 %vm892_vm7, %v7719_v56 }
 0xe87   : > { %v12716_v7 = vpop.f32.mrf.mxu0 }
 0xe88   : > { %v7609_v15 = vadd.f32 %v17203_v47, %v12716_v7 }
 0xe89   : > { %v7603_v13 = vpop.f32.mrf.mxu0 }
 0xe8a   : > { %v7604_v9 = vadd.f32 %v17203_v47, %v7603_v13 }
 0xe92   : > { %v12719_v42 = vpop.f32.mrf.mxu0 }
 0xe93   : > { %v7619_v33 = vadd.f32 %v17203_v47, %v12719_v42 }
 0xe94   : > { %v7613_v43 = vpop.f32.mrf.mxu0 }
 0xe95   : > { %v7614_v24 = vadd.f32 %v17203_v47, %v7613_v43 }
 0xe9b   : > { %v12722_v0 = vpop.f32.mrf.mxu0 }
 0xe9c   : > { %v7629_v32 = vadd.f32 %v17203_v47, %v12722_v0 }
 0xe9d   : > { %v7623_v52 = vpop.f32.mrf.mxu0 }
 0xe9e   : > { %v7624_v8 = vadd.f32 %v17203_v47, %v7623_v52 }
 0xea2   : > { %v12725_v23 = vpop.f32.mrf.mxu0 }
 0xea3   : > { %v7639_v35 = vadd.f32 %v17203_v47, %v12725_v23 }
 0xea4   : > { %v7633_v61 = vpop.f32.mrf.mxu0 }
 0xea5   : > { %v7634_v42 = vadd.f32 %v17203_v47, %v7633_v61 }
 0xeac   : > { %v12728_v60 = vpop.f32.mrf.mxu0 }
 0xeae   : > { %v7643_v44 = vpop.f32.mrf.mxu0 }
 0xeb3   : > { %v12731_v56 = vpop.f32.mrf.mxu0 }
 0xefc   : > { %v12745_v25 = vpop.f32.mrf.mxu1 }
 0xefd   : > { %v7898_v10 = vadd.f32 %v12745_v25, %v7599_v21 }
 0xefe   : > { %v7818_v34 = vpop.f32.mrf.mxu1 }
 0xeff   : > { %v11865_v17 = vmul.f32 -1.442695, %v7898_v10  ;;  %v7897_v28 = vadd.f32 %v7818_v34, %v7594_v3  ;;  %v7653_v10 = vpop.f32.mrf.mxu0 }
 0xf01   : > { %13425 = vpow2.f32 %v11865_v17  ;;  %v11864_v59 = vmul.f32 -1.442695, %v7897_v28  ;;  %v12748_v2 = vpop.f32.mrf.mxu1  ;;  %v12734_v23 = vpop.f32.mrf.mxu0 }
 0xf02   : > { %v7900_v5 = vadd.f32 %v12748_v2, %v7609_v15  ;;  %v7649_v15 = vadd.f32 %v17203_v47, %v12728_v60 }
 0xf03   : > { %13427 = vpow2.f32 %v11864_v59  ;;  %v7828_v18 = vpop.f32.mrf.mxu1 }
 0xf04   : > { %v11867_v31 = vmul.f32 -1.442695, %v7900_v5  ;;  %v7899_v14 = vadd.f32 %v7828_v18, %v7604_v9  ;;  %v7644_v9 = vadd.f32 %v17203_v47, %v7643_v44 }
 0xf06   : > { %13429 = vpow2.f32 %v11867_v31  ;;  %v11866_v1 = vmul.f32 -1.442695, %v7899_v14  ;;  %v7659_v31 = vadd.f32 %v17203_v47, %v12731_v56 }
 0xf08   : > { %13431 = vpow2.f32 %v11866_v1  ;;  %v12751_v63 = vpop.f32.mrf.mxu1 }
 0xf09   : > { %v7902_v30 = vadd.f32 %v12751_v63, %v7619_v33  ;;  %v7654_v63 = vadd.f32 %v17203_v47, %v7653_v10 }
 0xf0a   : > { %v7838_v50 = vpop.f32.mrf.mxu1 }
 0xf0b   : > { %v11869_v4 = vmul.f32 -1.442695, %v7902_v30  ;;  %v7901_v49 = vadd.f32 %v7838_v50, %v7614_v24  ;;  %v7663_v50 = vpop.f32.mrf.mxu0 }
 0xf0d   : > { %13433 = vpow2.f32 %v11869_v4  ;;  %v11868_v45 = vmul.f32 -1.442695, %v7901_v49 }
 0xf0e   : > { %v13426_v41 = vpop.eup %13425 }
 0xf0f   : > { %v7962_v58 = vadd.f32 1.0, %v13426_v41  ;;  %13435 = vpow2.f32 %v11868_v45  ;;  %v7669_v45 = vadd.f32 %v17203_v47, %v12734_v23 }
 0xf10   : > { %v13428_v26 = vpop.eup %13427  ;;  %v12754_v11 = vpop.f32.mrf.mxu1 }
 0xf11   : > { %13437 = vrcp.f32 %v7962_v58  ;;  %v7961_v37 = vadd.f32 1.0, %v13428_v26  ;;  %v7904_v20 = vadd.f32 %v12754_v11, %v7629_v32  ;;  %v7664_v11 = vadd.f32 %v17203_v47, %v7663_v50 }
 0xf12   : > { %v7848_v29 = vpop.f32.mrf.mxu1 }
 0xf13   : > { %v13430_v38 = vpop.eup %13429  ;;  %13439 = vrcp.f32 %v7961_v37  ;;  %v11871_v7 = vmul.f32 -1.442695, %v7904_v20  ;;  %v7903_v13 = vadd.f32 %v7848_v29, %v7624_v8 }
 0xf14   : > { %v7964_v43 = vadd.f32 1.0, %v13430_v38  ;;  %v12757_v21 = vpop.f32.mrf.mxu1 }
 0xf15   : > { %v13432_v0 = vpop.eup %13431  ;;  %13441 = vpow2.f32 %v11871_v7  ;;  %v11870_v25 = vmul.f32 -1.442695, %v7903_v13  ;;  %v7906_v3 = vadd.f32 %v12757_v21, %v7639_v35 }
 0xf16   : > { %13443 = vrcp.f32 %v7964_v43  ;;  %v7963_v52 = vadd.f32 1.0, %v13432_v0  ;;  %v7858_v34 = vpop.f32.mrf.mxu1 }
 0xf17   : > { %13445 = vpow2.f32 %v11870_v25  ;;  %v11873_v17 = vmul.f32 -1.442695, %v7906_v3  ;;  %v7905_v28 = vadd.f32 %v7858_v34, %v7634_v42 }
 0xf18   : > { %13447 = vrcp.f32 %v7963_v52 }
 0xf19   : > { %13449 = vpow2.f32 %v11873_v17  ;;  %v11872_v59 = vmul.f32 -1.442695, %v7905_v28  ;;  %v12760_v2 = vpop.f32.mrf.mxu1 }
 0xf1a   : > { %v13434_v5 = vpop.eup %13433  ;;  %v7908_v18 = vadd.f32 %v12760_v2, %v7649_v15 }
 0xf1b   : > { %v7966_v14 = vadd.f32 1.0, %v13434_v5  ;;  %13451 = vpow2.f32 %v11872_v59  ;;  %v7868_v33 = vpop.f32.mrf.mxu1 }
 0xf1c   : > { %v13436_v61 = vpop.eup %13435  ;;  %v11875_v1 = vmul.f32 -1.442695, %v7908_v18  ;;  %v7907_v24 = vadd.f32 %v7868_v33, %v7644_v9 }
 0xf1d   : > { %13453 = vrcp.f32 %v7966_v14  ;;  %v7965_v30 = vadd.f32 1.0, %v13436_v61  ;;  %v12763_v60 = vpop.f32.mrf.mxu1 }
 0xf1e   : > { %v13438_v4 = vpop.eup %13437  ;;  %13455 = vpow2.f32 %v11875_v1  ;;  %v11874_v49 = vmul.f32 -1.442695, %v7907_v24  ;;  %v7910_v32 = vadd.f32 %v12763_v60, %v7659_v31 }
 0xf1f   : > { %13457 = vrcp.f32 %v7965_v30  ;;  %v7878_v44 = vpop.f32.mrf.mxu1  ;;  %v8010_v41 = vmul.f32 2.0, %v13438_v4 }
 0xf20   : > { %v13440_v58 = vpop.eup %13439  ;;  %13459 = vpow2.f32 %v11874_v49  ;;  %v11877_v8 = vmul.f32 -1.442695, %v7910_v32  ;;  %v7909_v26 = vadd.f32 %v7878_v44, %v7654_v63 }
 0xf21   : > { %v12766_v37 = vpop.f32.mrf.mxu1  ;;  %v11881_v20 = vadd.f32 -1.0, %v8010_v41  ;;  %v8009_v35 = vmul.f32 2.0, %v13440_v58 }
 0xf22   : > { %v13442_v56 = vpop.eup %13441  ;;  %13461 = vpow2.f32 %v11877_v8  ;;  %v11876_v29 = vmul.f32 -1.442695, %v7909_v26  ;;  %v7912_v38 = vadd.f32 %v12766_v37, %v7669_v45 }
 0xf23   : > { %v13444_v7 = vpop.eup %13443  ;;  %v7968_v13 = vadd.f32 1.0, %v13442_v56  ;;  %v7888_v42 = vpop.f32.mrf.mxu1  ;;  %v17223_v43 = vsel %vm14321_vm10, %v11881_v20, %v13438_v4  ;;  %v11880_v21 = vadd.f32 -1.0, %v8009_v35 }
 0xf24   : > { %v13446_v0 = vpop.eup %13445  ;;  %13463 = vpow2.f32 %v11876_v29  ;;  %v11879_v25 = vmul.f32 -1.442695, %v7912_v38  ;;  %v7911_v3 = vadd.f32 %v7888_v42, %v7664_v11  ;;  %8091 = vrot.lane.b32.xlu1 %v17223_v43, %s13840_s14  ;;  %v8012_v47 = vmul.f32 2.0, %v13444_v7 }
 0xf25   : > { %v13448_v10 = vpop.eup %13447  ;;  %13465 = vrcp.f32 %v7968_v13  ;;  %v7967_v52 = vadd.f32 1.0, %v13446_v0  ;;  %v17229_v15 = vsel %vm14321_vm10, %v11880_v21, %v13440_v58 }
 0xf26   : > { %v13450_v34 = vpop.eup %13449  ;;  %13467 = vpow2.f32 %v11879_v25  ;;  %v11878_v17 = vmul.f32 -1.442695, %v7911_v3  ;;  %8089 = vrot.lane.b32.xlu0 %v17229_v15, %s13840_s14  ;;  %v11883_v28 = vadd.f32 -1.0, %v8012_v47  ;;  %v8011_v9 = vmul.f32 2.0, %v13448_v10 }
 0xf27   : > { %13469 = vrcp.f32 %v7967_v52  ;;  %v7970_v59 = vadd.f32 1.0, %v13450_v34 }
 0xf28   : > { %v13452_v2 = vpop.eup %13451  ;;  %13471 = vpow2.f32 %v11878_v17  ;;  %v17235_v23 = vsel %vm14321_vm10, %v11883_v28, %v13444_v7  ;;  %v11882_v5 = vadd.f32 -1.0, %v8011_v9 }
 0xf29   : > { %13473 = vrcp.f32 %v7970_v59  ;;  %v7969_v18 = vadd.f32 1.0, %v13452_v2  ;;  %8095 = vrot.lane.b32.xlu1 %v17235_v23, %s13840_s14 }
 0xf2a   : > { %v13454_v31 = vpop.eup %13453  ;;  %v17241_v14 = vsel %vm14321_vm10, %v11882_v5, %v13448_v10 }
 0xf2b   : > { %v13456_v33 = vpop.eup %13455  ;;  %13475 = vrcp.f32 %v7969_v18  ;;  %8093 = vrot.lane.b32.xlu0 %v17241_v14, %s13840_s14  ;;  %v8014_v61 = vmul.f32 2.0, %v13454_v31 }
 0xf2c   : > { %v13458_v1 = vpop.eup %13457  ;;  %v7972_v24 = vadd.f32 1.0, %v13456_v33 }
 0xf2d   : > { %v13460_v63 = vpop.eup %13459  ;;  %v11885_v30 = vadd.f32 -1.0, %v8014_v61  ;;  %v8013_v60 = vmul.f32 2.0, %v13458_v1 }
 0xf2e   : > { %13477 = vrcp.f32 %v7972_v24  ;;  %v7971_v50 = vadd.f32 1.0, %v13460_v63 }
 0xf2f   : > { %v13462_v4 = vpop.eup %13461  ;;  %v17247_v49 = vsel %vm14321_vm10, %v11885_v30, %v13454_v31  ;;  %v11884_v32 = vadd.f32 -1.0, %v8013_v60 }
 0xf30   : > { %13479 = vrcp.f32 %v7971_v50  ;;  %v7974_v45 = vadd.f32 1.0, %v13462_v4  ;;  %8099 = vrot.lane.b32.xlu1 %v17247_v49, %s13840_s14 }
 0xf31   : > { %v13464_v44 = vpop.eup %13463  ;;  %v17253_v41 = vsel %vm14321_vm10, %v11884_v32, %v13458_v1 }
 0xf32   : > { %v13466_v58 = vpop.eup %13465  ;;  %13481 = vrcp.f32 %v7974_v45  ;;  %v7973_v8 = vadd.f32 1.0, %v13464_v44  ;;  %8097 = vrot.lane.b32.xlu0 %v17253_v41, %s13840_s14 }
 0xf33   : > { %v13468_v26 = vpop.eup %13467  ;;  %v8016_v11 = vmul.f32 2.0, %v13466_v58 }
 0xf34   : > { %v13470_v37 = vpop.eup %13469  ;;  %13483 = vrcp.f32 %v7973_v8  ;;  %v7976_v20 = vadd.f32 1.0, %v13468_v26 }
 0xf35   : > { %v13472_v35 = vpop.eup %13471  ;;  %v11887_v56 = vadd.f32 -1.0, %v8016_v11  ;;  %v8015_v29 = vmul.f32 2.0, %v13470_v37 }
 0xf36   : > { %v13474_v38 = vpop.eup %13473  ;;  %13485 = vrcp.f32 %v7976_v20  ;;  %v7975_v7 = vadd.f32 1.0, %v13472_v35 }
 0xf37   : > { %v17259_v13 = vsel %vm14321_vm10, %v11887_v56, %v13466_v58  ;;  %v11886_v42 = vadd.f32 -1.0, %v8015_v29  ;;  %v8018_v21 = vmul.f32 2.0, %v13474_v38 }
 0xf38   : > { %v13476_v0 = vpop.eup %13475  ;;  %13487 = vrcp.f32 %v7975_v7  ;;  %8103 = vrot.lane.b32.xlu1 %v17259_v13, %s13840_s14 }
 0xf39   : > { %v17265_v25 = vsel %vm14321_vm10, %v11886_v42, %v13470_v37  ;;  %v11889_v3 = vadd.f32 -1.0, %v8018_v21  ;;  %v8017_v47 = vmul.f32 2.0, %v13476_v0 }
 0xf3a   : > { %8101 = vrot.lane.b32.xlu0 %v17265_v25, %s13840_s14 }
 0xf3b   : > { %v13478_v10 = vpop.eup %13477  ;;  %v17271_v52 = vsel %vm14321_vm10, %v11889_v3, %v13474_v38  ;;  %v11888_v34 = vadd.f32 -1.0, %v8017_v47 }
 0xf3c   : > { %8107 = vrot.lane.b32.xlu1 %v17271_v52, %s13840_s14  ;;  %v8020_v17 = vmul.f32 2.0, %v13478_v10 }
 0xf3d   : > { %v13480_v28 = vpop.eup %13479  ;;  %v17277_v9 = vsel %vm14321_vm10, %v11888_v34, %v13476_v0 }
 0xf3e   : > { %8105 = vrot.lane.b32.xlu0 %v17277_v9, %s13840_s14  ;;  %v11891_v59 = vadd.f32 -1.0, %v8020_v17  ;;  %v8019_v2 = vmul.f32 2.0, %v13480_v28 }
 0xf3f   : > { %v13482_v5 = vpop.eup %13481 }
 0xf40   : > { %v17283_v18 = vsel %vm14321_vm10, %v11891_v59, %v13478_v10  ;;  %v11890_v31 = vadd.f32 -1.0, %v8019_v2  ;;  %v8022_v33 = vmul.f32 2.0, %v13482_v5 }
 0xf41   : > { %v13484_v61 = vpop.eup %13483  ;;  %8111 = vrot.lane.b32.xlu1 %v17283_v18, %s13840_s14 }
 0xf42   : > { %v17289_v1 = vsel %vm14321_vm10, %v11890_v31, %v13480_v28  ;;  %v11893_v24 = vadd.f32 -1.0, %v8022_v33  ;;  %v8021_v63 = vmul.f32 2.0, %v13484_v61 }
 0xf43   : > { %v13486_v30 = vpop.eup %13485  ;;  %8109 = vrot.lane.b32.xlu0 %v17289_v1, %s13840_s14 }
 0xf44   : > { %v17295_v60 = vsel %vm14321_vm10, %v11893_v24, %v13482_v5  ;;  %v11892_v50 = vadd.f32 -1.0, %v8021_v63  ;;  %v8024_v4 = vmul.f32 2.0, %v13486_v30 }
 0xf45   : > { %v13488_v32 = vpop.eup %13487  ;;  %8115 = vrot.lane.b32.xlu1 %v17295_v60, %s13840_s14 }
 0xf46   : > { %v17301_v45 = vsel %vm14321_vm10, %v11892_v50, %v13484_v61  ;;  %v11895_v44 = vadd.f32 -1.0, %v8024_v4  ;;  %v8023_v58 = vmul.f32 2.0, %v13488_v32 }
 0xf47   : > { %8113 = vrot.lane.b32.xlu0 %v17301_v45, %s13840_s14 }
 0xf48   : > { %v17307_v8 = vsel %vm14321_vm10, %v11895_v44, %v13486_v30  ;;  %v11894_v26 = vadd.f32 -1.0, %v8023_v58 }
 0xf49   : > { %8119 = vrot.lane.b32.xlu1 %v17307_v8, %s13840_s14 }
 0xf4a   : > { %v17313_v11 = vsel %vm14321_vm10, %v11894_v26, %v13488_v32 }
 0xf4b   : > { %8117 = vrot.lane.b32.xlu0 %v17313_v11, %s13840_s14 }
 0xf96   : > { %v8092_v37 = vpop.permute.xlu1 %8091 }
 0xf97   : > { %v8138_v20 = vmul.f32 %v8092_v37, %v17223_v43 }
 0xf98   : > { %v8090_v35 = vpop.permute.xlu0 %8089 }
 0xf99   : > { %v8137_v56 = vmul.f32 %v8090_v35, %v17229_v15  ;;  %8171 = vrot.lane.b32.xlu1 %v8138_v20, %s13841_s18  ;;  %v8058_v20 = vmul.f32 %v17223_v43, %v16778_v48  ;;  %v8059_v48 = vmul.f32 %v17241_v14, %v16793_v54 }
 0xf9b   : > { %v8096_v29 = vpop.permute.xlu1 %8095  ;;  %8169 = vrot.lane.b32.xlu0 %v8137_v56, %s13841_s18 }
 0xf9c   : > { %v8140_v38 = vmul.f32 %v8096_v29, %v17235_v23  ;;  %v8057_v29 = vmul.f32 %v17229_v15, %v16783_v53 }
 0xf9d   : > { %v8094_v7 = vpop.permute.xlu0 %8093 }
 0xf9e   : > { %v8139_v42 = vmul.f32 %v8094_v7, %v17241_v14  ;;  %8175 = vrot.lane.b32.xlu1 %v8140_v38, %s13841_s18 }
 0xfa0   : > { %8173 = vrot.lane.b32.xlu0 %v8139_v42, %s13841_s18  ;;  %v8060_v42 = vmul.f32 %v17235_v23, %v16788_v46 }
 0xfa2   : > { %v8100_v21 = vpop.permute.xlu1 %8099 }
 0xfa3   : > { %v8142_v0 = vmul.f32 %v8100_v21, %v17247_v49 }
 0xfa4   : > { %v8098_v3 = vpop.permute.xlu0 %8097 }
 0xfa5   : > { %v8141_v47 = vmul.f32 %v8098_v3, %v17253_v41  ;;  %8179 = vrot.lane.b32.xlu1 %v8142_v0, %s13841_s18 }
 0xfa7   : > { %8177 = vrot.lane.b32.xlu0 %v8141_v47, %s13841_s18  ;;  %v8062_v47 = vmul.f32 %v17247_v49, %v16798_v12  ;;  %v8064_v12 = vmul.f32 %v17259_v13, %v16810_v62  ;;  %v8066_v62 = vmul.f32 %v17271_v52, %v16822_v39 }
 0xfaa   : > { %v8104_v10 = vpop.permute.xlu1 %8103 }
 0xfab   : > { %v8144_v34 = vmul.f32 %v8104_v10, %v17259_v13 }
 0xfac   : > { %v8102_v17 = vpop.permute.xlu0 %8101 }
 0xfad   : > { %v8143_v28 = vmul.f32 %v8102_v17, %v17265_v25  ;;  %8183 = vrot.lane.b32.xlu1 %v8144_v34, %s13841_s18  ;;  %v8061_v34 = vmul.f32 %v17253_v41, %v16803_v51  ;;  %v8063_v51 = vmul.f32 %v17265_v25, %v16816_v6  ;;  %v8065_v6 = vmul.f32 %v17277_v9, %v16827_v27 }
 0xfae   : > { %v8108_v59 = vpop.permute.xlu1 %8107  ;;  %v8067_v27 = vmul.f32 %v17289_v1, %v16839_v36 }
 0xfaf   : > { %v8146_v2 = vmul.f32 %v8108_v59, %v17271_v52  ;;  %8181 = vrot.lane.b32.xlu0 %v8143_v28, %s13841_s18 }
 0xfb0   : > { %v8106_v5 = vpop.permute.xlu0 %8105 }
 0xfb1   : > { %v8145_v31 = vmul.f32 %v8106_v5, %v17277_v9  ;;  %8187 = vrot.lane.b32.xlu1 %v8146_v2, %s13841_s18 }
 0xfb3   : > { %v8112_v33 = vpop.permute.xlu1 %8111  ;;  %8185 = vrot.lane.b32.xlu0 %v8145_v31, %s13841_s18 }
 0xfb4   : > { %v8148_v61 = vmul.f32 %v8112_v33, %v17283_v18 }
 0xfb5   : > { %v8110_v24 = vpop.permute.xlu0 %8109 }
 0xfb6   : > { %v8147_v63 = vmul.f32 %v8110_v24, %v17289_v1  ;;  %8191 = vrot.lane.b32.xlu1 %v8148_v61, %s13841_s18 }
 0xfb7   : > { %v8116_v30 = vpop.permute.xlu1 %8115 }
 0xfb8   : > { %v8150_v50 = vmul.f32 %v8116_v30, %v17295_v60  ;;  %8189 = vrot.lane.b32.xlu0 %v8147_v63, %s13841_s18 }
 0xfb9   : > { %v8114_v4 = vpop.permute.xlu0 %8113 }
 0xfba   : > { %v8149_v32 = vmul.f32 %v8114_v4, %v17301_v45  ;;  %8195 = vrot.lane.b32.xlu1 %v8150_v50, %s13841_s18 }
 0xfbb   : > { %v8120_v44 = vpop.permute.xlu1 %8119 }
 0xfbc   : > { %v8152_v58 = vmul.f32 %v8120_v44, %v17307_v8  ;;  %8193 = vrot.lane.b32.xlu0 %v8149_v32, %s13841_s18  ;;  %v8068_v44 = vmul.f32 %v17283_v18, %v16833_v40  ;;  %v8070_v40 = vmul.f32 %v17295_v60, %v16844_v16 }
 0xfbd   : > { %v8118_v26 = vpop.permute.xlu0 %8117 }
 0xfbe   : > { %v8151_v37 = vmul.f32 %v8118_v26, %v17313_v11  ;;  %8199 = vrot.lane.b32.xlu1 %v8152_v58, %s13841_s18 }
 0xfc0   : > { %8197 = vrot.lane.b32.xlu0 %v8151_v37, %s13841_s18 }
0x100b   : > { %v8172_v35 = vpop.permute.xlu1 %8171 }
0x100c   : > { %v17351_v56 = vadd.f32 %v8172_v35, %v8058_v20 }
0x100d   : > { %v8170_v38 = vpop.permute.xlu0 %8169 }
0x100e   : > { %13489 = vtanh.f32 %v17351_v56  ;;  %v17356_v7 = vadd.f32 %v8170_v38, %v8057_v29  ;;  %v8069_v38 = vmul.f32 %v17301_v45, %v16849_v19  ;;  %v8071_v19 = vmul.f32 %v17313_v11, %v16861_v22 }
0x1010   : > { %13491 = vtanh.f32 %v17356_v7  ;;  %v8176_v21 = vpop.permute.xlu1 %8175 }
0x1011   : > { %v17361_v0 = vadd.f32 %v8176_v21, %v8060_v42 }
0x1012   : > { %v8174_v3 = vpop.permute.xlu0 %8173 }
0x1013   : > { %13493 = vtanh.f32 %v17361_v0  ;;  %v17366_v53 = vadd.f32 %v8174_v3, %v8059_v48  ;;  %v8072_v48 = vmul.f32 %v17307_v8, %v16855_v57 }
0x1015   : > { %13495 = vtanh.f32 %v17366_v53 }
0x1017   : > { %v8180_v10 = vpop.permute.xlu1 %8179 }
0x1018   : > { %v17371_v46 = vadd.f32 %v8180_v10, %v8062_v47 }
0x1019   : > { %v8178_v17 = vpop.permute.xlu0 %8177 }
0x101a   : > { %13497 = vtanh.f32 %v17371_v46  ;;  %v17376_v54 = vadd.f32 %v8178_v17, %v8061_v34 }
0x101b   : > { %v13490_v28 = vpop.eup %13489 }
0x101c   : > { %13499 = vtanh.f32 %v17376_v54  ;;  %8267 = vrot.lane.b32.xlu1 %v13490_v28, %s13840_s14  ;;  %v8329_v28 = vld [vmem:[%s13931_s19 + $0x6] sm:$0x1] }
0x101d   : > { %v13492_v59 = vpop.eup %13491 }
0x101e   : > { %8265 = vrot.lane.b32.xlu0 %v13492_v59, %s13840_s14  ;;  %v8330_v59 = vld [vmem:[%s13931_s19 + $0xe] sm:$0x1] }
0x101f   : > { %v8184_v2 = vpop.permute.xlu1 %8183 }
0x1020   : > { %v13494_v5 = vpop.eup %13493  ;;  %v17383_v31 = vadd.f32 %v8184_v2, %v8064_v12  ;;  %v8331_v12 = vld [vmem:[%s13931_s19 + $0x16] sm:$0x1]  ;;  %v8332_v2 = vld [vmem:[%s13931_s19 + $0x1e] sm:$0x1] }
0x1021   : > { %v8182_v33 = vpop.permute.xlu0 %8181  ;;  %8271 = vrot.lane.b32.xlu1 %v13494_v5, %s13840_s14  ;;  %v8333_v5 = vld [vmem:[%s13931_s19 + $0x26] sm:$0x1] }
0x1022   : > { %v13496_v61 = vpop.eup %13495  ;;  %13501 = vtanh.f32 %v17383_v31  ;;  %v17389_v24 = vadd.f32 %v8182_v33, %v8063_v51  ;;  %v8334_v51 = vld [vmem:[%s13931_s19 + $0x2e] sm:$0x1] }
0x1023   : > { %v8188_v63 = vpop.permute.xlu1 %8187  ;;  %8269 = vrot.lane.b32.xlu0 %v13496_v61, %s13840_s14  ;;  %v8335_v61 = vld [vmem:[%s13931_s19 + $0x36] sm:$0x1] }
0x1024   : > { %13503 = vtanh.f32 %v17389_v24  ;;  %v17395_v30 = vadd.f32 %v8188_v63, %v8066_v62  ;;  %v8585_v62 = vrot.slane %v8330_v59, 7  ;;  %v8587_v63 = vrot.slane %v8331_v12, 6 }
0x1025   : > { %v8186_v50 = vpop.permute.xlu0 %8185 }
0x1026   : > { %13505 = vtanh.f32 %v17395_v30  ;;  %v17400_v4 = vadd.f32 %v8186_v50, %v8065_v6  ;;  %v8336_v6 = vld [vmem:[%s13931_s19 + $0x3e] sm:$0x1]  ;;  %v8589_v50 = vrot.slane %v8332_v2, 5 }
0x1027   : > { %v13498_v32 = vpop.eup %13497 }
0x1028   : > { %13507 = vtanh.f32 %v17400_v4  ;;  %v8192_v39 = vpop.permute.xlu1 %8191  ;;  %8275 = vrot.lane.b32.xlu1 %v13498_v32, %s13840_s14  ;;  %v8591_v32 = vrot.slane %v8333_v5, 4 }
0x1029   : > { %v13500_v58 = vpop.eup %13499  ;;  %v17406_v26 = vadd.f32 %v8192_v39, %v8068_v44  ;;  %v8593_v44 = vrot.slane %v8334_v51, 3  ;;  %v8595_v39 = vrot.slane %v8335_v61, 2 }
0x102a   : > { %v8190_v37 = vpop.permute.xlu0 %8189  ;;  %8273 = vrot.lane.b32.xlu0 %v13500_v58, %s13840_s14 }
0x102b   : > { %13509 = vtanh.f32 %v17406_v26  ;;  %v17412_v20 = vadd.f32 %v8190_v37, %v8067_v27  ;;  %v8586_v27 = vsel %vm662_vm0, %v8585_v62, %v8329_v28  ;;  %v8337_v37 = vld [vmem:[%s13931_s19 + $0x46] sm:$0x1]  ;;  %v8344_v28 = vld [vmem:[%s13931_s19 + $0x7e] sm:$0x1] }
0x102c   : > { %v8196_v35 = vpop.permute.xlu1 %8195 }
0x102d   : > { %13511 = vtanh.f32 %v17412_v20  ;;  %v17417_v29 = vadd.f32 %v8196_v35, %v8070_v40  ;;  %v8338_v40 = vld [vmem:[%s13931_s19 + $0x4e] sm:$0x1]  ;;  %v8339_v35 = vld [vmem:[%s13931_s19 + $0x56] sm:$0x1] }
0x102e   : > { %v8194_v42 = vpop.permute.xlu0 %8193 }
0x102f   : > { %v13502_v36 = vpop.eup %13501  ;;  %13513 = vtanh.f32 %v17417_v29  ;;  %v17422_v21 = vadd.f32 %v8194_v42, %v8069_v38  ;;  %v8588_v38 = vsel %vm665_vm1, %v8587_v63, %v8586_v27  ;;  %v8340_v42 = vld [vmem:[%s13931_s19 + $0x5e] sm:$0x1] }
0x1030   : > { %v8200_v3 = vpop.permute.xlu1 %8199  ;;  %8279 = vrot.lane.b32.xlu1 %v13502_v36, %s13840_s14  ;;  %v8341_v36 = vld [vmem:[%s13931_s19 + $0x66] sm:$0x1]  ;;  %v8603_v59 = vrot.slane %v8340_v42, 5 }
0x1031   : > { %v13504_v16 = vpop.eup %13503  ;;  %13515 = vtanh.f32 %v17422_v21  ;;  %v17428_v47 = vadd.f32 %v8200_v3, %v8072_v48  ;;  %v8342_v48 = vld [vmem:[%s13931_s19 + $0x6e] sm:$0x1]  ;;  %v8605_v12 = vrot.slane %v8341_v36, 4  ;;  %v13825_v42 = vld [vmem:[%s18800_s1] sm:$0xff] }
0x1032   : > { %v8198_v10 = vpop.permute.xlu0 %8197  ;;  %8277 = vrot.lane.b32.xlu0 %v13504_v16, %s13840_s14  ;;  %v8590_v16 = vsel %vm668_vm2, %v8589_v50, %v8588_v38  ;;  %v13824_v38 = vld [vmem:[%s18800_s1 + $0x8] sm:$0xff]  ;;  %v8345_v36 = vld [vmem:[%s13931_s19 + $0x86] sm:$0x1] }
0x1033   : > { %v13506_v57 = vpop.eup %13505  ;;  %13517 = vtanh.f32 %v17428_v47  ;;  %v17434_v34 = vadd.f32 %v8198_v10, %v8071_v19  ;;  %v8597_v19 = vrot.slane %v8336_v6, 1  ;;  %v8343_v10 = vld [vmem:[%s13931_s19 + $0x76] sm:$0x1] }
0x1034   : > { %8283 = vrot.lane.b32.xlu1 %v13506_v57, %s13840_s14  ;;  %v8599_v57 = vrot.slane %v8338_v40, 7  ;;  %v8609_v63 = vrot.slane %v8343_v10, 2  ;;  %v13822_v40 = vld [vmem:[%s18800_s1 + $0x18] sm:$0xff]  ;;  %v8350_v10 = vld [vmem:[%s13931_s19 + $0xae] sm:$0x1] }
0x1035   : > { %v13508_v17 = vpop.eup %13507  ;;  %13519 = vtanh.f32 %v17434_v34 }
0x1036   : > { %8281 = vrot.lane.b32.xlu0 %v13508_v17, %s13840_s14  ;;  %v8601_v17 = vrot.slane %v8339_v35, 6  ;;  %v8600_v51 = vsel %vm662_vm0, %v8599_v57, %v8337_v37  ;;  %v13823_v35 = vld [vmem:[%s18800_s1 + $0x10] sm:$0xff] }
0x1037   : > { %v8351_v57 = vld [vmem:[%s13931_s19 + $0xb6] sm:$0x1] }
0x1038   : > { %v13510_v22 = vpop.eup %13509  ;;  %v8602_v62 = vsel %vm665_vm1, %v8601_v17, %v8600_v51  ;;  %v8352_v17 = vld [vmem:[%s13931_s19 + $0xbe] sm:$0x1] }
0x1039   : > { %8287 = vrot.lane.b32.xlu1 %v13510_v22, %s13840_s14  ;;  %v8592_v22 = vsel %vm671_vm3, %v8591_v32, %v8590_v16  ;;  %v8604_v32 = vsel %vm668_vm2, %v8603_v59, %v8602_v62  ;;  %v8348_v16 = vld [vmem:[%s13931_s19 + $0x9e] sm:$0x1]  ;;  %v8354_v62 = vld [vmem:[%s13931_s19 + $0xce] sm:$0x1] }
0x103a   : > { %v13512_v33 = vpop.eup %13511  ;;  %v8594_v5 = vsel %vm674_vm4, %v8593_v44, %v8592_v22  ;;  %v8606_v44 = vsel %vm671_vm3, %v8605_v12, %v8604_v32  ;;  %v8617_v59 = vrot.slane %v8348_v16, 5  ;;  %v8357_v32 = vld [vmem:[%s13931_s19 + $0xe6] sm:$0x1]  ;;  %v8362_v16 = vld [vmem:[%s13931_s19 + $0x10e] sm:$0x1] }
0x103b   : > { %8285 = vrot.lane.b32.xlu0 %v13512_v33, %s13840_s14  ;;  %v8607_v33 = vrot.slane %v8342_v48, 3  ;;  %v8596_v61 = vsel %vm677_vm5, %v8595_v39, %v8594_v5  ;;  %v8346_v48 = vld [vmem:[%s13931_s19 + $0x8e] sm:$0x1]  ;;  %v8353_v5 = vld [vmem:[%s13931_s19 + $0xc6] sm:$0x1] }
0x103c   : > { %v13514_v58 = vpop.eup %13513  ;;  %v8598_v50 = vsel %vm680_vm6, %v8597_v19, %v8596_v61  ;;  %v8349_v19 = vld [vmem:[%s13931_s19 + $0xa6] sm:$0x1]  ;;  %v8613_v22 = vrot.slane %v8346_v48, 7  ;;  %v8625_v61 = vrot.slane %v8352_v17, 1  ;;  %v8633_v48 = vrot.slane %v8357_v32, 4 }
0x103d   : > { %8291 = vrot.lane.b32.xlu1 %v13514_v58, %s13840_s14  ;;  %v8611_v58 = vrot.slane %v8344_v28, 1  ;;  %12775 = vmatprep.mubr.msk.f32.mxu0 %vm892_vm7, %v8598_v50  ;;  %v8608_v27 = vsel %vm674_vm4, %v8607_v33, %v8606_v44  ;;  %v8619_v12 = vrot.slane %v8349_v19, 4  ;;  %v8623_v33 = vrot.slane %v8351_v57, 2  ;;  %v8356_v50 = vld [vmem:[%s13931_s19 + $0xde] sm:$0x1] }
0x103e   : > { %v13516_v3 = vpop.eup %13515  ;;  %v8610_v39 = vsel %vm677_vm5, %v8609_v63, %v8608_v27  ;;  %v8614_v51 = vsel %vm662_vm0, %v8613_v22, %v8345_v36  ;;  %v8355_v63 = vld [vmem:[%s13931_s19 + $0xd6] sm:$0x1]  ;;  %v8631_v36 = vrot.slane %v8356_v50, 5  ;;  %v8368_v32 = vld [vmem:[%s13931_s19 + $0x13e] sm:$0x1] }
0x103f   : > { %8289 = vrot.lane.b32.xlu0 %v13516_v3, %s13840_s14  ;;  %v8612_v37 = vsel %vm680_vm6, %v8611_v58, %v8610_v39  ;;  %v8347_v3 = vld [vmem:[%s13931_s19 + $0x96] sm:$0x1]  ;;  %v8358_v58 = vld [vmem:[%s13931_s19 + $0xee] sm:$0x1] }
0x1040   : > { %v13518_v2 = vpop.eup %13517  ;;  %12776 = vmatmul.mubr.msk.f32.vlgmr.msra.gmra.mxu0 %vm892_vm7, %v8612_v37  ;;  %v8615_v28 = vrot.slane %v8347_v3, 6  ;;  %v8359_v39 = vld [vmem:[%s13931_s19 + $0xf6] sm:$0x1]  ;;  %v8360_v37 = vld [vmem:[%s13931_s19 + $0xfe] sm:$0x1]  ;;  %v8635_v17 = vrot.slane %v8358_v58, 3 }
0x1041   : > { %8295 = vrot.lane.b32.xlu1 %v13518_v2, %s13840_s14  ;;  %12832 = vmatpush3.msra.mxu0 %v13822_v40  ;;  %v8621_v2 = vrot.slane %v8350_v10, 3  ;;  %v8627_v40 = vrot.slane %v8354_v62, 7  ;;  %v8361_v3 = vld [vmem:[%s13931_s19 + $0x106] sm:$0x1]  ;;  %v8637_v22 = vrot.slane %v8359_v39, 2  ;;  %v8639_v62 = vrot.slane %v8360_v37, 1 }
0x1042   : > { %v13520_v6 = vpop.eup %13519  ;;  %12833 = vmatprep.subr.mxu0 %v13823_v35  ;;  %v8367_v50 = vld [vmem:[%s13931_s19 + $0x136] sm:$0x1]  ;;  %v8641_v58 = vrot.slane %v8362_v16, 7  ;;  %v8369_v37 = vld [vmem:[%s13931_s19 + $0x146] sm:$0x1] }
0x1043   : > { %8293 = vrot.lane.b32.xlu0 %v13520_v6, %s13840_s14  ;;  %12834 = vmatpush3.msra.mxu0 %v13823_v35  ;;  %v8616_v6 = vsel %vm665_vm1, %v8615_v28, %v8614_v51  ;;  %v8629_v35 = vrot.slane %v8355_v63, 6  ;;  %v8628_v57 = vsel %vm662_vm0, %v8627_v40, %v8353_v5  ;;  %v8363_v28 = vld [vmem:[%s13931_s19 + $0x116] sm:$0x1]  ;;  %v8365_v63 = vld [vmem:[%s13931_s19 + $0x126] sm:$0x1] }
0x1044   : > { %12835 = vmatprep.subr.mxu0 %v13824_v38  ;;  %v8618_v27 = vsel %vm668_vm2, %v8617_v59, %v8616_v6  ;;  %v8364_v59 = vld [vmem:[%s13931_s19 + $0x11e] sm:$0x1]  ;;  %v8366_v6 = vld [vmem:[%s13931_s19 + $0x12e] sm:$0x1]  ;;  %v8647_v39 = vrot.slane %v8365_v63, 4 }
0x1045   : > { %12836 = vmatpush3.msra.mxu0 %v13824_v38  ;;  %v8630_v51 = vsel %vm665_vm1, %v8629_v35, %v8628_v57  ;;  %v8371_v16 = vld [vmem:[%s13931_s19 + $0x156] sm:$0x1]  ;;  %v8653_v57 = vrot.slane %v8368_v32, 1 }
0x1046   : > { %12837 = vmatprep.subr.mxu0 %v13825_v42  ;;  %v8632_v5 = vsel %vm668_vm2, %v8631_v36, %v8630_v51  ;;  %v8370_v36 = vld [vmem:[%s13931_s19 + $0x14e] sm:$0x1]  ;;  %v8375_v51 = vld [vmem:[%s13931_s19 + $0x176] sm:$0x1] }
0x1047   : > { %12838 = vmatpush3.msra.mxu0 %v13825_v42  ;;  %v8620_v42 = vsel %vm671_vm3, %v8619_v12, %v8618_v27  ;;  %v8645_v27 = vrot.slane %v8364_v59, 5  ;;  %v8655_v59 = vrot.slane %v8370_v36, 7 }
0x1048   : > { %v8622_v10 = vsel %vm674_vm4, %v8621_v2, %v8620_v42  ;;  %v8651_v42 = vrot.slane %v8367_v50, 2  ;;  %v8378_v50 = vld [vmem:[%s13931_s19 + $0x18e] sm:$0x1] }
0x1049   : > { %v8624_v12 = vsel %vm677_vm5, %v8623_v33, %v8622_v10  ;;  %v8634_v33 = vsel %vm671_vm3, %v8633_v48, %v8632_v5  ;;  %v8377_v5 = vld [vmem:[%s13931_s19 + $0x186] sm:$0x1] }
0x104a   : > { %v8626_v2 = vsel %vm680_vm6, %v8625_v61, %v8624_v12  ;;  %v8649_v61 = vrot.slane %v8366_v6, 3  ;;  %v8636_v35 = vsel %vm674_vm4, %v8635_v17, %v8634_v33  ;;  %v8374_v12 = vld [vmem:[%s13931_s19 + $0x16e] sm:$0x1]  ;;  %v8656_v6 = vsel %vm662_vm0, %v8655_v59, %v8369_v37  ;;  %v8380_v37 = vld [vmem:[%s13931_s19 + $0x19e] sm:$0x1] }
0x104b   : > { %12778 = vmatprep.mubr.msk.f32.mxu0 %vm892_vm7, %v8626_v2  ;;  %v8638_v48 = vsel %vm677_vm5, %v8637_v22, %v8636_v35  ;;  %v8376_v22 = vld [vmem:[%s13931_s19 + $0x17e] sm:$0x1]  ;;  %v8657_v2 = vrot.slane %v8371_v16, 6  ;;  %v8669_v35 = vrot.slane %v8378_v50, 7  ;;  %v8382_v16 = vld [vmem:[%s13931_s19 + $0x1ae] sm:$0x1] }
0x104c   : > { %v8385_v59 = vld [vmem:[%s13931_s19 + $0x1c6] sm:$0x1] }
0x108e   : > { %v8268_v44 = vpop.permute.xlu1 %8267 }
0x108f   : > { %v8314_v38 = vmul.f32 %v8268_v44, %v17223_v43 }
0x1090   : > { %v8266_v19 = vpop.permute.xlu0 %8265 }
0x1091   : > { %v8313_v43 = vmul.f32 %v8266_v19, %v17229_v15  ;;  %9004 = vrot.lane.b32.xlu1 %v8314_v38, %s13841_s18  ;;  %v8643_v15 = vrot.slane %v8363_v28, 6  ;;  %v8642_v38 = vsel %vm662_vm0, %v8641_v58, %v8361_v3  ;;  %v8372_v28 = vld [vmem:[%s13931_s19 + $0x15e] sm:$0x1]  ;;  %v8640_v3 = vsel %vm680_vm6, %v8639_v62, %v8638_v48 }
0x1092   : > { %12779 = vmatmul.mubr.msk.f32.gmra.mxu0 %vm892_vm7, %v8640_v3  ;;  %v8663_v58 = vrot.slane %v8374_v12, 3  ;;  %v8384_v48 = vld [vmem:[%s13931_s19 + $0x1be] sm:$0x1] }
0x1093   : > { %v8272_v44 = vpop.permute.xlu1 %8271  ;;  %9002 = vrot.lane.b32.xlu0 %v8313_v43, %s13841_s18  ;;  %v8644_v10 = vsel %vm665_vm1, %v8643_v15, %v8642_v38  ;;  %v8665_v15 = vrot.slane %v8375_v51, 2  ;;  %v8677_v51 = vrot.slane %v8382_v16, 3  ;;  %v8394_v16 = vld [vmem:[%s13931_s19 + $0x20e] sm:$0x1] }
0x1094   : > { %v8316_v40 = vmul.f32 %v8272_v44, %v17235_v23  ;;  %v8373_v23 = vld [vmem:[%s13931_s19 + $0x166] sm:$0x1]  ;;  %v8646_v43 = vsel %vm668_vm2, %v8645_v27, %v8644_v10  ;;  %v8379_v44 = vld [vmem:[%s13931_s19 + $0x196] sm:$0x1]  ;;  %v8658_v27 = vsel %vm665_vm1, %v8657_v2, %v8656_v6 }
0x1095   : > { %v8270_v19 = vpop.permute.xlu0 %8269  ;;  %v8648_v63 = vsel %vm671_vm3, %v8647_v39, %v8646_v43  ;;  %v8661_v32 = vrot.slane %v8373_v23, 4  ;;  %v8667_v39 = vrot.slane %v8376_v22, 1  ;;  %v8671_v23 = vrot.slane %v8379_v44, 6  ;;  %v8391_v44 = vld [vmem:[%s13931_s19 + $0x1f6] sm:$0x1] }
0x1096   : > { %v8315_v17 = vmul.f32 %v8270_v19, %v17241_v14  ;;  %9008 = vrot.lane.b32.xlu1 %v8316_v40, %s13841_s18  ;;  %v8659_v14 = vrot.slane %v8372_v28, 5  ;;  %v8650_v62 = vsel %vm674_vm4, %v8649_v61, %v8648_v63  ;;  %v8381_v40 = vld [vmem:[%s13931_s19 + $0x1a6] sm:$0x1]  ;;  %v8383_v19 = vld [vmem:[%s13931_s19 + $0x1b6] sm:$0x1]  ;;  %v8670_v28 = vsel %vm662_vm0, %v8669_v35, %v8377_v5 }
0x1097   : > { %v8652_v33 = vsel %vm677_vm5, %v8651_v42, %v8650_v62  ;;  %v8673_v43 = vrot.slane %v8380_v37, 5  ;;  %v8675_v12 = vrot.slane %v8381_v40, 4  ;;  %v8672_v6 = vsel %vm665_vm1, %v8671_v23, %v8670_v28  ;;  %v8389_v5 = vld [vmem:[%s13931_s19 + $0x1e6] sm:$0x1]  ;;  %v8396_v28 = vld [vmem:[%s13931_s19 + $0x21e] sm:$0x1] }
0x1098   : > { %9006 = vrot.lane.b32.xlu0 %v8315_v17, %s13841_s18  ;;  %v8654_v36 = vsel %vm680_vm6, %v8653_v57, %v8652_v33  ;;  %v8660_v61 = vsel %vm668_vm2, %v8659_v14, %v8658_v27  ;;  %v8386_v17 = vld [vmem:[%s13931_s19 + $0x1ce] sm:$0x1]  ;;  %v8679_v2 = vrot.slane %v8383_v19, 2  ;;  %v8388_v14 = vld [vmem:[%s13931_s19 + $0x1de] sm:$0x1]  ;;  %v8697_v23 = vrot.slane %v8394_v16, 7 }
0x1099   : > { %12781 = vmatprep.mubr.msk.f32.mxu0 %vm892_vm7, %v8654_v36  ;;  %v8662_v42 = vsel %vm671_vm3, %v8661_v32, %v8660_v61  ;;  %v8674_v62 = vsel %vm668_vm2, %v8673_v43, %v8672_v6  ;;  %v8681_v32 = vrot.slane %v8384_v48, 1  ;;  %v8392_v33 = vld [vmem:[%s13931_s19 + $0x1fe] sm:$0x1]  ;;  %v8687_v37 = vrot.slane %v8388_v14, 5  ;;  %v8393_v61 = vld [vmem:[%s13931_s19 + $0x206] sm:$0x1] }
0x109a   : > { %v8276_v38 = vpop.permute.xlu1 %8275  ;;  %v8664_v3 = vsel %vm674_vm4, %v8663_v58, %v8662_v42  ;;  %v8390_v58 = vld [vmem:[%s13931_s19 + $0x1ee] sm:$0x1]  ;;  %v8693_v36 = vrot.slane %v8391_v44, 2  ;;  %v8395_v42 = vld [vmem:[%s13931_s19 + $0x216] sm:$0x1] }
0x109b   : > { %v8318_v10 = vmul.f32 %v8276_v38, %v17247_v49  ;;  %v8387_v49 = vld [vmem:[%s13931_s19 + $0x1d6] sm:$0x1]  ;;  %v8666_v63 = vsel %vm677_vm5, %v8665_v15, %v8664_v3  ;;  %v8676_v15 = vsel %vm671_vm3, %v8675_v12, %v8674_v62  ;;  %v8691_v38 = vrot.slane %v8390_v58, 3  ;;  %v8397_v3 = vld [vmem:[%s13931_s19 + $0x226] sm:$0x1] }
0x109c   : > { %v8274_v57 = vpop.permute.xlu0 %8273  ;;  %v8668_v50 = vsel %vm680_vm6, %v8667_v39, %v8666_v63  ;;  %v8685_v27 = vrot.slane %v8387_v49, 6  ;;  %v8689_v39 = vrot.slane %v8389_v5, 4  ;;  %v8678_v40 = vsel %vm674_vm4, %v8677_v51, %v8676_v15  ;;  %v8398_v43 = vld [vmem:[%s13931_s19 + $0x22e] sm:$0x1]  ;;  %v8399_v12 = vld [vmem:[%s13931_s19 + $0x236] sm:$0x1] }
0x109d   : > { %v8317_v22 = vmul.f32 %v8274_v57, %v17253_v41  ;;  %9012 = vrot.lane.b32.xlu1 %v8318_v10, %s13841_s18  ;;  %v8683_v41 = vrot.slane %v8386_v17, 7  ;;  %12782 = vmatmul.mubr.msk.f32.gmra.mxu0 %vm892_vm7, %v8668_v50  ;;  %v8680_v19 = vsel %vm677_vm5, %v8679_v2, %v8678_v40  ;;  %v8695_v10 = vrot.slane %v8392_v33, 1  ;;  %v8401_v2 = vld [vmem:[%s13931_s19 + $0x246] sm:$0x1]  ;;  %v8403_v33 = vld [vmem:[%s13931_s19 + $0x256] sm:$0x1] }
0x109e   : > { %v8682_v57 = vsel %vm680_vm6, %v8681_v32, %v8680_v19  ;;  %v8698_v63 = vsel %vm662_vm0, %v8697_v23, %v8393_v61  ;;  %v8699_v6 = vrot.slane %v8395_v42, 6  ;;  %v8701_v50 = vrot.slane %v8396_v28, 5  ;;  %v8407_v19 = vld [vmem:[%s13931_s19 + $0x276] sm:$0x1] }
0x109f   : > { %9010 = vrot.lane.b32.xlu0 %v8317_v22, %s13841_s18  ;;  %v8684_v35 = vsel %vm662_vm0, %v8683_v41, %v8385_v59  ;;  %12784 = vmatprep.mubr.msk.f32.mxu0 %vm892_vm7, %v8682_v57  ;;  %v8400_v22 = vld [vmem:[%s13931_s19 + $0x23e] sm:$0x1]  ;;  %v8703_v62 = vrot.slane %v8397_v3, 4  ;;  %v8705_v32 = vrot.slane %v8398_v43, 3  ;;  %v8707_v15 = vrot.slane %v8399_v12, 2 }
0x10a0   : > { %v8686_v48 = vsel %vm665_vm1, %v8685_v27, %v8684_v35  ;;  %v8700_v41 = vsel %vm665_vm1, %v8699_v6, %v8698_v63  ;;  %v8404_v27 = vld [vmem:[%s13931_s19 + $0x25e] sm:$0x1]  ;;  %v8709_v35 = vrot.slane %v8400_v22, 1  ;;  %v8410_v3 = vld [vmem:[%s13931_s19 + $0x28e] sm:$0x1] }
0x10a1   : > { %v8688_v59 = vsel %vm668_vm2, %v8687_v37, %v8686_v48  ;;  %v8702_v40 = vsel %vm668_vm2, %v8701_v50, %v8700_v41  ;;  %v8408_v48 = vld [vmem:[%s13931_s19 + $0x27e] sm:$0x1]  ;;  %v8715_v42 = vrot.slane %v8404_v27, 5  ;;  %v8411_v22 = vld [vmem:[%s13931_s19 + $0x296] sm:$0x1]  ;;  %v8725_v50 = vrot.slane %v8410_v3, 7 }
0x10a2   : > { %v8280_v17 = vpop.permute.xlu1 %8279  ;;  %v8690_v49 = vsel %vm671_vm3, %v8689_v39, %v8688_v59  ;;  %v8704_v16 = vsel %vm671_vm3, %v8703_v62, %v8702_v40  ;;  %v8409_v59 = vld [vmem:[%s13931_s19 + $0x286] sm:$0x1]  ;;  %v8412_v63 = vld [vmem:[%s13931_s19 + $0x29e] sm:$0x1]  ;;  %v8418_v40 = vld [vmem:[%s13931_s19 + $0x2ce] sm:$0x1] }
0x10a3   : > { %v8320_v51 = vmul.f32 %v8280_v17, %v17259_v13  ;;  %v8692_v5 = vsel %vm674_vm4, %v8691_v38, %v8690_v49  ;;  %v8402_v13 = vld [vmem:[%s13931_s19 + $0x24e] sm:$0x1]  ;;  %v8405_v38 = vld [vmem:[%s13931_s19 + $0x266] sm:$0x1]  ;;  %v8706_v23 = vsel %vm674_vm4, %v8705_v32, %v8704_v16  ;;  %v8721_v49 = vrot.slane %v8407_v19, 2 }
0x10a4   : > { %v8278_v14 = vpop.permute.xlu0 %8277  ;;  %v8694_v44 = vsel %vm677_vm5, %v8693_v36, %v8692_v5  ;;  %v8711_v61 = vrot.slane %v8402_v13, 7  ;;  %v8708_v12 = vsel %vm677_vm5, %v8707_v15, %v8706_v23  ;;  %v8413_v5 = vld [vmem:[%s13931_s19 + $0x2a6] sm:$0x1]  ;;  %v8415_v13 = vld [vmem:[%s13931_s19 + $0x2b6] sm:$0x1]  ;;  %v8729_v41 = vrot.slane %v8412_v63, 5 }
0x10a5   : > { %v8319_v58 = vmul.f32 %v8278_v14, %v17265_v25  ;;  %9016 = vrot.lane.b32.xlu1 %v8320_v51, %s13841_s18  ;;  %v8696_v39 = vsel %vm680_vm6, %v8695_v10, %v8694_v44  ;;  %v8406_v25 = vld [vmem:[%s13931_s19 + $0x26e] sm:$0x1]  ;;  %v8713_v10 = vrot.slane %v8403_v33, 6  ;;  %v8710_v6 = vsel %vm680_vm6, %v8709_v35, %v8708_v12  ;;  %v8419_v16 = vld [vmem:[%s13931_s19 + $0x2d6] sm:$0x1] }
0x10a6   : > { %v8284_v37 = vpop.permute.xlu1 %8283  ;;  %12785 = vmatmul.mubr.msk.f32.gmra.mxu0 %vm892_vm7, %v8696_v39  ;;  %v8712_v17 = vsel %vm662_vm0, %v8711_v61, %v8401_v2  ;;  %v8719_v57 = vrot.slane %v8406_v25, 3  ;;  %v8723_v14 = vrot.slane %v8408_v48, 1  ;;  %v8727_v44 = vrot.slane %v8411_v22, 6  ;;  %v8417_v39 = vld [vmem:[%s13931_s19 + $0x2c6] sm:$0x1] }
0x10a7   : > { %v8322_v36 = vmul.f32 %v8284_v37, %v17271_v52  ;;  %9014 = vrot.lane.b32.xlu0 %v8319_v58, %s13841_s18  ;;  %v8717_v52 = vrot.slane %v8405_v38, 4  ;;  %v8714_v51 = vsel %vm665_vm1, %v8713_v10, %v8712_v17  ;;  %12787 = vmatprep.mubr.msk.f32.mxu0 %vm892_vm7, %v8710_v6  ;;  %v8416_v58 = vld [vmem:[%s13931_s19 + $0x2be] sm:$0x1]  ;;  %v8726_v27 = vsel %vm662_vm0, %v8725_v50, %v8409_v59  ;;  %v8422_v23 = vld [vmem:[%s13931_s19 + $0x2ee] sm:$0x1] }
0x10a8   : > { %v8282_v28 = vpop.permute.xlu0 %8281  ;;  %v8716_v2 = vsel %vm668_vm2, %v8715_v42, %v8714_v51  ;;  %v8731_v37 = vrot.slane %v8413_v5, 4  ;;  %v8728_v25 = vsel %vm665_vm1, %v8727_v44, %v8726_v27  ;;  %v8737_v42 = vrot.slane %v8416_v58, 1  ;;  %v8424_v59 = vld [vmem:[%s13931_s19 + $0x2fe] sm:$0x1]  ;;  %v8425_v22 = vld [vmem:[%s13931_s19 + $0x306] sm:$0x1] }
0x10a9   : > { %v8321_v43 = vmul.f32 %v8282_v28, %v17277_v9  ;;  %9020 = vrot.lane.b32.xlu1 %v8322_v36, %s13841_s18  ;;  %v8414_v9 = vld [vmem:[%s13931_s19 + $0x2ae] sm:$0x1]  ;;  %v8718_v32 = vsel %vm671_vm3, %v8717_v52, %v8716_v2  ;;  %v8735_v36 = vrot.slane %v8415_v13, 2  ;;  %v8730_v10 = vsel %vm668_vm2, %v8729_v41, %v8728_v25  ;;  %v8421_v28 = vld [vmem:[%s13931_s19 + $0x2e6] sm:$0x1] }
0x10aa   : > { %v8720_v33 = vsel %vm674_vm4, %v8719_v57, %v8718_v32  ;;  %v8733_v61 = vrot.slane %v8414_v9, 3  ;;  %v8732_v52 = vsel %vm671_vm3, %v8731_v37, %v8730_v10  ;;  %v8423_v57 = vld [vmem:[%s13931_s19 + $0x2f6] sm:$0x1]  ;;  %v8741_v3 = vrot.slane %v8419_v16, 6  ;;  %v8426_v63 = vld [vmem:[%s13931_s19 + $0x30e] sm:$0x1] }
0x10ab   : > { %v8288_v62 = vpop.permute.xlu1 %8287  ;;  %9018 = vrot.lane.b32.xlu0 %v8321_v43, %s13841_s18  ;;  %v8722_v38 = vsel %vm677_vm5, %v8721_v49, %v8720_v33  ;;  %v8745_v49 = vrot.slane %v8421_v28, 4  ;;  %v8747_v5 = vrot.slane %v8422_v23, 3  ;;  %v8749_v9 = vrot.slane %v8423_v57, 2  ;;  %v8428_v50 = vld [vmem:[%s13931_s19 + $0x31e] sm:$0x1] }
0x10ac   : > { %v8324_v15 = vmul.f32 %v8288_v62, %v17283_v18  ;;  %v8420_v18 = vld [vmem:[%s13931_s19 + $0x2de] sm:$0x1]  ;;  %v8724_v48 = vsel %vm680_vm6, %v8723_v14, %v8722_v38  ;;  %v8734_v12 = vsel %vm674_vm4, %v8733_v61, %v8732_v52  ;;  %v8751_v58 = vrot.slane %v8424_v59, 1  ;;  %v8429_v44 = vld [vmem:[%s13931_s19 + $0x326] sm:$0x1] }
0x10ad   : > { %v8286_v35 = vpop.permute.xlu0 %8285  ;;  %12788 = vmatmul.mubr.msk.f32.gmra.mxu0 %vm892_vm7, %v8724_v48  ;;  %v8743_v51 = vrot.slane %v8420_v18, 5  ;;  %v8736_v2 = vsel %vm677_vm5, %v8735_v36, %v8734_v12  ;;  %v8430_v41 = vld [vmem:[%s13931_s19 + $0x32e] sm:$0x1]  ;;  %v8431_v27 = vld [vmem:[%s13931_s19 + $0x336] sm:$0x1]  ;;  %v8757_v38 = vrot.slane %v8428_v50, 5 }
0x10ae   : > { %v8323_v19 = vmul.f32 %v8286_v35, %v17289_v1  ;;  %9024 = vrot.lane.b32.xlu1 %v8324_v15, %s13841_s18  ;;  %v8739_v1 = vrot.slane %v8418_v40, 7  ;;  %v8738_v32 = vsel %vm680_vm6, %v8737_v42, %v8736_v2  ;;  %v8432_v37 = vld [vmem:[%s13931_s19 + $0x33e] sm:$0x1]  ;;  %v8759_v25 = vrot.slane %v8429_v44, 4  ;;  %v8433_v61 = vld [vmem:[%s13931_s19 + $0x346] sm:$0x1] }
0x10af   : > { %v8292_v17 = vpop.permute.xlu1 %8291  ;;  %12790 = vmatprep.mubr.msk.f32.mxu0 %vm892_vm7, %v8738_v32  ;;  %v8434_v36 = vld [vmem:[%s13931_s19 + $0x34e] sm:$0x1]  ;;  %v8761_v48 = vrot.slane %v8430_v41, 3  ;;  %v8763_v10 = vrot.slane %v8431_v27, 2  ;;  %v8436_v42 = vld [vmem:[%s13931_s19 + $0x35e] sm:$0x1] }
0x10b0   : > { %v8326_v43 = vmul.f32 %v8292_v17, %v17295_v60  ;;  %9022 = vrot.lane.b32.xlu0 %v8323_v19, %s13841_s18  ;;  %v8740_v14 = vsel %vm662_vm0, %v8739_v1, %v8417_v39  ;;  %v8427_v60 = vld [vmem:[%s13931_s19 + $0x316] sm:$0x1]  ;;  %v8765_v52 = vrot.slane %v8432_v37, 1  ;;  %v8437_v57 = vld [vmem:[%s13931_s19 + $0x366] sm:$0x1] }
0x10b1   : > { %v8290_v6 = vpop.permute.xlu0 %8289  ;;  %v8742_v13 = vsel %vm665_vm1, %v8741_v3, %v8740_v14  ;;  %v8755_v39 = vrot.slane %v8427_v60, 6  ;;  %v8438_v59 = vld [vmem:[%s13931_s19 + $0x36e] sm:$0x1]  ;;  %v8440_v12 = vld [vmem:[%s13931_s19 + $0x37e] sm:$0x1] }
0x10b2   : > { %v8325_v62 = vmul.f32 %v8290_v6, %v17301_v45  ;;  %9028 = vrot.lane.b32.xlu1 %v8326_v43, %s13841_s18  ;;  %v8744_v33 = vsel %vm668_vm2, %v8743_v51, %v8742_v13  ;;  %v8753_v45 = vrot.slane %v8426_v63, 7  ;;  %v8439_v43 = vld [vmem:[%s13931_s19 + $0x376] sm:$0x1]  ;;  %v8767_v51 = vrot.slane %v8434_v36, 7  ;;  %v8441_v2 = vld [vmem:[%s13931_s19 + $0x386] sm:$0x1] }
0x10b3   : > { %v8296_v15 = vpop.permute.xlu1 %8295  ;;  %v8746_v35 = vsel %vm671_vm3, %v8745_v49, %v8744_v33  ;;  %v8773_v63 = vrot.slane %v8437_v57, 4  ;;  %v8775_v6 = vrot.slane %v8438_v59, 3  ;;  %v8779_v60 = vrot.slane %v8440_v12, 1  ;;  %v8442_v50 = vld [vmem:[%s13931_s19 + $0x38e] sm:$0x1] }
0x10b4   : > { %v8328_v40 = vmul.f32 %v8296_v15, %v17307_v8  ;;  %9026 = vrot.lane.b32.xlu0 %v8325_v62, %s13841_s18  ;;  %v8748_v18 = vsel %vm674_vm4, %v8747_v5, %v8746_v35  ;;  %v8754_v19 = vsel %vm662_vm0, %v8753_v45, %v8425_v22  ;;  %v8435_v8 = vld [vmem:[%s13931_s19 + $0x356] sm:$0x1]  ;;  %v8771_v22 = vrot.slane %v8436_v42, 5  ;;  %v8445_v44 = vld [vmem:[%s13931_s19 + $0x3a6] sm:$0x1] }
0x10b5   : > { %v8294_v16 = vpop.permute.xlu0 %8293  ;;  %v8750_v23 = vsel %vm677_vm5, %v8749_v9, %v8748_v18  ;;  %v8756_v17 = vsel %vm665_vm1, %v8755_v39, %v8754_v19  ;;  %v8768_v5 = vsel %vm662_vm0, %v8767_v51, %v8433_v61  ;;  %v8777_v9 = vrot.slane %v8439_v43, 2  ;;  %v8443_v62 = vld [vmem:[%s13931_s19 + $0x396] sm:$0x1]  ;;  %v8446_v41 = vld [vmem:[%s13931_s19 + $0x3ae] sm:$0x1] }
0x10b6   : > { %v8327_v28 = vmul.f32 %v8294_v16, %v17313_v11  ;;  %9032 = vrot.lane.b32.xlu1 %v8328_v40, %s13841_s18  ;;  %v8752_v1 = vsel %vm680_vm6, %v8751_v58, %v8750_v23  ;;  %v8758_v3 = vsel %vm668_vm2, %v8757_v38, %v8756_v17  ;;  %v8769_v11 = vrot.slane %v8435_v8, 6  ;;  %v8444_v58 = vld [vmem:[%s13931_s19 + $0x39e] sm:$0x1]  ;;  %v8447_v27 = vld [vmem:[%s13931_s19 + $0x3b6] sm:$0x1] }
0x10b7   : > { %12791 = vmatmul.mubr.msk.f32.gmra.mxu0 %vm892_vm7, %v8752_v1  ;;  %v8760_v49 = vsel %vm671_vm3, %v8759_v25, %v8758_v3  ;;  %v8448_v37 = vld [vmem:[%s13931_s19 + $0x3be] sm:$0x1]  ;;  %v8781_v45 = vrot.slane %v8442_v50, 7  ;;  %v8783_v39 = vrot.slane %v8443_v62, 6  ;;  %v8785_v35 = vrot.slane %v8444_v58, 5 }
0x10b8   : > { %9030 = vrot.lane.b32.xlu0 %v8327_v28, %s13841_s18  ;;  %v8762_v14 = vsel %vm674_vm4, %v8761_v48, %v8760_v49  ;;  %v8770_v13 = vsel %vm665_vm1, %v8769_v11, %v8768_v5  ;;  %v8787_v38 = vrot.slane %v8445_v44, 4  ;;  %v8789_v25 = vrot.slane %v8446_v41, 3  ;;  %v8449_v61 = vld [vmem:[%s13931_s19 + $0x3c6] sm:$0x1]  ;;  %v8450_v48 = vld [vmem:[%s13931_s19 + $0x3ce] sm:$0x1] }
0x10b9   : > { %v8764_v32 = vsel %vm677_vm5, %v8763_v10, %v8762_v14  ;;  %v8772_v33 = vsel %vm668_vm2, %v8771_v22, %v8770_v13  ;;  %v8782_v16 = vsel %vm662_vm0, %v8781_v45, %v8441_v2  ;;  %v8791_v18 = vrot.slane %v8447_v27, 2  ;;  %v8451_v10 = vld [vmem:[%s13931_s19 + $0x3d6] sm:$0x1]  ;;  %v8452_v28 = vld [vmem:[%s13931_s19 + $0x3de] sm:$0x1]  ;;  %v13829_v45 = vld [vmem:[%s18801_s2] sm:$0xff] }
0x10ba   : > { %v8766_v15 = vsel %vm680_vm6, %v8765_v52, %v8764_v32  ;;  %v8774_v40 = vsel %vm671_vm3, %v8773_v63, %v8772_v33  ;;  %v8793_v19 = vrot.slane %v8448_v37, 1  ;;  %v8784_v42 = vsel %vm665_vm1, %v8783_v39, %v8782_v16  ;;  %v8453_v23 = vld [vmem:[%s13931_s19 + $0x3e6] sm:$0x1]  ;;  %v8454_v17 = vld [vmem:[%s13931_s19 + $0x3ee] sm:$0x1]  ;;  %v13826_v41 = vld [vmem:[%s18801_s2 + $0x18] sm:$0xff] }
0x10bb   : > { %12793 = vmatprep.mubr.msk.f32.mxu0 %vm892_vm7, %v8766_v15  ;;  %v8776_v36 = vsel %vm674_vm4, %v8775_v6, %v8774_v40  ;;  %v8786_v57 = vsel %vm668_vm2, %v8785_v35, %v8784_v42  ;;  %v8455_v59 = vld [vmem:[%s13931_s19 + $0x3f6] sm:$0x1]  ;;  %v8795_v1 = vrot.slane %v8450_v48, 7  ;;  %v8797_v3 = vrot.slane %v8451_v10, 6  ;;  %v8456_v12 = vld [vmem:[%s13931_s19 + $0x3fe] sm:$0x1] }
0x10bc   : > { %v8778_v8 = vsel %vm677_vm5, %v8777_v9, %v8776_v36  ;;  %v8788_v43 = vsel %vm671_vm3, %v8787_v38, %v8786_v57  ;;  %v8799_v51 = vrot.slane %v8452_v28, 5  ;;  %v8801_v11 = vrot.slane %v8453_v23, 4  ;;  %v13827_v15 = vld [vmem:[%s18801_s2 + $0x10] sm:$0xff]  ;;  %v13828_v37 = vld [vmem:[%s18801_s2 + $0x8] sm:$0xff]  ;;  %v17776_v57 = vld [vmem:[%s18802_s3] ss:$0 sm:$0xff] }
0x10bd   : > { %v8780_v52 = vsel %vm680_vm6, %v8779_v60, %v8778_v8  ;;  %v8790_v49 = vsel %vm674_vm4, %v8789_v25, %v8788_v43  ;;  %v8796_v22 = vsel %vm662_vm0, %v8795_v1, %v8449_v61  ;;  %v8803_v63 = vrot.slane %v8454_v17, 3 }
0x10be   : > { %12794 = vmatmul.mubr.msk.f32.gmra.mxu0 %vm892_vm7, %v8780_v52  ;;  %v8792_v6 = vsel %vm677_vm5, %v8791_v18, %v8790_v49  ;;  %v8798_v2 = vsel %vm665_vm1, %v8797_v3, %v8796_v22  ;;  %v8805_v14 = vrot.slane %v8455_v59, 2  ;;  %v8807_v60 = vrot.slane %v8456_v12, 1 }
0x10bf   : > { %v8794_v5 = vsel %vm680_vm6, %v8793_v19, %v8792_v6  ;;  %v8800_v9 = vsel %vm668_vm2, %v8799_v51, %v8798_v2 }
0x10c0   : > { %12796 = vmatprep.mubr.msk.f32.mxu0 %vm892_vm7, %v8794_v5  ;;  %v8802_v50 = vsel %vm671_vm3, %v8801_v11, %v8800_v9 }
0x10c1   : > { %v8804_v62 = vsel %vm674_vm4, %v8803_v63, %v8802_v50 }
0x10c2   : > { %v8806_v32 = vsel %vm677_vm5, %v8805_v14, %v8804_v62 }
0x10c3   : > { %v8808_v13 = vsel %vm680_vm6, %v8807_v60, %v8806_v32 }
0x10c4   : > { %12797 = vmatmul.mubr.msk.f32.gmra.mxu0 %vm892_vm7, %v8808_v13 }
0x1100   : > { %v12777_v8 = vpop.f32.mrf.mxu0 }
0x1101   : > { %v8913_v59 = vadd.f32 %v17776_v57, %v12777_v8 }
0x1102   : > { %v8907_v42 = vpop.f32.mrf.mxu0 }
0x1103   : > { %v9005_v58 = vpop.permute.xlu1 %9004  ;;  %v8908_v43 = vadd.f32 %v17776_v57, %v8907_v42 }
0x1105   : > { %v9003_v44 = vpop.permute.xlu0 %9002 }
0x1106   : > { %12807 = vmatprep.mubr.msk.f32.mxu1 %vm892_vm7, %v9003_v44 }
0x1107   : > { %12808 = vmatmul.mubr.msk.f32.vlgmr.msra.gmra.mxu1 %vm892_vm7, %v9005_v58 }
0x1108   : > { %12864 = vmatpush3.msra.mxu1 %v13826_v41  ;;  %v9009_v27 = vpop.permute.xlu1 %9008 }
0x1109   : > { %12865 = vmatprep.subr.mxu1 %v13827_v15 }
0x110a   : > { %v9007_v33 = vpop.permute.xlu0 %9006  ;;  %12866 = vmatpush3.msra.mxu1 %v13827_v15 }
0x110b   : > { %12810 = vmatprep.mubr.msk.f32.mxu1 %vm892_vm7, %v9007_v33  ;;  %12867 = vmatprep.subr.mxu1 %v13828_v37 }
0x110c   : > { %12811 = vmatmul.mubr.msk.f32.gmra.mxu1 %vm892_vm7, %v9009_v27 }
0x110d   : > { %12868 = vmatpush3.msra.mxu1 %v13828_v37 }
0x110e   : > { %12869 = vmatprep.subr.mxu1 %v13829_v45 }
0x110f   : > { %12870 = vmatpush3.msra.mxu1 %v13829_v45  ;;  %v9013_v39 = vpop.permute.xlu1 %9012 }
0x1111   : > { %v9011_v40 = vpop.permute.xlu0 %9010 }
0x1112   : > { %12813 = vmatprep.mubr.msk.f32.mxu1 %vm892_vm7, %v9011_v40 }
0x1113   : > { %12814 = vmatmul.mubr.msk.f32.gmra.mxu1 %vm892_vm7, %v9013_v39 }
0x1117   : > { %v9017_v35 = vpop.permute.xlu1 %9016 }
0x1119   : > { %v9015_v38 = vpop.permute.xlu0 %9014 }
0x111a   : > { %12816 = vmatprep.mubr.msk.f32.mxu1 %vm892_vm7, %v9015_v38 }
0x111b   : > { %v9021_v25 = vpop.permute.xlu1 %9020  ;;  %12817 = vmatmul.mubr.msk.f32.gmra.mxu1 %vm892_vm7, %v9017_v35 }
0x111d   : > { %v9019_v61 = vpop.permute.xlu0 %9018 }
0x111e   : > { %12819 = vmatprep.mubr.msk.f32.mxu1 %vm892_vm7, %v9019_v61 }
0x111f   : > { %12820 = vmatmul.mubr.msk.f32.gmra.mxu1 %vm892_vm7, %v9021_v25 }
0x1120   : > { %v9025_v36 = vpop.permute.xlu1 %9024 }
0x1122   : > { %v9023_v16 = vpop.permute.xlu0 %9022 }
0x1123   : > { %12822 = vmatprep.mubr.msk.f32.mxu1 %vm892_vm7, %v9023_v16 }
0x1124   : > { %12823 = vmatmul.mubr.msk.f32.gmra.mxu1 %vm892_vm7, %v9025_v36  ;;  %v9029_v18 = vpop.permute.xlu1 %9028 }
0x1126   : > { %v9027_v19 = vpop.permute.xlu0 %9026 }
0x1127   : > { %12825 = vmatprep.mubr.msk.f32.mxu1 %vm892_vm7, %v9027_v19 }
0x1128   : > { %12826 = vmatmul.mubr.msk.f32.gmra.mxu1 %vm892_vm7, %v9029_v18  ;;  %v9033_v10 = vpop.permute.xlu1 %9032 }
0x112a   : > { %v9031_v48 = vpop.permute.xlu0 %9030 }
0x112b   : > { %12828 = vmatprep.mubr.msk.f32.mxu1 %vm892_vm7, %v9031_v48 }
0x112c   : > { %12829 = vmatmul.mubr.msk.f32.gmra.mxu1 %vm892_vm7, %v9033_v10 }
0x1152   : > { %v12780_v28 = vpop.f32.mrf.mxu0 }
0x1153   : > { %v8923_v11 = vadd.f32 %v17776_v57, %v12780_v28 }
0x1154   : > { %v8917_v23 = vpop.f32.mrf.mxu0 }
0x1155   : > { %v8918_v6 = vadd.f32 %v17776_v57, %v8917_v23 }
0x115d   : > { %v12783_v17 = vpop.f32.mrf.mxu0 }
0x115e   : > { %v8933_v32 = vadd.f32 %v17776_v57, %v12783_v17 }
0x115f   : > { %v8927_v52 = vpop.f32.mrf.mxu0 }
0x1160   : > { %v8928_v44 = vadd.f32 %v17776_v57, %v8927_v52 }
0x1166   : > { %v12786_v1 = vpop.f32.mrf.mxu0 }
0x1167   : > { %v8943_v39 = vadd.f32 %v17776_v57, %v12786_v1 }
0x1168   : > { %v8937_v51 = vpop.f32.mrf.mxu0 }
0x1169   : > { %v8938_v61 = vadd.f32 %v17776_v57, %v8937_v51 }
0x116d   : > { %v12789_v5 = vpop.f32.mrf.mxu0 }
0x116e   : > { %v8953_v48 = vadd.f32 %v17776_v57, %v12789_v5 }
0x116f   : > { %v8947_v13 = vpop.f32.mrf.mxu0 }
0x1170   : > { %v8948_v17 = vadd.f32 %v17776_v57, %v8947_v13 }
0x1177   : > { %v12792_v33 = vpop.f32.mrf.mxu0 }
0x1179   : > { %v8957_v35 = vpop.f32.mrf.mxu0 }
0x117e   : > { %v12795_v10 = vpop.f32.mrf.mxu0 }
0x11c7   : > { %v12809_v3 = vpop.f32.mrf.mxu1 }
0x11c8   : > { %v9212_v12 = vadd.f32 %v12809_v3, %v8913_v59 }
0x11c9   : > { %v9132_v49 = vpop.f32.mrf.mxu1 }
0x11ca   : > { %v11929_v22 = vmul.f32 -1.442695, %v9212_v12  ;;  %v9211_v63 = vadd.f32 %v9132_v49, %v8908_v43  ;;  %v8967_v12 = vpop.f32.mrf.mxu0 }
0x11cc   : > { %13521 = vpow2.f32 %v11929_v22  ;;  %v11928_v2 = vmul.f32 -1.442695, %v9211_v63  ;;  %v12812_v14 = vpop.f32.mrf.mxu1  ;;  %v12798_v5 = vpop.f32.mrf.mxu0 }
0x11cd   : > { %v9214_v9 = vadd.f32 %v12812_v14, %v8923_v11  ;;  %v8963_v11 = vadd.f32 %v17776_v57, %v12792_v33 }
0x11ce   : > { %13523 = vpow2.f32 %v11928_v2  ;;  %v9142_v60 = vpop.f32.mrf.mxu1 }
0x11cf   : > { %v11931_v50 = vmul.f32 -1.442695, %v9214_v9  ;;  %v9213_v62 = vadd.f32 %v9142_v60, %v8918_v6  ;;  %v8958_v6 = vadd.f32 %v17776_v57, %v8957_v35 }
0x11d1   : > { %13525 = vpow2.f32 %v11931_v50  ;;  %v11930_v58 = vmul.f32 -1.442695, %v9213_v62  ;;  %v8973_v50 = vadd.f32 %v17776_v57, %v12795_v10 }
0x11d3   : > { %13527 = vpow2.f32 %v11930_v58  ;;  %v12815_v41 = vpop.f32.mrf.mxu1 }
0x11d4   : > { %v9216_v15 = vadd.f32 %v12815_v41, %v8933_v32  ;;  %v8968_v41 = vadd.f32 %v17776_v57, %v8967_v12 }
0x11d5   : > { %v9152_v27 = vpop.f32.mrf.mxu1 }
0x11d6   : > { %v11933_v37 = vmul.f32 -1.442695, %v9216_v15  ;;  %v9215_v45 = vadd.f32 %v9152_v27, %v8928_v44  ;;  %v8977_v27 = vpop.f32.mrf.mxu0 }
0x11d8   : > { %13529 = vpow2.f32 %v11933_v37  ;;  %v11932_v40 = vmul.f32 -1.442695, %v9215_v45 }
0x11d9   : > { %v13522_v38 = vpop.eup %13521 }
0x11da   : > { %v9276_v25 = vadd.f32 1.0, %v13522_v38  ;;  %13531 = vpow2.f32 %v11932_v40  ;;  %v8983_v40 = vadd.f32 %v17776_v57, %v12798_v5 }
0x11db   : > { %v13524_v36 = vpop.eup %13523  ;;  %v12818_v16 = vpop.f32.mrf.mxu1 }
0x11dc   : > { %13533 = vrcp.f32 %v9276_v25  ;;  %v9275_v18 = vadd.f32 1.0, %v13524_v36  ;;  %v9218_v19 = vadd.f32 %v12818_v16, %v8943_v39  ;;  %v8978_v16 = vadd.f32 %v17776_v57, %v8977_v27 }
0x11dd   : > { %v9162_v8 = vpop.f32.mrf.mxu1 }
0x11de   : > { %v13526_v42 = vpop.eup %13525  ;;  %13535 = vrcp.f32 %v9275_v18  ;;  %v11935_v28 = vmul.f32 -1.442695, %v9218_v19  ;;  %v9217_v23 = vadd.f32 %v9162_v8, %v8938_v61 }
0x11df   : > { %v9278_v52 = vadd.f32 1.0, %v13526_v42  ;;  %v12821_v59 = vpop.f32.mrf.mxu1 }
0x11e0   : > { %v13528_v1 = vpop.eup %13527  ;;  %13537 = vpow2.f32 %v11935_v28  ;;  %v11934_v3 = vmul.f32 -1.442695, %v9217_v23  ;;  %v9220_v43 = vadd.f32 %v12821_v59, %v8953_v48 }
0x11e1   : > { %13539 = vrcp.f32 %v9278_v52  ;;  %v9277_v51 = vadd.f32 1.0, %v13528_v1  ;;  %v9172_v49 = vpop.f32.mrf.mxu1 }
0x11e2   : > { %13541 = vpow2.f32 %v11934_v3  ;;  %v11937_v22 = vmul.f32 -1.442695, %v9220_v43  ;;  %v9219_v63 = vadd.f32 %v9172_v49, %v8948_v17 }
0x11e3   : > { %13543 = vrcp.f32 %v9277_v51 }
0x11e4   : > { %13545 = vpow2.f32 %v11937_v22  ;;  %v11936_v2 = vmul.f32 -1.442695, %v9219_v63  ;;  %v12824_v14 = vpop.f32.mrf.mxu1 }
0x11e5   : > { %v13530_v9 = vpop.eup %13529  ;;  %v9222_v60 = vadd.f32 %v12824_v14, %v8963_v11 }
0x11e6   : > { %v9280_v62 = vadd.f32 1.0, %v13530_v9  ;;  %13547 = vpow2.f32 %v11936_v2  ;;  %v9182_v32 = vpop.f32.mrf.mxu1 }
0x11e7   : > { %v13532_v13 = vpop.eup %13531  ;;  %v11939_v58 = vmul.f32 -1.442695, %v9222_v60  ;;  %v9221_v44 = vadd.f32 %v9182_v32, %v8958_v6 }
0x11e8   : > { %13549 = vrcp.f32 %v9280_v62  ;;  %v9279_v15 = vadd.f32 1.0, %v13532_v13  ;;  %v12827_v33 = vpop.f32.mrf.mxu1 }
0x11e9   : > { %v13534_v37 = vpop.eup %13533  ;;  %13551 = vpow2.f32 %v11939_v58  ;;  %v11938_v45 = vmul.f32 -1.442695, %v9221_v44  ;;  %v9224_v39 = vadd.f32 %v12827_v33, %v8973_v50 }
0x11ea   : > { %13553 = vrcp.f32 %v9279_v15  ;;  %v9192_v35 = vpop.f32.mrf.mxu1  ;;  %v9324_v38 = vmul.f32 2.0, %v13534_v37 }
0x11eb   : > { %v13536_v25 = vpop.eup %13535  ;;  %13555 = vpow2.f32 %v11938_v45  ;;  %v11941_v61 = vmul.f32 -1.442695, %v9224_v39  ;;  %v9223_v36 = vadd.f32 %v9192_v35, %v8968_v41 }
0x11ec   : > { %v12830_v18 = vpop.f32.mrf.mxu1  ;;  %v11945_v19 = vadd.f32 -1.0, %v9324_v38  ;;  %v9323_v48 = vmul.f32 2.0, %v13536_v25 }
0x11ed   : > { %v13538_v10 = vpop.eup %13537  ;;  %13557 = vpow2.f32 %v11941_v61  ;;  %v11940_v8 = vmul.f32 -1.442695, %v9223_v36  ;;  %v9226_v42 = vadd.f32 %v12830_v18, %v8983_v40 }
0x11ee   : > { %v13540_v28 = vpop.eup %13539  ;;  %v9282_v23 = vadd.f32 1.0, %v13538_v10  ;;  %v9202_v17 = vpop.f32.mrf.mxu1  ;;  %v17796_v52 = vsel %vm14321_vm10, %v11945_v19, %v13534_v37  ;;  %v11944_v59 = vadd.f32 -1.0, %v9323_v48 }
0x11ef   : > { %v13542_v1 = vpop.eup %13541  ;;  %13559 = vpow2.f32 %v11940_v8  ;;  %v11943_v3 = vmul.f32 -1.442695, %v9226_v42  ;;  %v9225_v43 = vadd.f32 %v9202_v17, %v8978_v16  ;;  %9405 = vrot.lane.b32.xlu1 %v17796_v52, %s13840_s14  ;;  %v9326_v57 = vmul.f32 2.0, %v13540_v28 }
0x11f0   : > { %v13544_v12 = vpop.eup %13543  ;;  %13561 = vrcp.f32 %v9282_v23  ;;  %v9281_v51 = vadd.f32 1.0, %v13542_v1  ;;  %v17802_v11 = vsel %vm14321_vm10, %v11944_v59, %v13536_v25 }
0x11f1   : > { %v13546_v49 = vpop.eup %13545  ;;  %13563 = vpow2.f32 %v11943_v3  ;;  %v11942_v22 = vmul.f32 -1.442695, %v9225_v43  ;;  %9403 = vrot.lane.b32.xlu0 %v17802_v11, %s13840_s14  ;;  %v11947_v63 = vadd.f32 -1.0, %v9326_v57  ;;  %v9325_v6 = vmul.f32 2.0, %v13544_v12 }
0x11f2   : > { %13565 = vrcp.f32 %v9281_v51  ;;  %v9284_v2 = vadd.f32 1.0, %v13546_v49 }
0x11f3   : > { %v13548_v14 = vpop.eup %13547  ;;  %13567 = vpow2.f32 %v11942_v22  ;;  %v17808_v5 = vsel %vm14321_vm10, %v11947_v63, %v13540_v28  ;;  %v11946_v9 = vadd.f32 -1.0, %v9325_v6 }
0x11f4   : > { %13569 = vrcp.f32 %v9284_v2  ;;  %v9283_v60 = vadd.f32 1.0, %v13548_v14  ;;  %9409 = vrot.lane.b32.xlu1 %v17808_v5, %s13840_s14 }
0x11f5   : > { %v13550_v50 = vpop.eup %13549  ;;  %v17814_v62 = vsel %vm14321_vm10, %v11946_v9, %v13544_v12 }
0x11f6   : > { %v13552_v32 = vpop.eup %13551  ;;  %13571 = vrcp.f32 %v9283_v60  ;;  %9407 = vrot.lane.b32.xlu0 %v17814_v62, %s13840_s14  ;;  %v9328_v13 = vmul.f32 2.0, %v13550_v50 }
0x11f7   : > { %v13554_v58 = vpop.eup %13553  ;;  %v9286_v44 = vadd.f32 1.0, %v13552_v32 }
0x11f8   : > { %v13556_v41 = vpop.eup %13555  ;;  %v11949_v15 = vadd.f32 -1.0, %v9328_v13  ;;  %v9327_v33 = vmul.f32 2.0, %v13554_v58 }
0x11f9   : > { %13573 = vrcp.f32 %v9286_v44  ;;  %v9285_v27 = vadd.f32 1.0, %v13556_v41 }
0x11fa   : > { %v13558_v37 = vpop.eup %13557  ;;  %v17820_v45 = vsel %vm14321_vm10, %v11949_v15, %v13550_v50  ;;  %v11948_v39 = vadd.f32 -1.0, %v9327_v33 }
0x11fb   : > { %13575 = vrcp.f32 %v9285_v27  ;;  %v9288_v40 = vadd.f32 1.0, %v13558_v37  ;;  %9413 = vrot.lane.b32.xlu1 %v17820_v45, %s13840_s14 }
0x11fc   : > { %v13560_v35 = vpop.eup %13559  ;;  %v17826_v38 = vsel %vm14321_vm10, %v11948_v39, %v13554_v58 }
0x11fd   : > { %v13562_v25 = vpop.eup %13561  ;;  %13577 = vrcp.f32 %v9288_v40  ;;  %v9287_v61 = vadd.f32 1.0, %v13560_v35  ;;  %9411 = vrot.lane.b32.xlu0 %v17826_v38, %s13840_s14 }
0x11fe   : > { %v13564_v36 = vpop.eup %13563  ;;  %v9330_v16 = vmul.f32 2.0, %v13562_v25 }
0x11ff   : > { %v13566_v18 = vpop.eup %13565  ;;  %13579 = vrcp.f32 %v9287_v61  ;;  %v9290_v19 = vadd.f32 1.0, %v13564_v36 }
0x1200   : > { %v13568_v48 = vpop.eup %13567  ;;  %v11951_v10 = vadd.f32 -1.0, %v9330_v16  ;;  %v9329_v8 = vmul.f32 2.0, %v13566_v18 }
0x1201   : > { %v13570_v42 = vpop.eup %13569  ;;  %13581 = vrcp.f32 %v9290_v19  ;;  %v9289_v28 = vadd.f32 1.0, %v13568_v48 }
0x1202   : > { %v17832_v23 = vsel %vm14321_vm10, %v11951_v10, %v13562_v25  ;;  %v11950_v17 = vadd.f32 -1.0, %v9329_v8  ;;  %v9332_v59 = vmul.f32 2.0, %v13570_v42 }
0x1203   : > { %v13572_v1 = vpop.eup %13571  ;;  %13583 = vrcp.f32 %v9289_v28  ;;  %9417 = vrot.lane.b32.xlu1 %v17832_v23, %s13840_s14 }
0x1204   : > { %v17838_v3 = vsel %vm14321_vm10, %v11950_v17, %v13566_v18  ;;  %v11953_v43 = vadd.f32 -1.0, %v9332_v59  ;;  %v9331_v57 = vmul.f32 2.0, %v13572_v1 }
0x1205   : > { %9415 = vrot.lane.b32.xlu0 %v17838_v3, %s13840_s14 }
0x1206   : > { %v13574_v12 = vpop.eup %13573  ;;  %v17844_v51 = vsel %vm14321_vm10, %v11953_v43, %v13570_v42  ;;  %v11952_v49 = vadd.f32 -1.0, %v9331_v57 }
0x1207   : > { %9421 = vrot.lane.b32.xlu1 %v17844_v51, %s13840_s14  ;;  %v9334_v22 = vmul.f32 2.0, %v13574_v12 }
0x1208   : > { %v13576_v63 = vpop.eup %13575  ;;  %v17850_v6 = vsel %vm14321_vm10, %v11952_v49, %v13572_v1 }
0x1209   : > { %9419 = vrot.lane.b32.xlu0 %v17850_v6, %s13840_s14  ;;  %v11955_v2 = vadd.f32 -1.0, %v9334_v22  ;;  %v9333_v14 = vmul.f32 2.0, %v13576_v63 }
0x120a   : > { %v13578_v9 = vpop.eup %13577 }
0x120b   : > { %v17856_v60 = vsel %vm14321_vm10, %v11955_v2, %v13574_v12  ;;  %v11954_v50 = vadd.f32 -1.0, %v9333_v14  ;;  %v9336_v32 = vmul.f32 2.0, %v13578_v9 }
0x120c   : > { %v13580_v13 = vpop.eup %13579  ;;  %9425 = vrot.lane.b32.xlu1 %v17856_v60, %s13840_s14 }
0x120d   : > { %v17862_v58 = vsel %vm14321_vm10, %v11954_v50, %v13576_v63  ;;  %v11957_v44 = vadd.f32 -1.0, %v9336_v32  ;;  %v9335_v41 = vmul.f32 2.0, %v13580_v13 }
0x120e   : > { %v13582_v15 = vpop.eup %13581  ;;  %9423 = vrot.lane.b32.xlu0 %v17862_v58, %s13840_s14 }
0x120f   : > { %v17868_v33 = vsel %vm14321_vm10, %v11957_v44, %v13578_v9  ;;  %v11956_v27 = vadd.f32 -1.0, %v9335_v41  ;;  %v9338_v37 = vmul.f32 2.0, %v13582_v15 }
0x1210   : > { %v13584_v39 = vpop.eup %13583  ;;  %9429 = vrot.lane.b32.xlu1 %v17868_v33, %s13840_s14 }
0x1211   : > { %v17874_v40 = vsel %vm14321_vm10, %v11956_v27, %v13580_v13  ;;  %v11959_v35 = vadd.f32 -1.0, %v9338_v37  ;;  %v9337_v25 = vmul.f32 2.0, %v13584_v39 }
0x1212   : > { %9427 = vrot.lane.b32.xlu0 %v17874_v40, %s13840_s14 }
0x1213   : > { %v17880_v61 = vsel %vm14321_vm10, %v11959_v35, %v13582_v15  ;;  %v11958_v36 = vadd.f32 -1.0, %v9337_v25 }
0x1214   : > { %9433 = vrot.lane.b32.xlu1 %v17880_v61, %s13840_s14 }
0x1215   : > { %v17886_v16 = vsel %vm14321_vm10, %v11958_v36, %v13584_v39 }
0x1216   : > { %9431 = vrot.lane.b32.xlu0 %v17886_v16, %s13840_s14 }
0x1261   : > { %v9406_v18 = vpop.permute.xlu1 %9405 }
0x1262   : > { %v9452_v19 = vmul.f32 %v9406_v18, %v17796_v52 }
0x1263   : > { %v9404_v48 = vpop.permute.xlu0 %9403 }
0x1264   : > { %v9451_v10 = vmul.f32 %v9404_v48, %v17802_v11  ;;  %9485 = vrot.lane.b32.xlu1 %v9452_v19, %s13841_s18  ;;  %v9372_v19 = vmul.f32 %v17796_v52, %v17351_v56  ;;  %v9373_v56 = vmul.f32 %v17814_v62, %v17366_v53 }
0x1266   : > { %v9410_v8 = vpop.permute.xlu1 %9409  ;;  %9483 = vrot.lane.b32.xlu0 %v9451_v10, %s13841_s18 }
0x1267   : > { %v9454_v42 = vmul.f32 %v9410_v8, %v17808_v5  ;;  %v9371_v8 = vmul.f32 %v17802_v11, %v17356_v7 }
0x1268   : > { %v9408_v28 = vpop.permute.xlu0 %9407 }
0x1269   : > { %v9453_v17 = vmul.f32 %v9408_v28, %v17814_v62  ;;  %9489 = vrot.lane.b32.xlu1 %v9454_v42, %s13841_s18 }
0x126b   : > { %9487 = vrot.lane.b32.xlu0 %v9453_v17, %s13841_s18  ;;  %v9374_v17 = vmul.f32 %v17808_v5, %v17361_v0 }
0x126d   : > { %v9414_v59 = vpop.permute.xlu1 %9413 }
0x126e   : > { %v9456_v1 = vmul.f32 %v9414_v59, %v17820_v45 }
0x126f   : > { %v9412_v43 = vpop.permute.xlu0 %9411 }
0x1270   : > { %v9455_v57 = vmul.f32 %v9412_v43, %v17826_v38  ;;  %9493 = vrot.lane.b32.xlu1 %v9456_v1, %s13841_s18 }
0x1272   : > { %9491 = vrot.lane.b32.xlu0 %v9455_v57, %s13841_s18  ;;  %v9376_v57 = vmul.f32 %v17820_v45, %v17371_v46  ;;  %v9378_v46 = vmul.f32 %v17832_v23, %v17383_v31  ;;  %v9380_v31 = vmul.f32 %v17844_v51, %v17395_v30 }
0x1275   : > { %v9418_v12 = vpop.permute.xlu1 %9417 }
0x1276   : > { %v9458_v49 = vmul.f32 %v9418_v12, %v17832_v23 }
0x1277   : > { %v9416_v22 = vpop.permute.xlu0 %9415 }
0x1278   : > { %v9457_v63 = vmul.f32 %v9416_v22, %v17838_v3  ;;  %9497 = vrot.lane.b32.xlu1 %v9458_v49, %s13841_s18  ;;  %v9375_v49 = vmul.f32 %v17826_v38, %v17376_v54  ;;  %v9377_v54 = vmul.f32 %v17838_v3, %v17389_v24  ;;  %v9379_v24 = vmul.f32 %v17850_v6, %v17400_v4 }
0x1279   : > { %v9422_v2 = vpop.permute.xlu1 %9421  ;;  %v9381_v4 = vmul.f32 %v17862_v58, %v17412_v20 }
0x127a   : > { %v9460_v14 = vmul.f32 %v9422_v2, %v17844_v51  ;;  %9495 = vrot.lane.b32.xlu0 %v9457_v63, %s13841_s18 }
0x127b   : > { %v9420_v9 = vpop.permute.xlu0 %9419 }
0x127c   : > { %v9459_v50 = vmul.f32 %v9420_v9, %v17850_v6  ;;  %9501 = vrot.lane.b32.xlu1 %v9460_v14, %s13841_s18 }
0x127e   : > { %v9426_v32 = vpop.permute.xlu1 %9425  ;;  %9499 = vrot.lane.b32.xlu0 %v9459_v50, %s13841_s18 }
0x127f   : > { %v9462_v13 = vmul.f32 %v9426_v32, %v17856_v60 }
0x1280   : > { %v9424_v44 = vpop.permute.xlu0 %9423 }
0x1281   : > { %v9461_v41 = vmul.f32 %v9424_v44, %v17862_v58  ;;  %9505 = vrot.lane.b32.xlu1 %v9462_v13, %s13841_s18 }
0x1282   : > { %v9430_v15 = vpop.permute.xlu1 %9429 }
0x1283   : > { %v9464_v27 = vmul.f32 %v9430_v15, %v17868_v33  ;;  %9503 = vrot.lane.b32.xlu0 %v9461_v41, %s13841_s18 }
0x1284   : > { %v9428_v37 = vpop.permute.xlu0 %9427 }
0x1285   : > { %v9463_v39 = vmul.f32 %v9428_v37, %v17874_v40  ;;  %9509 = vrot.lane.b32.xlu1 %v9464_v27, %s13841_s18 }
0x1286   : > { %v9434_v35 = vpop.permute.xlu1 %9433 }
0x1287   : > { %v9466_v25 = vmul.f32 %v9434_v35, %v17880_v61  ;;  %9507 = vrot.lane.b32.xlu0 %v9463_v39, %s13841_s18  ;;  %v9382_v35 = vmul.f32 %v17856_v60, %v17406_v26  ;;  %v9384_v26 = vmul.f32 %v17868_v33, %v17417_v29 }
0x1288   : > { %v9432_v36 = vpop.permute.xlu0 %9431 }
0x1289   : > { %v9465_v18 = vmul.f32 %v9432_v36, %v17886_v16  ;;  %9513 = vrot.lane.b32.xlu1 %v9466_v25, %s13841_s18 }
0x128b   : > { %9511 = vrot.lane.b32.xlu0 %v9465_v18, %s13841_s18 }
0x12d6   : > { %v9486_v48 = vpop.permute.xlu1 %9485 }
0x12d7   : > { %v17924_v10 = vadd.f32 %v9486_v48, %v9372_v19 }
0x12d8   : > { %v9484_v42 = vpop.permute.xlu0 %9483 }
0x12d9   : > { %13585 = vtanh.f32 %v17924_v10  ;;  %v17929_v28 = vadd.f32 %v9484_v42, %v9371_v8  ;;  %v9383_v42 = vmul.f32 %v17874_v40, %v17422_v21  ;;  %v9385_v21 = vmul.f32 %v17886_v16, %v17434_v34 }
0x12db   : > { %13587 = vtanh.f32 %v17929_v28  ;;  %v9490_v59 = vpop.permute.xlu1 %9489 }
0x12dc   : > { %v17934_v1 = vadd.f32 %v9490_v59, %v9374_v17 }
0x12dd   : > { %v9488_v43 = vpop.permute.xlu0 %9487 }
0x12de   : > { %13589 = vtanh.f32 %v17934_v1  ;;  %v17939_v7 = vadd.f32 %v9488_v43, %v9373_v56  ;;  %v9386_v56 = vmul.f32 %v17880_v61, %v17428_v47 }
0x12e0   : > { %13591 = vtanh.f32 %v17939_v7 }
0x12e2   : > { %v9494_v12 = vpop.permute.xlu1 %9493 }
0x12e3   : > { %v17944_v0 = vadd.f32 %v9494_v12, %v9376_v57 }
0x12e4   : > { %v9492_v22 = vpop.permute.xlu0 %9491 }
0x12e5   : > { %13593 = vtanh.f32 %v17944_v0  ;;  %v17949_v53 = vadd.f32 %v9492_v22, %v9375_v49 }
0x12e6   : > { %v13586_v63 = vpop.eup %13585 }
0x12e7   : > { %13595 = vtanh.f32 %v17949_v53  ;;  %9581 = vrot.lane.b32.xlu1 %v13586_v63, %s13840_s14  ;;  %v9643_v63 = vld [vmem:[%s13931_s19 + $0x7] sm:$0x1] }
0x12e8   : > { %v13588_v2 = vpop.eup %13587 }
0x12e9   : > { %9579 = vrot.lane.b32.xlu0 %v13588_v2, %s13840_s14  ;;  %v9644_v2 = vld [vmem:[%s13931_s19 + $0xf] sm:$0x1] }
0x12ea   : > { %v9498_v14 = vpop.permute.xlu1 %9497 }
0x12eb   : > { %v13590_v9 = vpop.eup %13589  ;;  %v17956_v50 = vadd.f32 %v9498_v14, %v9378_v46  ;;  %v9645_v46 = vld [vmem:[%s13931_s19 + $0x17] sm:$0x1]  ;;  %v9646_v14 = vld [vmem:[%s13931_s19 + $0x1f] sm:$0x1] }
0x12ec   : > { %v9496_v32 = vpop.permute.xlu0 %9495  ;;  %9585 = vrot.lane.b32.xlu1 %v13590_v9, %s13840_s14  ;;  %v9647_v9 = vld [vmem:[%s13931_s19 + $0x27] sm:$0x1] }
0x12ed   : > { %v13592_v13 = vpop.eup %13591  ;;  %13597 = vtanh.f32 %v17956_v50  ;;  %v17962_v44 = vadd.f32 %v9496_v32, %v9377_v54  ;;  %v9648_v54 = vld [vmem:[%s13931_s19 + $0x2f] sm:$0x1] }
0x12ee   : > { %v9502_v41 = vpop.permute.xlu1 %9501  ;;  %9583 = vrot.lane.b32.xlu0 %v13592_v13, %s13840_s14  ;;  %v9649_v13 = vld [vmem:[%s13931_s19 + $0x37] sm:$0x1] }
0x12ef   : > { %13599 = vtanh.f32 %v17962_v44  ;;  %v17968_v15 = vadd.f32 %v9502_v41, %v9380_v31  ;;  %v9899_v31 = vrot.slane %v9644_v2, 7  ;;  %v9901_v41 = vrot.slane %v9645_v46, 6 }
0x12f0   : > { %v9500_v27 = vpop.permute.xlu0 %9499 }
0x12f1   : > { %13601 = vtanh.f32 %v17968_v15  ;;  %v17973_v37 = vadd.f32 %v9500_v27, %v9379_v24  ;;  %v9650_v24 = vld [vmem:[%s13931_s19 + $0x3f] sm:$0x1]  ;;  %v9903_v27 = vrot.slane %v9646_v14, 5 }
0x12f2   : > { %v13594_v39 = vpop.eup %13593 }
0x12f3   : > { %13603 = vtanh.f32 %v17973_v37  ;;  %v9506_v30 = vpop.permute.xlu1 %9505  ;;  %9589 = vrot.lane.b32.xlu1 %v13594_v39, %s13840_s14  ;;  %v9905_v39 = vrot.slane %v9647_v9, 4 }
0x12f4   : > { %v13596_v25 = vpop.eup %13595  ;;  %v17979_v36 = vadd.f32 %v9506_v30, %v9382_v35  ;;  %v9907_v35 = vrot.slane %v9648_v54, 3  ;;  %v9909_v30 = vrot.slane %v9649_v13, 2 }
0x12f5   : > { %v9504_v18 = vpop.permute.xlu0 %9503  ;;  %9587 = vrot.lane.b32.xlu0 %v13596_v25, %s13840_s14 }
0x12f6   : > { %13605 = vtanh.f32 %v17979_v36  ;;  %v17985_v19 = vadd.f32 %v9504_v18, %v9381_v4  ;;  %v9900_v4 = vsel %vm662_vm0, %v9899_v31, %v9643_v63  ;;  %v9651_v18 = vld [vmem:[%s13931_s19 + $0x47] sm:$0x1]  ;;  %v9658_v63 = vld [vmem:[%s13931_s19 + $0x7f] sm:$0x1] }
0x12f7   : > { %v9510_v48 = vpop.permute.xlu1 %9509 }
0x12f8   : > { %13607 = vtanh.f32 %v17985_v19  ;;  %v17990_v8 = vadd.f32 %v9510_v48, %v9384_v26  ;;  %v9652_v26 = vld [vmem:[%s13931_s19 + $0x4f] sm:$0x1]  ;;  %v9653_v48 = vld [vmem:[%s13931_s19 + $0x57] sm:$0x1] }
0x12f9   : > { %v9508_v17 = vpop.permute.xlu0 %9507 }
0x12fa   : > { %v13598_v20 = vpop.eup %13597  ;;  %13609 = vtanh.f32 %v17990_v8  ;;  %v17995_v59 = vadd.f32 %v9508_v17, %v9383_v42  ;;  %v9902_v42 = vsel %vm665_vm1, %v9901_v41, %v9900_v4  ;;  %v9654_v17 = vld [vmem:[%s13931_s19 + $0x5f] sm:$0x1] }
0x12fb   : > { %v9514_v43 = vpop.permute.xlu1 %9513  ;;  %9593 = vrot.lane.b32.xlu1 %v13598_v20, %s13840_s14  ;;  %v9655_v20 = vld [vmem:[%s13931_s19 + $0x67] sm:$0x1]  ;;  %v9917_v2 = vrot.slane %v9654_v17, 5  ;;  %v9662_v17 = vld [vmem:[%s13931_s19 + $0x9f] sm:$0x1] }
0x12fc   : > { %v13600_v29 = vpop.eup %13599  ;;  %13611 = vtanh.f32 %v17995_v59  ;;  %v18001_v57 = vadd.f32 %v9514_v43, %v9386_v56  ;;  %v9656_v56 = vld [vmem:[%s13931_s19 + $0x6f] sm:$0x1]  ;;  %v9919_v46 = vrot.slane %v9655_v20, 4  ;;  %v9663_v20 = vld [vmem:[%s13931_s19 + $0xa7] sm:$0x1] }
0x12fd   : > { %v9512_v12 = vpop.permute.xlu0 %9511  ;;  %9591 = vrot.lane.b32.xlu0 %v13600_v29, %s13840_s14  ;;  %v9904_v29 = vsel %vm668_vm2, %v9903_v27, %v9902_v42  ;;  %v9661_v42 = vld [vmem:[%s13931_s19 + $0x97] sm:$0x1] }
0x12fe   : > { %v13602_v47 = vpop.eup %13601  ;;  %13613 = vtanh.f32 %v18001_v57  ;;  %v18007_v49 = vadd.f32 %v9512_v12, %v9385_v21  ;;  %v9911_v21 = vrot.slane %v9650_v24, 1  ;;  %v9657_v12 = vld [vmem:[%s13931_s19 + $0x77] sm:$0x1] }
0x12ff   : > { %9597 = vrot.lane.b32.xlu1 %v13602_v47, %s13840_s14  ;;  %v9913_v47 = vrot.slane %v9652_v26, 7  ;;  %v9923_v41 = vrot.slane %v9657_v12, 2  ;;  %v9659_v26 = vld [vmem:[%s13931_s19 + $0x87] sm:$0x1]  ;;  %v9929_v12 = vrot.slane %v9661_v42, 6 }
0x1300   : > { %v13604_v22 = vpop.eup %13603  ;;  %13615 = vtanh.f32 %v18007_v49  ;;  %v9675_v42 = vld [vmem:[%s13931_s19 + $0x107] sm:$0x1] }
0x1301   : > { %9595 = vrot.lane.b32.xlu0 %v13604_v22, %s13840_s14  ;;  %v9915_v22 = vrot.slane %v9653_v48, 6  ;;  %v9914_v54 = vsel %vm662_vm0, %v9913_v47, %v9651_v18  ;;  %v9660_v48 = vld [vmem:[%s13931_s19 + $0x8f] sm:$0x1]  ;;  %v9931_v47 = vrot.slane %v9662_v17, 5 }
0x1302   : > { %v9676_v17 = vld [vmem:[%s13931_s19 + $0x10f] sm:$0x1] }
0x1303   : > { %v13606_v34 = vpop.eup %13605  ;;  %v9916_v31 = vsel %vm665_vm1, %v9915_v22, %v9914_v54  ;;  %v9933_v22 = vrot.slane %v9663_v20, 4  ;;  %v9669_v54 = vld [vmem:[%s13931_s19 + $0xd7] sm:$0x1] }
0x1304   : > { %9601 = vrot.lane.b32.xlu1 %v13606_v34, %s13840_s14  ;;  %v9906_v34 = vsel %vm671_vm3, %v9905_v39, %v9904_v29  ;;  %v9918_v39 = vsel %vm668_vm2, %v9917_v2, %v9916_v31  ;;  %v9666_v29 = vld [vmem:[%s13931_s19 + $0xbf] sm:$0x1]  ;;  %v9671_v31 = vld [vmem:[%s13931_s19 + $0xe7] sm:$0x1] }
0x1305   : > { %v13608_v32 = vpop.eup %13607  ;;  %v9908_v9 = vsel %vm674_vm4, %v9907_v35, %v9906_v34  ;;  %v9925_v35 = vrot.slane %v9658_v63, 1  ;;  %v9667_v63 = vld [vmem:[%s13931_s19 + $0xc7] sm:$0x1] }
0x1306   : > { %9599 = vrot.lane.b32.xlu0 %v13608_v32, %s13840_s14  ;;  %v9921_v32 = vrot.slane %v9656_v56, 3  ;;  %v9910_v13 = vsel %vm677_vm5, %v9909_v30, %v9908_v9  ;;  %v9920_v30 = vsel %vm671_vm3, %v9919_v46, %v9918_v39  ;;  %v9664_v56 = vld [vmem:[%s13931_s19 + $0xaf] sm:$0x1]  ;;  %v9673_v39 = vld [vmem:[%s13931_s19 + $0xf7] sm:$0x1] }
0x1307   : > { %v13610_v25 = vpop.eup %13609  ;;  %v9912_v27 = vsel %vm680_vm6, %v9911_v21, %v9910_v13  ;;  %v9927_v21 = vrot.slane %v9660_v48, 7  ;;  %v9935_v34 = vrot.slane %v9664_v56, 3  ;;  %v9668_v9 = vld [vmem:[%s13931_s19 + $0xcf] sm:$0x1]  ;;  %v9670_v13 = vld [vmem:[%s13931_s19 + $0xdf] sm:$0x1] }
0x1308   : > { %9605 = vrot.lane.b32.xlu1 %v13610_v25, %s13840_s14  ;;  %12839 = vmatprep.mubr.msk.f32.mxu0 %vm892_vm7, %v9912_v27  ;;  %v9922_v25 = vsel %vm674_vm4, %v9921_v32, %v9920_v30  ;;  %v9941_v30 = vrot.slane %v9668_v9, 7  ;;  %v9947_v48 = vrot.slane %v9671_v31, 4  ;;  %v9682_v31 = vld [vmem:[%s13931_s19 + $0x13f] sm:$0x1] }
0x1309   : > { %v13612_v43 = vpop.eup %13611  ;;  %v9924_v4 = vsel %vm677_vm5, %v9923_v41, %v9922_v25  ;;  %v9928_v2 = vsel %vm662_vm0, %v9927_v21, %v9659_v26  ;;  %v9672_v41 = vld [vmem:[%s13931_s19 + $0xef] sm:$0x1]  ;;  %v9943_v25 = vrot.slane %v9669_v54, 6  ;;  %v9945_v26 = vrot.slane %v9670_v13, 5  ;;  %v9679_v54 = vld [vmem:[%s13931_s19 + $0x127] sm:$0x1] }
0x130a   : > { %9603 = vrot.lane.b32.xlu0 %v13612_v43, %s13840_s14  ;;  %v9926_v18 = vsel %vm680_vm6, %v9925_v35, %v9924_v4  ;;  %v9665_v43 = vld [vmem:[%s13931_s19 + $0xb7] sm:$0x1]  ;;  %v9930_v32 = vsel %vm665_vm1, %v9929_v12, %v9928_v2  ;;  %v9674_v35 = vld [vmem:[%s13931_s19 + $0xff] sm:$0x1]  ;;  %v9951_v21 = vrot.slane %v9673_v39, 2  ;;  %v9961_v39 = vrot.slane %v9679_v54, 4 }
0x130b   : > { %v13614_v14 = vpop.eup %13613  ;;  %12840 = vmatmul.mubr.msk.f32.vlgmr.msra.gmra.mxu0 %vm892_vm7, %v9926_v18  ;;  %v9937_v46 = vrot.slane %v9665_v43, 2  ;;  %v9932_v27 = vsel %vm668_vm2, %v9931_v47, %v9930_v32  ;;  %v9942_v43 = vsel %vm662_vm0, %v9941_v30, %v9667_v63  ;;  %v9677_v12 = vld [vmem:[%s13931_s19 + $0x117] sm:$0x1]  ;;  %v9678_v47 = vld [vmem:[%s13931_s19 + $0x11f] sm:$0x1]  ;;  %v9953_v9 = vrot.slane %v9674_v35, 1 }
0x130c   : > { %9609 = vrot.lane.b32.xlu1 %v13614_v14, %s13840_s14  ;;  %v9939_v14 = vrot.slane %v9666_v29, 1  ;;  %v9934_v18 = vsel %vm671_vm3, %v9933_v22, %v9932_v27  ;;  %v9949_v29 = vrot.slane %v9672_v41, 3  ;;  %v9944_v2 = vsel %vm665_vm1, %v9943_v25, %v9942_v43  ;;  %v9680_v32 = vld [vmem:[%s13931_s19 + $0x12f] sm:$0x1]  ;;  %v9681_v13 = vld [vmem:[%s13931_s19 + $0x137] sm:$0x1] }
0x130d   : > { %v13616_v24 = vpop.eup %13615  ;;  %v9936_v56 = vsel %vm674_vm4, %v9935_v34, %v9934_v18  ;;  %v9946_v63 = vsel %vm668_vm2, %v9945_v26, %v9944_v2  ;;  %v9955_v41 = vrot.slane %v9676_v17, 7  ;;  %v9959_v27 = vrot.slane %v9678_v47, 5  ;;  %v9683_v35 = vld [vmem:[%s13931_s19 + $0x147] sm:$0x1]  ;;  %v9684_v26 = vld [vmem:[%s13931_s19 + $0x14f] sm:$0x1] }
0x130e   : > { %9607 = vrot.lane.b32.xlu0 %v13616_v24, %s13840_s14  ;;  %v9938_v22 = vsel %vm677_vm5, %v9937_v46, %v9936_v56  ;;  %v9948_v46 = vsel %vm671_vm3, %v9947_v48, %v9946_v63  ;;  %v9965_v18 = vrot.slane %v9681_v13, 2  ;;  %v9685_v17 = vld [vmem:[%s13931_s19 + $0x157] sm:$0x1]  ;;  %v9967_v43 = vrot.slane %v9682_v31, 1  ;;  %v9691_v63 = vld [vmem:[%s13931_s19 + $0x187] sm:$0x1] }
0x130f   : > { %v9940_v34 = vsel %vm680_vm6, %v9939_v14, %v9938_v22  ;;  %v9963_v14 = vrot.slane %v9680_v32, 3  ;;  %v9950_v25 = vsel %vm674_vm4, %v9949_v29, %v9948_v46  ;;  %v9969_v47 = vrot.slane %v9684_v26, 7  ;;  %v9688_v22 = vld [vmem:[%s13931_s19 + $0x16f] sm:$0x1]  ;;  %v9689_v2 = vld [vmem:[%s13931_s19 + $0x177] sm:$0x1] }
0x1310   : > { %12842 = vmatprep.mubr.msk.f32.mxu0 %vm892_vm7, %v9940_v34  ;;  %v9952_v48 = vsel %vm677_vm5, %v9951_v21, %v9950_v25  ;;  %v9690_v21 = vld [vmem:[%s13931_s19 + $0x17f] sm:$0x1]  ;;  %v9971_v34 = vrot.slane %v9685_v17, 6  ;;  %v9692_v13 = vld [vmem:[%s13931_s19 + $0x18f] sm:$0x1] }
0x1311   : > { %v9970_v32 = vsel %vm662_vm0, %v9969_v47, %v9683_v35  ;;  %v9694_v35 = vld [vmem:[%s13931_s19 + $0x19f] sm:$0x1]  ;;  %v9983_v25 = vrot.slane %v9692_v13, 7  ;;  %v9696_v17 = vld [vmem:[%s13931_s19 + $0x1af] sm:$0x1] }
0x1312   : > { %v9699_v47 = vld [vmem:[%s13931_s19 + $0x1c7] sm:$0x1] }
0x1359   : > { %v9582_v24 = vpop.permute.xlu1 %9581 }
0x135a   : > { %v9628_v4 = vmul.f32 %v9582_v24, %v17796_v52 }
0x135b   : > { %v9580_v20 = vpop.permute.xlu0 %9579 }
0x135c   : > { %v9627_v52 = vmul.f32 %v9580_v20, %v17802_v11  ;;  %10318 = vrot.lane.b32.xlu1 %v9628_v4, %s13841_s18  ;;  %v9957_v11 = vrot.slane %v9677_v12, 6  ;;  %v9956_v4 = vsel %vm662_vm0, %v9955_v41, %v9675_v42  ;;  %v9686_v12 = vld [vmem:[%s13931_s19 + $0x15f] sm:$0x1]  ;;  %v9954_v42 = vsel %vm680_vm6, %v9953_v9, %v9952_v48 }
0x135d   : > { %12843 = vmatmul.mubr.msk.f32.gmra.mxu0 %vm892_vm7, %v9954_v42  ;;  %v9977_v41 = vrot.slane %v9688_v22, 3  ;;  %v9698_v48 = vld [vmem:[%s13931_s19 + $0x1bf] sm:$0x1] }
0x135e   : > { %v9586_v24 = vpop.permute.xlu1 %9585  ;;  %10316 = vrot.lane.b32.xlu0 %v9627_v52, %s13841_s18  ;;  %v9958_v56 = vsel %vm665_vm1, %v9957_v11, %v9956_v4  ;;  %v9979_v11 = vrot.slane %v9689_v2, 2  ;;  %v9991_v2 = vrot.slane %v9696_v17, 3  ;;  %v9708_v17 = vld [vmem:[%s13931_s19 + $0x20f] sm:$0x1] }
0x135f   : > { %v9630_v30 = vmul.f32 %v9586_v24, %v17808_v5  ;;  %v9687_v5 = vld [vmem:[%s13931_s19 + $0x167] sm:$0x1]  ;;  %v9960_v52 = vsel %vm668_vm2, %v9959_v27, %v9958_v56  ;;  %v9693_v24 = vld [vmem:[%s13931_s19 + $0x197] sm:$0x1]  ;;  %v9972_v27 = vsel %vm665_vm1, %v9971_v34, %v9970_v32 }
0x1360   : > { %v9584_v20 = vpop.permute.xlu0 %9583  ;;  %v9962_v54 = vsel %vm671_vm3, %v9961_v39, %v9960_v52  ;;  %v9975_v31 = vrot.slane %v9687_v5, 4  ;;  %v9981_v39 = vrot.slane %v9690_v21, 1  ;;  %v9985_v5 = vrot.slane %v9693_v24, 6  ;;  %v9705_v24 = vld [vmem:[%s13931_s19 + $0x1f7] sm:$0x1] }
0x1361   : > { %v9629_v29 = vmul.f32 %v9584_v20, %v17814_v62  ;;  %10322 = vrot.lane.b32.xlu1 %v9630_v30, %s13841_s18  ;;  %v9973_v62 = vrot.slane %v9686_v12, 5  ;;  %v9964_v9 = vsel %vm674_vm4, %v9963_v14, %v9962_v54  ;;  %v9695_v30 = vld [vmem:[%s13931_s19 + $0x1a7] sm:$0x1]  ;;  %v9697_v20 = vld [vmem:[%s13931_s19 + $0x1b7] sm:$0x1]  ;;  %v9984_v12 = vsel %vm662_vm0, %v9983_v25, %v9691_v63 }
0x1362   : > { %v9966_v46 = vsel %vm677_vm5, %v9965_v18, %v9964_v9  ;;  %v9987_v52 = vrot.slane %v9694_v35, 5  ;;  %v9989_v22 = vrot.slane %v9695_v30, 4  ;;  %v9986_v32 = vsel %vm665_vm1, %v9985_v5, %v9984_v12  ;;  %v9703_v63 = vld [vmem:[%s13931_s19 + $0x1e7] sm:$0x1]  ;;  %v9710_v12 = vld [vmem:[%s13931_s19 + $0x21f] sm:$0x1] }
0x1363   : > { %10320 = vrot.lane.b32.xlu0 %v9629_v29, %s13841_s18  ;;  %v9968_v26 = vsel %vm680_vm6, %v9967_v43, %v9966_v46  ;;  %v9974_v14 = vsel %vm668_vm2, %v9973_v62, %v9972_v27  ;;  %v9700_v29 = vld [vmem:[%s13931_s19 + $0x1cf] sm:$0x1]  ;;  %v9993_v34 = vrot.slane %v9697_v20, 2  ;;  %v9702_v62 = vld [vmem:[%s13931_s19 + $0x1df] sm:$0x1]  ;;  %v10011_v5 = vrot.slane %v9708_v17, 7 }
0x1364   : > { %12845 = vmatprep.mubr.msk.f32.mxu0 %vm892_vm7, %v9968_v26  ;;  %v9976_v18 = vsel %vm671_vm3, %v9975_v31, %v9974_v14  ;;  %v9988_v9 = vsel %vm668_vm2, %v9987_v52, %v9986_v32  ;;  %v9995_v31 = vrot.slane %v9698_v48, 1  ;;  %v9706_v46 = vld [vmem:[%s13931_s19 + $0x1ff] sm:$0x1]  ;;  %v10001_v35 = vrot.slane %v9702_v62, 5  ;;  %v9707_v14 = vld [vmem:[%s13931_s19 + $0x207] sm:$0x1] }
0x1365   : > { %v9590_v4 = vpop.permute.xlu1 %9589  ;;  %v9978_v42 = vsel %vm674_vm4, %v9977_v41, %v9976_v18  ;;  %v9704_v41 = vld [vmem:[%s13931_s19 + $0x1ef] sm:$0x1]  ;;  %v10007_v26 = vrot.slane %v9705_v24, 2  ;;  %v9709_v18 = vld [vmem:[%s13931_s19 + $0x217] sm:$0x1] }
0x1366   : > { %v9632_v56 = vmul.f32 %v9590_v4, %v17820_v45  ;;  %v9701_v45 = vld [vmem:[%s13931_s19 + $0x1d7] sm:$0x1]  ;;  %v9980_v54 = vsel %vm677_vm5, %v9979_v11, %v9978_v42  ;;  %v9990_v11 = vsel %vm671_vm3, %v9989_v22, %v9988_v9  ;;  %v10005_v4 = vrot.slane %v9704_v41, 3  ;;  %v9711_v42 = vld [vmem:[%s13931_s19 + $0x227] sm:$0x1] }
0x1367   : > { %v9588_v43 = vpop.permute.xlu0 %9587  ;;  %v9982_v13 = vsel %vm680_vm6, %v9981_v39, %v9980_v54  ;;  %v9999_v27 = vrot.slane %v9701_v45, 6  ;;  %v10003_v39 = vrot.slane %v9703_v63, 4  ;;  %v9992_v30 = vsel %vm674_vm4, %v9991_v2, %v9990_v11  ;;  %v9712_v52 = vld [vmem:[%s13931_s19 + $0x22f] sm:$0x1]  ;;  %v9713_v22 = vld [vmem:[%s13931_s19 + $0x237] sm:$0x1] }
0x1368   : > { %v9631_v21 = vmul.f32 %v9588_v43, %v17826_v38  ;;  %10326 = vrot.lane.b32.xlu1 %v9632_v56, %s13841_s18  ;;  %v9997_v38 = vrot.slane %v9700_v29, 7  ;;  %12846 = vmatmul.mubr.msk.f32.gmra.mxu0 %vm892_vm7, %v9982_v13  ;;  %v9994_v20 = vsel %vm677_vm5, %v9993_v34, %v9992_v30  ;;  %v10009_v56 = vrot.slane %v9706_v46, 1  ;;  %v9715_v34 = vld [vmem:[%s13931_s19 + $0x247] sm:$0x1]  ;;  %v9717_v46 = vld [vmem:[%s13931_s19 + $0x257] sm:$0x1] }
0x1369   : > { %v9996_v43 = vsel %vm680_vm6, %v9995_v31, %v9994_v20  ;;  %v10012_v54 = vsel %vm662_vm0, %v10011_v5, %v9707_v14  ;;  %v10013_v32 = vrot.slane %v9709_v18, 6  ;;  %v10015_v13 = vrot.slane %v9710_v12, 5  ;;  %v9721_v20 = vld [vmem:[%s13931_s19 + $0x277] sm:$0x1] }
0x136a   : > { %10324 = vrot.lane.b32.xlu0 %v9631_v21, %s13841_s18  ;;  %v9998_v25 = vsel %vm662_vm0, %v9997_v38, %v9699_v47  ;;  %12848 = vmatprep.mubr.msk.f32.mxu0 %vm892_vm7, %v9996_v43  ;;  %v9714_v21 = vld [vmem:[%s13931_s19 + $0x23f] sm:$0x1]  ;;  %v10017_v9 = vrot.slane %v9711_v42, 4  ;;  %v10019_v31 = vrot.slane %v9712_v52, 3  ;;  %v10021_v11 = vrot.slane %v9713_v22, 2 }
0x136b   : > { %v10000_v48 = vsel %vm665_vm1, %v9999_v27, %v9998_v25  ;;  %v10014_v38 = vsel %vm665_vm1, %v10013_v32, %v10012_v54  ;;  %v9718_v27 = vld [vmem:[%s13931_s19 + $0x25f] sm:$0x1]  ;;  %v10023_v25 = vrot.slane %v9714_v21, 1  ;;  %v9724_v42 = vld [vmem:[%s13931_s19 + $0x28f] sm:$0x1] }
0x136c   : > { %v10002_v47 = vsel %vm668_vm2, %v10001_v35, %v10000_v48  ;;  %v10016_v30 = vsel %vm668_vm2, %v10015_v13, %v10014_v38  ;;  %v9722_v48 = vld [vmem:[%s13931_s19 + $0x27f] sm:$0x1]  ;;  %v10029_v18 = vrot.slane %v9718_v27, 5  ;;  %v9725_v21 = vld [vmem:[%s13931_s19 + $0x297] sm:$0x1]  ;;  %v10039_v13 = vrot.slane %v9724_v42, 7 }
0x136d   : > { %v9594_v29 = vpop.permute.xlu1 %9593  ;;  %v10004_v45 = vsel %vm671_vm3, %v10003_v39, %v10002_v47  ;;  %v10018_v17 = vsel %vm671_vm3, %v10017_v9, %v10016_v30  ;;  %v9723_v47 = vld [vmem:[%s13931_s19 + $0x287] sm:$0x1]  ;;  %v9726_v54 = vld [vmem:[%s13931_s19 + $0x29f] sm:$0x1]  ;;  %v9732_v30 = vld [vmem:[%s13931_s19 + $0x2cf] sm:$0x1] }
0x136e   : > { %v9634_v2 = vmul.f32 %v9594_v29, %v17832_v23  ;;  %v10006_v63 = vsel %vm674_vm4, %v10005_v4, %v10004_v45  ;;  %v9716_v23 = vld [vmem:[%s13931_s19 + $0x24f] sm:$0x1]  ;;  %v9719_v4 = vld [vmem:[%s13931_s19 + $0x267] sm:$0x1]  ;;  %v10020_v5 = vsel %vm674_vm4, %v10019_v31, %v10018_v17  ;;  %v10035_v45 = vrot.slane %v9721_v20, 2 }
0x136f   : > { %v9592_v62 = vpop.permute.xlu0 %9591  ;;  %v10008_v24 = vsel %vm677_vm5, %v10007_v26, %v10006_v63  ;;  %v10025_v14 = vrot.slane %v9716_v23, 7  ;;  %v10022_v22 = vsel %vm677_vm5, %v10021_v11, %v10020_v5  ;;  %v9727_v63 = vld [vmem:[%s13931_s19 + $0x2a7] sm:$0x1]  ;;  %v9729_v23 = vld [vmem:[%s13931_s19 + $0x2b7] sm:$0x1]  ;;  %v10043_v38 = vrot.slane %v9726_v54, 5 }
0x1370   : > { %v9633_v41 = vmul.f32 %v9592_v62, %v17838_v3  ;;  %10330 = vrot.lane.b32.xlu1 %v9634_v2, %s13841_s18  ;;  %v10010_v39 = vsel %vm680_vm6, %v10009_v56, %v10008_v24  ;;  %v9720_v3 = vld [vmem:[%s13931_s19 + $0x26f] sm:$0x1]  ;;  %v10027_v56 = vrot.slane %v9717_v46, 6  ;;  %v10024_v32 = vsel %vm680_vm6, %v10023_v25, %v10022_v22  ;;  %v9733_v17 = vld [vmem:[%s13931_s19 + $0x2d7] sm:$0x1] }
0x1371   : > { %v9598_v35 = vpop.permute.xlu1 %9597  ;;  %12849 = vmatmul.mubr.msk.f32.gmra.mxu0 %vm892_vm7, %v10010_v39  ;;  %v10026_v29 = vsel %vm662_vm0, %v10025_v14, %v9715_v34  ;;  %v10033_v43 = vrot.slane %v9720_v3, 3  ;;  %v10037_v62 = vrot.slane %v9722_v48, 1  ;;  %v10041_v24 = vrot.slane %v9725_v21, 6  ;;  %v9731_v39 = vld [vmem:[%s13931_s19 + $0x2c7] sm:$0x1] }
0x1372   : > { %v9636_v26 = vmul.f32 %v9598_v35, %v17844_v51  ;;  %10328 = vrot.lane.b32.xlu0 %v9633_v41, %s13841_s18  ;;  %v10031_v51 = vrot.slane %v9719_v4, 4  ;;  %v10028_v2 = vsel %vm665_vm1, %v10027_v56, %v10026_v29  ;;  %12851 = vmatprep.mubr.msk.f32.mxu0 %vm892_vm7, %v10024_v32  ;;  %v9730_v41 = vld [vmem:[%s13931_s19 + $0x2bf] sm:$0x1]  ;;  %v10040_v27 = vsel %vm662_vm0, %v10039_v13, %v9723_v47  ;;  %v9736_v5 = vld [vmem:[%s13931_s19 + $0x2ef] sm:$0x1] }
0x1373   : > { %v9596_v12 = vpop.permute.xlu0 %9595  ;;  %v10030_v34 = vsel %vm668_vm2, %v10029_v18, %v10028_v2  ;;  %v10045_v35 = vrot.slane %v9727_v63, 4  ;;  %v10042_v3 = vsel %vm665_vm1, %v10041_v24, %v10040_v27  ;;  %v10051_v18 = vrot.slane %v9730_v41, 1  ;;  %v9738_v47 = vld [vmem:[%s13931_s19 + $0x2ff] sm:$0x1]  ;;  %v9739_v21 = vld [vmem:[%s13931_s19 + $0x307] sm:$0x1] }
0x1374   : > { %v9635_v52 = vmul.f32 %v9596_v12, %v17850_v6  ;;  %10334 = vrot.lane.b32.xlu1 %v9636_v26, %s13841_s18  ;;  %v9728_v6 = vld [vmem:[%s13931_s19 + $0x2af] sm:$0x1]  ;;  %v10032_v31 = vsel %vm671_vm3, %v10031_v51, %v10030_v34  ;;  %v10049_v26 = vrot.slane %v9729_v23, 2  ;;  %v10044_v56 = vsel %vm668_vm2, %v10043_v38, %v10042_v3  ;;  %v9735_v12 = vld [vmem:[%s13931_s19 + $0x2e7] sm:$0x1] }
0x1375   : > { %v10034_v46 = vsel %vm674_vm4, %v10033_v43, %v10032_v31  ;;  %v10047_v14 = vrot.slane %v9728_v6, 3  ;;  %v10046_v51 = vsel %vm671_vm3, %v10045_v35, %v10044_v56  ;;  %v9737_v43 = vld [vmem:[%s13931_s19 + $0x2f7] sm:$0x1]  ;;  %v10055_v42 = vrot.slane %v9733_v17, 6  ;;  %v9740_v54 = vld [vmem:[%s13931_s19 + $0x30f] sm:$0x1] }
0x1376   : > { %v9602_v9 = vpop.permute.xlu1 %9601  ;;  %10332 = vrot.lane.b32.xlu0 %v9635_v52, %s13841_s18  ;;  %v10036_v4 = vsel %vm677_vm5, %v10035_v45, %v10034_v46  ;;  %v10059_v45 = vrot.slane %v9735_v12, 4  ;;  %v10061_v63 = vrot.slane %v9736_v5, 3  ;;  %v10063_v6 = vrot.slane %v9737_v43, 2  ;;  %v9742_v13 = vld [vmem:[%s13931_s19 + $0x31f] sm:$0x1] }
0x1377   : > { %v9638_v11 = vmul.f32 %v9602_v9, %v17856_v60  ;;  %v9734_v60 = vld [vmem:[%s13931_s19 + $0x2df] sm:$0x1]  ;;  %v10038_v48 = vsel %vm680_vm6, %v10037_v62, %v10036_v4  ;;  %v10048_v22 = vsel %vm674_vm4, %v10047_v14, %v10046_v51  ;;  %v10065_v41 = vrot.slane %v9738_v47, 1  ;;  %v9743_v24 = vld [vmem:[%s13931_s19 + $0x327] sm:$0x1] }
0x1378   : > { %v9600_v25 = vpop.permute.xlu0 %9599  ;;  %12852 = vmatmul.mubr.msk.f32.gmra.mxu0 %vm892_vm7, %v10038_v48  ;;  %v10057_v2 = vrot.slane %v9734_v60, 5  ;;  %v10050_v34 = vsel %vm677_vm5, %v10049_v26, %v10048_v22  ;;  %v9744_v38 = vld [vmem:[%s13931_s19 + $0x32f] sm:$0x1]  ;;  %v9745_v27 = vld [vmem:[%s13931_s19 + $0x337] sm:$0x1]  ;;  %v10071_v4 = vrot.slane %v9742_v13, 5 }
0x1379   : > { %v9637_v20 = vmul.f32 %v9600_v25, %v17862_v58  ;;  %10338 = vrot.lane.b32.xlu1 %v9638_v11, %s13841_s18  ;;  %v10053_v58 = vrot.slane %v9732_v30, 7  ;;  %v10052_v31 = vsel %vm680_vm6, %v10051_v18, %v10050_v34  ;;  %v9746_v35 = vld [vmem:[%s13931_s19 + $0x33f] sm:$0x1]  ;;  %v10073_v3 = vrot.slane %v9743_v24, 4  ;;  %v9747_v14 = vld [vmem:[%s13931_s19 + $0x347] sm:$0x1] }
0x137a   : > { %v9606_v29 = vpop.permute.xlu1 %9605  ;;  %12854 = vmatprep.mubr.msk.f32.mxu0 %vm892_vm7, %v10052_v31  ;;  %v9748_v26 = vld [vmem:[%s13931_s19 + $0x34f] sm:$0x1]  ;;  %v10075_v48 = vrot.slane %v9744_v38, 3  ;;  %v10077_v56 = vrot.slane %v9745_v27, 2  ;;  %v9750_v18 = vld [vmem:[%s13931_s19 + $0x35f] sm:$0x1] }
0x137b   : > { %v9640_v52 = vmul.f32 %v9606_v29, %v17868_v33  ;;  %10336 = vrot.lane.b32.xlu0 %v9637_v20, %s13841_s18  ;;  %v10054_v62 = vsel %vm662_vm0, %v10053_v58, %v9731_v39  ;;  %v9741_v33 = vld [vmem:[%s13931_s19 + $0x317] sm:$0x1]  ;;  %v10079_v51 = vrot.slane %v9746_v35, 1  ;;  %v9751_v43 = vld [vmem:[%s13931_s19 + $0x367] sm:$0x1] }
0x137c   : > { %v9604_v32 = vpop.permute.xlu0 %9603  ;;  %v10056_v23 = vsel %vm665_vm1, %v10055_v42, %v10054_v62  ;;  %v10069_v39 = vrot.slane %v9741_v33, 6  ;;  %v9752_v47 = vld [vmem:[%s13931_s19 + $0x36f] sm:$0x1]  ;;  %v9754_v22 = vld [vmem:[%s13931_s19 + $0x37f] sm:$0x1] }
0x137d   : > { %v9639_v9 = vmul.f32 %v9604_v32, %v17874_v40  ;;  %10342 = vrot.lane.b32.xlu1 %v9640_v52, %s13841_s18  ;;  %v10058_v46 = vsel %vm668_vm2, %v10057_v2, %v10056_v23  ;;  %v10067_v40 = vrot.slane %v9740_v54, 7  ;;  %v9753_v52 = vld [vmem:[%s13931_s19 + $0x377] sm:$0x1]  ;;  %v10081_v2 = vrot.slane %v9748_v26, 7  ;;  %v9755_v34 = vld [vmem:[%s13931_s19 + $0x387] sm:$0x1] }
0x137e   : > { %v9610_v11 = vpop.permute.xlu1 %9609  ;;  %v10060_v25 = vsel %vm671_vm3, %v10059_v45, %v10058_v46  ;;  %v10087_v54 = vrot.slane %v9751_v43, 4  ;;  %v10089_v32 = vrot.slane %v9752_v47, 3  ;;  %v10093_v33 = vrot.slane %v9754_v22, 1  ;;  %v9756_v13 = vld [vmem:[%s13931_s19 + $0x38f] sm:$0x1] }
0x137f   : > { %v9642_v30 = vmul.f32 %v9610_v11, %v17880_v61  ;;  %10340 = vrot.lane.b32.xlu0 %v9639_v9, %s13841_s18  ;;  %v10062_v60 = vsel %vm674_vm4, %v10061_v63, %v10060_v25  ;;  %v10068_v20 = vsel %vm662_vm0, %v10067_v40, %v9739_v21  ;;  %v9749_v61 = vld [vmem:[%s13931_s19 + $0x357] sm:$0x1]  ;;  %v10085_v21 = vrot.slane %v9750_v18, 5  ;;  %v9759_v24 = vld [vmem:[%s13931_s19 + $0x3a7] sm:$0x1] }
0x1380   : > { %v9608_v17 = vpop.permute.xlu0 %9607  ;;  %v10064_v5 = vsel %vm677_vm5, %v10063_v6, %v10062_v60  ;;  %v10070_v29 = vsel %vm665_vm1, %v10069_v39, %v10068_v20  ;;  %v10082_v63 = vsel %vm662_vm0, %v10081_v2, %v9747_v14  ;;  %v10091_v6 = vrot.slane %v9753_v52, 2  ;;  %v9757_v9 = vld [vmem:[%s13931_s19 + $0x397] sm:$0x1]  ;;  %v9760_v38 = vld [vmem:[%s13931_s19 + $0x3af] sm:$0x1] }
0x1381   : > { %v9641_v12 = vmul.f32 %v9608_v17, %v17886_v16  ;;  %10346 = vrot.lane.b32.xlu1 %v9642_v30, %s13841_s18  ;;  %v10066_v58 = vsel %vm680_vm6, %v10065_v41, %v10064_v5  ;;  %v10072_v42 = vsel %vm668_vm2, %v10071_v4, %v10070_v29  ;;  %v10083_v16 = vrot.slane %v9749_v61, 6  ;;  %v9758_v41 = vld [vmem:[%s13931_s19 + $0x39f] sm:$0x1]  ;;  %v9761_v27 = vld [vmem:[%s13931_s19 + $0x3b7] sm:$0x1] }
0x1382   : > { %12855 = vmatmul.mubr.msk.f32.gmra.mxu0 %vm892_vm7, %v10066_v58  ;;  %v10074_v45 = vsel %vm671_vm3, %v10073_v3, %v10072_v42  ;;  %v9762_v35 = vld [vmem:[%s13931_s19 + $0x3bf] sm:$0x1]  ;;  %v10095_v40 = vrot.slane %v9756_v13, 7  ;;  %v10097_v39 = vrot.slane %v9757_v9, 6  ;;  %v10099_v25 = vrot.slane %v9758_v41, 5 }
0x1383   : > { %10344 = vrot.lane.b32.xlu0 %v9641_v12, %s13841_s18  ;;  %v10076_v62 = vsel %vm674_vm4, %v10075_v48, %v10074_v45  ;;  %v10084_v23 = vsel %vm665_vm1, %v10083_v16, %v10082_v63  ;;  %v10101_v4 = vrot.slane %v9759_v24, 4  ;;  %v10103_v3 = vrot.slane %v9760_v38, 3  ;;  %v9763_v14 = vld [vmem:[%s13931_s19 + $0x3c7] sm:$0x1]  ;;  %v9764_v48 = vld [vmem:[%s13931_s19 + $0x3cf] sm:$0x1] }
0x1384   : > { %v10078_v31 = vsel %vm677_vm5, %v10077_v56, %v10076_v62  ;;  %v10086_v46 = vsel %vm668_vm2, %v10085_v21, %v10084_v23  ;;  %v10096_v17 = vsel %vm662_vm0, %v10095_v40, %v9755_v34  ;;  %v10105_v60 = vrot.slane %v9761_v27, 2  ;;  %v9765_v56 = vld [vmem:[%s13931_s19 + $0x3d7] sm:$0x1]  ;;  %v9766_v12 = vld [vmem:[%s13931_s19 + $0x3df] sm:$0x1] }
0x1385   : > { %v10080_v11 = vsel %vm680_vm6, %v10079_v51, %v10078_v31  ;;  %v10088_v30 = vsel %vm671_vm3, %v10087_v54, %v10086_v46  ;;  %v10107_v20 = vrot.slane %v9762_v35, 1  ;;  %v10098_v18 = vsel %vm665_vm1, %v10097_v39, %v10096_v17  ;;  %v9767_v5 = vld [vmem:[%s13931_s19 + $0x3e7] sm:$0x1]  ;;  %v9768_v29 = vld [vmem:[%s13931_s19 + $0x3ef] sm:$0x1] }
0x1386   : > { %12857 = vmatprep.mubr.msk.f32.mxu0 %vm892_vm7, %v10080_v11  ;;  %v10090_v26 = vsel %vm674_vm4, %v10089_v32, %v10088_v30  ;;  %v10100_v43 = vsel %vm668_vm2, %v10099_v25, %v10098_v18  ;;  %v9769_v47 = vld [vmem:[%s13931_s19 + $0x3f7] sm:$0x1]  ;;  %v10109_v58 = vrot.slane %v9764_v48, 7  ;;  %v10111_v42 = vrot.slane %v9765_v56, 6  ;;  %v9770_v22 = vld [vmem:[%s13931_s19 + $0x3ff] sm:$0x1] }
0x1387   : > { %v10092_v61 = vsel %vm677_vm5, %v10091_v6, %v10090_v26  ;;  %v10102_v52 = vsel %vm671_vm3, %v10101_v4, %v10100_v43  ;;  %v10113_v2 = vrot.slane %v9766_v12, 5  ;;  %v10115_v16 = vrot.slane %v9767_v5, 4  ;;  %v18325_v12 = vld [vmem:[%s18802_s3] ss:$0 sm:$0xff] }
0x1388   : > { %v10094_v51 = vsel %vm680_vm6, %v10093_v33, %v10092_v61  ;;  %v10104_v45 = vsel %vm674_vm4, %v10103_v3, %v10102_v52  ;;  %v10110_v21 = vsel %vm662_vm0, %v10109_v58, %v9763_v14  ;;  %v10117_v54 = vrot.slane %v9768_v29, 3 }
0x1389   : > { %12858 = vmatmul.mubr.msk.f32.gmra.mxu0 %vm892_vm7, %v10094_v51  ;;  %v10106_v32 = vsel %vm677_vm5, %v10105_v60, %v10104_v45  ;;  %v10112_v34 = vsel %vm665_vm1, %v10111_v42, %v10110_v21  ;;  %v10119_v62 = vrot.slane %v9769_v47, 2  ;;  %v10121_v33 = vrot.slane %v9770_v22, 1 }
0x138a   : > { %v10108_v63 = vsel %vm680_vm6, %v10107_v20, %v10106_v32  ;;  %v10114_v6 = vsel %vm668_vm2, %v10113_v2, %v10112_v34 }
0x138b   : > { %12860 = vmatprep.mubr.msk.f32.mxu0 %vm892_vm7, %v10108_v63  ;;  %v10116_v13 = vsel %vm671_vm3, %v10115_v16, %v10114_v6 }
0x138c   : > { %v10118_v9 = vsel %vm674_vm4, %v10117_v54, %v10116_v13 }
0x138d   : > { %v10120_v31 = vsel %vm677_vm5, %v10119_v62, %v10118_v9 }
0x138e   : > { %v10122_v23 = vsel %vm680_vm6, %v10121_v33, %v10120_v31 }
0x138f   : > { %12861 = vmatmul.mubr.msk.f32.gmra.mxu0 %vm892_vm7, %v10122_v23 }
0x13cb   : > { %v12841_v60 = vpop.f32.mrf.mxu0 }
0x13cc   : > { %v10227_v5 = vadd.f32 %v18325_v12, %v12841_v60 }
0x13cd   : > { %v10221_v20 = vpop.f32.mrf.mxu0 }
0x13ce   : > { %v10319_v41 = vpop.permute.xlu1 %10318  ;;  %v10222_v43 = vadd.f32 %v18325_v12, %v10221_v20 }
0x13d0   : > { %v10317_v24 = vpop.permute.xlu0 %10316 }
0x13d1   : > { %12871 = vmatprep.mubr.msk.f32.mxu1 %vm892_vm7, %v10317_v24 }
0x13d2   : > { %12872 = vmatmul.mubr.msk.f32.vlgmr.msra.gmra.mxu1 %vm892_vm7, %v10319_v41 }
0x13d3   : > { %v10323_v11 = vpop.permute.xlu1 %10322 }
0x13d5   : > { %v10321_v38 = vpop.permute.xlu0 %10320 }
0x13d6   : > { %12874 = vmatprep.mubr.msk.f32.mxu1 %vm892_vm7, %v10321_v38 }
0x13d7   : > { %12875 = vmatmul.mubr.msk.f32.gmra.mxu1 %vm892_vm7, %v10323_v11 }
0x13da   : > { %v10327_v46 = vpop.permute.xlu1 %10326 }
0x13dc   : > { %v10325_v27 = vpop.permute.xlu0 %10324 }
0x13dd   : > { %12877 = vmatprep.mubr.msk.f32.mxu1 %vm892_vm7, %v10325_v27 }
0x13de   : > { %12878 = vmatmul.mubr.msk.f32.gmra.mxu1 %vm892_vm7, %v10327_v46 }
0x13e2   : > { %v10331_v35 = vpop.permute.xlu1 %10330 }
0x13e4   : > { %v10329_v40 = vpop.permute.xlu0 %10328 }
0x13e5   : > { %12880 = vmatprep.mubr.msk.f32.mxu1 %vm892_vm7, %v10329_v40 }
0x13e6   : > { %v10335_v39 = vpop.permute.xlu1 %10334  ;;  %12881 = vmatmul.mubr.msk.f32.gmra.mxu1 %vm892_vm7, %v10331_v35 }
0x13e8   : > { %v10333_v30 = vpop.permute.xlu0 %10332 }
0x13e9   : > { %12883 = vmatprep.mubr.msk.f32.mxu1 %vm892_vm7, %v10333_v30 }
0x13ea   : > { %12884 = vmatmul.mubr.msk.f32.gmra.mxu1 %vm892_vm7, %v10335_v39 }
0x13eb   : > { %v10339_v25 = vpop.permute.xlu1 %10338 }
0x13ed   : > { %v10337_v4 = vpop.permute.xlu0 %10336 }
0x13ee   : > { %12886 = vmatprep.mubr.msk.f32.mxu1 %vm892_vm7, %v10337_v4 }
0x13ef   : > { %12887 = vmatmul.mubr.msk.f32.gmra.mxu1 %vm892_vm7, %v10339_v25  ;;  %v10343_v3 = vpop.permute.xlu1 %10342 }
0x13f1   : > { %v10341_v14 = vpop.permute.xlu0 %10340 }
0x13f2   : > { %12889 = vmatprep.mubr.msk.f32.mxu1 %vm892_vm7, %v10341_v14 }
0x13f3   : > { %12890 = vmatmul.mubr.msk.f32.gmra.mxu1 %vm892_vm7, %v10343_v3  ;;  %v10347_v17 = vpop.permute.xlu1 %10346 }
0x13f5   : > { %v10345_v26 = vpop.permute.xlu0 %10344 }
0x13f6   : > { %12892 = vmatprep.mubr.msk.f32.mxu1 %vm892_vm7, %v10345_v26 }
0x13f7   : > { %12893 = vmatmul.mubr.msk.f32.gmra.mxu1 %vm892_vm7, %v10347_v17 }
0x141d   : > { %v12844_v48 = vpop.f32.mrf.mxu0 }
0x141e   : > { %v10237_v42 = vadd.f32 %v18325_v12, %v12844_v48 }
0x141f   : > { %v10231_v56 = vpop.f32.mrf.mxu0 }
0x1420   : > { %v10232_v16 = vadd.f32 %v18325_v12, %v10231_v56 }
0x1428   : > { %v12847_v61 = vpop.f32.mrf.mxu0 }
0x1429   : > { %v10247_v6 = vadd.f32 %v18325_v12, %v12847_v61 }
0x142a   : > { %v10241_v18 = vpop.f32.mrf.mxu0 }
0x142b   : > { %v10242_v9 = vadd.f32 %v18325_v12, %v10241_v18 }
0x1431   : > { %v12850_v29 = vpop.f32.mrf.mxu0 }
0x1432   : > { %v10257_v46 = vadd.f32 %v18325_v12, %v12850_v29 }
0x1433   : > { %v10251_v58 = vpop.f32.mrf.mxu0 }
0x1434   : > { %v10252_v30 = vadd.f32 %v18325_v12, %v10251_v58 }
0x1438   : > { %v12853_v54 = vpop.f32.mrf.mxu0 }
0x1439   : > { %v10267_v26 = vadd.f32 %v18325_v12, %v12853_v54 }
0x143a   : > { %v10261_v33 = vpop.f32.mrf.mxu0 }
0x143b   : > { %v10262_v61 = vadd.f32 %v18325_v12, %v10261_v33 }
0x1442   : > { %v12856_v41 = vpop.f32.mrf.mxu0 }
0x1444   : > { %v10271_v35 = vpop.f32.mrf.mxu0 }
0x1449   : > { %v12859_v17 = vpop.f32.mrf.mxu0 }
0x1492   : > { %v12873_v51 = vpop.f32.mrf.mxu1 }
0x1493   : > { %v10526_v47 = vadd.f32 %v12873_v51, %v10227_v5 }
0x1494   : > { %v10446_v52 = vpop.f32.mrf.mxu1 }
0x1495   : > { %v11993_v22 = vmul.f32 -1.442695, %v10526_v47  ;;  %v10525_v2 = vadd.f32 %v10446_v52, %v10222_v43  ;;  %v10281_v47 = vpop.f32.mrf.mxu0 }
0x1497   : > { %13617 = vpow2.f32 %v11993_v22  ;;  %v11992_v45 = vmul.f32 -1.442695, %v10525_v2  ;;  %v12876_v21 = vpop.f32.mrf.mxu1  ;;  %v12862_v54 = vpop.f32.mrf.mxu0 }
0x1498   : > { %v10528_v32 = vadd.f32 %v12876_v21, %v10237_v42  ;;  %v10277_v42 = vadd.f32 %v18325_v12, %v12856_v41 }
0x1499   : > { %13619 = vpow2.f32 %v11992_v45  ;;  %v10456_v34 = vpop.f32.mrf.mxu1 }
0x149a   : > { %v11995_v62 = vmul.f32 -1.442695, %v10528_v32  ;;  %v10527_v63 = vadd.f32 %v10456_v34, %v10232_v16  ;;  %v10272_v16 = vadd.f32 %v18325_v12, %v10271_v35 }
0x149c   : > { %13621 = vpow2.f32 %v11995_v62  ;;  %v11994_v13 = vmul.f32 -1.442695, %v10527_v63  ;;  %v10287_v62 = vadd.f32 %v18325_v12, %v12859_v17 }
0x149e   : > { %13623 = vpow2.f32 %v11994_v13  ;;  %v12879_v31 = vpop.f32.mrf.mxu1 }
0x149f   : > { %v10530_v23 = vadd.f32 %v12879_v31, %v10247_v6  ;;  %v10282_v31 = vadd.f32 %v18325_v12, %v10281_v47 }
0x14a0   : > { %v10466_v24 = vpop.f32.mrf.mxu1 }
0x14a1   : > { %v11997_v38 = vmul.f32 -1.442695, %v10530_v23  ;;  %v10529_v11 = vadd.f32 %v10466_v24, %v10242_v9  ;;  %v10291_v24 = vpop.f32.mrf.mxu0 }
0x14a3   : > { %13625 = vpow2.f32 %v11997_v38  ;;  %v11996_v27 = vmul.f32 -1.442695, %v10529_v11 }
0x14a4   : > { %v13618_v40 = vpop.eup %13617 }
0x14a5   : > { %v10590_v39 = vadd.f32 1.0, %v13618_v40  ;;  %13627 = vpow2.f32 %v11996_v27  ;;  %v10297_v27 = vadd.f32 %v18325_v12, %v12862_v54 }
0x14a6   : > { %v13620_v25 = vpop.eup %13619  ;;  %v12882_v4 = vpop.f32.mrf.mxu1 }
0x14a7   : > { %13629 = vrcp.f32 %v10590_v39  ;;  %v10589_v3 = vadd.f32 1.0, %v13620_v25  ;;  %v10532_v14 = vadd.f32 %v12882_v4, %v10257_v46  ;;  %v10292_v4 = vadd.f32 %v18325_v12, %v10291_v24 }
0x14a8   : > { %v10476_v60 = vpop.f32.mrf.mxu1 }
0x14a9   : > { %v13622_v20 = vpop.eup %13621  ;;  %13631 = vrcp.f32 %v10589_v3  ;;  %v11999_v48 = vmul.f32 -1.442695, %v10532_v14  ;;  %v10531_v56 = vadd.f32 %v10476_v60, %v10252_v30 }
0x14aa   : > { %v10592_v18 = vadd.f32 1.0, %v13622_v20  ;;  %v12885_v5 = vpop.f32.mrf.mxu1 }
0x14ab   : > { %v13624_v29 = vpop.eup %13623  ;;  %13633 = vpow2.f32 %v11999_v48  ;;  %v11998_v51 = vmul.f32 -1.442695, %v10531_v56  ;;  %v10534_v43 = vadd.f32 %v12885_v5, %v10267_v26 }
0x14ac   : > { %13635 = vrcp.f32 %v10592_v18  ;;  %v10591_v58 = vadd.f32 1.0, %v13624_v29  ;;  %v10486_v52 = vpop.f32.mrf.mxu1 }
0x14ad   : > { %13637 = vpow2.f32 %v11998_v51  ;;  %v12001_v22 = vmul.f32 -1.442695, %v10534_v43  ;;  %v10533_v2 = vadd.f32 %v10486_v52, %v10262_v61 }
0x14ae   : > { %13639 = vrcp.f32 %v10591_v58 }
0x14af   : > { %13641 = vpow2.f32 %v12001_v22  ;;  %v12000_v45 = vmul.f32 -1.442695, %v10533_v2  ;;  %v12888_v21 = vpop.f32.mrf.mxu1 }
0x14b0   : > { %v13626_v32 = vpop.eup %13625  ;;  %v10536_v34 = vadd.f32 %v12888_v21, %v10277_v42 }
0x14b1   : > { %v10594_v63 = vadd.f32 1.0, %v13626_v32  ;;  %13643 = vpow2.f32 %v12000_v45  ;;  %v10496_v6 = vpop.f32.mrf.mxu1 }
0x14b2   : > { %v13628_v33 = vpop.eup %13627  ;;  %v12003_v13 = vmul.f32 -1.442695, %v10536_v34  ;;  %v10535_v9 = vadd.f32 %v10496_v6, %v10272_v16 }
0x14b3   : > { %13645 = vrcp.f32 %v10594_v63  ;;  %v10593_v23 = vadd.f32 1.0, %v13628_v33  ;;  %v12891_v41 = vpop.f32.mrf.mxu1 }
0x14b4   : > { %v13630_v38 = vpop.eup %13629  ;;  %13647 = vpow2.f32 %v12003_v13  ;;  %v12002_v11 = vmul.f32 -1.442695, %v10535_v9  ;;  %v10538_v46 = vadd.f32 %v12891_v41, %v10287_v62 }
0x14b5   : > { %13649 = vrcp.f32 %v10593_v23  ;;  %v10506_v35 = vpop.f32.mrf.mxu1  ;;  %v10638_v40 = vmul.f32 2.0, %v13630_v38 }
0x14b6   : > { %v13632_v39 = vpop.eup %13631  ;;  %13651 = vpow2.f32 %v12002_v11  ;;  %v12005_v30 = vmul.f32 -1.442695, %v10538_v46  ;;  %v10537_v25 = vadd.f32 %v10506_v35, %v10282_v31 }
0x14b7   : > { %v12894_v3 = vpop.f32.mrf.mxu1  ;;  %v12009_v14 = vadd.f32 -1.0, %v10638_v40  ;;  %v10637_v26 = vmul.f32 2.0, %v13632_v39 }
0x14b8   : > { %v13634_v17 = vpop.eup %13633  ;;  %13653 = vpow2.f32 %v12005_v30  ;;  %v12004_v60 = vmul.f32 -1.442695, %v10537_v25  ;;  %v10540_v20 = vadd.f32 %v12894_v3, %v10297_v27 }
0x14b9   : > { %v13636_v48 = vpop.eup %13635  ;;  %v10596_v56 = vadd.f32 1.0, %v13634_v17  ;;  %v10516_v61 = vpop.f32.mrf.mxu1  ;;  %v18345_v18 = vsel %vm14321_vm10, %v12009_v14, %v13630_v38  ;;  %v12008_v5 = vadd.f32 -1.0, %v10637_v26 }
0x14ba   : > { %v13638_v29 = vpop.eup %13637  ;;  %13655 = vpow2.f32 %v12004_v60  ;;  %v12007_v51 = vmul.f32 -1.442695, %v10540_v20  ;;  %v10539_v43 = vadd.f32 %v10516_v61, %v10292_v4  ;;  %10719 = vrot.lane.b32.xlu1 %v18345_v18, %s13840_s14  ;;  %v10640_v12 = vmul.f32 2.0, %v13636_v48 }
0x14bb   : > { %v13640_v47 = vpop.eup %13639  ;;  %13657 = vrcp.f32 %v10596_v56  ;;  %v10595_v58 = vadd.f32 1.0, %v13638_v29  ;;  %v18351_v42 = vsel %vm14321_vm10, %v12008_v5, %v13632_v39 }
0x14bc   : > { %v13642_v52 = vpop.eup %13641  ;;  %13659 = vpow2.f32 %v12007_v51  ;;  %v12006_v22 = vmul.f32 -1.442695, %v10539_v43  ;;  %10717 = vrot.lane.b32.xlu0 %v18351_v42, %s13840_s14  ;;  %v12011_v2 = vadd.f32 -1.0, %v10640_v12  ;;  %v10639_v16 = vmul.f32 2.0, %v13640_v47 }
0x14bd   : > { %13661 = vrcp.f32 %v10595_v58  ;;  %v10598_v45 = vadd.f32 1.0, %v13642_v52 }
0x14be   : > { %v13644_v21 = vpop.eup %13643  ;;  %13663 = vpow2.f32 %v12006_v22  ;;  %v18357_v54 = vsel %vm14321_vm10, %v12011_v2, %v13636_v48  ;;  %v12010_v32 = vadd.f32 -1.0, %v10639_v16 }
0x14bf   : > { %13665 = vrcp.f32 %v10598_v45  ;;  %v10597_v34 = vadd.f32 1.0, %v13644_v21  ;;  %10723 = vrot.lane.b32.xlu1 %v18357_v54, %s13840_s14 }
0x14c0   : > { %v13646_v62 = vpop.eup %13645  ;;  %v18363_v63 = vsel %vm14321_vm10, %v12010_v32, %v13640_v47 }
0x14c1   : > { %v13648_v6 = vpop.eup %13647  ;;  %13667 = vrcp.f32 %v10597_v34  ;;  %10721 = vrot.lane.b32.xlu0 %v18363_v63, %s13840_s14  ;;  %v10642_v33 = vmul.f32 2.0, %v13646_v62 }
0x14c2   : > { %v13650_v13 = vpop.eup %13649  ;;  %v10600_v9 = vadd.f32 1.0, %v13648_v6 }
0x14c3   : > { %v13652_v31 = vpop.eup %13651  ;;  %v12013_v23 = vadd.f32 -1.0, %v10642_v33  ;;  %v10641_v41 = vmul.f32 2.0, %v13650_v13 }
0x14c4   : > { %13669 = vrcp.f32 %v10600_v9  ;;  %v10599_v24 = vadd.f32 1.0, %v13652_v31 }
0x14c5   : > { %v13654_v38 = vpop.eup %13653  ;;  %v18369_v11 = vsel %vm14321_vm10, %v12013_v23, %v13646_v62  ;;  %v12012_v46 = vadd.f32 -1.0, %v10641_v41 }
0x14c6   : > { %13671 = vrcp.f32 %v10599_v24  ;;  %v10602_v27 = vadd.f32 1.0, %v13654_v38  ;;  %10727 = vrot.lane.b32.xlu1 %v18369_v11, %s13840_s14 }
0x14c7   : > { %v13656_v35 = vpop.eup %13655  ;;  %v18375_v40 = vsel %vm14321_vm10, %v12012_v46, %v13650_v13 }
0x14c8   : > { %v13658_v39 = vpop.eup %13657  ;;  %13673 = vrcp.f32 %v10602_v27  ;;  %v10601_v30 = vadd.f32 1.0, %v13656_v35  ;;  %10725 = vrot.lane.b32.xlu0 %v18375_v40, %s13840_s14 }
0x14c9   : > { %v13660_v25 = vpop.eup %13659  ;;  %v10644_v4 = vmul.f32 2.0, %v13658_v39 }
0x14ca   : > { %v13662_v3 = vpop.eup %13661  ;;  %13675 = vrcp.f32 %v10601_v30  ;;  %v10604_v14 = vadd.f32 1.0, %v13660_v25 }
0x14cb   : > { %v13664_v26 = vpop.eup %13663  ;;  %v12015_v17 = vadd.f32 -1.0, %v10644_v4  ;;  %v10643_v60 = vmul.f32 2.0, %v13662_v3 }
0x14cc   : > { %v13666_v20 = vpop.eup %13665  ;;  %13677 = vrcp.f32 %v10604_v14  ;;  %v10603_v48 = vadd.f32 1.0, %v13664_v26 }
0x14cd   : > { %v18381_v56 = vsel %vm14321_vm10, %v12015_v17, %v13658_v39  ;;  %v12014_v61 = vadd.f32 -1.0, %v10643_v60  ;;  %v10646_v5 = vmul.f32 2.0, %v13666_v20 }
0x14ce   : > { %v13668_v29 = vpop.eup %13667  ;;  %13679 = vrcp.f32 %v10603_v48  ;;  %10731 = vrot.lane.b32.xlu1 %v18381_v56, %s13840_s14 }
0x14cf   : > { %v18387_v51 = vsel %vm14321_vm10, %v12014_v61, %v13662_v3  ;;  %v12017_v43 = vadd.f32 -1.0, %v10646_v5  ;;  %v10645_v12 = vmul.f32 2.0, %v13668_v29 }
0x14d0   : > { %10729 = vrot.lane.b32.xlu0 %v18387_v51, %s13840_s14 }
0x14d1   : > { %v13670_v47 = vpop.eup %13669  ;;  %v18393_v58 = vsel %vm14321_vm10, %v12017_v43, %v13666_v20  ;;  %v12016_v52 = vadd.f32 -1.0, %v10645_v12 }
0x14d2   : > { %10735 = vrot.lane.b32.xlu1 %v18393_v58, %s13840_s14  ;;  %v10648_v22 = vmul.f32 2.0, %v13670_v47 }
0x14d3   : > { %v13672_v2 = vpop.eup %13671  ;;  %v18399_v16 = vsel %vm14321_vm10, %v12016_v52, %v13668_v29 }
0x14d4   : > { %10733 = vrot.lane.b32.xlu0 %v18399_v16, %s13840_s14  ;;  %v12019_v45 = vadd.f32 -1.0, %v10648_v22  ;;  %v10647_v21 = vmul.f32 2.0, %v13672_v2 }
0x14d5   : > { %v13674_v32 = vpop.eup %13673 }
0x14d6   : > { %v18405_v34 = vsel %vm14321_vm10, %v12019_v45, %v13670_v47  ;;  %v12018_v62 = vadd.f32 -1.0, %v10647_v21  ;;  %v10650_v6 = vmul.f32 2.0, %v13674_v32 }
0x14d7   : > { %v13676_v33 = vpop.eup %13675  ;;  %10739 = vrot.lane.b32.xlu1 %v18405_v34, %s13840_s14 }
0x14d8   : > { %v18411_v13 = vsel %vm14321_vm10, %v12018_v62, %v13672_v2  ;;  %v12021_v9 = vadd.f32 -1.0, %v10650_v6  ;;  %v10649_v31 = vmul.f32 2.0, %v13676_v33 }
0x14d9   : > { %v13678_v23 = vpop.eup %13677  ;;  %10737 = vrot.lane.b32.xlu0 %v18411_v13, %s13840_s14 }
0x14da   : > { %v18417_v41 = vsel %vm14321_vm10, %v12021_v9, %v13674_v32  ;;  %v12020_v24 = vadd.f32 -1.0, %v10649_v31  ;;  %v10652_v38 = vmul.f32 2.0, %v13678_v23 }
0x14db   : > { %v13680_v46 = vpop.eup %13679  ;;  %10743 = vrot.lane.b32.xlu1 %v18417_v41, %s13840_s14 }
0x14dc   : > { %v18423_v27 = vsel %vm14321_vm10, %v12020_v24, %v13676_v33  ;;  %v12023_v35 = vadd.f32 -1.0, %v10652_v38  ;;  %v10651_v39 = vmul.f32 2.0, %v13680_v46 }
0x14dd   : > { %10741 = vrot.lane.b32.xlu0 %v18423_v27, %s13840_s14 }
0x14de   : > { %v18429_v30 = vsel %vm14321_vm10, %v12023_v35, %v13678_v23  ;;  %v12022_v25 = vadd.f32 -1.0, %v10651_v39 }
0x14df   : > { %10747 = vrot.lane.b32.xlu1 %v18429_v30, %s13840_s14 }
0x14e0   : > { %v18435_v4 = vsel %vm14321_vm10, %v12022_v25, %v13680_v46 }
0x14e1   : > { %10745 = vrot.lane.b32.xlu0 %v18435_v4, %s13840_s14 }
0x152c   : > { %v10720_v3 = vpop.permute.xlu1 %10719 }
0x152d   : > { %v10766_v14 = vmul.f32 %v10720_v3, %v18345_v18  ;;  %v10686_v3 = vmul.f32 %v18345_v18, %v17924_v10 }
0x152e   : > { %v10718_v26 = vpop.permute.xlu0 %10717 }
0x152f   : > { %v10765_v17 = vmul.f32 %v10718_v26, %v18351_v42  ;;  %10799 = vrot.lane.b32.xlu1 %v10766_v14, %s13841_s18 }
0x1531   : > { %v10724_v60 = vpop.permute.xlu1 %10723  ;;  %10797 = vrot.lane.b32.xlu0 %v10765_v17, %s13841_s18  ;;  %v10685_v17 = vmul.f32 %v18351_v42, %v17929_v28 }
0x1532   : > { %v10768_v20 = vmul.f32 %v10724_v60, %v18357_v54 }
0x1533   : > { %v10722_v48 = vpop.permute.xlu0 %10721 }
0x1534   : > { %v10767_v55 = vmul.f32 %v10722_v48, %v18363_v63  ;;  %10803 = vrot.lane.b32.xlu1 %v10768_v20, %s13841_s18  ;;  %v10688_v48 = vmul.f32 %v18357_v54, %v17934_v1 }
0x1536   : > { %10801 = vrot.lane.b32.xlu0 %v10767_v55, %s13841_s18 }
0x1538   : > { %v10728_v61 = vpop.permute.xlu1 %10727 }
0x1539   : > { %v10770_v5 = vmul.f32 %v10728_v61, %v18369_v11 }
0x153a   : > { %v10726_v29 = vpop.permute.xlu0 %10725 }
0x153b   : > { %v10769_v43 = vmul.f32 %v10726_v29, %v18375_v40  ;;  %10807 = vrot.lane.b32.xlu1 %v10770_v5, %s13841_s18  ;;  %v10687_v5 = vmul.f32 %v18363_v63, %v17939_v7 }
0x153d   : > { %10805 = vrot.lane.b32.xlu0 %v10769_v43, %s13841_s18  ;;  %v10690_v43 = vmul.f32 %v18369_v11, %v17944_v0 }
0x1540   : > { %v10732_v12 = vpop.permute.xlu1 %10731 }
0x1541   : > { %v10772_v47 = vmul.f32 %v10732_v12, %v18381_v56 }
0x1542   : > { %v10730_v52 = vpop.permute.xlu0 %10729 }
0x1543   : > { %v10771_v22 = vmul.f32 %v10730_v52, %v18387_v51  ;;  %10811 = vrot.lane.b32.xlu1 %v10772_v47, %s13841_s18  ;;  %v10689_v47 = vmul.f32 %v18375_v40, %v17949_v53 }
0x1544   : > { %v10736_v2 = vpop.permute.xlu1 %10735 }
0x1545   : > { %v10774_v45 = vmul.f32 %v10736_v2, %v18393_v58  ;;  %10809 = vrot.lane.b32.xlu0 %v10771_v22, %s13841_s18  ;;  %v10692_v2 = vmul.f32 %v18381_v56, %v17956_v50 }
0x1546   : > { %v10734_v21 = vpop.permute.xlu0 %10733 }
0x1547   : > { %v10773_v32 = vmul.f32 %v10734_v21, %v18399_v16  ;;  %10815 = vrot.lane.b32.xlu1 %v10774_v45, %s13841_s18 }
0x1549   : > { %v10740_v62 = vpop.permute.xlu1 %10739  ;;  %10813 = vrot.lane.b32.xlu0 %v10773_v32, %s13841_s18  ;;  %v10691_v32 = vmul.f32 %v18387_v51, %v17962_v44 }
0x154a   : > { %v10776_v6 = vmul.f32 %v10740_v62, %v18405_v34 }
0x154b   : > { %v10738_v33 = vpop.permute.xlu0 %10737 }
0x154c   : > { %v10775_v9 = vmul.f32 %v10738_v33, %v18411_v13  ;;  %10819 = vrot.lane.b32.xlu1 %v10776_v6, %s13841_s18  ;;  %v10694_v33 = vmul.f32 %v18393_v58, %v17968_v15 }
0x154d   : > { %v10744_v31 = vpop.permute.xlu1 %10743 }
0x154e   : > { %v10778_v23 = vmul.f32 %v10744_v31, %v18417_v41  ;;  %10817 = vrot.lane.b32.xlu0 %v10775_v9, %s13841_s18  ;;  %v10693_v31 = vmul.f32 %v18399_v16, %v17973_v37 }
0x154f   : > { %v10742_v24 = vpop.permute.xlu0 %10741 }
0x1550   : > { %v10777_v38 = vmul.f32 %v10742_v24, %v18423_v27  ;;  %10823 = vrot.lane.b32.xlu1 %v10778_v23, %s13841_s18 }
0x1551   : > { %v10748_v46 = vpop.permute.xlu1 %10747 }
0x1552   : > { %v10780_v35 = vmul.f32 %v10748_v46, %v18429_v30  ;;  %10821 = vrot.lane.b32.xlu0 %v10777_v38, %s13841_s18  ;;  %v10696_v38 = vmul.f32 %v18405_v34, %v17979_v36 }
0x1553   : > { %v10746_v39 = vpop.permute.xlu0 %10745 }
0x1554   : > { %v10779_v25 = vmul.f32 %v10746_v39, %v18435_v4  ;;  %10827 = vrot.lane.b32.xlu1 %v10780_v35, %s13841_s18  ;;  %v10695_v39 = vmul.f32 %v18411_v13, %v17985_v19  ;;  %v10700_v19 = vmul.f32 %v18429_v30, %v18001_v57 }
0x1556   : > { %10825 = vrot.lane.b32.xlu0 %v10779_v25, %s13841_s18 }
0x15a1   : > { %v10800_v14 = vpop.permute.xlu1 %10799 }
0x15a2   : > { %v10846_v26 = vadd.f32 %v10800_v14, %v10686_v3  ;;  %v10698_v3 = vmul.f32 %v18417_v41, %v17990_v8  ;;  %v10699_v8 = vmul.f32 %v18435_v4, %v18007_v49  ;;  %v10959_v49 = vld [vmem:[%s18805_s6 + $0x10] sm:$0xff] }
0x15a3   : > { %v10798_v60 = vpop.permute.xlu0 %10797 }
0x15a4   : > { %13681 = vtanh.f32 %v10846_v26  ;;  %v10845_v20 = vadd.f32 %v10798_v60, %v10685_v17  ;;  %v10697_v26 = vmul.f32 %v18423_v27, %v17995_v59 }
0x15a6   : > { %13683 = vtanh.f32 %v10845_v20  ;;  %v10804_v55 = vpop.permute.xlu1 %10803 }
0x15a7   : > { %v10848_v61 = vadd.f32 %v10804_v55, %v10688_v48 }
0x15a8   : > { %v10802_v29 = vpop.permute.xlu0 %10801 }
0x15a9   : > { %13685 = vtanh.f32 %v10848_v61  ;;  %v10847_v10 = vadd.f32 %v10802_v29, %v10687_v5 }
0x15ab   : > { %13687 = vtanh.f32 %v10847_v10 }
0x15ad   : > { %v10808_v28 = vpop.permute.xlu1 %10807 }
0x15ae   : > { %v10850_v12 = vadd.f32 %v10808_v28, %v10690_v43  ;;  %v10960_v43 = vld [vmem:[%s18805_s6 + $0x18] sm:$0xff] }
0x15af   : > { %v10806_v52 = vpop.permute.xlu0 %10805  ;;  %12895 = vmatprep.subr.mxu0 %v10960_v43 }
0x15b0   : > { %13689 = vtanh.f32 %v10850_v12  ;;  %v10849_v1 = vadd.f32 %v10806_v52, %v10689_v47  ;;  %12896 = vmatpush3.msra.mxu0 %v10960_v43  ;;  %v10958_v12 = vld [vmem:[%s18805_s6 + $0x8] sm:$0xff]  ;;  %v10957_v52 = vld [vmem:[%s18805_s6] sm:$0xff] }
0x15b1   : > { %v13682_v22 = vpop.eup %13681  ;;  %12897 = vmatprep.subr.mxu0 %v10959_v49 }
0x15b2   : > { %13691 = vtanh.f32 %v10849_v1  ;;  %10895 = vrot.lane.b32.xlu1 %v13682_v22, %s13840_s14  ;;  %12898 = vmatpush3.msra.mxu0 %v10959_v49 }
0x15b3   : > { %v13684_v7 = vpop.eup %13683  ;;  %12899 = vmatprep.subr.mxu0 %v10958_v12 }
0x15b4   : > { %10893 = vrot.lane.b32.xlu0 %v13684_v7, %s13840_s14  ;;  %12900 = vmatpush3.msra.mxu0 %v10958_v12 }
0x15b5   : > { %v10812_v45 = vpop.permute.xlu1 %10811  ;;  %12901 = vmatprep.subr.mxu0 %v10957_v52 }
0x15b6   : > { %v13686_v0 = vpop.eup %13685  ;;  %v10852_v21 = vadd.f32 %v10812_v45, %v10692_v2  ;;  %12902 = vmatpush3.msra.mxu0 %v10957_v52 }
0x15b7   : > { %v10810_v53 = vpop.permute.xlu0 %10809  ;;  %10899 = vrot.lane.b32.xlu1 %v13686_v0, %s13840_s14 }
0x15b8   : > { %v13688_v62 = vpop.eup %13687  ;;  %13693 = vtanh.f32 %v10852_v21  ;;  %v10851_v6 = vadd.f32 %v10810_v53, %v10691_v32 }
0x15b9   : > { %v10816_v9 = vpop.permute.xlu1 %10815  ;;  %10897 = vrot.lane.b32.xlu0 %v13688_v62, %s13840_s14 }
0x15ba   : > { %13695 = vtanh.f32 %v10851_v6  ;;  %v10854_v50 = vadd.f32 %v10816_v9, %v10694_v33 }
0x15bb   : > { %v10814_v23 = vpop.permute.xlu0 %10813 }
0x15bc   : > { %13697 = vtanh.f32 %v10854_v50  ;;  %v10853_v44 = vadd.f32 %v10814_v23, %v10693_v31 }
0x15bd   : > { %v13690_v24 = vpop.eup %13689 }
0x15be   : > { %13699 = vtanh.f32 %v10853_v44  ;;  %v10820_v46 = vpop.permute.xlu1 %10819  ;;  %10903 = vrot.lane.b32.xlu1 %v13690_v24, %s13840_s14 }
0x15bf   : > { %v13692_v15 = vpop.eup %13691  ;;  %v10856_v35 = vadd.f32 %v10820_v46, %v10696_v38 }
0x15c0   : > { %v10818_v25 = vpop.permute.xlu0 %10817  ;;  %10901 = vrot.lane.b32.xlu0 %v13692_v15, %s13840_s14 }
0x15c1   : > { %13701 = vtanh.f32 %v10856_v35  ;;  %v10855_v37 = vadd.f32 %v10818_v25, %v10695_v39 }
0x15c2   : > { %v10824_v14 = vpop.permute.xlu1 %10823 }
0x15c3   : > { %13703 = vtanh.f32 %v10855_v37  ;;  %v10858_v36 = vadd.f32 %v10824_v14, %v10698_v3 }
0x15c4   : > { %v10822_v17 = vpop.permute.xlu0 %10821 }
0x15c5   : > { %v13694_v60 = vpop.eup %13693  ;;  %13705 = vtanh.f32 %v10858_v36  ;;  %v10857_v20 = vadd.f32 %v10822_v17, %v10697_v26 }
0x15c6   : > { %v10828_v48 = vpop.permute.xlu1 %10827  ;;  %10907 = vrot.lane.b32.xlu1 %v13694_v60, %s13840_s14 }
0x15c7   : > { %v13696_v55 = vpop.eup %13695  ;;  %13707 = vtanh.f32 %v10857_v20  ;;  %v10860_v61 = vadd.f32 %v10828_v48, %v10700_v19 }
0x15c8   : > { %v10826_v5 = vpop.permute.xlu0 %10825  ;;  %10905 = vrot.lane.b32.xlu0 %v13696_v55, %s13840_s14 }
0x15c9   : > { %v13698_v59 = vpop.eup %13697  ;;  %13709 = vtanh.f32 %v10860_v61  ;;  %v10859_v29 = vadd.f32 %v10826_v5, %v10699_v8  ;;  %v12024_v61 = vld [vmem:[%s18806_s7] ss:$0 sm:$0xff] }
0x15ca   : > { %10911 = vrot.lane.b32.xlu1 %v13698_v59, %s13840_s14 }
0x15cb   : > { %v13700_v10 = vpop.eup %13699  ;;  %13711 = vtanh.f32 %v10859_v29 }
0x15cc   : > { %10909 = vrot.lane.b32.xlu0 %v13700_v10, %s13840_s14 }
0x15ce   : > { %v13702_v57 = vpop.eup %13701 }
0x15cf   : > { %10915 = vrot.lane.b32.xlu1 %v13702_v57, %s13840_s14 }
0x15d0   : > { %v13704_v28 = vpop.eup %13703 }
0x15d1   : > { %10913 = vrot.lane.b32.xlu0 %v13704_v28, %s13840_s14 }
0x15d2   : > { %v13706_v47 = vpop.eup %13705 }
0x15d3   : > { %10919 = vrot.lane.b32.xlu1 %v13706_v47, %s13840_s14 }
0x15d4   : > { %v13708_v1 = vpop.eup %13707 }
0x15d5   : > { %10917 = vrot.lane.b32.xlu0 %v13708_v1, %s13840_s14 }
0x15d6   : > { %v13710_v22 = vpop.eup %13709 }
0x15d7   : > { %10923 = vrot.lane.b32.xlu1 %v13710_v22, %s13840_s14 }
0x15d8   : > { %v13712_v7 = vpop.eup %13711 }
0x15d9   : > { %10921 = vrot.lane.b32.xlu0 %v13712_v7, %s13840_s14 }
0x1624   : > { %v10896_v2 = vpop.permute.xlu1 %10895 }
0x1625   : > { %v10942_v45 = vmul.f32 %v10896_v2, %v18345_v18 }
0x1626   : > { %v10894_v0 = vpop.permute.xlu0 %10893 }
0x1627   : > { %v10941_v21 = vmul.f32 %v10894_v0, %v18351_v42  ;;  %10986 = vrot.lane.b32.xlu1 %v10942_v45, %s13841_s18 }
0x1629   : > { %v10900_v32 = vpop.permute.xlu1 %10899  ;;  %10984 = vrot.lane.b32.xlu0 %v10941_v21, %s13841_s18 }
0x162a   : > { %v10944_v53 = vmul.f32 %v10900_v32, %v18357_v54 }
0x162b   : > { %v10898_v62 = vpop.permute.xlu0 %10897 }
0x162c   : > { %v10943_v6 = vmul.f32 %v10898_v62, %v18363_v63  ;;  %10990 = vrot.lane.b32.xlu1 %v10944_v53, %s13841_s18 }
0x162e   : > { %10988 = vrot.lane.b32.xlu0 %v10943_v6, %s13841_s18 }
0x1630   : > { %v10904_v33 = vpop.permute.xlu1 %10903 }
0x1631   : > { %v10946_v18 = vmul.f32 %v10904_v33, %v18369_v11 }
0x1632   : > { %v10902_v9 = vpop.permute.xlu0 %10901 }
0x1633   : > { %v10945_v42 = vmul.f32 %v10902_v9, %v18375_v40  ;;  %10994 = vrot.lane.b32.xlu1 %v10946_v18, %s13841_s18 }
0x1635   : > { %10992 = vrot.lane.b32.xlu0 %v10945_v42, %s13841_s18 }
0x1638   : > { %v10908_v50 = vpop.permute.xlu1 %10907 }
0x1639   : > { %v10948_v54 = vmul.f32 %v10908_v50, %v18381_v56 }
0x163a   : > { %v10906_v31 = vpop.permute.xlu0 %10905 }
0x163b   : > { %v10947_v63 = vmul.f32 %v10906_v31, %v18387_v51  ;;  %10998 = vrot.lane.b32.xlu1 %v10948_v54, %s13841_s18 }
0x163c   : > { %v10912_v23 = vpop.permute.xlu1 %10911 }
0x163d   : > { %v10950_v44 = vmul.f32 %v10912_v23, %v18393_v58  ;;  %10996 = vrot.lane.b32.xlu0 %v10947_v63, %s13841_s18 }
0x163e   : > { %v10910_v11 = vpop.permute.xlu0 %10909 }
0x163f   : > { %v10949_v40 = vmul.f32 %v10910_v11, %v18399_v16  ;;  %11002 = vrot.lane.b32.xlu1 %v10950_v44, %s13841_s18 }
0x1641   : > { %v10916_v24 = vpop.permute.xlu1 %10915  ;;  %11000 = vrot.lane.b32.xlu0 %v10949_v40, %s13841_s18 }
0x1642   : > { %v10952_v56 = vmul.f32 %v10916_v24, %v18405_v34 }
0x1643   : > { %v10914_v38 = vpop.permute.xlu0 %10913 }
0x1644   : > { %v10951_v51 = vmul.f32 %v10914_v38, %v18411_v13  ;;  %11006 = vrot.lane.b32.xlu1 %v10952_v56, %s13841_s18 }
0x1645   : > { %v10920_v46 = vpop.permute.xlu1 %10919 }
0x1646   : > { %v10954_v58 = vmul.f32 %v10920_v46, %v18417_v41  ;;  %11004 = vrot.lane.b32.xlu0 %v10951_v51, %s13841_s18 }
0x1647   : > { %v10918_v15 = vpop.permute.xlu0 %10917 }
0x1648   : > { %v10953_v16 = vmul.f32 %v10918_v15, %v18423_v27  ;;  %11010 = vrot.lane.b32.xlu1 %v10954_v58, %s13841_s18 }
0x1649   : > { %v10924_v35 = vpop.permute.xlu1 %10923 }
0x164a   : > { %v10956_v39 = vmul.f32 %v10924_v35, %v18429_v30  ;;  %11008 = vrot.lane.b32.xlu0 %v10953_v16, %s13841_s18 }
0x164b   : > { %v10922_v34 = vpop.permute.xlu0 %10921 }
0x164c   : > { %v10955_v13 = vmul.f32 %v10922_v34, %v18435_v4  ;;  %11014 = vrot.lane.b32.xlu1 %v10956_v39, %s13841_s18 }
0x164e   : > { %11012 = vrot.lane.b32.xlu0 %v10955_v13, %s13841_s18 }
0x1699   : > { %v10987_v41 = vpop.permute.xlu1 %10986 }
0x169b   : > { %v10985_v25 = vpop.permute.xlu0 %10984 }
0x169c   : > { %12903 = vmatprep.mubr.msk.f32.mxu0 %vm892_vm7, %v10985_v25 }
0x169d   : > { %12904 = vmatmul.mubr.msk.f32.vlgmr.msra.gmra.mxu0 %vm892_vm7, %v10987_v41 }
0x169e   : > { %v10991_v37 = vpop.permute.xlu1 %10990 }
0x16a0   : > { %v10989_v27 = vpop.permute.xlu0 %10988 }
0x16a1   : > { %12906 = vmatprep.mubr.msk.f32.mxu0 %vm892_vm7, %v10989_v27 }
0x16a2   : > { %12907 = vmatmul.mubr.msk.f32.gmra.mxu0 %vm892_vm7, %v10991_v37 }
0x16a5   : > { %v10995_v30 = vpop.permute.xlu1 %10994 }
0x16a7   : > { %v10993_v3 = vpop.permute.xlu0 %10992 }
0x16a8   : > { %12909 = vmatprep.mubr.msk.f32.mxu0 %vm892_vm7, %v10993_v3 }
0x16a9   : > { %12910 = vmatmul.mubr.msk.f32.gmra.mxu0 %vm892_vm7, %v10995_v30 }
0x16ad   : > { %v10999_v4 = vpop.permute.xlu1 %10998 }
0x16af   : > { %v10997_v14 = vpop.permute.xlu0 %10996 }
0x16b0   : > { %12912 = vmatprep.mubr.msk.f32.mxu0 %vm892_vm7, %v10997_v14 }
0x16b1   : > { %v11003_v36 = vpop.permute.xlu1 %11002  ;;  %12913 = vmatmul.mubr.msk.f32.gmra.mxu0 %vm892_vm7, %v10999_v4 }
0x16b3   : > { %v11001_v26 = vpop.permute.xlu0 %11000 }
0x16b4   : > { %12915 = vmatprep.mubr.msk.f32.mxu0 %vm892_vm7, %v11001_v26 }
0x16b5   : > { %12916 = vmatmul.mubr.msk.f32.gmra.mxu0 %vm892_vm7, %v11003_v36 }
0x16b6   : > { %v11007_v17 = vpop.permute.xlu1 %11006 }
0x16b8   : > { %v11005_v60 = vpop.permute.xlu0 %11004 }
0x16b9   : > { %12918 = vmatprep.mubr.msk.f32.mxu0 %vm892_vm7, %v11005_v60 }
0x16ba   : > { %12919 = vmatmul.mubr.msk.f32.gmra.mxu0 %vm892_vm7, %v11007_v17  ;;  %v11011_v20 = vpop.permute.xlu1 %11010 }
0x16bc   : > { %v11009_v19 = vpop.permute.xlu0 %11008 }
0x16bd   : > { %12921 = vmatprep.mubr.msk.f32.mxu0 %vm892_vm7, %v11009_v19 }
0x16be   : > { %12922 = vmatmul.mubr.msk.f32.gmra.mxu0 %vm892_vm7, %v11011_v20  ;;  %v11015_v55 = vpop.permute.xlu1 %11014 }
0x16c0   : > { %v11013_v48 = vpop.permute.xlu0 %11012 }
0x16c1   : > { %12924 = vmatprep.mubr.msk.f32.mxu0 %vm892_vm7, %v11013_v48 }
0x16c2   : > { %12925 = vmatmul.mubr.msk.f32.gmra.mxu0 %vm892_vm7, %v11015_v55 }
0x175d   : > { %v12905_v8 = vpop.f32.mrf.mxu0 }
0x175e   : > { %v18582_v5 = vadd.f32 %v12905_v8, %v12024_v61 }
0x175f   : > { %v11114_v59 = vpop.f32.mrf.mxu0 }
0x1760   : > { %v18584_v29 = vadd.f32 %v12024_v61, %v11114_v59  ;;  %v11197_v10 = vsel %vm11193_vm11, %v18582_v5, -inf }
0x1761   : > { %11198 = vmax.xlane.f32.xlu1 %v11197_v10 }
0x1762   : > { %v12908_v57 = vpop.f32.mrf.mxu0  ;;  %v11194_v43 = vsel %vm11193_vm11, %v18584_v29, -inf }
0x1763   : > { %v18590_v49 = vadd.f32 %v12908_v57, %v12024_v61  ;;  %11195 = vmax.xlane.f32.xlu0 %v11194_v43 }
0x1764   : > { %v11124_v28 = vpop.f32.mrf.mxu0 }
0x1765   : > { %v18592_v12 = vadd.f32 %v12024_v61, %v11124_v28  ;;  %v11203_v47 = vsel %vm11193_vm11, %v18590_v49, -inf }
0x1767   : > { %11204 = vmax.xlane.f32.xlu0 %v11203_v47  ;;  %v11200_v22 = vsel %vm11193_vm11, %v18592_v12, -inf }
0x1769   : > { %v12911_v52 = vpop.f32.mrf.mxu0 }
0x176a   : > { %v18596_v1 = vadd.f32 %v12911_v52, %v12024_v61 }
0x176b   : > { %v11134_v7 = vpop.f32.mrf.mxu0  ;;  %11201 = vmax.xlane.f32.xlu0 %v11200_v22 }
0x176c   : > { %v18600_v2 = vadd.f32 %v12024_v61, %v11134_v7  ;;  %v11209_v0 = vsel %vm11193_vm11, %v18596_v1, -inf }
0x176e   : > { %v11206_v45 = vsel %vm11193_vm11, %v18600_v2, -inf }
0x176f   : > { %11207 = vmax.xlane.f32.xlu1 %v11206_v45  ;;  %11210 = vmax.xlane.f32.xlu0 %v11209_v0 }
0x1771   : > { %v12914_v21 = vpop.f32.mrf.mxu0 }
0x1772   : > { %v18606_v32 = vadd.f32 %v12914_v21, %v12024_v61 }
0x1773   : > { %v11144_v53 = vpop.f32.mrf.mxu0 }
0x1774   : > { %v18608_v62 = vadd.f32 %v12024_v61, %v11144_v53  ;;  %v11215_v6 = vsel %vm11193_vm11, %v18606_v32, -inf }
0x1775   : > { %v12917_v33 = vpop.f32.mrf.mxu0  ;;  %11216 = vmax.xlane.f32.xlu0 %v11215_v6 }
0x1776   : > { %v18612_v18 = vadd.f32 %v12917_v33, %v12024_v61  ;;  %v11212_v9 = vsel %vm11193_vm11, %v18608_v62, -inf }
0x1777   : > { %11213 = vmax.xlane.f32.xlu1 %v11212_v9  ;;  %v11154_v42 = vpop.f32.mrf.mxu0 }
0x1778   : > { %v18616_v50 = vadd.f32 %v12024_v61, %v11154_v42  ;;  %v11221_v54 = vsel %vm11193_vm11, %v18612_v18, -inf }
0x1779   : > { %11222 = vmax.xlane.f32.xlu0 %v11221_v54 }
0x177a   : > { %v12920_v31 = vpop.f32.mrf.mxu0  ;;  %v11218_v63 = vsel %vm11193_vm11, %v18616_v50, -inf }
0x177b   : > { %v18622_v23 = vadd.f32 %v12920_v31, %v12024_v61  ;;  %11219 = vmax.xlane.f32.xlu1 %v11218_v63 }
0x177c   : > { %v11164_v44 = vpop.f32.mrf.mxu0 }
0x177d   : > { %v18624_v11 = vadd.f32 %v12024_v61, %v11164_v44  ;;  %v11227_v40 = vsel %vm11193_vm11, %v18622_v23, -inf }
0x177e   : > { %v12923_v24 = vpop.f32.mrf.mxu0  ;;  %11228 = vmax.xlane.f32.xlu0 %v11227_v40 }
0x177f   : > { %v18628_v56 = vadd.f32 %v12923_v24, %v12024_v61  ;;  %v11224_v38 = vsel %vm11193_vm11, %v18624_v11, -inf }
0x1780   : > { %11225 = vmax.xlane.f32.xlu1 %v11224_v38  ;;  %v11174_v51 = vpop.f32.mrf.mxu0 }
0x1781   : > { %v18632_v46 = vadd.f32 %v12024_v61, %v11174_v51  ;;  %v11233_v58 = vsel %vm11193_vm11, %v18628_v56, -inf }
0x1782   : > { %v12926_v15 = vpop.f32.mrf.mxu0  ;;  %11234 = vmax.xlane.f32.xlu0 %v11233_v58 }
0x1783   : > { %v18636_v16 = vadd.f32 %v12926_v15, %v12024_v61  ;;  %v11230_v35 = vsel %vm11193_vm11, %v18632_v46, -inf }
0x1784   : > { %11231 = vmax.xlane.f32.xlu1 %v11230_v35  ;;  %v11184_v39 = vpop.f32.mrf.mxu0 }
0x1785   : > { %v18640_v34 = vadd.f32 %v12024_v61, %v11184_v39  ;;  %v11239_v13 = vsel %vm11193_vm11, %v18636_v16, -inf }
0x1786   : > { %11240 = vmax.xlane.f32.xlu0 %v11239_v13 }
0x1787   : > { %v11236_v41 = vsel %vm11193_vm11, %v18640_v34, -inf }
0x1788   : > { %11237 = vmax.xlane.f32.xlu1 %v11236_v41 }
0x17ea   : > { %v18646_v25 = vpop.xlane.xlu1 %11198 }
0x17eb   : > { %v11243_v27 = vsub.f32 %v18582_v5, %v18646_v25 }
0x17ec   : > { %v18650_v37 = vpop.xlane.xlu0 %11195 }
0x17ed   : > { %v11260_v30 = vmul.f32 1.442695, %v11243_v27  ;;  %v11242_v3 = vsub.f32 %v18584_v29, %v18650_v37 }
0x17ef   : > { %13713 = vpow2.f32 %v11260_v30  ;;  %v11258_v4 = vmul.f32 1.442695, %v11242_v3 }
0x17f0   : > { %v18654_v14 = vpop.xlane.xlu0 %11204 }
0x17f1   : > { %13715 = vpow2.f32 %v11258_v4  ;;  %v11245_v36 = vsub.f32 %v18590_v49, %v18654_v14 }
0x17f3   : > { %v11264_v26 = vmul.f32 1.442695, %v11245_v36 }
0x17f4   : > { %v18658_v17 = vpop.xlane.xlu0 %11201 }
0x17f5   : > { %13717 = vpow2.f32 %v11264_v26  ;;  %v11244_v60 = vsub.f32 %v18592_v12, %v18658_v17 }
0x17f7   : > { %v11262_v20 = vmul.f32 1.442695, %v11244_v60 }
0x17f8   : > { %v18662_v19 = vpop.xlane.xlu1 %11207  ;;  %v18664_v48 = vpop.xlane.xlu0 %11210 }
0x17f9   : > { %13719 = vpow2.f32 %v11262_v20  ;;  %v11246_v55 = vsub.f32 %v18600_v2, %v18662_v19  ;;  %v11247_v61 = vsub.f32 %v18596_v1, %v18664_v48 }
0x17fb   : > { %v11266_v8 = vmul.f32 1.442695, %v11246_v55  ;;  %v11268_v59 = vmul.f32 1.442695, %v11247_v61 }
0x17fc   : > { %v13714_v10 = vpop.eup %13713 }
0x17fd   : > { %13721 = vpow2.f32 %v11266_v8  ;;  %v11293_v57 = vsel %vm11193_vm11, %v13714_v10, 0.0 }
0x17fe   : > { %v13716_v43 = vpop.eup %13715  ;;  %13723 = vpow2.f32 %v11268_v59  ;;  %v18671_v28 = vpop.xlane.xlu0 %11216  ;;  %11294 = vadd.xlane.f32.xlu0 %v11293_v57 }
0x17ff   : > { %v11249_v47 = vsub.f32 %v18606_v32, %v18671_v28  ;;  %v11290_v52 = vsel %vm11193_vm11, %v13716_v43, 0.0 }
0x1800   : > { %v18676_v22 = vpop.xlane.xlu1 %11213  ;;  %11291 = vadd.xlane.f32.xlu1 %v11290_v52 }
0x1801   : > { %v11248_v7 = vsub.f32 %v18608_v62, %v18676_v22  ;;  %v11272_v45 = vmul.f32 1.442695, %v11249_v47 }
0x1802   : > { %v13718_v0 = vpop.eup %13717  ;;  %v18680_v21 = vpop.xlane.xlu0 %11222 }
0x1803   : > { %v11270_v53 = vmul.f32 1.442695, %v11248_v7  ;;  %13725 = vpow2.f32 %v11272_v45  ;;  %v11251_v6 = vsub.f32 %v18612_v18, %v18680_v21  ;;  %v11299_v33 = vsel %vm11193_vm11, %v13718_v0, 0.0 }
0x1804   : > { %v18685_v9 = vpop.xlane.xlu1 %11219  ;;  %11300 = vadd.xlane.f32.xlu0 %v11299_v33 }
0x1805   : > { %13727 = vpow2.f32 %v11270_v53  ;;  %v11250_v42 = vsub.f32 %v18616_v50, %v18685_v9  ;;  %v11276_v54 = vmul.f32 1.442695, %v11251_v6 }
0x1806   : > { %v13720_v31 = vpop.eup %13719 }
0x1807   : > { %v11274_v63 = vmul.f32 1.442695, %v11250_v42  ;;  %13729 = vpow2.f32 %v11276_v54  ;;  %v18689_v44 = vpop.xlane.xlu0 %11228  ;;  %v11296_v40 = vsel %vm11193_vm11, %v13720_v31, 0.0 }
0x1808   : > { %v11253_v24 = vsub.f32 %v18622_v23, %v18689_v44  ;;  %11297 = vadd.xlane.f32.xlu1 %v11296_v40 }
0x1809   : > { %13731 = vpow2.f32 %v11274_v63  ;;  %v18694_v38 = vpop.xlane.xlu1 %11225 }
0x180a   : > { %v13722_v51 = vpop.eup %13721  ;;  %v11252_v58 = vsub.f32 %v18624_v11, %v18694_v38  ;;  %v11280_v15 = vmul.f32 1.442695, %v11253_v24 }
0x180b   : > { %v13724_v35 = vpop.eup %13723  ;;  %v18698_v39 = vpop.xlane.xlu0 %11234  ;;  %v11302_v13 = vsel %vm11193_vm11, %v13722_v51, 0.0 }
0x180c   : > { %v11278_v41 = vmul.f32 1.442695, %v11252_v58  ;;  %13733 = vpow2.f32 %v11280_v15  ;;  %v11255_v27 = vsub.f32 %v18628_v56, %v18698_v39  ;;  %11303 = vadd.xlane.f32.xlu1 %v11302_v13  ;;  %v11305_v30 = vsel %vm11193_vm11, %v13724_v35, 0.0 }
0x180d   : > { %v18704_v3 = vpop.xlane.xlu1 %11231  ;;  %11306 = vadd.xlane.f32.xlu0 %v11305_v30 }
0x180e   : > { %13735 = vpow2.f32 %v11278_v41  ;;  %v11254_v4 = vsub.f32 %v18632_v46, %v18704_v3  ;;  %v11284_v36 = vmul.f32 1.442695, %v11255_v27 }
0x180f   : > { %v18708_v26 = vpop.xlane.xlu0 %11240 }
0x1810   : > { %v13726_v60 = vpop.eup %13725  ;;  %v11282_v20 = vmul.f32 1.442695, %v11254_v4  ;;  %13737 = vpow2.f32 %v11284_v36  ;;  %v11257_v55 = vsub.f32 %v18636_v16, %v18708_v26 }
0x1811   : > { %v18712_v61 = vpop.xlane.xlu1 %11237  ;;  %v11311_v8 = vsel %vm11193_vm11, %v13726_v60, 0.0 }
0x1812   : > { %v13728_v59 = vpop.eup %13727  ;;  %13739 = vpow2.f32 %v11282_v20  ;;  %v11256_v10 = vsub.f32 %v18640_v34, %v18712_v61  ;;  %v11288_v57 = vmul.f32 1.442695, %v11257_v55  ;;  %11312 = vadd.xlane.f32.xlu0 %v11311_v8 }
0x1813   : > { %v11308_v43 = vsel %vm11193_vm11, %v13728_v59, 0.0 }
0x1814   : > { %v13730_v47 = vpop.eup %13729  ;;  %v11286_v52 = vmul.f32 1.442695, %v11256_v10  ;;  %13741 = vpow2.f32 %v11288_v57  ;;  %11309 = vadd.xlane.f32.xlu1 %v11308_v43 }
0x1815   : > { %v11317_v7 = vsel %vm11193_vm11, %v13730_v47, 0.0 }
0x1816   : > { %v13732_v45 = vpop.eup %13731  ;;  %13743 = vpow2.f32 %v11286_v52  ;;  %11318 = vadd.xlane.f32.xlu0 %v11317_v7 }
0x1817   : > { %v11314_v0 = vsel %vm11193_vm11, %v13732_v45, 0.0 }
0x1818   : > { %11315 = vadd.xlane.f32.xlu1 %v11314_v0 }
0x1819   : > { %v13734_v53 = vpop.eup %13733 }
0x181a   : > { %v11323_v6 = vsel %vm11193_vm11, %v13734_v53, 0.0 }
0x181b   : > { %v13736_v33 = vpop.eup %13735  ;;  %11324 = vadd.xlane.f32.xlu0 %v11323_v6 }
0x181c   : > { %v11320_v42 = vsel %vm11193_vm11, %v13736_v33, 0.0 }
0x181d   : > { %v13738_v54 = vpop.eup %13737  ;;  %11321 = vadd.xlane.f32.xlu1 %v11320_v42 }
0x181e   : > { %v11329_v31 = vsel %vm11193_vm11, %v13738_v54, 0.0 }
0x181f   : > { %v13740_v63 = vpop.eup %13739  ;;  %11330 = vadd.xlane.f32.xlu0 %v11329_v31 }
0x1820   : > { %v11326_v40 = vsel %vm11193_vm11, %v13740_v63, 0.0 }
0x1821   : > { %v13742_v24 = vpop.eup %13741  ;;  %11327 = vadd.xlane.f32.xlu1 %v11326_v40 }
0x1822   : > { %v11335_v51 = vsel %vm11193_vm11, %v13742_v24, 0.0 }
0x1823   : > { %v13744_v58 = vpop.eup %13743  ;;  %11336 = vadd.xlane.f32.xlu0 %v11335_v51 }
0x1824   : > { %v11332_v15 = vsel %vm11193_vm11, %v13744_v58, 0.0 }
0x1825   : > { %11333 = vadd.xlane.f32.xlu1 %v11332_v15 }
0x1887   : > { %v11295_v35 = vpop.xlane.xlu0 %11294 }
0x1888   : > { %13745 = vlog2.f32 %v11295_v35 }
0x1889   : > { %v11292_v13 = vpop.xlane.xlu1 %11291 }
0x188a   : > { %13747 = vlog2.f32 %v11292_v13 }
0x188d   : > { %v11301_v41 = vpop.xlane.xlu0 %11300 }
0x188e   : > { %13749 = vlog2.f32 %v11301_v41 }
0x1891   : > { %v11298_v27 = vpop.xlane.xlu1 %11297 }
0x1892   : > { %13751 = vlog2.f32 %v11298_v27 }
0x1895   : > { %v13746_v30 = vpop.eup %13745  ;;  %v11304_v4 = vpop.xlane.xlu1 %11303 }
0x1896   : > { %v11341_v36 = vmul.f32 0.6931472, %v13746_v30  ;;  %13753 = vlog2.f32 %v11304_v4  ;;  %v11307_v60 = vpop.xlane.xlu0 %11306 }
0x1897   : > { %v13748_v20 = vpop.eup %13747  ;;  %13755 = vlog2.f32 %v11307_v60 }
0x1898   : > { %v11371_v55 = vadd.f32 %v11341_v36, %v18646_v25  ;;  %v11339_v8 = vmul.f32 0.6931472, %v13748_v20 }
0x189a   : > { %v11387_v59 = vsub.f32 %v18582_v5, %v11371_v55  ;;  %v11370_v10 = vadd.f32 %v11339_v8, %v18650_v37 }
0x189b   : > { %v13750_v57 = vpop.eup %13749  ;;  %v11313_v43 = vpop.xlane.xlu0 %11312 }
0x189c   : > { %11403 = vst.msk [vmem:[%s18731_s20 + $0x8] sm:$0xff] %vm11193_vm11, %v11387_v59  ;;  %v11386_v47 = vsub.f32 %v18584_v29, %v11370_v10  ;;  %v11345_v25 = vmul.f32 0.6931472, %v13750_v57  ;;  %13757 = vlog2.f32 %v11313_v43 }
0x189d   : > { %v11310_v52 = vpop.xlane.xlu1 %11309 }
0x189e   : > { %11402 = vst.msk [vmem:[%s18731_s20] sm:$0xff] %vm11193_vm11, %v11386_v47  ;;  %v11373_v7 = vadd.f32 %v11345_v25, %v18654_v14  ;;  %13759 = vlog2.f32 %v11310_v52 }
0x189f   : > { %v13752_v45 = vpop.eup %13751  ;;  %v11319_v5 = vpop.xlane.xlu0 %11318 }
0x18a0   : > { %v11389_v37 = vsub.f32 %v18590_v49, %v11373_v7  ;;  %v11343_v0 = vmul.f32 0.6931472, %v13752_v45  ;;  %13761 = vlog2.f32 %v11319_v5 }
0x18a1   : > { %v11316_v53 = vpop.xlane.xlu1 %11315 }
0x18a2   : > { %11405 = vst.msk [vmem:[%s18731_s20 + $0x18] sm:$0xff] %vm11193_vm11, %v11389_v37  ;;  %v11372_v29 = vadd.f32 %v11343_v0, %v18658_v17  ;;  %13763 = vlog2.f32 %v11316_v53 }
0x18a3   : > { %v13754_v6 = vpop.eup %13753 }
0x18a4   : > { %v13756_v33 = vpop.eup %13755  ;;  %v11388_v42 = vsub.f32 %v18592_v12, %v11372_v29  ;;  %v11347_v14 = vmul.f32 0.6931472, %v13754_v6  ;;  %v11325_v54 = vpop.xlane.xlu0 %11324 }
0x18a5   : > { %v11349_v31 = vmul.f32 0.6931472, %v13756_v33  ;;  %13765 = vlog2.f32 %v11325_v54 }
0x18a6   : > { %11404 = vst.msk [vmem:[%s18731_s20 + $0x10] sm:$0xff] %vm11193_vm11, %v11388_v42  ;;  %v11374_v49 = vadd.f32 %v11347_v14, %v18662_v19  ;;  %v11322_v63 = vpop.xlane.xlu1 %11321 }
0x18a7   : > { %v11375_v40 = vadd.f32 %v11349_v31, %v18664_v48  ;;  %13767 = vlog2.f32 %v11322_v63 }
0x18a8   : > { %v11390_v17 = vsub.f32 %v18600_v2, %v11374_v49  ;;  %v11331_v24 = vpop.xlane.xlu0 %11330 }
0x18a9   : > { %v13758_v51 = vpop.eup %13757  ;;  %v11391_v58 = vsub.f32 %v18596_v1, %v11375_v40  ;;  %13769 = vlog2.f32 %v11331_v24 }
0x18aa   : > { %11406 = vst.msk [vmem:[%s18731_s20 + $0x20] sm:$0xff] %vm11193_vm11, %v11390_v17  ;;  %v11353_v12 = vmul.f32 0.6931472, %v13758_v51  ;;  %v11328_v15 = vpop.xlane.xlu1 %11327 }
0x18ab   : > { %v13760_v35 = vpop.eup %13759  ;;  %11407 = vst.msk [vmem:[%s18731_s20 + $0x28] sm:$0xff] %vm11193_vm11, %v11391_v58  ;;  %13771 = vlog2.f32 %v11328_v15 }
0x18ac   : > { %v11351_v19 = vmul.f32 0.6931472, %v13760_v35  ;;  %v11377_v48 = vadd.f32 %v11353_v12, %v18671_v28  ;;  %v11337_v13 = vpop.xlane.xlu0 %11336 }
0x18ad   : > { %v13762_v2 = vpop.eup %13761  ;;  %13773 = vlog2.f32 %v11337_v13 }
0x18ae   : > { %v11376_v41 = vadd.f32 %v11351_v19, %v18676_v22  ;;  %v11393_v1 = vsub.f32 %v18606_v32, %v11377_v48  ;;  %v11357_v27 = vmul.f32 0.6931472, %v13762_v2  ;;  %v11334_v30 = vpop.xlane.xlu1 %11333 }
0x18af   : > { %v13764_v4 = vpop.eup %13763  ;;  %13775 = vlog2.f32 %v11334_v30 }
0x18b0   : > { %v11392_v36 = vsub.f32 %v18608_v62, %v11376_v41  ;;  %11409 = vst.msk [vmem:[%s18731_s20 + $0x38] sm:$0xff] %vm11193_vm11, %v11393_v1  ;;  %v11355_v60 = vmul.f32 0.6931472, %v13764_v4  ;;  %v11379_v28 = vadd.f32 %v11357_v27, %v18680_v21 }
0x18b2   : > { %v13766_v20 = vpop.eup %13765  ;;  %11408 = vst.msk [vmem:[%s18731_s20 + $0x30] sm:$0xff] %vm11193_vm11, %v11392_v36  ;;  %v11378_v22 = vadd.f32 %v11355_v60, %v18685_v9  ;;  %v11395_v32 = vsub.f32 %v18612_v18, %v11379_v28 }
0x18b3   : > { %v11361_v55 = vmul.f32 0.6931472, %v13766_v20 }
0x18b4   : > { %v13768_v8 = vpop.eup %13767  ;;  %v11394_v59 = vsub.f32 %v18616_v50, %v11378_v22  ;;  %11411 = vst.msk [vmem:[%s18731_s20 + $0x48] sm:$0xff] %vm11193_vm11, %v11395_v32 }
0x18b5   : > { %v11359_v62 = vmul.f32 0.6931472, %v13768_v8  ;;  %v11381_v10 = vadd.f32 %v11361_v55, %v18689_v44 }
0x18b6   : > { %v13770_v57 = vpop.eup %13769  ;;  %11410 = vst.msk [vmem:[%s18731_s20 + $0x40] sm:$0xff] %vm11193_vm11, %v11394_v59 }
0x18b7   : > { %v11380_v21 = vadd.f32 %v11359_v62, %v18694_v38  ;;  %v11397_v9 = vsub.f32 %v18622_v23, %v11381_v10  ;;  %v11365_v43 = vmul.f32 0.6931472, %v13770_v57 }
0x18b8   : > { %v13772_v18 = vpop.eup %13771 }
0x18b9   : > { %v11396_v47 = vsub.f32 %v18624_v11, %v11380_v21  ;;  %11413 = vst.msk [vmem:[%s18731_s20 + $0x58] sm:$0xff] %vm11193_vm11, %v11397_v9  ;;  %v11363_v50 = vmul.f32 0.6931472, %v13772_v18  ;;  %v11383_v25 = vadd.f32 %v11365_v43, %v18698_v39 }
0x18ba   : > { %v13774_v44 = vpop.eup %13773 }
0x18bb   : > { %11412 = vst.msk [vmem:[%s18731_s20 + $0x50] sm:$0xff] %vm11193_vm11, %v11396_v47  ;;  %v11382_v52 = vadd.f32 %v11363_v50, %v18704_v3  ;;  %v11399_v38 = vsub.f32 %v18628_v56, %v11383_v25  ;;  %v11369_v23 = vmul.f32 0.6931472, %v13774_v44 }
0x18bc   : > { %v13776_v7 = vpop.eup %13775 }
0x18bd   : > { %v11398_v45 = vsub.f32 %v18632_v46, %v11382_v52  ;;  %11415 = vst.msk [vmem:[%s18731_s20 + $0x68] sm:$0xff] %vm11193_vm11, %v11399_v38  ;;  %v11367_v11 = vmul.f32 0.6931472, %v13776_v7  ;;  %v11385_v5 = vadd.f32 %v11369_v23, %v18708_v26 }
0x18bf   : > { %11414 = vst.msk [vmem:[%s18731_s20 + $0x60] sm:$0xff] %vm11193_vm11, %v11398_v45  ;;  %v11384_v39 = vadd.f32 %v11367_v11, %v18712_v61  ;;  %v11401_v37 = vsub.f32 %v18636_v16, %v11385_v5 }
0x18c1   : > { %v11400_v0 = vsub.f32 %v18640_v34, %v11384_v39  ;;  %11417 = vst.msk [vmem:[%s18731_s20 + $0x78] sm:$0xff] %vm11193_vm11, %v11401_v37 }
0x18c3   : > { %11416 = vst.msk [vmem:[%s18731_s20 + $0x70] sm:$0xff] %vm11193_vm11, %v11400_v0 }
0x18c4 PF: > { %s18_s27 = sadd.s32 1, %s13838_s27  }
0x18c5   : > { %p15_p5 = scmp.ge.s32.totalorder %s18_s27, 4  }
0x18c7   :  { %17 = sbr.rel (!%p15_p5) target bundleno = 1 (0x1), region = 88 }

</bundles_post_ra>
